<compile_context>
chip_gen: v6e
topology: v6e:2x2x1
jax: 0.10.0
libtpu: 0.0.40
codegen_flags: <defaults>
</compile_context>

<pallas_src>
import math
import functools

import numpy as np
import jax
import jax.numpy as jnp
from jax.experimental import pallas as pl
from jax.experimental.pallas import tpu as pltpu  # noqa: F401  (not needed at this size; see layer-tiling TODO)

HEAD_PAD = 128          # class-head outputs (6 / 47) padded to a full 128-lane column
NEG_INF = -1e9

ENC_KEYS = ('emb', 'pos_flat', 'ln_g', 'ln_b', 'wqkv', 'bqkv', 'wo', 'bo',
            'ln1_g', 'ln1_b', 'w1', 'b1', 'w2', 'b2', 'ln2_g', 'ln2_b')
DEC_KEYS = ('emb', 'pos0', 'ln_g', 'ln_b',
            'wv_s', 'bv_s', 'wo_s', 'bo_s', 'ln_s_g', 'ln_s_b',
            'wq_c', 'bq_c', 'wkv_c', 'bkv_c', 'wo_c', 'bo_c', 'ln_c_g', 'ln_c_b',
            'w1', 'b1', 'w2', 'b2', 'ln_f_g', 'ln_f_b', 'hw', 'hb')
# decoder params with a per-layer leading axis (stored as (2*L, ...), indexed di*L + i)
DEC_PER_LAYER = ('wv_s', 'bv_s', 'wo_s', 'bo_s', 'ln_s_g', 'ln_s_b',
                 'wq_c', 'bq_c', 'wkv_c', 'bkv_c', 'wo_c', 'bo_c', 'ln_c_g', 'ln_c_b',
                 'w1', 'b1', 'w2', 'b2', 'ln_f_g', 'ln_f_b')


# ----------------------------- in-kernel building blocks -----------------------------

def _layer_norm(y, g, b):
    # eps = 1e-6, biased variance (matches nn.LayerNorm)
    mean = jnp.mean(y, axis=-1, keepdims=True)
    var = jnp.mean(jnp.square(y - mean), axis=-1, keepdims=True)
    return (y - mean) * jax.lax.rsqrt(var + 1e-6) * g + b


def _ffn_block(x, w1, b1, w2, b2, g, bt):
    h = jnp.maximum(jnp.dot(x, w1, preferred_element_type=jnp.float32) + b1, 0.0)
    y = jnp.dot(h, w2, preferred_element_type=jnp.float32) + b2
    return _layer_norm(y + x, g, bt)


def _attn_core(q_all, k_all, v_all, bias, wo, bo, x_res, g, bt, *, n_head, d_k, d_v):
    """Multi-head attention core on batch-flattened 2-D activations.

    q_all: (Rq, h*d_k)  queries, already scaled by 1/sqrt(d_k)
    k_all: (Rk, h*d_k); v_all: (Rk, h*d_v)
    bias:  (Rq, Rk) additive mask bias (0 keep / -1e9 drop), hoisted out of all loops.
    """
    k_all_t = k_all.T                       # ONE transpose per sublayer; per-head
                                            # slices below are sublane-aligned views
    outs = []
    for hh in range(n_head):
        s = jnp.dot(q_all[:, hh * d_k:(hh + 1) * d_k],
                    k_all_t[hh * d_k:(hh + 1) * d_k, :],
                    preferred_element_type=jnp.float32) + bias
        s = s - jnp.max(s, axis=-1, keepdims=True)
        p = jnp.exp(s)
        p = p * pl.reciprocal(jnp.sum(p, axis=-1, keepdims=True))
        outs.append(jnp.dot(p, v_all[:, hh * d_v:(hh + 1) * d_v],
                            preferred_element_type=jnp.float32))
    o = jnp.concatenate(outs, axis=-1)      # (Rq, h*d_v): one Wo matmul for all heads
    y = jnp.dot(o, wo, preferred_element_type=jnp.float32) + bo
    return _layer_norm(y + x_res, g, bt)


# ----------------------------- single fused model kernel -----------------------------

def _model_kernel(*refs, b, l, n_head, d_k, d_v, n_layers, pad_id, cls_id, v_pad):
    M = b * l
    hdk = n_head * d_k
    scale = 1.0 / math.sqrt(d_k)

    src_col_ref, src_row_ref, bat_col_ref, bat_row_ref, cls_ref = refs[:5]
    k = 5
    ep = {name: refs[k + j] for j, name in enumerate(ENC_KEYS)}
    k += len(ENC_KEYS)
    dp = {name: refs[k + j] for j, name in enumerate(DEC_KEYS)}
    k += len(DEC_KEYS)
    out_refs = (refs[k], refs[k + 1])

    # ---- padding masks as additive biases, built ONCE and hoisted out of all loops ----
    key_keep = src_row_ref[...] != pad_id                                    # (1, M)
    same_batch = bat_col_ref[...] == bat_row_ref[...]                        # (M, M)
    enc_bias = jnp.where(jnp.logical_and(same_batch, key_keep), 0.0, NEG_INF)  # (M, M)
    q_batch = jax.lax.broadcasted_iota(jnp.int32, (b, M), 0)
    dec_bias = jnp.where(jnp.logical_and(q_batch == bat_row_ref[...], key_keep),
                         0.0, NEG_INF)                                       # (b, M)

    # ---- encoder: in-kernel embedding gather (one-hot MXU matmul) + pos + LN ----
    v_iota_m = jax.lax.broadcasted_iota(jnp.int32, (M, v_pad), 1)
    oh_src = (v_iota_m == src_col_ref[...]).astype(jnp.float32)              # (M, v_pad)
    x = (jnp.dot(oh_src, ep['emb'][...], preferred_element_type=jnp.float32)
         + ep['pos_flat'][...])
    x = _layer_norm(x, ep['ln_g'][...], ep['ln_b'][...])

    # TODO(synk): if layers / d_model grow, move the layer loop onto a grid axis with
    # per-layer BlockSpecs (double-buffered weights) and use lax.fori_loop instead of
    # the static unroll, to keep VMEM/vreg pressure flat (v7x has only 64 MiB VMEM).
    for i in range(n_layers):
        qkv = jnp.dot(x, ep['wqkv'][i], preferred_element_type=jnp.float32) + ep['bqkv'][i]
        x = _attn_core(qkv[:, :hdk] * scale, qkv[:, hdk:2 * hdk], qkv[:, 2 * hdk:],
                       enc_bias, ep['wo'][i], ep['bo'][i], x,
                       ep['ln1_g'][i], ep['ln1_b'][i],
                       n_head=n_head, d_k=d_k, d_v=d_v)
        x = _ffn_block(x, ep['w1'][i], ep['b1'][i], ep['w2'][i], ep['b2'][i],
                       ep['ln2_g'][i], ep['ln2_b'][i])
    enc = x                                                                  # (M, d), stays in VMEM

    # ---- both decoders, straight line (no grid / no cross-core split) ----
    v_iota_b = jax.lax.broadcasted_iota(jnp.int32, (b, v_pad), 1)
    for di in range(2):
        tgt = cls_id if di == 0 else cls_ref[...]
        oh_tgt = (v_iota_b == tgt).astype(jnp.float32)                       # (b, v_pad)
        y = (jnp.dot(oh_tgt, dp['emb'][di], preferred_element_type=jnp.float32)
             + dp['pos0'][di])
        y = _layer_norm(y, dp['ln_g'][di], dp['ln_b'][di])
        for i in range(n_layers):
            li = di * n_layers + i
            # Decoder self-attention with L_q = L_k = 1: softmax over a single key is
            # the identity (Q/K projections and the target mask cancel), so the sublayer
            # reduces exactly to LN(Wo·(Wv·y + bv) + bo + y).
            v = jnp.dot(y, dp['wv_s'][li], preferred_element_type=jnp.float32) + dp['bv_s'][li]
            o = jnp.dot(v, dp['wo_s'][li], preferred_element_type=jnp.float32) + dp['bo_s'][li]
            y = _layer_norm(o + y, dp['ln_s_g'][li], dp['ln_s_b'][li])
            # Encoder-decoder cross attention (per-layer K/V projection of enc).
            q_all = (jnp.dot(y, dp['wq_c'][li], preferred_element_type=jnp.float32)
                     + dp['bq_c'][li]) * scale
            kv = jnp.dot(enc, dp['wkv_c'][li], preferred_element_type=jnp.float32) + dp['bkv_c'][li]
            y = _attn_core(q_all, kv[:, :hdk], kv[:, hdk:], dec_bias,
                           dp['wo_c'][li], dp['bo_c'][li], y,
                           dp['ln_c_g'][li], dp['ln_c_b'][li],
                           n_head=n_head, d_k=d_k, d_v=d_v)
            y = _ffn_block(y, dp['w1'][li], dp['b1'][li], dp['w2'][li], dp['b2'][li],
                           dp['ln_f_g'][li], dp['ln_f_b'][li])
        # Fused class head (128-lane padded, lane-dense store; sliced outside the kernel).
        out_refs[di][...] = (jnp.dot(y, dp['hw'][di], preferred_element_type=jnp.float32)
                             + dp['hb'][di])


# ----------------------------- full model forward -----------------------------

def model_forward(params, source_seq, classlabels, cfg):
    b, l = source_seq.shape
    M = b * l
    ep, dp = params['encoder'], params['decoders']

    # Tiny id/index inputs; batch-id vectors are trace-time numpy constants (no XLA ops).
    src_col = source_seq.reshape(M, 1).astype(jnp.int32)
    src_row = source_seq.reshape(1, M).astype(jnp.int32)
    bat = np.repeat(np.arange(b, dtype=np.int32), l)
    bat_col = jnp.asarray(bat.reshape(M, 1))
    bat_row = jnp.asarray(bat.reshape(1, M))
    cls_ids = classlabels.reshape(b, 1).astype(jnp.int32)
    # Positional rows for the batch-flattened encoder input (row r -> pos[r % l]).
    pos_flat = jnp.tile(ep['pos'][:l], (b, 1))

    enc_map = dict(ep)
    enc_map['pos_flat'] = pos_flat
    enc_inputs = [enc_map[name] for name in ENC_KEYS]
    dec_inputs = [dp[name] for name in DEC_KEYS]

    kern = functools.partial(
        _model_kernel, b=b, l=l, n_head=cfg['heads'], d_k=cfg['d_k'], d_v=cfg['d_v'],
        n_layers=cfg['layers'], pad_id=cfg['pad_id'], cls_id=cfg['cls_label_id'],
        v_pad=ep['emb'].shape[0])

    h1, h2 = pl.pallas_call(
        kern,
        out_shape=(jax.ShapeDtypeStruct((b, HEAD_PAD), jnp.float32),
                   jax.ShapeDtypeStruct((b, HEAD_PAD), jnp.float32)),
    )(src_col, src_row, bat_col, bat_row, cls_ids, *enc_inputs, *dec_inputs)
    return h1[:, :6], h2[:, :47]


# ----------------------------- parameter init -----------------------------

def _xavier(key, shape):
    a = math.sqrt(6.0 / (shape[0] + shape[1]))
    return jax.random.uniform(key, shape, jnp.float32, -a, a)


def _sinusoid_table(n_pos, d):
    pos = np.arange(n_pos)[:, None].astype(np.float64)
    i = np.arange(d)[None, :]
    angle = pos / np.power(10000, 2 * (i // 2) / d)
    table = np.zeros((n_pos, d))
    table[:, 0::2] = np.sin(angle[:, 0::2])
    table[:, 1::2] = np.cos(angle[:, 1::2])
    return jnp.asarray(table, dtype=jnp.float32)


def _padded_vocab(v):
    return ((v + 63) // 64) * 64            # pad the one-hot contraction dim


def _pad_emb(emb, v_pad):
    return jnp.zeros((v_pad, emb.shape[1]), jnp.float32).at[:emb.shape[0]].set(emb)


def _init_encoder(key, cfg):
    d, L = cfg['d_model'], cfg['layers']
    h, dk, dv, di = cfg['heads'], cfg['d_k'], cfg['d_v'], cfg['d_inner']
    v_pad = _padded_vocab(cfg['vocab_size'])
    keys = jax.random.split(key, L + 1)
    wqkv, wo, w1, w2 = [], [], [], []
    for i in range(L):
        ks = jax.random.split(keys[i], 6)
        wqkv.append(jnp.concatenate([_xavier(ks[0], (d, h * dk)),
                                     _xavier(ks[1], (d, h * dk)),
                                     _xavier(ks[2], (d, h * dv))], axis=1))
        wo.append(_xavier(ks[3], (h * dv, d)))
        w1.append(_xavier(ks[4], (d, di)))
        w2.append(_xavier(ks[5], (di, d)))
    z = lambda *s: jnp.zeros(s, jnp.float32)
    o = lambda *s: jnp.ones(s, jnp.float32)
    return dict(
        emb=_pad_emb(_xavier(keys[-1], (cfg['vocab_size'], d)), v_pad),
        pos=_sinusoid_table(cfg['num_pos'], d),
        ln_g=o(1, d), ln_b=z(1, d),
        wqkv=jnp.stack(wqkv), bqkv=z(L, 1, 2 * h * dk + h * dv),
        wo=jnp.stack(wo), bo=z(L, 1, d),
        ln1_g=o(L, 1, d), ln1_b=z(L, 1, d),
        w1=jnp.stack(w1), b1=z(L, 1, di),
        w2=jnp.stack(w2), b2=z(L, 1, d),
        ln2_g=o(L, 1, d), ln2_b=z(L, 1, d),
    )


def _init_decoder(key, cfg, n_cls):
    d, L = cfg['d_model'], cfg['layers']
    h, dk, dv, di = cfg['heads'], cfg['d_k'], cfg['d_v'], cfg['d_inner']
    v_pad = _padded_vocab(cfg['vocab_size'])
    keys = jax.random.split(key, L + 2)
    wv_s, wo_s, wq_c, wkv_c, wo_c, w1, w2 = [], [], [], [], [], [], []
    for i in range(L):
        ks = jax.random.split(keys[i], 8)
        # Decoder self-attention Q/K weights are omitted: with target length 1 the
        # softmax is the identity and they cannot affect the forward output.
        wv_s.append(_xavier(ks[0], (d, h * dv)))
        wo_s.append(_xavier(ks[1], (h * dv, d)))
        wq_c.append(_xavier(ks[2], (d, h * dk)))
        wkv_c.append(jnp.concatenate([_xavier(ks[3], (d, h * dk)),
                                      _xavier(ks[4], (d, h * dv))], axis=1))
        wo_c.append(_xavier(ks[5], (h * dv, d)))
        w1.append(_xavier(ks[6], (d, di)))
        w2.append(_xavier(ks[7], (di, d)))
    hw = jnp.zeros((d, HEAD_PAD), jnp.float32).at[:, :n_cls].set(_xavier(keys[-2], (d, n_cls)))
    z = lambda *s: jnp.zeros(s, jnp.float32)
    o = lambda *s: jnp.ones(s, jnp.float32)
    return dict(
        emb=_pad_emb(_xavier(keys[-1], (cfg['vocab_size'], d)), v_pad),
        pos0=_sinusoid_table(cfg['num_pos'], d)[0:1],     # target length is always 1
        ln_g=o(1, d), ln_b=z(1, d),
        wv_s=jnp.stack(wv_s), bv_s=z(L, 1, h * dv),
        wo_s=jnp.stack(wo_s), bo_s=z(L, 1, d),
        ln_s_g=o(L, 1, d), ln_s_b=z(L, 1, d),
        wq_c=jnp.stack(wq_c), bq_c=z(L, 1, h * dk),
        wkv_c=jnp.stack(wkv_c), bkv_c=z(L, 1, h * dk + h * dv),
        wo_c=jnp.stack(wo_c), bo_c=z(L, 1, d),
        ln_c_g=o(L, 1, d), ln_c_b=z(L, 1, d),
        w1=jnp.stack(w1), b1=z(L, 1, di),
        w2=jnp.stack(w2), b2=z(L, 1, d),
        ln_f_g=o(L, 1, d), ln_f_b=z(L, 1, d),
        hw=hw, hb=z(1, HEAD_PAD),
    )


def init_params(key, cfg):
    k_enc, k_d1, k_d2 = jax.random.split(key, 3)
    d1 = _init_decoder(k_d1, cfg, 6)
    d2 = _init_decoder(k_d2, cfg, 47)
    # Both decoders run inside the single fused kernel: per-layer params are stored as
    # one (2*L, ...) stack (indexed di*L + i in-kernel); per-decoder params as (2, ...).
    dec = {}
    for name in d1:
        if name in DEC_PER_LAYER:
            dec[name] = jnp.concatenate([d1[name], d2[name]], axis=0)
        else:
            dec[name] = jnp.stack([d1[name], d2[name]], axis=0)
    return dict(encoder=_init_encoder(k_enc, cfg), decoders=dec)


# ----------------------------- main -----------------------------

if __name__ == "__main__":
    cfg = dict(vocab_size=50, pad_id=0, cls_label_id=2,
               d_model=32, d_inner=64, layers=2, heads=4, d_k=8, d_v=8, num_pos=16)

    params = init_params(jax.random.PRNGKey(0), cfg)

    b, l = 2, 8
    k1, k2 = jax.random.split(jax.random.PRNGKey(0))
    source_seq = jax.random.randint(k1, (b, l), 1, cfg['vocab_size'], dtype=jnp.int32)
    source_seq = source_seq.at[:, -2:].set(cfg['pad_id'])   # a bit of padding per row
    classlabels = jax.random.randint(k2, (b,), 1, 47, dtype=jnp.int32)

    fwd = jax.jit(lambda p, s, c: model_forward(p, s, c, cfg))
    h1, h2 = fwd(params, source_seq, classlabels)
    jax.block_until_ready((h1, h2))

    assert h1.shape == (b, 6) and h1.dtype == jnp.float32
    assert h2.shape == (b, 47) and h2.dtype == jnp.float32
    assert bool(jnp.all(jnp.isfinite(h1))) and bool(jnp.all(jnp.isfinite(h2)))
    print("KERNEL_OK")
</pallas_src>

<mosaic_0001>
module attributes {stable_mosaic.version = 11 : i64} {
  func.func @_model_kernel(%arg0: memref<16x1xi32, #tpu.memory_space<vmem>>, %arg1: memref<1x16xi32, #tpu.memory_space<vmem>>, %arg2: memref<16x1xi32, #tpu.memory_space<vmem>>, %arg3: memref<1x16xi32, #tpu.memory_space<vmem>>, %arg4: memref<2x1xi32, #tpu.memory_space<vmem>>, %arg5: memref<64x32xf32, #tpu.memory_space<vmem>>, %arg6: memref<16x32xf32, #tpu.memory_space<vmem>>, %arg7: memref<1x32xf32, #tpu.memory_space<vmem>>, %arg8: memref<1x32xf32, #tpu.memory_space<vmem>>, %arg9: memref<2x32x96xf32, #tpu.memory_space<vmem>>, %arg10: memref<2x1x96xf32, #tpu.memory_space<vmem>>, %arg11: memref<2x32x32xf32, #tpu.memory_space<vmem>>, %arg12: memref<2x1x32xf32, #tpu.memory_space<vmem>>, %arg13: memref<2x1x32xf32, #tpu.memory_space<vmem>>, %arg14: memref<2x1x32xf32, #tpu.memory_space<vmem>>, %arg15: memref<2x32x64xf32, #tpu.memory_space<vmem>>, %arg16: memref<2x1x64xf32, #tpu.memory_space<vmem>>, %arg17: memref<2x64x32xf32, #tpu.memory_space<vmem>>, %arg18: memref<2x1x32xf32, #tpu.memory_space<vmem>>, %arg19: memref<2x1x32xf32, #tpu.memory_space<vmem>>, %arg20: memref<2x1x32xf32, #tpu.memory_space<vmem>>, %arg21: memref<2x64x32xf32, #tpu.memory_space<vmem>>, %arg22: memref<2x1x32xf32, #tpu.memory_space<vmem>>, %arg23: memref<2x1x32xf32, #tpu.memory_space<vmem>>, %arg24: memref<2x1x32xf32, #tpu.memory_space<vmem>>, %arg25: memref<4x32x32xf32, #tpu.memory_space<vmem>>, %arg26: memref<4x1x32xf32, #tpu.memory_space<vmem>>, %arg27: memref<4x32x32xf32, #tpu.memory_space<vmem>>, %arg28: memref<4x1x32xf32, #tpu.memory_space<vmem>>, %arg29: memref<4x1x32xf32, #tpu.memory_space<vmem>>, %arg30: memref<4x1x32xf32, #tpu.memory_space<vmem>>, %arg31: memref<4x32x32xf32, #tpu.memory_space<vmem>>, %arg32: memref<4x1x32xf32, #tpu.memory_space<vmem>>, %arg33: memref<4x32x64xf32, #tpu.memory_space<vmem>>, %arg34: memref<4x1x64xf32, #tpu.memory_space<vmem>>, %arg35: memref<4x32x32xf32, #tpu.memory_space<vmem>>, %arg36: memref<4x1x32xf32, #tpu.memory_space<vmem>>, %arg37: memref<4x1x32xf32, #tpu.memory_space<vmem>>, %arg38: memref<4x1x32xf32, #tpu.memory_space<vmem>>, %arg39: memref<4x32x64xf32, #tpu.memory_space<vmem>>, %arg40: memref<4x1x64xf32, #tpu.memory_space<vmem>>, %arg41: memref<4x64x32xf32, #tpu.memory_space<vmem>>, %arg42: memref<4x1x32xf32, #tpu.memory_space<vmem>>, %arg43: memref<4x1x32xf32, #tpu.memory_space<vmem>>, %arg44: memref<4x1x32xf32, #tpu.memory_space<vmem>>, %arg45: memref<2x32x128xf32, #tpu.memory_space<vmem>>, %arg46: memref<2x1x128xf32, #tpu.memory_space<vmem>>, %arg47: memref<2x128xf32, #tpu.memory_space<vmem>>, %arg48: memref<2x128xf32, #tpu.memory_space<vmem>>) attributes {dimension_semantics = [], scalar_prefetch = 0 : i64, scratch_operands = 0 : i64, tpu.core_type = #tpu.core_type<tc>} {
    %c0 = arith.constant 0 : index
    %c0_0 = arith.constant 0 : index
    %0 = vector.load %arg1[%c0, %c0_0] : memref<1x16xi32, #tpu.memory_space<vmem>>, vector<1x16xi32>
    %c0_i32 = arith.constant 0 : i32
    %1 = vector.broadcast %c0_i32 : i32 to vector<1x16xi32>
    %2 = arith.cmpi ne, %0, %1 : vector<1x16xi32>
    %c0_1 = arith.constant 0 : index
    %c0_2 = arith.constant 0 : index
    %3 = vector.load %arg2[%c0_1, %c0_2] : memref<16x1xi32, #tpu.memory_space<vmem>>, vector<16x1xi32>
    %c0_3 = arith.constant 0 : index
    %c0_4 = arith.constant 0 : index
    %4 = vector.load %arg3[%c0_3, %c0_4] : memref<1x16xi32, #tpu.memory_space<vmem>>, vector<1x16xi32>
    %5 = vector.broadcast %3 : vector<16x1xi32> to vector<16x16xi32>
    %6 = vector.broadcast %4 : vector<1x16xi32> to vector<16x16xi32>
    %7 = arith.cmpi eq, %5, %6 : vector<16x16xi32>
    %8 = vector.broadcast %2 : vector<1x16xi1> to vector<16x16xi1>
    %9 = arith.andi %7, %8 : vector<16x16xi1>
    %cst = arith.constant 0.000000e+00 : f32
    %cst_5 = arith.constant -1.000000e+09 : f32
    %10 = vector.broadcast %cst : f32 to vector<16x16xf32>
    %11 = vector.broadcast %cst_5 : f32 to vector<16x16xf32>
    %12 = arith.select %9, %10, %11 : vector<16x16xi1>, vector<16x16xf32>
    %13 = tpu.iota {dimensions = array<i32: 0>} : vector<2x16xi32>
    %c0_6 = arith.constant 0 : index
    %c0_7 = arith.constant 0 : index
    %14 = vector.load %arg3[%c0_6, %c0_7] : memref<1x16xi32, #tpu.memory_space<vmem>>, vector<1x16xi32>
    %15 = vector.broadcast %14 : vector<1x16xi32> to vector<2x16xi32>
    %16 = arith.cmpi eq, %13, %15 : vector<2x16xi32>
    %17 = vector.broadcast %2 : vector<1x16xi1> to vector<2x16xi1>
    %18 = arith.andi %16, %17 : vector<2x16xi1>
    %cst_8 = arith.constant 0.000000e+00 : f32
    %cst_9 = arith.constant -1.000000e+09 : f32
    %19 = vector.broadcast %cst_8 : f32 to vector<2x16xf32>
    %20 = vector.broadcast %cst_9 : f32 to vector<2x16xf32>
    %21 = arith.select %18, %19, %20 : vector<2x16xi1>, vector<2x16xf32>
    %22 = tpu.iota {dimensions = array<i32: 1>} : vector<16x64xi32>
    %c0_10 = arith.constant 0 : index
    %c0_11 = arith.constant 0 : index
    %23 = vector.load %arg0[%c0_10, %c0_11] : memref<16x1xi32, #tpu.memory_space<vmem>>, vector<16x1xi32>
    %24 = vector.broadcast %23 : vector<16x1xi32> to vector<16x64xi32>
    %25 = arith.cmpi eq, %22, %24 : vector<16x64xi32>
    %26 = arith.extui %25 : vector<16x64xi1> to vector<16x64xi32>
    %27 = arith.sitofp %26 : vector<16x64xi32> to vector<16x64xf32>
    %c0_12 = arith.constant 0 : index
    %c0_13 = arith.constant 0 : index
    %28 = vector.load %arg5[%c0_12, %c0_13] : memref<64x32xf32, #tpu.memory_space<vmem>>, vector<64x32xf32>
    %cst_14 = arith.constant dense<0.000000e+00> : vector<16x32xf32>
    %29 = tpu.matmul %27, %28, %cst_14 {dimension_numbers = #tpu.dot_dimension_numbers<[1], [0], [0], [1], [0, 0, 1, 1], [], []>} : vector<16x64xf32>, vector<64x32xf32>, vector<16x32xf32> -> vector<16x32xf32>
    %c0_15 = arith.constant 0 : index
    %c0_16 = arith.constant 0 : index
    %30 = vector.load %arg6[%c0_15, %c0_16] : memref<16x32xf32, #tpu.memory_space<vmem>>, vector<16x32xf32>
    %31 = arith.addf %29, %30 : vector<16x32xf32>
    %c0_17 = arith.constant 0 : index
    %c0_18 = arith.constant 0 : index
    %32 = vector.load %arg7[%c0_17, %c0_18] : memref<1x32xf32, #tpu.memory_space<vmem>>, vector<1x32xf32>
    %c0_19 = arith.constant 0 : index
    %c0_20 = arith.constant 0 : index
    %33 = vector.load %arg8[%c0_19, %c0_20] : memref<1x32xf32, #tpu.memory_space<vmem>>, vector<1x32xf32>
    %cst_21 = arith.constant dense<0.000000e+00> : vector<16xf32>
    %34 = vector.multi_reduction <add>, %31, %cst_21 [1] : vector<16x32xf32> to vector<16xf32>
    %35 = vector.shape_cast %34 : vector<16xf32> to vector<16x1xf32>
    %cst_22 = arith.constant 3.200000e+01 : f32
    %36 = vector.broadcast %cst_22 : f32 to vector<16x1xf32>
    %37 = arith.divf %35, %36 : vector<16x1xf32>
    %38 = vector.broadcast %37 : vector<16x1xf32> to vector<16x32xf32>
    %39 = arith.subf %31, %38 : vector<16x32xf32>
    %40 = arith.mulf %39, %39 : vector<16x32xf32>
    %cst_23 = arith.constant dense<0.000000e+00> : vector<16xf32>
    %41 = vector.multi_reduction <add>, %40, %cst_23 [1] : vector<16x32xf32> to vector<16xf32>
    %42 = vector.shape_cast %41 : vector<16xf32> to vector<16x1xf32>
    %cst_24 = arith.constant 3.200000e+01 : f32
    %43 = vector.broadcast %cst_24 : f32 to vector<16x1xf32>
    %44 = arith.divf %42, %43 : vector<16x1xf32>
    %45 = vector.broadcast %37 : vector<16x1xf32> to vector<16x32xf32>
    %46 = arith.subf %31, %45 : vector<16x32xf32>
    %cst_25 = arith.constant 9.99999997E-7 : f32
    %47 = vector.broadcast %cst_25 : f32 to vector<16x1xf32>
    %48 = arith.addf %44, %47 : vector<16x1xf32>
    %49 = math.rsqrt %48 : vector<16x1xf32>
    %50 = vector.broadcast %49 : vector<16x1xf32> to vector<16x32xf32>
    %51 = arith.mulf %46, %50 : vector<16x32xf32>
    %52 = vector.broadcast %32 : vector<1x32xf32> to vector<16x32xf32>
    %53 = arith.mulf %51, %52 : vector<16x32xf32>
    %54 = vector.broadcast %33 : vector<1x32xf32> to vector<16x32xf32>
    %55 = arith.addf %53, %54 : vector<16x32xf32>
    %c0_26 = arith.constant 0 : index
    %c0_27 = arith.constant 0 : index
    %c0_28 = arith.constant 0 : index
    %56 = vector.load %arg9[%c0_26, %c0_27, %c0_28] : memref<2x32x96xf32, #tpu.memory_space<vmem>>, vector<1x32x96xf32>
    %57 = vector.shape_cast %56 : vector<1x32x96xf32> to vector<32x96xf32>
    %cst_29 = arith.constant dense<0.000000e+00> : vector<16x96xf32>
    %58 = tpu.matmul %55, %57, %cst_29 {dimension_numbers = #tpu.dot_dimension_numbers<[1], [0], [0], [1], [0, 0, 1, 1], [], []>} : vector<16x32xf32>, vector<32x96xf32>, vector<16x96xf32> -> vector<16x96xf32>
    %c0_30 = arith.constant 0 : index
    %c0_31 = arith.constant 0 : index
    %c0_32 = arith.constant 0 : index
    %59 = vector.load %arg10[%c0_30, %c0_31, %c0_32] : memref<2x1x96xf32, #tpu.memory_space<vmem>>, vector<1x1x96xf32>
    %60 = vector.shape_cast %59 : vector<1x1x96xf32> to vector<1x96xf32>
    %61 = vector.broadcast %60 : vector<1x96xf32> to vector<16x96xf32>
    %62 = arith.addf %58, %61 : vector<16x96xf32>
    %63 = vector.extract_strided_slice %62 {offsets = [0, 0], sizes = [16, 32], strides = [1, 1]} : vector<16x96xf32> to vector<16x32xf32>
    %cst_33 = arith.constant 0.353553385 : f32
    %64 = vector.broadcast %cst_33 : f32 to vector<16x32xf32>
    %65 = arith.mulf %63, %64 : vector<16x32xf32>
    %66 = vector.extract_strided_slice %62 {offsets = [0, 32], sizes = [16, 32], strides = [1, 1]} : vector<16x96xf32> to vector<16x32xf32>
    %67 = vector.extract_strided_slice %62 {offsets = [0, 64], sizes = [16, 32], strides = [1, 1]} : vector<16x96xf32> to vector<16x32xf32>
    %c0_34 = arith.constant 0 : index
    %c0_35 = arith.constant 0 : index
    %c0_36 = arith.constant 0 : index
    %68 = vector.load %arg11[%c0_34, %c0_35, %c0_36] : memref<2x32x32xf32, #tpu.memory_space<vmem>>, vector<1x32x32xf32>
    %69 = vector.shape_cast %68 : vector<1x32x32xf32> to vector<32x32xf32>
    %c0_37 = arith.constant 0 : index
    %c0_38 = arith.constant 0 : index
    %c0_39 = arith.constant 0 : index
    %70 = vector.load %arg12[%c0_37, %c0_38, %c0_39] : memref<2x1x32xf32, #tpu.memory_space<vmem>>, vector<1x1x32xf32>
    %71 = vector.shape_cast %70 : vector<1x1x32xf32> to vector<1x32xf32>
    %c0_40 = arith.constant 0 : index
    %c0_41 = arith.constant 0 : index
    %c0_42 = arith.constant 0 : index
    %72 = vector.load %arg13[%c0_40, %c0_41, %c0_42] : memref<2x1x32xf32, #tpu.memory_space<vmem>>, vector<1x1x32xf32>
    %73 = vector.shape_cast %72 : vector<1x1x32xf32> to vector<1x32xf32>
    %c0_43 = arith.constant 0 : index
    %c0_44 = arith.constant 0 : index
    %c0_45 = arith.constant 0 : index
    %74 = vector.load %arg14[%c0_43, %c0_44, %c0_45] : memref<2x1x32xf32, #tpu.memory_space<vmem>>, vector<1x1x32xf32>
    %75 = vector.shape_cast %74 : vector<1x1x32xf32> to vector<1x32xf32>
    %76 = tpu.transpose %66, [1, 0] : vector<16x32xf32> -> vector<32x16xf32>
    %77 = vector.extract_strided_slice %65 {offsets = [0, 0], sizes = [16, 8], strides = [1, 1]} : vector<16x32xf32> to vector<16x8xf32>
    %78 = vector.extract_strided_slice %76 {offsets = [0, 0], sizes = [8, 16], strides = [1, 1]} : vector<32x16xf32> to vector<8x16xf32>
    %cst_46 = arith.constant dense<0.000000e+00> : vector<16x16xf32>
    %79 = tpu.matmul %77, %78, %cst_46 {dimension_numbers = #tpu.dot_dimension_numbers<[1], [0], [0], [1], [0, 0, 1, 1], [], []>} : vector<16x8xf32>, vector<8x16xf32>, vector<16x16xf32> -> vector<16x16xf32>
    %80 = arith.addf %79, %12 : vector<16x16xf32>
    %cst_47 = arith.constant dense<0xFF800000> : vector<16xf32>
    %81 = vector.multi_reduction <maximumf>, %80, %cst_47 [1] : vector<16x16xf32> to vector<16xf32>
    %82 = vector.shape_cast %81 : vector<16xf32> to vector<16x1xf32>
    %83 = vector.broadcast %82 : vector<16x1xf32> to vector<16x16xf32>
    %84 = arith.subf %80, %83 : vector<16x16xf32>
    %85 = math.exp %84 : vector<16x16xf32>
    %cst_48 = arith.constant dense<0.000000e+00> : vector<16xf32>
    %86 = vector.multi_reduction <add>, %85, %cst_48 [1] : vector<16x16xf32> to vector<16xf32>
    %87 = vector.shape_cast %86 : vector<16xf32> to vector<16x1xf32>
    %88 = tpu.reciprocal %87 : vector<16x1xf32> -> vector<16x1xf32>
    %89 = vector.broadcast %88 : vector<16x1xf32> to vector<16x16xf32>
    %90 = arith.mulf %85, %89 : vector<16x16xf32>
    %91 = vector.extract_strided_slice %67 {offsets = [0, 0], sizes = [16, 8], strides = [1, 1]} : vector<16x32xf32> to vector<16x8xf32>
    %cst_49 = arith.constant dense<0.000000e+00> : vector<16x8xf32>
    %92 = tpu.matmul %90, %91, %cst_49 {dimension_numbers = #tpu.dot_dimension_numbers<[1], [0], [0], [1], [0, 0, 1, 1], [], []>} : vector<16x16xf32>, vector<16x8xf32>, vector<16x8xf32> -> vector<16x8xf32>
    %93 = vector.extract_strided_slice %65 {offsets = [0, 8], sizes = [16, 8], strides = [1, 1]} : vector<16x32xf32> to vector<16x8xf32>
    %94 = vector.extract_strided_slice %76 {offsets = [8, 0], sizes = [8, 16], strides = [1, 1]} : vector<32x16xf32> to vector<8x16xf32>
    %cst_50 = arith.constant dense<0.000000e+00> : vector<16x16xf32>
    %95 = tpu.matmul %93, %94, %cst_50 {dimension_numbers = #tpu.dot_dimension_numbers<[1], [0], [0], [1], [0, 0, 1, 1], [], []>} : vector<16x8xf32>, vector<8x16xf32>, vector<16x16xf32> -> vector<16x16xf32>
    %96 = arith.addf %95, %12 : vector<16x16xf32>
    %cst_51 = arith.constant dense<0xFF800000> : vector<16xf32>
    %97 = vector.multi_reduction <maximumf>, %96, %cst_51 [1] : vector<16x16xf32> to vector<16xf32>
    %98 = vector.shape_cast %97 : vector<16xf32> to vector<16x1xf32>
    %99 = vector.broadcast %98 : vector<16x1xf32> to vector<16x16xf32>
    %100 = arith.subf %96, %99 : vector<16x16xf32>
    %101 = math.exp %100 : vector<16x16xf32>
    %cst_52 = arith.constant dense<0.000000e+00> : vector<16xf32>
    %102 = vector.multi_reduction <add>, %101, %cst_52 [1] : vector<16x16xf32> to vector<16xf32>
    %103 = vector.shape_cast %102 : vector<16xf32> to vector<16x1xf32>
    %104 = tpu.reciprocal %103 : vector<16x1xf32> -> vector<16x1xf32>
    %105 = vector.broadcast %104 : vector<16x1xf32> to vector<16x16xf32>
    %106 = arith.mulf %101, %105 : vector<16x16xf32>
    %107 = vector.extract_strided_slice %67 {offsets = [0, 8], sizes = [16, 8], strides = [1, 1]} : vector<16x32xf32> to vector<16x8xf32>
    %cst_53 = arith.constant dense<0.000000e+00> : vector<16x8xf32>
    %108 = tpu.matmul %106, %107, %cst_53 {dimension_numbers = #tpu.dot_dimension_numbers<[1], [0], [0], [1], [0, 0, 1, 1], [], []>} : vector<16x16xf32>, vector<16x8xf32>, vector<16x8xf32> -> vector<16x8xf32>
    %109 = vector.extract_strided_slice %65 {offsets = [0, 16], sizes = [16, 8], strides = [1, 1]} : vector<16x32xf32> to vector<16x8xf32>
    %110 = vector.extract_strided_slice %76 {offsets = [16, 0], sizes = [8, 16], strides = [1, 1]} : vector<32x16xf32> to vector<8x16xf32>
    %cst_54 = arith.constant dense<0.000000e+00> : vector<16x16xf32>
    %111 = tpu.matmul %109, %110, %cst_54 {dimension_numbers = #tpu.dot_dimension_numbers<[1], [0], [0], [1], [0, 0, 1, 1], [], []>} : vector<16x8xf32>, vector<8x16xf32>, vector<16x16xf32> -> vector<16x16xf32>
    %112 = arith.addf %111, %12 : vector<16x16xf32>
    %cst_55 = arith.constant dense<0xFF800000> : vector<16xf32>
    %113 = vector.multi_reduction <maximumf>, %112, %cst_55 [1] : vector<16x16xf32> to vector<16xf32>
    %114 = vector.shape_cast %113 : vector<16xf32> to vector<16x1xf32>
    %115 = vector.broadcast %114 : vector<16x1xf32> to vector<16x16xf32>
    %116 = arith.subf %112, %115 : vector<16x16xf32>
    %117 = math.exp %116 : vector<16x16xf32>
    %cst_56 = arith.constant dense<0.000000e+00> : vector<16xf32>
    %118 = vector.multi_reduction <add>, %117, %cst_56 [1] : vector<16x16xf32> to vector<16xf32>
    %119 = vector.shape_cast %118 : vector<16xf32> to vector<16x1xf32>
    %120 = tpu.reciprocal %119 : vector<16x1xf32> -> vector<16x1xf32>
    %121 = vector.broadcast %120 : vector<16x1xf32> to vector<16x16xf32>
    %122 = arith.mulf %117, %121 : vector<16x16xf32>
    %123 = vector.extract_strided_slice %67 {offsets = [0, 16], sizes = [16, 8], strides = [1, 1]} : vector<16x32xf32> to vector<16x8xf32>
    %cst_57 = arith.constant dense<0.000000e+00> : vector<16x8xf32>
    %124 = tpu.matmul %122, %123, %cst_57 {dimension_numbers = #tpu.dot_dimension_numbers<[1], [0], [0], [1], [0, 0, 1, 1], [], []>} : vector<16x16xf32>, vector<16x8xf32>, vector<16x8xf32> -> vector<16x8xf32>
    %125 = vector.extract_strided_slice %65 {offsets = [0, 24], sizes = [16, 8], strides = [1, 1]} : vector<16x32xf32> to vector<16x8xf32>
    %126 = vector.extract_strided_slice %76 {offsets = [24, 0], sizes = [8, 16], strides = [1, 1]} : vector<32x16xf32> to vector<8x16xf32>
    %cst_58 = arith.constant dense<0.000000e+00> : vector<16x16xf32>
    %127 = tpu.matmul %125, %126, %cst_58 {dimension_numbers = #tpu.dot_dimension_numbers<[1], [0], [0], [1], [0, 0, 1, 1], [], []>} : vector<16x8xf32>, vector<8x16xf32>, vector<16x16xf32> -> vector<16x16xf32>
    %128 = arith.addf %127, %12 : vector<16x16xf32>
    %cst_59 = arith.constant dense<0xFF800000> : vector<16xf32>
    %129 = vector.multi_reduction <maximumf>, %128, %cst_59 [1] : vector<16x16xf32> to vector<16xf32>
    %130 = vector.shape_cast %129 : vector<16xf32> to vector<16x1xf32>
    %131 = vector.broadcast %130 : vector<16x1xf32> to vector<16x16xf32>
    %132 = arith.subf %128, %131 : vector<16x16xf32>
    %133 = math.exp %132 : vector<16x16xf32>
    %cst_60 = arith.constant dense<0.000000e+00> : vector<16xf32>
    %134 = vector.multi_reduction <add>, %133, %cst_60 [1] : vector<16x16xf32> to vector<16xf32>
    %135 = vector.shape_cast %134 : vector<16xf32> to vector<16x1xf32>
    %136 = tpu.reciprocal %135 : vector<16x1xf32> -> vector<16x1xf32>
    %137 = vector.broadcast %136 : vector<16x1xf32> to vector<16x16xf32>
    %138 = arith.mulf %133, %137 : vector<16x16xf32>
    %139 = vector.extract_strided_slice %67 {offsets = [0, 24], sizes = [16, 8], strides = [1, 1]} : vector<16x32xf32> to vector<16x8xf32>
    %cst_61 = arith.constant dense<0.000000e+00> : vector<16x8xf32>
    %140 = tpu.matmul %138, %139, %cst_61 {dimension_numbers = #tpu.dot_dimension_numbers<[1], [0], [0], [1], [0, 0, 1, 1], [], []>} : vector<16x16xf32>, vector<16x8xf32>, vector<16x8xf32> -> vector<16x8xf32>
    %141 = tpu.concatenate %92, %108, %124, %140 in 1 : vector<16x8xf32>, vector<16x8xf32>, vector<16x8xf32>, vector<16x8xf32> -> vector<16x32xf32>
    %cst_62 = arith.constant dense<0.000000e+00> : vector<16x32xf32>
    %142 = tpu.matmul %141, %69, %cst_62 {dimension_numbers = #tpu.dot_dimension_numbers<[1], [0], [0], [1], [0, 0, 1, 1], [], []>} : vector<16x32xf32>, vector<32x32xf32>, vector<16x32xf32> -> vector<16x32xf32>
    %143 = vector.broadcast %71 : vector<1x32xf32> to vector<16x32xf32>
    %144 = arith.addf %142, %143 : vector<16x32xf32>
    %145 = arith.addf %144, %55 : vector<16x32xf32>
    %cst_63 = arith.constant dense<0.000000e+00> : vector<16xf32>
    %146 = vector.multi_reduction <add>, %145, %cst_63 [1] : vector<16x32xf32> to vector<16xf32>
    %147 = vector.shape_cast %146 : vector<16xf32> to vector<16x1xf32>
    %cst_64 = arith.constant 3.200000e+01 : f32
    %148 = vector.broadcast %cst_64 : f32 to vector<16x1xf32>
    %149 = arith.divf %147, %148 : vector<16x1xf32>
    %150 = vector.broadcast %149 : vector<16x1xf32> to vector<16x32xf32>
    %151 = arith.subf %145, %150 : vector<16x32xf32>
    %152 = arith.mulf %151, %151 : vector<16x32xf32>
    %cst_65 = arith.constant dense<0.000000e+00> : vector<16xf32>
    %153 = vector.multi_reduction <add>, %152, %cst_65 [1] : vector<16x32xf32> to vector<16xf32>
    %154 = vector.shape_cast %153 : vector<16xf32> to vector<16x1xf32>
    %cst_66 = arith.constant 3.200000e+01 : f32
    %155 = vector.broadcast %cst_66 : f32 to vector<16x1xf32>
    %156 = arith.divf %154, %155 : vector<16x1xf32>
    %157 = vector.broadcast %149 : vector<16x1xf32> to vector<16x32xf32>
    %158 = arith.subf %145, %157 : vector<16x32xf32>
    %cst_67 = arith.constant 9.99999997E-7 : f32
    %159 = vector.broadcast %cst_67 : f32 to vector<16x1xf32>
    %160 = arith.addf %156, %159 : vector<16x1xf32>
    %161 = math.rsqrt %160 : vector<16x1xf32>
    %162 = vector.broadcast %161 : vector<16x1xf32> to vector<16x32xf32>
    %163 = arith.mulf %158, %162 : vector<16x32xf32>
    %164 = vector.broadcast %73 : vector<1x32xf32> to vector<16x32xf32>
    %165 = arith.mulf %163, %164 : vector<16x32xf32>
    %166 = vector.broadcast %75 : vector<1x32xf32> to vector<16x32xf32>
    %167 = arith.addf %165, %166 : vector<16x32xf32>
    %c0_68 = arith.constant 0 : index
    %c0_69 = arith.constant 0 : index
    %c0_70 = arith.constant 0 : index
    %168 = vector.load %arg15[%c0_68, %c0_69, %c0_70] : memref<2x32x64xf32, #tpu.memory_space<vmem>>, vector<1x32x64xf32>
    %169 = vector.shape_cast %168 : vector<1x32x64xf32> to vector<32x64xf32>
    %c0_71 = arith.constant 0 : index
    %c0_72 = arith.constant 0 : index
    %c0_73 = arith.constant 0 : index
    %170 = vector.load %arg16[%c0_71, %c0_72, %c0_73] : memref<2x1x64xf32, #tpu.memory_space<vmem>>, vector<1x1x64xf32>
    %171 = vector.shape_cast %170 : vector<1x1x64xf32> to vector<1x64xf32>
    %c0_74 = arith.constant 0 : index
    %c0_75 = arith.constant 0 : index
    %c0_76 = arith.constant 0 : index
    %172 = vector.load %arg17[%c0_74, %c0_75, %c0_76] : memref<2x64x32xf32, #tpu.memory_space<vmem>>, vector<1x64x32xf32>
    %173 = vector.shape_cast %172 : vector<1x64x32xf32> to vector<64x32xf32>
    %c0_77 = arith.constant 0 : index
    %c0_78 = arith.constant 0 : index
    %c0_79 = arith.constant 0 : index
    %174 = vector.load %arg18[%c0_77, %c0_78, %c0_79] : memref<2x1x32xf32, #tpu.memory_space<vmem>>, vector<1x1x32xf32>
    %175 = vector.shape_cast %174 : vector<1x1x32xf32> to vector<1x32xf32>
    %c0_80 = arith.constant 0 : index
    %c0_81 = arith.constant 0 : index
    %c0_82 = arith.constant 0 : index
    %176 = vector.load %arg19[%c0_80, %c0_81, %c0_82] : memref<2x1x32xf32, #tpu.memory_space<vmem>>, vector<1x1x32xf32>
    %177 = vector.shape_cast %176 : vector<1x1x32xf32> to vector<1x32xf32>
    %c0_83 = arith.constant 0 : index
    %c0_84 = arith.constant 0 : index
    %c0_85 = arith.constant 0 : index
    %178 = vector.load %arg20[%c0_83, %c0_84, %c0_85] : memref<2x1x32xf32, #tpu.memory_space<vmem>>, vector<1x1x32xf32>
    %179 = vector.shape_cast %178 : vector<1x1x32xf32> to vector<1x32xf32>
    %cst_86 = arith.constant dense<0.000000e+00> : vector<16x64xf32>
    %180 = tpu.matmul %167, %169, %cst_86 {dimension_numbers = #tpu.dot_dimension_numbers<[1], [0], [0], [1], [0, 0, 1, 1], [], []>} : vector<16x32xf32>, vector<32x64xf32>, vector<16x64xf32> -> vector<16x64xf32>
    %181 = vector.broadcast %171 : vector<1x64xf32> to vector<16x64xf32>
    %182 = arith.addf %180, %181 : vector<16x64xf32>
    %cst_87 = arith.constant 0.000000e+00 : f32
    %183 = vector.broadcast %cst_87 : f32 to vector<16x64xf32>
    %184 = arith.maximumf %182, %183 : vector<16x64xf32>
    %cst_88 = arith.constant dense<0.000000e+00> : vector<16x32xf32>
    %185 = tpu.matmul %184, %173, %cst_88 {dimension_numbers = #tpu.dot_dimension_numbers<[1], [0], [0], [1], [0, 0, 1, 1], [], []>} : vector<16x64xf32>, vector<64x32xf32>, vector<16x32xf32> -> vector<16x32xf32>
    %186 = vector.broadcast %175 : vector<1x32xf32> to vector<16x32xf32>
    %187 = arith.addf %185, %186 : vector<16x32xf32>
    %188 = arith.addf %187, %167 : vector<16x32xf32>
    %cst_89 = arith.constant dense<0.000000e+00> : vector<16xf32>
    %189 = vector.multi_reduction <add>, %188, %cst_89 [1] : vector<16x32xf32> to vector<16xf32>
    %190 = vector.shape_cast %189 : vector<16xf32> to vector<16x1xf32>
    %cst_90 = arith.constant 3.200000e+01 : f32
    %191 = vector.broadcast %cst_90 : f32 to vector<16x1xf32>
    %192 = arith.divf %190, %191 : vector<16x1xf32>
    %193 = vector.broadcast %192 : vector<16x1xf32> to vector<16x32xf32>
    %194 = arith.subf %188, %193 : vector<16x32xf32>
    %195 = arith.mulf %194, %194 : vector<16x32xf32>
    %cst_91 = arith.constant dense<0.000000e+00> : vector<16xf32>
    %196 = vector.multi_reduction <add>, %195, %cst_91 [1] : vector<16x32xf32> to vector<16xf32>
    %197 = vector.shape_cast %196 : vector<16xf32> to vector<16x1xf32>
    %cst_92 = arith.constant 3.200000e+01 : f32
    %198 = vector.broadcast %cst_92 : f32 to vector<16x1xf32>
    %199 = arith.divf %197, %198 : vector<16x1xf32>
    %200 = vector.broadcast %192 : vector<16x1xf32> to vector<16x32xf32>
    %201 = arith.subf %188, %200 : vector<16x32xf32>
    %cst_93 = arith.constant 9.99999997E-7 : f32
    %202 = vector.broadcast %cst_93 : f32 to vector<16x1xf32>
    %203 = arith.addf %199, %202 : vector<16x1xf32>
    %204 = math.rsqrt %203 : vector<16x1xf32>
    %205 = vector.broadcast %204 : vector<16x1xf32> to vector<16x32xf32>
    %206 = arith.mulf %201, %205 : vector<16x32xf32>
    %207 = vector.broadcast %177 : vector<1x32xf32> to vector<16x32xf32>
    %208 = arith.mulf %206, %207 : vector<16x32xf32>
    %209 = vector.broadcast %179 : vector<1x32xf32> to vector<16x32xf32>
    %210 = arith.addf %208, %209 : vector<16x32xf32>
    %c1 = arith.constant 1 : index
    %c0_94 = arith.constant 0 : index
    %c0_95 = arith.constant 0 : index
    %211 = vector.load %arg9[%c1, %c0_94, %c0_95] : memref<2x32x96xf32, #tpu.memory_space<vmem>>, vector<1x32x96xf32>
    %212 = vector.shape_cast %211 : vector<1x32x96xf32> to vector<32x96xf32>
    %cst_96 = arith.constant dense<0.000000e+00> : vector<16x96xf32>
    %213 = tpu.matmul %210, %212, %cst_96 {dimension_numbers = #tpu.dot_dimension_numbers<[1], [0], [0], [1], [0, 0, 1, 1], [], []>} : vector<16x32xf32>, vector<32x96xf32>, vector<16x96xf32> -> vector<16x96xf32>
    %c1_97 = arith.constant 1 : index
    %c0_98 = arith.constant 0 : index
    %c0_99 = arith.constant 0 : index
    %214 = vector.load %arg10[%c1_97, %c0_98, %c0_99] : memref<2x1x96xf32, #tpu.memory_space<vmem>>, vector<1x1x96xf32>
    %215 = vector.shape_cast %214 : vector<1x1x96xf32> to vector<1x96xf32>
    %216 = vector.broadcast %215 : vector<1x96xf32> to vector<16x96xf32>
    %217 = arith.addf %213, %216 : vector<16x96xf32>
    %218 = vector.extract_strided_slice %217 {offsets = [0, 0], sizes = [16, 32], strides = [1, 1]} : vector<16x96xf32> to vector<16x32xf32>
    %cst_100 = arith.constant 0.353553385 : f32
    %219 = vector.broadcast %cst_100 : f32 to vector<16x32xf32>
    %220 = arith.mulf %218, %219 : vector<16x32xf32>
    %221 = vector.extract_strided_slice %217 {offsets = [0, 32], sizes = [16, 32], strides = [1, 1]} : vector<16x96xf32> to vector<16x32xf32>
    %222 = vector.extract_strided_slice %217 {offsets = [0, 64], sizes = [16, 32], strides = [1, 1]} : vector<16x96xf32> to vector<16x32xf32>
    %c1_101 = arith.constant 1 : index
    %c0_102 = arith.constant 0 : index
    %c0_103 = arith.constant 0 : index
    %223 = vector.load %arg11[%c1_101, %c0_102, %c0_103] : memref<2x32x32xf32, #tpu.memory_space<vmem>>, vector<1x32x32xf32>
    %224 = vector.shape_cast %223 : vector<1x32x32xf32> to vector<32x32xf32>
    %c1_104 = arith.constant 1 : index
    %c0_105 = arith.constant 0 : index
    %c0_106 = arith.constant 0 : index
    %225 = vector.load %arg12[%c1_104, %c0_105, %c0_106] : memref<2x1x32xf32, #tpu.memory_space<vmem>>, vector<1x1x32xf32>
    %226 = vector.shape_cast %225 : vector<1x1x32xf32> to vector<1x32xf32>
    %c1_107 = arith.constant 1 : index
    %c0_108 = arith.constant 0 : index
    %c0_109 = arith.constant 0 : index
    %227 = vector.load %arg13[%c1_107, %c0_108, %c0_109] : memref<2x1x32xf32, #tpu.memory_space<vmem>>, vector<1x1x32xf32>
    %228 = vector.shape_cast %227 : vector<1x1x32xf32> to vector<1x32xf32>
    %c1_110 = arith.constant 1 : index
    %c0_111 = arith.constant 0 : index
    %c0_112 = arith.constant 0 : index
    %229 = vector.load %arg14[%c1_110, %c0_111, %c0_112] : memref<2x1x32xf32, #tpu.memory_space<vmem>>, vector<1x1x32xf32>
    %230 = vector.shape_cast %229 : vector<1x1x32xf32> to vector<1x32xf32>
    %231 = tpu.transpose %221, [1, 0] : vector<16x32xf32> -> vector<32x16xf32>
    %232 = vector.extract_strided_slice %220 {offsets = [0, 0], sizes = [16, 8], strides = [1, 1]} : vector<16x32xf32> to vector<16x8xf32>
    %233 = vector.extract_strided_slice %231 {offsets = [0, 0], sizes = [8, 16], strides = [1, 1]} : vector<32x16xf32> to vector<8x16xf32>
    %cst_113 = arith.constant dense<0.000000e+00> : vector<16x16xf32>
    %234 = tpu.matmul %232, %233, %cst_113 {dimension_numbers = #tpu.dot_dimension_numbers<[1], [0], [0], [1], [0, 0, 1, 1], [], []>} : vector<16x8xf32>, vector<8x16xf32>, vector<16x16xf32> -> vector<16x16xf32>
    %235 = arith.addf %234, %12 : vector<16x16xf32>
    %cst_114 = arith.constant dense<0xFF800000> : vector<16xf32>
    %236 = vector.multi_reduction <maximumf>, %235, %cst_114 [1] : vector<16x16xf32> to vector<16xf32>
    %237 = vector.shape_cast %236 : vector<16xf32> to vector<16x1xf32>
    %238 = vector.broadcast %237 : vector<16x1xf32> to vector<16x16xf32>
    %239 = arith.subf %235, %238 : vector<16x16xf32>
    %240 = math.exp %239 : vector<16x16xf32>
    %cst_115 = arith.constant dense<0.000000e+00> : vector<16xf32>
    %241 = vector.multi_reduction <add>, %240, %cst_115 [1] : vector<16x16xf32> to vector<16xf32>
    %242 = vector.shape_cast %241 : vector<16xf32> to vector<16x1xf32>
    %243 = tpu.reciprocal %242 : vector<16x1xf32> -> vector<16x1xf32>
    %244 = vector.broadcast %243 : vector<16x1xf32> to vector<16x16xf32>
    %245 = arith.mulf %240, %244 : vector<16x16xf32>
    %246 = vector.extract_strided_slice %222 {offsets = [0, 0], sizes = [16, 8], strides = [1, 1]} : vector<16x32xf32> to vector<16x8xf32>
    %cst_116 = arith.constant dense<0.000000e+00> : vector<16x8xf32>
    %247 = tpu.matmul %245, %246, %cst_116 {dimension_numbers = #tpu.dot_dimension_numbers<[1], [0], [0], [1], [0, 0, 1, 1], [], []>} : vector<16x16xf32>, vector<16x8xf32>, vector<16x8xf32> -> vector<16x8xf32>
    %248 = vector.extract_strided_slice %220 {offsets = [0, 8], sizes = [16, 8], strides = [1, 1]} : vector<16x32xf32> to vector<16x8xf32>
    %249 = vector.extract_strided_slice %231 {offsets = [8, 0], sizes = [8, 16], strides = [1, 1]} : vector<32x16xf32> to vector<8x16xf32>
    %cst_117 = arith.constant dense<0.000000e+00> : vector<16x16xf32>
    %250 = tpu.matmul %248, %249, %cst_117 {dimension_numbers = #tpu.dot_dimension_numbers<[1], [0], [0], [1], [0, 0, 1, 1], [], []>} : vector<16x8xf32>, vector<8x16xf32>, vector<16x16xf32> -> vector<16x16xf32>
    %251 = arith.addf %250, %12 : vector<16x16xf32>
    %cst_118 = arith.constant dense<0xFF800000> : vector<16xf32>
    %252 = vector.multi_reduction <maximumf>, %251, %cst_118 [1] : vector<16x16xf32> to vector<16xf32>
    %253 = vector.shape_cast %252 : vector<16xf32> to vector<16x1xf32>
    %254 = vector.broadcast %253 : vector<16x1xf32> to vector<16x16xf32>
    %255 = arith.subf %251, %254 : vector<16x16xf32>
    %256 = math.exp %255 : vector<16x16xf32>
    %cst_119 = arith.constant dense<0.000000e+00> : vector<16xf32>
    %257 = vector.multi_reduction <add>, %256, %cst_119 [1] : vector<16x16xf32> to vector<16xf32>
    %258 = vector.shape_cast %257 : vector<16xf32> to vector<16x1xf32>
    %259 = tpu.reciprocal %258 : vector<16x1xf32> -> vector<16x1xf32>
    %260 = vector.broadcast %259 : vector<16x1xf32> to vector<16x16xf32>
    %261 = arith.mulf %256, %260 : vector<16x16xf32>
    %262 = vector.extract_strided_slice %222 {offsets = [0, 8], sizes = [16, 8], strides = [1, 1]} : vector<16x32xf32> to vector<16x8xf32>
    %cst_120 = arith.constant dense<0.000000e+00> : vector<16x8xf32>
    %263 = tpu.matmul %261, %262, %cst_120 {dimension_numbers = #tpu.dot_dimension_numbers<[1], [0], [0], [1], [0, 0, 1, 1], [], []>} : vector<16x16xf32>, vector<16x8xf32>, vector<16x8xf32> -> vector<16x8xf32>
    %264 = vector.extract_strided_slice %220 {offsets = [0, 16], sizes = [16, 8], strides = [1, 1]} : vector<16x32xf32> to vector<16x8xf32>
    %265 = vector.extract_strided_slice %231 {offsets = [16, 0], sizes = [8, 16], strides = [1, 1]} : vector<32x16xf32> to vector<8x16xf32>
    %cst_121 = arith.constant dense<0.000000e+00> : vector<16x16xf32>
    %266 = tpu.matmul %264, %265, %cst_121 {dimension_numbers = #tpu.dot_dimension_numbers<[1], [0], [0], [1], [0, 0, 1, 1], [], []>} : vector<16x8xf32>, vector<8x16xf32>, vector<16x16xf32> -> vector<16x16xf32>
    %267 = arith.addf %266, %12 : vector<16x16xf32>
    %cst_122 = arith.constant dense<0xFF800000> : vector<16xf32>
    %268 = vector.multi_reduction <maximumf>, %267, %cst_122 [1] : vector<16x16xf32> to vector<16xf32>
    %269 = vector.shape_cast %268 : vector<16xf32> to vector<16x1xf32>
    %270 = vector.broadcast %269 : vector<16x1xf32> to vector<16x16xf32>
    %271 = arith.subf %267, %270 : vector<16x16xf32>
    %272 = math.exp %271 : vector<16x16xf32>
    %cst_123 = arith.constant dense<0.000000e+00> : vector<16xf32>
    %273 = vector.multi_reduction <add>, %272, %cst_123 [1] : vector<16x16xf32> to vector<16xf32>
    %274 = vector.shape_cast %273 : vector<16xf32> to vector<16x1xf32>
    %275 = tpu.reciprocal %274 : vector<16x1xf32> -> vector<16x1xf32>
    %276 = vector.broadcast %275 : vector<16x1xf32> to vector<16x16xf32>
    %277 = arith.mulf %272, %276 : vector<16x16xf32>
    %278 = vector.extract_strided_slice %222 {offsets = [0, 16], sizes = [16, 8], strides = [1, 1]} : vector<16x32xf32> to vector<16x8xf32>
    %cst_124 = arith.constant dense<0.000000e+00> : vector<16x8xf32>
    %279 = tpu.matmul %277, %278, %cst_124 {dimension_numbers = #tpu.dot_dimension_numbers<[1], [0], [0], [1], [0, 0, 1, 1], [], []>} : vector<16x16xf32>, vector<16x8xf32>, vector<16x8xf32> -> vector<16x8xf32>
    %280 = vector.extract_strided_slice %220 {offsets = [0, 24], sizes = [16, 8], strides = [1, 1]} : vector<16x32xf32> to vector<16x8xf32>
    %281 = vector.extract_strided_slice %231 {offsets = [24, 0], sizes = [8, 16], strides = [1, 1]} : vector<32x16xf32> to vector<8x16xf32>
    %cst_125 = arith.constant dense<0.000000e+00> : vector<16x16xf32>
    %282 = tpu.matmul %280, %281, %cst_125 {dimension_numbers = #tpu.dot_dimension_numbers<[1], [0], [0], [1], [0, 0, 1, 1], [], []>} : vector<16x8xf32>, vector<8x16xf32>, vector<16x16xf32> -> vector<16x16xf32>
    %283 = arith.addf %282, %12 : vector<16x16xf32>
    %cst_126 = arith.constant dense<0xFF800000> : vector<16xf32>
    %284 = vector.multi_reduction <maximumf>, %283, %cst_126 [1] : vector<16x16xf32> to vector<16xf32>
    %285 = vector.shape_cast %284 : vector<16xf32> to vector<16x1xf32>
    %286 = vector.broadcast %285 : vector<16x1xf32> to vector<16x16xf32>
    %287 = arith.subf %283, %286 : vector<16x16xf32>
    %288 = math.exp %287 : vector<16x16xf32>
    %cst_127 = arith.constant dense<0.000000e+00> : vector<16xf32>
    %289 = vector.multi_reduction <add>, %288, %cst_127 [1] : vector<16x16xf32> to vector<16xf32>
    %290 = vector.shape_cast %289 : vector<16xf32> to vector<16x1xf32>
    %291 = tpu.reciprocal %290 : vector<16x1xf32> -> vector<16x1xf32>
    %292 = vector.broadcast %291 : vector<16x1xf32> to vector<16x16xf32>
    %293 = arith.mulf %288, %292 : vector<16x16xf32>
    %294 = vector.extract_strided_slice %222 {offsets = [0, 24], sizes = [16, 8], strides = [1, 1]} : vector<16x32xf32> to vector<16x8xf32>
    %cst_128 = arith.constant dense<0.000000e+00> : vector<16x8xf32>
    %295 = tpu.matmul %293, %294, %cst_128 {dimension_numbers = #tpu.dot_dimension_numbers<[1], [0], [0], [1], [0, 0, 1, 1], [], []>} : vector<16x16xf32>, vector<16x8xf32>, vector<16x8xf32> -> vector<16x8xf32>
    %296 = tpu.concatenate %247, %263, %279, %295 in 1 : vector<16x8xf32>, vector<16x8xf32>, vector<16x8xf32>, vector<16x8xf32> -> vector<16x32xf32>
    %cst_129 = arith.constant dense<0.000000e+00> : vector<16x32xf32>
    %297 = tpu.matmul %296, %224, %cst_129 {dimension_numbers = #tpu.dot_dimension_numbers<[1], [0], [0], [1], [0, 0, 1, 1], [], []>} : vector<16x32xf32>, vector<32x32xf32>, vector<16x32xf32> -> vector<16x32xf32>
    %298 = vector.broadcast %226 : vector<1x32xf32> to vector<16x32xf32>
    %299 = arith.addf %297, %298 : vector<16x32xf32>
    %300 = arith.addf %299, %210 : vector<16x32xf32>
    %cst_130 = arith.constant dense<0.000000e+00> : vector<16xf32>
    %301 = vector.multi_reduction <add>, %300, %cst_130 [1] : vector<16x32xf32> to vector<16xf32>
    %302 = vector.shape_cast %301 : vector<16xf32> to vector<16x1xf32>
    %cst_131 = arith.constant 3.200000e+01 : f32
    %303 = vector.broadcast %cst_131 : f32 to vector<16x1xf32>
    %304 = arith.divf %302, %303 : vector<16x1xf32>
    %305 = vector.broadcast %304 : vector<16x1xf32> to vector<16x32xf32>
    %306 = arith.subf %300, %305 : vector<16x32xf32>
    %307 = arith.mulf %306, %306 : vector<16x32xf32>
    %cst_132 = arith.constant dense<0.000000e+00> : vector<16xf32>
    %308 = vector.multi_reduction <add>, %307, %cst_132 [1] : vector<16x32xf32> to vector<16xf32>
    %309 = vector.shape_cast %308 : vector<16xf32> to vector<16x1xf32>
    %cst_133 = arith.constant 3.200000e+01 : f32
    %310 = vector.broadcast %cst_133 : f32 to vector<16x1xf32>
    %311 = arith.divf %309, %310 : vector<16x1xf32>
    %312 = vector.broadcast %304 : vector<16x1xf32> to vector<16x32xf32>
    %313 = arith.subf %300, %312 : vector<16x32xf32>
    %cst_134 = arith.constant 9.99999997E-7 : f32
    %314 = vector.broadcast %cst_134 : f32 to vector<16x1xf32>
    %315 = arith.addf %311, %314 : vector<16x1xf32>
    %316 = math.rsqrt %315 : vector<16x1xf32>
    %317 = vector.broadcast %316 : vector<16x1xf32> to vector<16x32xf32>
    %318 = arith.mulf %313, %317 : vector<16x32xf32>
    %319 = vector.broadcast %228 : vector<1x32xf32> to vector<16x32xf32>
    %320 = arith.mulf %318, %319 : vector<16x32xf32>
    %321 = vector.broadcast %230 : vector<1x32xf32> to vector<16x32xf32>
    %322 = arith.addf %320, %321 : vector<16x32xf32>
    %c1_135 = arith.constant 1 : index
    %c0_136 = arith.constant 0 : index
    %c0_137 = arith.constant 0 : index
    %323 = vector.load %arg15[%c1_135, %c0_136, %c0_137] : memref<2x32x64xf32, #tpu.memory_space<vmem>>, vector<1x32x64xf32>
    %324 = vector.shape_cast %323 : vector<1x32x64xf32> to vector<32x64xf32>
    %c1_138 = arith.constant 1 : index
    %c0_139 = arith.constant 0 : index
    %c0_140 = arith.constant 0 : index
    %325 = vector.load %arg16[%c1_138, %c0_139, %c0_140] : memref<2x1x64xf32, #tpu.memory_space<vmem>>, vector<1x1x64xf32>
    %326 = vector.shape_cast %325 : vector<1x1x64xf32> to vector<1x64xf32>
    %c1_141 = arith.constant 1 : index
    %c0_142 = arith.constant 0 : index
    %c0_143 = arith.constant 0 : index
    %327 = vector.load %arg17[%c1_141, %c0_142, %c0_143] : memref<2x64x32xf32, #tpu.memory_space<vmem>>, vector<1x64x32xf32>
    %328 = vector.shape_cast %327 : vector<1x64x32xf32> to vector<64x32xf32>
    %c1_144 = arith.constant 1 : index
    %c0_145 = arith.constant 0 : index
    %c0_146 = arith.constant 0 : index
    %329 = vector.load %arg18[%c1_144, %c0_145, %c0_146] : memref<2x1x32xf32, #tpu.memory_space<vmem>>, vector<1x1x32xf32>
    %330 = vector.shape_cast %329 : vector<1x1x32xf32> to vector<1x32xf32>
    %c1_147 = arith.constant 1 : index
    %c0_148 = arith.constant 0 : index
    %c0_149 = arith.constant 0 : index
    %331 = vector.load %arg19[%c1_147, %c0_148, %c0_149] : memref<2x1x32xf32, #tpu.memory_space<vmem>>, vector<1x1x32xf32>
    %332 = vector.shape_cast %331 : vector<1x1x32xf32> to vector<1x32xf32>
    %c1_150 = arith.constant 1 : index
    %c0_151 = arith.constant 0 : index
    %c0_152 = arith.constant 0 : index
    %333 = vector.load %arg20[%c1_150, %c0_151, %c0_152] : memref<2x1x32xf32, #tpu.memory_space<vmem>>, vector<1x1x32xf32>
    %334 = vector.shape_cast %333 : vector<1x1x32xf32> to vector<1x32xf32>
    %cst_153 = arith.constant dense<0.000000e+00> : vector<16x64xf32>
    %335 = tpu.matmul %322, %324, %cst_153 {dimension_numbers = #tpu.dot_dimension_numbers<[1], [0], [0], [1], [0, 0, 1, 1], [], []>} : vector<16x32xf32>, vector<32x64xf32>, vector<16x64xf32> -> vector<16x64xf32>
    %336 = vector.broadcast %326 : vector<1x64xf32> to vector<16x64xf32>
    %337 = arith.addf %335, %336 : vector<16x64xf32>
    %cst_154 = arith.constant 0.000000e+00 : f32
    %338 = vector.broadcast %cst_154 : f32 to vector<16x64xf32>
    %339 = arith.maximumf %337, %338 : vector<16x64xf32>
    %cst_155 = arith.constant dense<0.000000e+00> : vector<16x32xf32>
    %340 = tpu.matmul %339, %328, %cst_155 {dimension_numbers = #tpu.dot_dimension_numbers<[1], [0], [0], [1], [0, 0, 1, 1], [], []>} : vector<16x64xf32>, vector<64x32xf32>, vector<16x32xf32> -> vector<16x32xf32>
    %341 = vector.broadcast %330 : vector<1x32xf32> to vector<16x32xf32>
    %342 = arith.addf %340, %341 : vector<16x32xf32>
    %343 = arith.addf %342, %322 : vector<16x32xf32>
    %cst_156 = arith.constant dense<0.000000e+00> : vector<16xf32>
    %344 = vector.multi_reduction <add>, %343, %cst_156 [1] : vector<16x32xf32> to vector<16xf32>
    %345 = vector.shape_cast %344 : vector<16xf32> to vector<16x1xf32>
    %cst_157 = arith.constant 3.200000e+01 : f32
    %346 = vector.broadcast %cst_157 : f32 to vector<16x1xf32>
    %347 = arith.divf %345, %346 : vector<16x1xf32>
    %348 = vector.broadcast %347 : vector<16x1xf32> to vector<16x32xf32>
    %349 = arith.subf %343, %348 : vector<16x32xf32>
    %350 = arith.mulf %349, %349 : vector<16x32xf32>
    %cst_158 = arith.constant dense<0.000000e+00> : vector<16xf32>
    %351 = vector.multi_reduction <add>, %350, %cst_158 [1] : vector<16x32xf32> to vector<16xf32>
    %352 = vector.shape_cast %351 : vector<16xf32> to vector<16x1xf32>
    %cst_159 = arith.constant 3.200000e+01 : f32
    %353 = vector.broadcast %cst_159 : f32 to vector<16x1xf32>
    %354 = arith.divf %352, %353 : vector<16x1xf32>
    %355 = vector.broadcast %347 : vector<16x1xf32> to vector<16x32xf32>
    %356 = arith.subf %343, %355 : vector<16x32xf32>
    %cst_160 = arith.constant 9.99999997E-7 : f32
    %357 = vector.broadcast %cst_160 : f32 to vector<16x1xf32>
    %358 = arith.addf %354, %357 : vector<16x1xf32>
    %359 = math.rsqrt %358 : vector<16x1xf32>
    %360 = vector.broadcast %359 : vector<16x1xf32> to vector<16x32xf32>
    %361 = arith.mulf %356, %360 : vector<16x32xf32>
    %362 = vector.broadcast %332 : vector<1x32xf32> to vector<16x32xf32>
    %363 = arith.mulf %361, %362 : vector<16x32xf32>
    %364 = vector.broadcast %334 : vector<1x32xf32> to vector<16x32xf32>
    %365 = arith.addf %363, %364 : vector<16x32xf32>
    %366 = tpu.iota {dimensions = array<i32: 1>} : vector<2x64xi32>
    %c2_i32 = arith.constant 2 : i32
    %367 = vector.broadcast %c2_i32 : i32 to vector<2x64xi32>
    %368 = arith.cmpi eq, %366, %367 : vector<2x64xi32>
    %369 = arith.extui %368 : vector<2x64xi1> to vector<2x64xi32>
    %370 = arith.sitofp %369 : vector<2x64xi32> to vector<2x64xf32>
    %c0_161 = arith.constant 0 : index
    %c0_162 = arith.constant 0 : index
    %c0_163 = arith.constant 0 : index
    %371 = vector.load %arg21[%c0_161, %c0_162, %c0_163] : memref<2x64x32xf32, #tpu.memory_space<vmem>>, vector<1x64x32xf32>
    %372 = vector.shape_cast %371 : vector<1x64x32xf32> to vector<64x32xf32>
    %cst_164 = arith.constant dense<0.000000e+00> : vector<2x32xf32>
    %373 = tpu.matmul %370, %372, %cst_164 {dimension_numbers = #tpu.dot_dimension_numbers<[1], [0], [0], [1], [0, 0, 1, 1], [], []>} : vector<2x64xf32>, vector<64x32xf32>, vector<2x32xf32> -> vector<2x32xf32>
    %c0_165 = arith.constant 0 : index
    %c0_166 = arith.constant 0 : index
    %c0_167 = arith.constant 0 : index
    %374 = vector.load %arg22[%c0_165, %c0_166, %c0_167] : memref<2x1x32xf32, #tpu.memory_space<vmem>>, vector<1x1x32xf32>
    %375 = vector.shape_cast %374 : vector<1x1x32xf32> to vector<1x32xf32>
    %376 = vector.broadcast %375 : vector<1x32xf32> to vector<2x32xf32>
    %377 = arith.addf %373, %376 : vector<2x32xf32>
    %c0_168 = arith.constant 0 : index
    %c0_169 = arith.constant 0 : index
    %c0_170 = arith.constant 0 : index
    %378 = vector.load %arg23[%c0_168, %c0_169, %c0_170] : memref<2x1x32xf32, #tpu.memory_space<vmem>>, vector<1x1x32xf32>
    %379 = vector.shape_cast %378 : vector<1x1x32xf32> to vector<1x32xf32>
    %c0_171 = arith.constant 0 : index
    %c0_172 = arith.constant 0 : index
    %c0_173 = arith.constant 0 : index
    %380 = vector.load %arg24[%c0_171, %c0_172, %c0_173] : memref<2x1x32xf32, #tpu.memory_space<vmem>>, vector<1x1x32xf32>
    %381 = vector.shape_cast %380 : vector<1x1x32xf32> to vector<1x32xf32>
    %cst_174 = arith.constant dense<0.000000e+00> : vector<2xf32>
    %382 = vector.multi_reduction <add>, %377, %cst_174 [1] : vector<2x32xf32> to vector<2xf32>
    %383 = vector.shape_cast %382 : vector<2xf32> to vector<2x1xf32>
    %cst_175 = arith.constant 3.200000e+01 : f32
    %384 = vector.broadcast %cst_175 : f32 to vector<2x1xf32>
    %385 = arith.divf %383, %384 : vector<2x1xf32>
    %386 = vector.broadcast %385 : vector<2x1xf32> to vector<2x32xf32>
    %387 = arith.subf %377, %386 : vector<2x32xf32>
    %388 = arith.mulf %387, %387 : vector<2x32xf32>
    %cst_176 = arith.constant dense<0.000000e+00> : vector<2xf32>
    %389 = vector.multi_reduction <add>, %388, %cst_176 [1] : vector<2x32xf32> to vector<2xf32>
    %390 = vector.shape_cast %389 : vector<2xf32> to vector<2x1xf32>
    %cst_177 = arith.constant 3.200000e+01 : f32
    %391 = vector.broadcast %cst_177 : f32 to vector<2x1xf32>
    %392 = arith.divf %390, %391 : vector<2x1xf32>
    %393 = vector.broadcast %385 : vector<2x1xf32> to vector<2x32xf32>
    %394 = arith.subf %377, %393 : vector<2x32xf32>
    %cst_178 = arith.constant 9.99999997E-7 : f32
    %395 = vector.broadcast %cst_178 : f32 to vector<2x1xf32>
    %396 = arith.addf %392, %395 : vector<2x1xf32>
    %397 = math.rsqrt %396 : vector<2x1xf32>
    %398 = vector.broadcast %397 : vector<2x1xf32> to vector<2x32xf32>
    %399 = arith.mulf %394, %398 : vector<2x32xf32>
    %400 = vector.broadcast %379 : vector<1x32xf32> to vector<2x32xf32>
    %401 = arith.mulf %399, %400 : vector<2x32xf32>
    %402 = vector.broadcast %381 : vector<1x32xf32> to vector<2x32xf32>
    %403 = arith.addf %401, %402 : vector<2x32xf32>
    %c0_179 = arith.constant 0 : index
    %c0_180 = arith.constant 0 : index
    %c0_181 = arith.constant 0 : index
    %404 = vector.load %arg25[%c0_179, %c0_180, %c0_181] : memref<4x32x32xf32, #tpu.memory_space<vmem>>, vector<1x32x32xf32>
    %405 = vector.shape_cast %404 : vector<1x32x32xf32> to vector<32x32xf32>
    %cst_182 = arith.constant dense<0.000000e+00> : vector<2x32xf32>
    %406 = tpu.matmul %403, %405, %cst_182 {dimension_numbers = #tpu.dot_dimension_numbers<[1], [0], [0], [1], [0, 0, 1, 1], [], []>} : vector<2x32xf32>, vector<32x32xf32>, vector<2x32xf32> -> vector<2x32xf32>
    %c0_183 = arith.constant 0 : index
    %c0_184 = arith.constant 0 : index
    %c0_185 = arith.constant 0 : index
    %407 = vector.load %arg26[%c0_183, %c0_184, %c0_185] : memref<4x1x32xf32, #tpu.memory_space<vmem>>, vector<1x1x32xf32>
    %408 = vector.shape_cast %407 : vector<1x1x32xf32> to vector<1x32xf32>
    %409 = vector.broadcast %408 : vector<1x32xf32> to vector<2x32xf32>
    %410 = arith.addf %406, %409 : vector<2x32xf32>
    %c0_186 = arith.constant 0 : index
    %c0_187 = arith.constant 0 : index
    %c0_188 = arith.constant 0 : index
    %411 = vector.load %arg27[%c0_186, %c0_187, %c0_188] : memref<4x32x32xf32, #tpu.memory_space<vmem>>, vector<1x32x32xf32>
    %412 = vector.shape_cast %411 : vector<1x32x32xf32> to vector<32x32xf32>
    %cst_189 = arith.constant dense<0.000000e+00> : vector<2x32xf32>
    %413 = tpu.matmul %410, %412, %cst_189 {dimension_numbers = #tpu.dot_dimension_numbers<[1], [0], [0], [1], [0, 0, 1, 1], [], []>} : vector<2x32xf32>, vector<32x32xf32>, vector<2x32xf32> -> vector<2x32xf32>
    %c0_190 = arith.constant 0 : index
    %c0_191 = arith.constant 0 : index
    %c0_192 = arith.constant 0 : index
    %414 = vector.load %arg28[%c0_190, %c0_191, %c0_192] : memref<4x1x32xf32, #tpu.memory_space<vmem>>, vector<1x1x32xf32>
    %415 = vector.shape_cast %414 : vector<1x1x32xf32> to vector<1x32xf32>
    %416 = vector.broadcast %415 : vector<1x32xf32> to vector<2x32xf32>
    %417 = arith.addf %413, %416 : vector<2x32xf32>
    %418 = arith.addf %417, %403 : vector<2x32xf32>
    %c0_193 = arith.constant 0 : index
    %c0_194 = arith.constant 0 : index
    %c0_195 = arith.constant 0 : index
    %419 = vector.load %arg29[%c0_193, %c0_194, %c0_195] : memref<4x1x32xf32, #tpu.memory_space<vmem>>, vector<1x1x32xf32>
    %420 = vector.shape_cast %419 : vector<1x1x32xf32> to vector<1x32xf32>
    %c0_196 = arith.constant 0 : index
    %c0_197 = arith.constant 0 : index
    %c0_198 = arith.constant 0 : index
    %421 = vector.load %arg30[%c0_196, %c0_197, %c0_198] : memref<4x1x32xf32, #tpu.memory_space<vmem>>, vector<1x1x32xf32>
    %422 = vector.shape_cast %421 : vector<1x1x32xf32> to vector<1x32xf32>
    %cst_199 = arith.constant dense<0.000000e+00> : vector<2xf32>
    %423 = vector.multi_reduction <add>, %418, %cst_199 [1] : vector<2x32xf32> to vector<2xf32>
    %424 = vector.shape_cast %423 : vector<2xf32> to vector<2x1xf32>
    %cst_200 = arith.constant 3.200000e+01 : f32
    %425 = vector.broadcast %cst_200 : f32 to vector<2x1xf32>
    %426 = arith.divf %424, %425 : vector<2x1xf32>
    %427 = vector.broadcast %426 : vector<2x1xf32> to vector<2x32xf32>
    %428 = arith.subf %418, %427 : vector<2x32xf32>
    %429 = arith.mulf %428, %428 : vector<2x32xf32>
    %cst_201 = arith.constant dense<0.000000e+00> : vector<2xf32>
    %430 = vector.multi_reduction <add>, %429, %cst_201 [1] : vector<2x32xf32> to vector<2xf32>
    %431 = vector.shape_cast %430 : vector<2xf32> to vector<2x1xf32>
    %cst_202 = arith.constant 3.200000e+01 : f32
    %432 = vector.broadcast %cst_202 : f32 to vector<2x1xf32>
    %433 = arith.divf %431, %432 : vector<2x1xf32>
    %434 = vector.broadcast %426 : vector<2x1xf32> to vector<2x32xf32>
    %435 = arith.subf %418, %434 : vector<2x32xf32>
    %cst_203 = arith.constant 9.99999997E-7 : f32
    %436 = vector.broadcast %cst_203 : f32 to vector<2x1xf32>
    %437 = arith.addf %433, %436 : vector<2x1xf32>
    %438 = math.rsqrt %437 : vector<2x1xf32>
    %439 = vector.broadcast %438 : vector<2x1xf32> to vector<2x32xf32>
    %440 = arith.mulf %435, %439 : vector<2x32xf32>
    %441 = vector.broadcast %420 : vector<1x32xf32> to vector<2x32xf32>
    %442 = arith.mulf %440, %441 : vector<2x32xf32>
    %443 = vector.broadcast %422 : vector<1x32xf32> to vector<2x32xf32>
    %444 = arith.addf %442, %443 : vector<2x32xf32>
    %c0_204 = arith.constant 0 : index
    %c0_205 = arith.constant 0 : index
    %c0_206 = arith.constant 0 : index
    %445 = vector.load %arg31[%c0_204, %c0_205, %c0_206] : memref<4x32x32xf32, #tpu.memory_space<vmem>>, vector<1x32x32xf32>
    %446 = vector.shape_cast %445 : vector<1x32x32xf32> to vector<32x32xf32>
    %cst_207 = arith.constant dense<0.000000e+00> : vector<2x32xf32>
    %447 = tpu.matmul %444, %446, %cst_207 {dimension_numbers = #tpu.dot_dimension_numbers<[1], [0], [0], [1], [0, 0, 1, 1], [], []>} : vector<2x32xf32>, vector<32x32xf32>, vector<2x32xf32> -> vector<2x32xf32>
    %c0_208 = arith.constant 0 : index
    %c0_209 = arith.constant 0 : index
    %c0_210 = arith.constant 0 : index
    %448 = vector.load %arg32[%c0_208, %c0_209, %c0_210] : memref<4x1x32xf32, #tpu.memory_space<vmem>>, vector<1x1x32xf32>
    %449 = vector.shape_cast %448 : vector<1x1x32xf32> to vector<1x32xf32>
    %450 = vector.broadcast %449 : vector<1x32xf32> to vector<2x32xf32>
    %451 = arith.addf %447, %450 : vector<2x32xf32>
    %cst_211 = arith.constant 0.353553385 : f32
    %452 = vector.broadcast %cst_211 : f32 to vector<2x32xf32>
    %453 = arith.mulf %451, %452 : vector<2x32xf32>
    %c0_212 = arith.constant 0 : index
    %c0_213 = arith.constant 0 : index
    %c0_214 = arith.constant 0 : index
    %454 = vector.load %arg33[%c0_212, %c0_213, %c0_214] : memref<4x32x64xf32, #tpu.memory_space<vmem>>, vector<1x32x64xf32>
    %455 = vector.shape_cast %454 : vector<1x32x64xf32> to vector<32x64xf32>
    %cst_215 = arith.constant dense<0.000000e+00> : vector<16x64xf32>
    %456 = tpu.matmul %365, %455, %cst_215 {dimension_numbers = #tpu.dot_dimension_numbers<[1], [0], [0], [1], [0, 0, 1, 1], [], []>} : vector<16x32xf32>, vector<32x64xf32>, vector<16x64xf32> -> vector<16x64xf32>
    %c0_216 = arith.constant 0 : index
    %c0_217 = arith.constant 0 : index
    %c0_218 = arith.constant 0 : index
    %457 = vector.load %arg34[%c0_216, %c0_217, %c0_218] : memref<4x1x64xf32, #tpu.memory_space<vmem>>, vector<1x1x64xf32>
    %458 = vector.shape_cast %457 : vector<1x1x64xf32> to vector<1x64xf32>
    %459 = vector.broadcast %458 : vector<1x64xf32> to vector<16x64xf32>
    %460 = arith.addf %456, %459 : vector<16x64xf32>
    %461 = vector.extract_strided_slice %460 {offsets = [0, 0], sizes = [16, 32], strides = [1, 1]} : vector<16x64xf32> to vector<16x32xf32>
    %462 = vector.extract_strided_slice %460 {offsets = [0, 32], sizes = [16, 32], strides = [1, 1]} : vector<16x64xf32> to vector<16x32xf32>
    %c0_219 = arith.constant 0 : index
    %c0_220 = arith.constant 0 : index
    %c0_221 = arith.constant 0 : index
    %463 = vector.load %arg35[%c0_219, %c0_220, %c0_221] : memref<4x32x32xf32, #tpu.memory_space<vmem>>, vector<1x32x32xf32>
    %464 = vector.shape_cast %463 : vector<1x32x32xf32> to vector<32x32xf32>
    %c0_222 = arith.constant 0 : index
    %c0_223 = arith.constant 0 : index
    %c0_224 = arith.constant 0 : index
    %465 = vector.load %arg36[%c0_222, %c0_223, %c0_224] : memref<4x1x32xf32, #tpu.memory_space<vmem>>, vector<1x1x32xf32>
    %466 = vector.shape_cast %465 : vector<1x1x32xf32> to vector<1x32xf32>
    %c0_225 = arith.constant 0 : index
    %c0_226 = arith.constant 0 : index
    %c0_227 = arith.constant 0 : index
    %467 = vector.load %arg37[%c0_225, %c0_226, %c0_227] : memref<4x1x32xf32, #tpu.memory_space<vmem>>, vector<1x1x32xf32>
    %468 = vector.shape_cast %467 : vector<1x1x32xf32> to vector<1x32xf32>
    %c0_228 = arith.constant 0 : index
    %c0_229 = arith.constant 0 : index
    %c0_230 = arith.constant 0 : index
    %469 = vector.load %arg38[%c0_228, %c0_229, %c0_230] : memref<4x1x32xf32, #tpu.memory_space<vmem>>, vector<1x1x32xf32>
    %470 = vector.shape_cast %469 : vector<1x1x32xf32> to vector<1x32xf32>
    %471 = tpu.transpose %461, [1, 0] : vector<16x32xf32> -> vector<32x16xf32>
    %472 = vector.extract_strided_slice %453 {offsets = [0, 0], sizes = [2, 8], strides = [1, 1]} : vector<2x32xf32> to vector<2x8xf32>
    %473 = vector.extract_strided_slice %471 {offsets = [0, 0], sizes = [8, 16], strides = [1, 1]} : vector<32x16xf32> to vector<8x16xf32>
    %cst_231 = arith.constant dense<0.000000e+00> : vector<2x16xf32>
    %474 = tpu.matmul %472, %473, %cst_231 {dimension_numbers = #tpu.dot_dimension_numbers<[1], [0], [0], [1], [0, 0, 1, 1], [], []>} : vector<2x8xf32>, vector<8x16xf32>, vector<2x16xf32> -> vector<2x16xf32>
    %475 = arith.addf %474, %21 : vector<2x16xf32>
    %cst_232 = arith.constant dense<0xFF800000> : vector<2xf32>
    %476 = vector.multi_reduction <maximumf>, %475, %cst_232 [1] : vector<2x16xf32> to vector<2xf32>
    %477 = vector.shape_cast %476 : vector<2xf32> to vector<2x1xf32>
    %478 = vector.broadcast %477 : vector<2x1xf32> to vector<2x16xf32>
    %479 = arith.subf %475, %478 : vector<2x16xf32>
    %480 = math.exp %479 : vector<2x16xf32>
    %cst_233 = arith.constant dense<0.000000e+00> : vector<2xf32>
    %481 = vector.multi_reduction <add>, %480, %cst_233 [1] : vector<2x16xf32> to vector<2xf32>
    %482 = vector.shape_cast %481 : vector<2xf32> to vector<2x1xf32>
    %483 = tpu.reciprocal %482 : vector<2x1xf32> -> vector<2x1xf32>
    %484 = vector.broadcast %483 : vector<2x1xf32> to vector<2x16xf32>
    %485 = arith.mulf %480, %484 : vector<2x16xf32>
    %486 = vector.extract_strided_slice %462 {offsets = [0, 0], sizes = [16, 8], strides = [1, 1]} : vector<16x32xf32> to vector<16x8xf32>
    %cst_234 = arith.constant dense<0.000000e+00> : vector<2x8xf32>
    %487 = tpu.matmul %485, %486, %cst_234 {dimension_numbers = #tpu.dot_dimension_numbers<[1], [0], [0], [1], [0, 0, 1, 1], [], []>} : vector<2x16xf32>, vector<16x8xf32>, vector<2x8xf32> -> vector<2x8xf32>
    %488 = vector.extract_strided_slice %453 {offsets = [0, 8], sizes = [2, 8], strides = [1, 1]} : vector<2x32xf32> to vector<2x8xf32>
    %489 = vector.extract_strided_slice %471 {offsets = [8, 0], sizes = [8, 16], strides = [1, 1]} : vector<32x16xf32> to vector<8x16xf32>
    %cst_235 = arith.constant dense<0.000000e+00> : vector<2x16xf32>
    %490 = tpu.matmul %488, %489, %cst_235 {dimension_numbers = #tpu.dot_dimension_numbers<[1], [0], [0], [1], [0, 0, 1, 1], [], []>} : vector<2x8xf32>, vector<8x16xf32>, vector<2x16xf32> -> vector<2x16xf32>
    %491 = arith.addf %490, %21 : vector<2x16xf32>
    %cst_236 = arith.constant dense<0xFF800000> : vector<2xf32>
    %492 = vector.multi_reduction <maximumf>, %491, %cst_236 [1] : vector<2x16xf32> to vector<2xf32>
    %493 = vector.shape_cast %492 : vector<2xf32> to vector<2x1xf32>
    %494 = vector.broadcast %493 : vector<2x1xf32> to vector<2x16xf32>
    %495 = arith.subf %491, %494 : vector<2x16xf32>
    %496 = math.exp %495 : vector<2x16xf32>
    %cst_237 = arith.constant dense<0.000000e+00> : vector<2xf32>
    %497 = vector.multi_reduction <add>, %496, %cst_237 [1] : vector<2x16xf32> to vector<2xf32>
    %498 = vector.shape_cast %497 : vector<2xf32> to vector<2x1xf32>
    %499 = tpu.reciprocal %498 : vector<2x1xf32> -> vector<2x1xf32>
    %500 = vector.broadcast %499 : vector<2x1xf32> to vector<2x16xf32>
    %501 = arith.mulf %496, %500 : vector<2x16xf32>
    %502 = vector.extract_strided_slice %462 {offsets = [0, 8], sizes = [16, 8], strides = [1, 1]} : vector<16x32xf32> to vector<16x8xf32>
    %cst_238 = arith.constant dense<0.000000e+00> : vector<2x8xf32>
    %503 = tpu.matmul %501, %502, %cst_238 {dimension_numbers = #tpu.dot_dimension_numbers<[1], [0], [0], [1], [0, 0, 1, 1], [], []>} : vector<2x16xf32>, vector<16x8xf32>, vector<2x8xf32> -> vector<2x8xf32>
    %504 = vector.extract_strided_slice %453 {offsets = [0, 16], sizes = [2, 8], strides = [1, 1]} : vector<2x32xf32> to vector<2x8xf32>
    %505 = vector.extract_strided_slice %471 {offsets = [16, 0], sizes = [8, 16], strides = [1, 1]} : vector<32x16xf32> to vector<8x16xf32>
    %cst_239 = arith.constant dense<0.000000e+00> : vector<2x16xf32>
    %506 = tpu.matmul %504, %505, %cst_239 {dimension_numbers = #tpu.dot_dimension_numbers<[1], [0], [0], [1], [0, 0, 1, 1], [], []>} : vector<2x8xf32>, vector<8x16xf32>, vector<2x16xf32> -> vector<2x16xf32>
    %507 = arith.addf %506, %21 : vector<2x16xf32>
    %cst_240 = arith.constant dense<0xFF800000> : vector<2xf32>
    %508 = vector.multi_reduction <maximumf>, %507, %cst_240 [1] : vector<2x16xf32> to vector<2xf32>
    %509 = vector.shape_cast %508 : vector<2xf32> to vector<2x1xf32>
    %510 = vector.broadcast %509 : vector<2x1xf32> to vector<2x16xf32>
    %511 = arith.subf %507, %510 : vector<2x16xf32>
    %512 = math.exp %511 : vector<2x16xf32>
    %cst_241 = arith.constant dense<0.000000e+00> : vector<2xf32>
    %513 = vector.multi_reduction <add>, %512, %cst_241 [1] : vector<2x16xf32> to vector<2xf32>
    %514 = vector.shape_cast %513 : vector<2xf32> to vector<2x1xf32>
    %515 = tpu.reciprocal %514 : vector<2x1xf32> -> vector<2x1xf32>
    %516 = vector.broadcast %515 : vector<2x1xf32> to vector<2x16xf32>
    %517 = arith.mulf %512, %516 : vector<2x16xf32>
    %518 = vector.extract_strided_slice %462 {offsets = [0, 16], sizes = [16, 8], strides = [1, 1]} : vector<16x32xf32> to vector<16x8xf32>
    %cst_242 = arith.constant dense<0.000000e+00> : vector<2x8xf32>
    %519 = tpu.matmul %517, %518, %cst_242 {dimension_numbers = #tpu.dot_dimension_numbers<[1], [0], [0], [1], [0, 0, 1, 1], [], []>} : vector<2x16xf32>, vector<16x8xf32>, vector<2x8xf32> -> vector<2x8xf32>
    %520 = vector.extract_strided_slice %453 {offsets = [0, 24], sizes = [2, 8], strides = [1, 1]} : vector<2x32xf32> to vector<2x8xf32>
    %521 = vector.extract_strided_slice %471 {offsets = [24, 0], sizes = [8, 16], strides = [1, 1]} : vector<32x16xf32> to vector<8x16xf32>
    %cst_243 = arith.constant dense<0.000000e+00> : vector<2x16xf32>
    %522 = tpu.matmul %520, %521, %cst_243 {dimension_numbers = #tpu.dot_dimension_numbers<[1], [0], [0], [1], [0, 0, 1, 1], [], []>} : vector<2x8xf32>, vector<8x16xf32>, vector<2x16xf32> -> vector<2x16xf32>
    %523 = arith.addf %522, %21 : vector<2x16xf32>
    %cst_244 = arith.constant dense<0xFF800000> : vector<2xf32>
    %524 = vector.multi_reduction <maximumf>, %523, %cst_244 [1] : vector<2x16xf32> to vector<2xf32>
    %525 = vector.shape_cast %524 : vector<2xf32> to vector<2x1xf32>
    %526 = vector.broadcast %525 : vector<2x1xf32> to vector<2x16xf32>
    %527 = arith.subf %523, %526 : vector<2x16xf32>
    %528 = math.exp %527 : vector<2x16xf32>
    %cst_245 = arith.constant dense<0.000000e+00> : vector<2xf32>
    %529 = vector.multi_reduction <add>, %528, %cst_245 [1] : vector<2x16xf32> to vector<2xf32>
    %530 = vector.shape_cast %529 : vector<2xf32> to vector<2x1xf32>
    %531 = tpu.reciprocal %530 : vector<2x1xf32> -> vector<2x1xf32>
    %532 = vector.broadcast %531 : vector<2x1xf32> to vector<2x16xf32>
    %533 = arith.mulf %528, %532 : vector<2x16xf32>
    %534 = vector.extract_strided_slice %462 {offsets = [0, 24], sizes = [16, 8], strides = [1, 1]} : vector<16x32xf32> to vector<16x8xf32>
    %cst_246 = arith.constant dense<0.000000e+00> : vector<2x8xf32>
    %535 = tpu.matmul %533, %534, %cst_246 {dimension_numbers = #tpu.dot_dimension_numbers<[1], [0], [0], [1], [0, 0, 1, 1], [], []>} : vector<2x16xf32>, vector<16x8xf32>, vector<2x8xf32> -> vector<2x8xf32>
    %536 = tpu.concatenate %487, %503, %519, %535 in 1 : vector<2x8xf32>, vector<2x8xf32>, vector<2x8xf32>, vector<2x8xf32> -> vector<2x32xf32>
    %cst_247 = arith.constant dense<0.000000e+00> : vector<2x32xf32>
    %537 = tpu.matmul %536, %464, %cst_247 {dimension_numbers = #tpu.dot_dimension_numbers<[1], [0], [0], [1], [0, 0, 1, 1], [], []>} : vector<2x32xf32>, vector<32x32xf32>, vector<2x32xf32> -> vector<2x32xf32>
    %538 = vector.broadcast %466 : vector<1x32xf32> to vector<2x32xf32>
    %539 = arith.addf %537, %538 : vector<2x32xf32>
    %540 = arith.addf %539, %444 : vector<2x32xf32>
    %cst_248 = arith.constant dense<0.000000e+00> : vector<2xf32>
    %541 = vector.multi_reduction <add>, %540, %cst_248 [1] : vector<2x32xf32> to vector<2xf32>
    %542 = vector.shape_cast %541 : vector<2xf32> to vector<2x1xf32>
    %cst_249 = arith.constant 3.200000e+01 : f32
    %543 = vector.broadcast %cst_249 : f32 to vector<2x1xf32>
    %544 = arith.divf %542, %543 : vector<2x1xf32>
    %545 = vector.broadcast %544 : vector<2x1xf32> to vector<2x32xf32>
    %546 = arith.subf %540, %545 : vector<2x32xf32>
    %547 = arith.mulf %546, %546 : vector<2x32xf32>
    %cst_250 = arith.constant dense<0.000000e+00> : vector<2xf32>
    %548 = vector.multi_reduction <add>, %547, %cst_250 [1] : vector<2x32xf32> to vector<2xf32>
    %549 = vector.shape_cast %548 : vector<2xf32> to vector<2x1xf32>
    %cst_251 = arith.constant 3.200000e+01 : f32
    %550 = vector.broadcast %cst_251 : f32 to vector<2x1xf32>
    %551 = arith.divf %549, %550 : vector<2x1xf32>
    %552 = vector.broadcast %544 : vector<2x1xf32> to vector<2x32xf32>
    %553 = arith.subf %540, %552 : vector<2x32xf32>
    %cst_252 = arith.constant 9.99999997E-7 : f32
    %554 = vector.broadcast %cst_252 : f32 to vector<2x1xf32>
    %555 = arith.addf %551, %554 : vector<2x1xf32>
    %556 = math.rsqrt %555 : vector<2x1xf32>
    %557 = vector.broadcast %556 : vector<2x1xf32> to vector<2x32xf32>
    %558 = arith.mulf %553, %557 : vector<2x32xf32>
    %559 = vector.broadcast %468 : vector<1x32xf32> to vector<2x32xf32>
    %560 = arith.mulf %558, %559 : vector<2x32xf32>
    %561 = vector.broadcast %470 : vector<1x32xf32> to vector<2x32xf32>
    %562 = arith.addf %560, %561 : vector<2x32xf32>
    %c0_253 = arith.constant 0 : index
    %c0_254 = arith.constant 0 : index
    %c0_255 = arith.constant 0 : index
    %563 = vector.load %arg39[%c0_253, %c0_254, %c0_255] : memref<4x32x64xf32, #tpu.memory_space<vmem>>, vector<1x32x64xf32>
    %564 = vector.shape_cast %563 : vector<1x32x64xf32> to vector<32x64xf32>
    %c0_256 = arith.constant 0 : index
    %c0_257 = arith.constant 0 : index
    %c0_258 = arith.constant 0 : index
    %565 = vector.load %arg40[%c0_256, %c0_257, %c0_258] : memref<4x1x64xf32, #tpu.memory_space<vmem>>, vector<1x1x64xf32>
    %566 = vector.shape_cast %565 : vector<1x1x64xf32> to vector<1x64xf32>
    %c0_259 = arith.constant 0 : index
    %c0_260 = arith.constant 0 : index
    %c0_261 = arith.constant 0 : index
    %567 = vector.load %arg41[%c0_259, %c0_260, %c0_261] : memref<4x64x32xf32, #tpu.memory_space<vmem>>, vector<1x64x32xf32>
    %568 = vector.shape_cast %567 : vector<1x64x32xf32> to vector<64x32xf32>
    %c0_262 = arith.constant 0 : index
    %c0_263 = arith.constant 0 : index
    %c0_264 = arith.constant 0 : index
    %569 = vector.load %arg42[%c0_262, %c0_263, %c0_264] : memref<4x1x32xf32, #tpu.memory_space<vmem>>, vector<1x1x32xf32>
    %570 = vector.shape_cast %569 : vector<1x1x32xf32> to vector<1x32xf32>
    %c0_265 = arith.constant 0 : index
    %c0_266 = arith.constant 0 : index
    %c0_267 = arith.constant 0 : index
    %571 = vector.load %arg43[%c0_265, %c0_266, %c0_267] : memref<4x1x32xf32, #tpu.memory_space<vmem>>, vector<1x1x32xf32>
    %572 = vector.shape_cast %571 : vector<1x1x32xf32> to vector<1x32xf32>
    %c0_268 = arith.constant 0 : index
    %c0_269 = arith.constant 0 : index
    %c0_270 = arith.constant 0 : index
    %573 = vector.load %arg44[%c0_268, %c0_269, %c0_270] : memref<4x1x32xf32, #tpu.memory_space<vmem>>, vector<1x1x32xf32>
    %574 = vector.shape_cast %573 : vector<1x1x32xf32> to vector<1x32xf32>
    %cst_271 = arith.constant dense<0.000000e+00> : vector<2x64xf32>
    %575 = tpu.matmul %562, %564, %cst_271 {dimension_numbers = #tpu.dot_dimension_numbers<[1], [0], [0], [1], [0, 0, 1, 1], [], []>} : vector<2x32xf32>, vector<32x64xf32>, vector<2x64xf32> -> vector<2x64xf32>
    %576 = vector.broadcast %566 : vector<1x64xf32> to vector<2x64xf32>
    %577 = arith.addf %575, %576 : vector<2x64xf32>
    %cst_272 = arith.constant 0.000000e+00 : f32
    %578 = vector.broadcast %cst_272 : f32 to vector<2x64xf32>
    %579 = arith.maximumf %577, %578 : vector<2x64xf32>
    %cst_273 = arith.constant dense<0.000000e+00> : vector<2x32xf32>
    %580 = tpu.matmul %579, %568, %cst_273 {dimension_numbers = #tpu.dot_dimension_numbers<[1], [0], [0], [1], [0, 0, 1, 1], [], []>} : vector<2x64xf32>, vector<64x32xf32>, vector<2x32xf32> -> vector<2x32xf32>
    %581 = vector.broadcast %570 : vector<1x32xf32> to vector<2x32xf32>
    %582 = arith.addf %580, %581 : vector<2x32xf32>
    %583 = arith.addf %582, %562 : vector<2x32xf32>
    %cst_274 = arith.constant dense<0.000000e+00> : vector<2xf32>
    %584 = vector.multi_reduction <add>, %583, %cst_274 [1] : vector<2x32xf32> to vector<2xf32>
    %585 = vector.shape_cast %584 : vector<2xf32> to vector<2x1xf32>
    %cst_275 = arith.constant 3.200000e+01 : f32
    %586 = vector.broadcast %cst_275 : f32 to vector<2x1xf32>
    %587 = arith.divf %585, %586 : vector<2x1xf32>
    %588 = vector.broadcast %587 : vector<2x1xf32> to vector<2x32xf32>
    %589 = arith.subf %583, %588 : vector<2x32xf32>
    %590 = arith.mulf %589, %589 : vector<2x32xf32>
    %cst_276 = arith.constant dense<0.000000e+00> : vector<2xf32>
    %591 = vector.multi_reduction <add>, %590, %cst_276 [1] : vector<2x32xf32> to vector<2xf32>
    %592 = vector.shape_cast %591 : vector<2xf32> to vector<2x1xf32>
    %cst_277 = arith.constant 3.200000e+01 : f32
    %593 = vector.broadcast %cst_277 : f32 to vector<2x1xf32>
    %594 = arith.divf %592, %593 : vector<2x1xf32>
    %595 = vector.broadcast %587 : vector<2x1xf32> to vector<2x32xf32>
    %596 = arith.subf %583, %595 : vector<2x32xf32>
    %cst_278 = arith.constant 9.99999997E-7 : f32
    %597 = vector.broadcast %cst_278 : f32 to vector<2x1xf32>
    %598 = arith.addf %594, %597 : vector<2x1xf32>
    %599 = math.rsqrt %598 : vector<2x1xf32>
    %600 = vector.broadcast %599 : vector<2x1xf32> to vector<2x32xf32>
    %601 = arith.mulf %596, %600 : vector<2x32xf32>
    %602 = vector.broadcast %572 : vector<1x32xf32> to vector<2x32xf32>
    %603 = arith.mulf %601, %602 : vector<2x32xf32>
    %604 = vector.broadcast %574 : vector<1x32xf32> to vector<2x32xf32>
    %605 = arith.addf %603, %604 : vector<2x32xf32>
    %c1_279 = arith.constant 1 : index
    %c0_280 = arith.constant 0 : index
    %c0_281 = arith.constant 0 : index
    %606 = vector.load %arg25[%c1_279, %c0_280, %c0_281] : memref<4x32x32xf32, #tpu.memory_space<vmem>>, vector<1x32x32xf32>
    %607 = vector.shape_cast %606 : vector<1x32x32xf32> to vector<32x32xf32>
    %cst_282 = arith.constant dense<0.000000e+00> : vector<2x32xf32>
    %608 = tpu.matmul %605, %607, %cst_282 {dimension_numbers = #tpu.dot_dimension_numbers<[1], [0], [0], [1], [0, 0, 1, 1], [], []>} : vector<2x32xf32>, vector<32x32xf32>, vector<2x32xf32> -> vector<2x32xf32>
    %c1_283 = arith.constant 1 : index
    %c0_284 = arith.constant 0 : index
    %c0_285 = arith.constant 0 : index
    %609 = vector.load %arg26[%c1_283, %c0_284, %c0_285] : memref<4x1x32xf32, #tpu.memory_space<vmem>>, vector<1x1x32xf32>
    %610 = vector.shape_cast %609 : vector<1x1x32xf32> to vector<1x32xf32>
    %611 = vector.broadcast %610 : vector<1x32xf32> to vector<2x32xf32>
    %612 = arith.addf %608, %611 : vector<2x32xf32>
    %c1_286 = arith.constant 1 : index
    %c0_287 = arith.constant 0 : index
    %c0_288 = arith.constant 0 : index
    %613 = vector.load %arg27[%c1_286, %c0_287, %c0_288] : memref<4x32x32xf32, #tpu.memory_space<vmem>>, vector<1x32x32xf32>
    %614 = vector.shape_cast %613 : vector<1x32x32xf32> to vector<32x32xf32>
    %cst_289 = arith.constant dense<0.000000e+00> : vector<2x32xf32>
    %615 = tpu.matmul %612, %614, %cst_289 {dimension_numbers = #tpu.dot_dimension_numbers<[1], [0], [0], [1], [0, 0, 1, 1], [], []>} : vector<2x32xf32>, vector<32x32xf32>, vector<2x32xf32> -> vector<2x32xf32>
    %c1_290 = arith.constant 1 : index
    %c0_291 = arith.constant 0 : index
    %c0_292 = arith.constant 0 : index
    %616 = vector.load %arg28[%c1_290, %c0_291, %c0_292] : memref<4x1x32xf32, #tpu.memory_space<vmem>>, vector<1x1x32xf32>
    %617 = vector.shape_cast %616 : vector<1x1x32xf32> to vector<1x32xf32>
    %618 = vector.broadcast %617 : vector<1x32xf32> to vector<2x32xf32>
    %619 = arith.addf %615, %618 : vector<2x32xf32>
    %620 = arith.addf %619, %605 : vector<2x32xf32>
    %c1_293 = arith.constant 1 : index
    %c0_294 = arith.constant 0 : index
    %c0_295 = arith.constant 0 : index
    %621 = vector.load %arg29[%c1_293, %c0_294, %c0_295] : memref<4x1x32xf32, #tpu.memory_space<vmem>>, vector<1x1x32xf32>
    %622 = vector.shape_cast %621 : vector<1x1x32xf32> to vector<1x32xf32>
    %c1_296 = arith.constant 1 : index
    %c0_297 = arith.constant 0 : index
    %c0_298 = arith.constant 0 : index
    %623 = vector.load %arg30[%c1_296, %c0_297, %c0_298] : memref<4x1x32xf32, #tpu.memory_space<vmem>>, vector<1x1x32xf32>
    %624 = vector.shape_cast %623 : vector<1x1x32xf32> to vector<1x32xf32>
    %cst_299 = arith.constant dense<0.000000e+00> : vector<2xf32>
    %625 = vector.multi_reduction <add>, %620, %cst_299 [1] : vector<2x32xf32> to vector<2xf32>
    %626 = vector.shape_cast %625 : vector<2xf32> to vector<2x1xf32>
    %cst_300 = arith.constant 3.200000e+01 : f32
    %627 = vector.broadcast %cst_300 : f32 to vector<2x1xf32>
    %628 = arith.divf %626, %627 : vector<2x1xf32>
    %629 = vector.broadcast %628 : vector<2x1xf32> to vector<2x32xf32>
    %630 = arith.subf %620, %629 : vector<2x32xf32>
    %631 = arith.mulf %630, %630 : vector<2x32xf32>
    %cst_301 = arith.constant dense<0.000000e+00> : vector<2xf32>
    %632 = vector.multi_reduction <add>, %631, %cst_301 [1] : vector<2x32xf32> to vector<2xf32>
    %633 = vector.shape_cast %632 : vector<2xf32> to vector<2x1xf32>
    %cst_302 = arith.constant 3.200000e+01 : f32
    %634 = vector.broadcast %cst_302 : f32 to vector<2x1xf32>
    %635 = arith.divf %633, %634 : vector<2x1xf32>
    %636 = vector.broadcast %628 : vector<2x1xf32> to vector<2x32xf32>
    %637 = arith.subf %620, %636 : vector<2x32xf32>
    %cst_303 = arith.constant 9.99999997E-7 : f32
    %638 = vector.broadcast %cst_303 : f32 to vector<2x1xf32>
    %639 = arith.addf %635, %638 : vector<2x1xf32>
    %640 = math.rsqrt %639 : vector<2x1xf32>
    %641 = vector.broadcast %640 : vector<2x1xf32> to vector<2x32xf32>
    %642 = arith.mulf %637, %641 : vector<2x32xf32>
    %643 = vector.broadcast %622 : vector<1x32xf32> to vector<2x32xf32>
    %644 = arith.mulf %642, %643 : vector<2x32xf32>
    %645 = vector.broadcast %624 : vector<1x32xf32> to vector<2x32xf32>
    %646 = arith.addf %644, %645 : vector<2x32xf32>
    %c1_304 = arith.constant 1 : index
    %c0_305 = arith.constant 0 : index
    %c0_306 = arith.constant 0 : index
    %647 = vector.load %arg31[%c1_304, %c0_305, %c0_306] : memref<4x32x32xf32, #tpu.memory_space<vmem>>, vector<1x32x32xf32>
    %648 = vector.shape_cast %647 : vector<1x32x32xf32> to vector<32x32xf32>
    %cst_307 = arith.constant dense<0.000000e+00> : vector<2x32xf32>
    %649 = tpu.matmul %646, %648, %cst_307 {dimension_numbers = #tpu.dot_dimension_numbers<[1], [0], [0], [1], [0, 0, 1, 1], [], []>} : vector<2x32xf32>, vector<32x32xf32>, vector<2x32xf32> -> vector<2x32xf32>
    %c1_308 = arith.constant 1 : index
    %c0_309 = arith.constant 0 : index
    %c0_310 = arith.constant 0 : index
    %650 = vector.load %arg32[%c1_308, %c0_309, %c0_310] : memref<4x1x32xf32, #tpu.memory_space<vmem>>, vector<1x1x32xf32>
    %651 = vector.shape_cast %650 : vector<1x1x32xf32> to vector<1x32xf32>
    %652 = vector.broadcast %651 : vector<1x32xf32> to vector<2x32xf32>
    %653 = arith.addf %649, %652 : vector<2x32xf32>
    %cst_311 = arith.constant 0.353553385 : f32
    %654 = vector.broadcast %cst_311 : f32 to vector<2x32xf32>
    %655 = arith.mulf %653, %654 : vector<2x32xf32>
    %c1_312 = arith.constant 1 : index
    %c0_313 = arith.constant 0 : index
    %c0_314 = arith.constant 0 : index
    %656 = vector.load %arg33[%c1_312, %c0_313, %c0_314] : memref<4x32x64xf32, #tpu.memory_space<vmem>>, vector<1x32x64xf32>
    %657 = vector.shape_cast %656 : vector<1x32x64xf32> to vector<32x64xf32>
    %cst_315 = arith.constant dense<0.000000e+00> : vector<16x64xf32>
    %658 = tpu.matmul %365, %657, %cst_315 {dimension_numbers = #tpu.dot_dimension_numbers<[1], [0], [0], [1], [0, 0, 1, 1], [], []>} : vector<16x32xf32>, vector<32x64xf32>, vector<16x64xf32> -> vector<16x64xf32>
    %c1_316 = arith.constant 1 : index
    %c0_317 = arith.constant 0 : index
    %c0_318 = arith.constant 0 : index
    %659 = vector.load %arg34[%c1_316, %c0_317, %c0_318] : memref<4x1x64xf32, #tpu.memory_space<vmem>>, vector<1x1x64xf32>
    %660 = vector.shape_cast %659 : vector<1x1x64xf32> to vector<1x64xf32>
    %661 = vector.broadcast %660 : vector<1x64xf32> to vector<16x64xf32>
    %662 = arith.addf %658, %661 : vector<16x64xf32>
    %663 = vector.extract_strided_slice %662 {offsets = [0, 0], sizes = [16, 32], strides = [1, 1]} : vector<16x64xf32> to vector<16x32xf32>
    %664 = vector.extract_strided_slice %662 {offsets = [0, 32], sizes = [16, 32], strides = [1, 1]} : vector<16x64xf32> to vector<16x32xf32>
    %c1_319 = arith.constant 1 : index
    %c0_320 = arith.constant 0 : index
    %c0_321 = arith.constant 0 : index
    %665 = vector.load %arg35[%c1_319, %c0_320, %c0_321] : memref<4x32x32xf32, #tpu.memory_space<vmem>>, vector<1x32x32xf32>
    %666 = vector.shape_cast %665 : vector<1x32x32xf32> to vector<32x32xf32>
    %c1_322 = arith.constant 1 : index
    %c0_323 = arith.constant 0 : index
    %c0_324 = arith.constant 0 : index
    %667 = vector.load %arg36[%c1_322, %c0_323, %c0_324] : memref<4x1x32xf32, #tpu.memory_space<vmem>>, vector<1x1x32xf32>
    %668 = vector.shape_cast %667 : vector<1x1x32xf32> to vector<1x32xf32>
    %c1_325 = arith.constant 1 : index
    %c0_326 = arith.constant 0 : index
    %c0_327 = arith.constant 0 : index
    %669 = vector.load %arg37[%c1_325, %c0_326, %c0_327] : memref<4x1x32xf32, #tpu.memory_space<vmem>>, vector<1x1x32xf32>
    %670 = vector.shape_cast %669 : vector<1x1x32xf32> to vector<1x32xf32>
    %c1_328 = arith.constant 1 : index
    %c0_329 = arith.constant 0 : index
    %c0_330 = arith.constant 0 : index
    %671 = vector.load %arg38[%c1_328, %c0_329, %c0_330] : memref<4x1x32xf32, #tpu.memory_space<vmem>>, vector<1x1x32xf32>
    %672 = vector.shape_cast %671 : vector<1x1x32xf32> to vector<1x32xf32>
    %673 = tpu.transpose %663, [1, 0] : vector<16x32xf32> -> vector<32x16xf32>
    %674 = vector.extract_strided_slice %655 {offsets = [0, 0], sizes = [2, 8], strides = [1, 1]} : vector<2x32xf32> to vector<2x8xf32>
    %675 = vector.extract_strided_slice %673 {offsets = [0, 0], sizes = [8, 16], strides = [1, 1]} : vector<32x16xf32> to vector<8x16xf32>
    %cst_331 = arith.constant dense<0.000000e+00> : vector<2x16xf32>
    %676 = tpu.matmul %674, %675, %cst_331 {dimension_numbers = #tpu.dot_dimension_numbers<[1], [0], [0], [1], [0, 0, 1, 1], [], []>} : vector<2x8xf32>, vector<8x16xf32>, vector<2x16xf32> -> vector<2x16xf32>
    %677 = arith.addf %676, %21 : vector<2x16xf32>
    %cst_332 = arith.constant dense<0xFF800000> : vector<2xf32>
    %678 = vector.multi_reduction <maximumf>, %677, %cst_332 [1] : vector<2x16xf32> to vector<2xf32>
    %679 = vector.shape_cast %678 : vector<2xf32> to vector<2x1xf32>
    %680 = vector.broadcast %679 : vector<2x1xf32> to vector<2x16xf32>
    %681 = arith.subf %677, %680 : vector<2x16xf32>
    %682 = math.exp %681 : vector<2x16xf32>
    %cst_333 = arith.constant dense<0.000000e+00> : vector<2xf32>
    %683 = vector.multi_reduction <add>, %682, %cst_333 [1] : vector<2x16xf32> to vector<2xf32>
    %684 = vector.shape_cast %683 : vector<2xf32> to vector<2x1xf32>
    %685 = tpu.reciprocal %684 : vector<2x1xf32> -> vector<2x1xf32>
    %686 = vector.broadcast %685 : vector<2x1xf32> to vector<2x16xf32>
    %687 = arith.mulf %682, %686 : vector<2x16xf32>
    %688 = vector.extract_strided_slice %664 {offsets = [0, 0], sizes = [16, 8], strides = [1, 1]} : vector<16x32xf32> to vector<16x8xf32>
    %cst_334 = arith.constant dense<0.000000e+00> : vector<2x8xf32>
    %689 = tpu.matmul %687, %688, %cst_334 {dimension_numbers = #tpu.dot_dimension_numbers<[1], [0], [0], [1], [0, 0, 1, 1], [], []>} : vector<2x16xf32>, vector<16x8xf32>, vector<2x8xf32> -> vector<2x8xf32>
    %690 = vector.extract_strided_slice %655 {offsets = [0, 8], sizes = [2, 8], strides = [1, 1]} : vector<2x32xf32> to vector<2x8xf32>
    %691 = vector.extract_strided_slice %673 {offsets = [8, 0], sizes = [8, 16], strides = [1, 1]} : vector<32x16xf32> to vector<8x16xf32>
    %cst_335 = arith.constant dense<0.000000e+00> : vector<2x16xf32>
    %692 = tpu.matmul %690, %691, %cst_335 {dimension_numbers = #tpu.dot_dimension_numbers<[1], [0], [0], [1], [0, 0, 1, 1], [], []>} : vector<2x8xf32>, vector<8x16xf32>, vector<2x16xf32> -> vector<2x16xf32>
    %693 = arith.addf %692, %21 : vector<2x16xf32>
    %cst_336 = arith.constant dense<0xFF800000> : vector<2xf32>
    %694 = vector.multi_reduction <maximumf>, %693, %cst_336 [1] : vector<2x16xf32> to vector<2xf32>
    %695 = vector.shape_cast %694 : vector<2xf32> to vector<2x1xf32>
    %696 = vector.broadcast %695 : vector<2x1xf32> to vector<2x16xf32>
    %697 = arith.subf %693, %696 : vector<2x16xf32>
    %698 = math.exp %697 : vector<2x16xf32>
    %cst_337 = arith.constant dense<0.000000e+00> : vector<2xf32>
    %699 = vector.multi_reduction <add>, %698, %cst_337 [1] : vector<2x16xf32> to vector<2xf32>
    %700 = vector.shape_cast %699 : vector<2xf32> to vector<2x1xf32>
    %701 = tpu.reciprocal %700 : vector<2x1xf32> -> vector<2x1xf32>
    %702 = vector.broadcast %701 : vector<2x1xf32> to vector<2x16xf32>
    %703 = arith.mulf %698, %702 : vector<2x16xf32>
    %704 = vector.extract_strided_slice %664 {offsets = [0, 8], sizes = [16, 8], strides = [1, 1]} : vector<16x32xf32> to vector<16x8xf32>
    %cst_338 = arith.constant dense<0.000000e+00> : vector<2x8xf32>
    %705 = tpu.matmul %703, %704, %cst_338 {dimension_numbers = #tpu.dot_dimension_numbers<[1], [0], [0], [1], [0, 0, 1, 1], [], []>} : vector<2x16xf32>, vector<16x8xf32>, vector<2x8xf32> -> vector<2x8xf32>
    %706 = vector.extract_strided_slice %655 {offsets = [0, 16], sizes = [2, 8], strides = [1, 1]} : vector<2x32xf32> to vector<2x8xf32>
    %707 = vector.extract_strided_slice %673 {offsets = [16, 0], sizes = [8, 16], strides = [1, 1]} : vector<32x16xf32> to vector<8x16xf32>
    %cst_339 = arith.constant dense<0.000000e+00> : vector<2x16xf32>
    %708 = tpu.matmul %706, %707, %cst_339 {dimension_numbers = #tpu.dot_dimension_numbers<[1], [0], [0], [1], [0, 0, 1, 1], [], []>} : vector<2x8xf32>, vector<8x16xf32>, vector<2x16xf32> -> vector<2x16xf32>
    %709 = arith.addf %708, %21 : vector<2x16xf32>
    %cst_340 = arith.constant dense<0xFF800000> : vector<2xf32>
    %710 = vector.multi_reduction <maximumf>, %709, %cst_340 [1] : vector<2x16xf32> to vector<2xf32>
    %711 = vector.shape_cast %710 : vector<2xf32> to vector<2x1xf32>
    %712 = vector.broadcast %711 : vector<2x1xf32> to vector<2x16xf32>
    %713 = arith.subf %709, %712 : vector<2x16xf32>
    %714 = math.exp %713 : vector<2x16xf32>
    %cst_341 = arith.constant dense<0.000000e+00> : vector<2xf32>
    %715 = vector.multi_reduction <add>, %714, %cst_341 [1] : vector<2x16xf32> to vector<2xf32>
    %716 = vector.shape_cast %715 : vector<2xf32> to vector<2x1xf32>
    %717 = tpu.reciprocal %716 : vector<2x1xf32> -> vector<2x1xf32>
    %718 = vector.broadcast %717 : vector<2x1xf32> to vector<2x16xf32>
    %719 = arith.mulf %714, %718 : vector<2x16xf32>
    %720 = vector.extract_strided_slice %664 {offsets = [0, 16], sizes = [16, 8], strides = [1, 1]} : vector<16x32xf32> to vector<16x8xf32>
    %cst_342 = arith.constant dense<0.000000e+00> : vector<2x8xf32>
    %721 = tpu.matmul %719, %720, %cst_342 {dimension_numbers = #tpu.dot_dimension_numbers<[1], [0], [0], [1], [0, 0, 1, 1], [], []>} : vector<2x16xf32>, vector<16x8xf32>, vector<2x8xf32> -> vector<2x8xf32>
    %722 = vector.extract_strided_slice %655 {offsets = [0, 24], sizes = [2, 8], strides = [1, 1]} : vector<2x32xf32> to vector<2x8xf32>
    %723 = vector.extract_strided_slice %673 {offsets = [24, 0], sizes = [8, 16], strides = [1, 1]} : vector<32x16xf32> to vector<8x16xf32>
    %cst_343 = arith.constant dense<0.000000e+00> : vector<2x16xf32>
    %724 = tpu.matmul %722, %723, %cst_343 {dimension_numbers = #tpu.dot_dimension_numbers<[1], [0], [0], [1], [0, 0, 1, 1], [], []>} : vector<2x8xf32>, vector<8x16xf32>, vector<2x16xf32> -> vector<2x16xf32>
    %725 = arith.addf %724, %21 : vector<2x16xf32>
    %cst_344 = arith.constant dense<0xFF800000> : vector<2xf32>
    %726 = vector.multi_reduction <maximumf>, %725, %cst_344 [1] : vector<2x16xf32> to vector<2xf32>
    %727 = vector.shape_cast %726 : vector<2xf32> to vector<2x1xf32>
    %728 = vector.broadcast %727 : vector<2x1xf32> to vector<2x16xf32>
    %729 = arith.subf %725, %728 : vector<2x16xf32>
    %730 = math.exp %729 : vector<2x16xf32>
    %cst_345 = arith.constant dense<0.000000e+00> : vector<2xf32>
    %731 = vector.multi_reduction <add>, %730, %cst_345 [1] : vector<2x16xf32> to vector<2xf32>
    %732 = vector.shape_cast %731 : vector<2xf32> to vector<2x1xf32>
    %733 = tpu.reciprocal %732 : vector<2x1xf32> -> vector<2x1xf32>
    %734 = vector.broadcast %733 : vector<2x1xf32> to vector<2x16xf32>
    %735 = arith.mulf %730, %734 : vector<2x16xf32>
    %736 = vector.extract_strided_slice %664 {offsets = [0, 24], sizes = [16, 8], strides = [1, 1]} : vector<16x32xf32> to vector<16x8xf32>
    %cst_346 = arith.constant dense<0.000000e+00> : vector<2x8xf32>
    %737 = tpu.matmul %735, %736, %cst_346 {dimension_numbers = #tpu.dot_dimension_numbers<[1], [0], [0], [1], [0, 0, 1, 1], [], []>} : vector<2x16xf32>, vector<16x8xf32>, vector<2x8xf32> -> vector<2x8xf32>
    %738 = tpu.concatenate %689, %705, %721, %737 in 1 : vector<2x8xf32>, vector<2x8xf32>, vector<2x8xf32>, vector<2x8xf32> -> vector<2x32xf32>
    %cst_347 = arith.constant dense<0.000000e+00> : vector<2x32xf32>
    %739 = tpu.matmul %738, %666, %cst_347 {dimension_numbers = #tpu.dot_dimension_numbers<[1], [0], [0], [1], [0, 0, 1, 1], [], []>} : vector<2x32xf32>, vector<32x32xf32>, vector<2x32xf32> -> vector<2x32xf32>
    %740 = vector.broadcast %668 : vector<1x32xf32> to vector<2x32xf32>
    %741 = arith.addf %739, %740 : vector<2x32xf32>
    %742 = arith.addf %741, %646 : vector<2x32xf32>
    %cst_348 = arith.constant dense<0.000000e+00> : vector<2xf32>
    %743 = vector.multi_reduction <add>, %742, %cst_348 [1] : vector<2x32xf32> to vector<2xf32>
    %744 = vector.shape_cast %743 : vector<2xf32> to vector<2x1xf32>
    %cst_349 = arith.constant 3.200000e+01 : f32
    %745 = vector.broadcast %cst_349 : f32 to vector<2x1xf32>
    %746 = arith.divf %744, %745 : vector<2x1xf32>
    %747 = vector.broadcast %746 : vector<2x1xf32> to vector<2x32xf32>
    %748 = arith.subf %742, %747 : vector<2x32xf32>
    %749 = arith.mulf %748, %748 : vector<2x32xf32>
    %cst_350 = arith.constant dense<0.000000e+00> : vector<2xf32>
    %750 = vector.multi_reduction <add>, %749, %cst_350 [1] : vector<2x32xf32> to vector<2xf32>
    %751 = vector.shape_cast %750 : vector<2xf32> to vector<2x1xf32>
    %cst_351 = arith.constant 3.200000e+01 : f32
    %752 = vector.broadcast %cst_351 : f32 to vector<2x1xf32>
    %753 = arith.divf %751, %752 : vector<2x1xf32>
    %754 = vector.broadcast %746 : vector<2x1xf32> to vector<2x32xf32>
    %755 = arith.subf %742, %754 : vector<2x32xf32>
    %cst_352 = arith.constant 9.99999997E-7 : f32
    %756 = vector.broadcast %cst_352 : f32 to vector<2x1xf32>
    %757 = arith.addf %753, %756 : vector<2x1xf32>
    %758 = math.rsqrt %757 : vector<2x1xf32>
    %759 = vector.broadcast %758 : vector<2x1xf32> to vector<2x32xf32>
    %760 = arith.mulf %755, %759 : vector<2x32xf32>
    %761 = vector.broadcast %670 : vector<1x32xf32> to vector<2x32xf32>
    %762 = arith.mulf %760, %761 : vector<2x32xf32>
    %763 = vector.broadcast %672 : vector<1x32xf32> to vector<2x32xf32>
    %764 = arith.addf %762, %763 : vector<2x32xf32>
    %c1_353 = arith.constant 1 : index
    %c0_354 = arith.constant 0 : index
    %c0_355 = arith.constant 0 : index
    %765 = vector.load %arg39[%c1_353, %c0_354, %c0_355] : memref<4x32x64xf32, #tpu.memory_space<vmem>>, vector<1x32x64xf32>
    %766 = vector.shape_cast %765 : vector<1x32x64xf32> to vector<32x64xf32>
    %c1_356 = arith.constant 1 : index
    %c0_357 = arith.constant 0 : index
    %c0_358 = arith.constant 0 : index
    %767 = vector.load %arg40[%c1_356, %c0_357, %c0_358] : memref<4x1x64xf32, #tpu.memory_space<vmem>>, vector<1x1x64xf32>
    %768 = vector.shape_cast %767 : vector<1x1x64xf32> to vector<1x64xf32>
    %c1_359 = arith.constant 1 : index
    %c0_360 = arith.constant 0 : index
    %c0_361 = arith.constant 0 : index
    %769 = vector.load %arg41[%c1_359, %c0_360, %c0_361] : memref<4x64x32xf32, #tpu.memory_space<vmem>>, vector<1x64x32xf32>
    %770 = vector.shape_cast %769 : vector<1x64x32xf32> to vector<64x32xf32>
    %c1_362 = arith.constant 1 : index
    %c0_363 = arith.constant 0 : index
    %c0_364 = arith.constant 0 : index
    %771 = vector.load %arg42[%c1_362, %c0_363, %c0_364] : memref<4x1x32xf32, #tpu.memory_space<vmem>>, vector<1x1x32xf32>
    %772 = vector.shape_cast %771 : vector<1x1x32xf32> to vector<1x32xf32>
    %c1_365 = arith.constant 1 : index
    %c0_366 = arith.constant 0 : index
    %c0_367 = arith.constant 0 : index
    %773 = vector.load %arg43[%c1_365, %c0_366, %c0_367] : memref<4x1x32xf32, #tpu.memory_space<vmem>>, vector<1x1x32xf32>
    %774 = vector.shape_cast %773 : vector<1x1x32xf32> to vector<1x32xf32>
    %c1_368 = arith.constant 1 : index
    %c0_369 = arith.constant 0 : index
    %c0_370 = arith.constant 0 : index
    %775 = vector.load %arg44[%c1_368, %c0_369, %c0_370] : memref<4x1x32xf32, #tpu.memory_space<vmem>>, vector<1x1x32xf32>
    %776 = vector.shape_cast %775 : vector<1x1x32xf32> to vector<1x32xf32>
    %cst_371 = arith.constant dense<0.000000e+00> : vector<2x64xf32>
    %777 = tpu.matmul %764, %766, %cst_371 {dimension_numbers = #tpu.dot_dimension_numbers<[1], [0], [0], [1], [0, 0, 1, 1], [], []>} : vector<2x32xf32>, vector<32x64xf32>, vector<2x64xf32> -> vector<2x64xf32>
    %778 = vector.broadcast %768 : vector<1x64xf32> to vector<2x64xf32>
    %779 = arith.addf %777, %778 : vector<2x64xf32>
    %cst_372 = arith.constant 0.000000e+00 : f32
    %780 = vector.broadcast %cst_372 : f32 to vector<2x64xf32>
    %781 = arith.maximumf %779, %780 : vector<2x64xf32>
    %cst_373 = arith.constant dense<0.000000e+00> : vector<2x32xf32>
    %782 = tpu.matmul %781, %770, %cst_373 {dimension_numbers = #tpu.dot_dimension_numbers<[1], [0], [0], [1], [0, 0, 1, 1], [], []>} : vector<2x64xf32>, vector<64x32xf32>, vector<2x32xf32> -> vector<2x32xf32>
    %783 = vector.broadcast %772 : vector<1x32xf32> to vector<2x32xf32>
    %784 = arith.addf %782, %783 : vector<2x32xf32>
    %785 = arith.addf %784, %764 : vector<2x32xf32>
    %cst_374 = arith.constant dense<0.000000e+00> : vector<2xf32>
    %786 = vector.multi_reduction <add>, %785, %cst_374 [1] : vector<2x32xf32> to vector<2xf32>
    %787 = vector.shape_cast %786 : vector<2xf32> to vector<2x1xf32>
    %cst_375 = arith.constant 3.200000e+01 : f32
    %788 = vector.broadcast %cst_375 : f32 to vector<2x1xf32>
    %789 = arith.divf %787, %788 : vector<2x1xf32>
    %790 = vector.broadcast %789 : vector<2x1xf32> to vector<2x32xf32>
    %791 = arith.subf %785, %790 : vector<2x32xf32>
    %792 = arith.mulf %791, %791 : vector<2x32xf32>
    %cst_376 = arith.constant dense<0.000000e+00> : vector<2xf32>
    %793 = vector.multi_reduction <add>, %792, %cst_376 [1] : vector<2x32xf32> to vector<2xf32>
    %794 = vector.shape_cast %793 : vector<2xf32> to vector<2x1xf32>
    %cst_377 = arith.constant 3.200000e+01 : f32
    %795 = vector.broadcast %cst_377 : f32 to vector<2x1xf32>
    %796 = arith.divf %794, %795 : vector<2x1xf32>
    %797 = vector.broadcast %789 : vector<2x1xf32> to vector<2x32xf32>
    %798 = arith.subf %785, %797 : vector<2x32xf32>
    %cst_378 = arith.constant 9.99999997E-7 : f32
    %799 = vector.broadcast %cst_378 : f32 to vector<2x1xf32>
    %800 = arith.addf %796, %799 : vector<2x1xf32>
    %801 = math.rsqrt %800 : vector<2x1xf32>
    %802 = vector.broadcast %801 : vector<2x1xf32> to vector<2x32xf32>
    %803 = arith.mulf %798, %802 : vector<2x32xf32>
    %804 = vector.broadcast %774 : vector<1x32xf32> to vector<2x32xf32>
    %805 = arith.mulf %803, %804 : vector<2x32xf32>
    %806 = vector.broadcast %776 : vector<1x32xf32> to vector<2x32xf32>
    %807 = arith.addf %805, %806 : vector<2x32xf32>
    %c0_379 = arith.constant 0 : index
    %c0_380 = arith.constant 0 : index
    %c0_381 = arith.constant 0 : index
    %808 = vector.load %arg45[%c0_379, %c0_380, %c0_381] : memref<2x32x128xf32, #tpu.memory_space<vmem>>, vector<1x32x128xf32>
    %809 = vector.shape_cast %808 : vector<1x32x128xf32> to vector<32x128xf32>
    %cst_382 = arith.constant dense<0.000000e+00> : vector<2x128xf32>
    %810 = tpu.matmul %807, %809, %cst_382 {dimension_numbers = #tpu.dot_dimension_numbers<[1], [0], [0], [1], [0, 0, 1, 1], [], []>} : vector<2x32xf32>, vector<32x128xf32>, vector<2x128xf32> -> vector<2x128xf32>
    %c0_383 = arith.constant 0 : index
    %c0_384 = arith.constant 0 : index
    %c0_385 = arith.constant 0 : index
    %811 = vector.load %arg46[%c0_383, %c0_384, %c0_385] : memref<2x1x128xf32, #tpu.memory_space<vmem>>, vector<1x1x128xf32>
    %812 = vector.shape_cast %811 : vector<1x1x128xf32> to vector<1x128xf32>
    %813 = vector.broadcast %812 : vector<1x128xf32> to vector<2x128xf32>
    %814 = arith.addf %810, %813 : vector<2x128xf32>
    %c0_386 = arith.constant 0 : index
    %c0_387 = arith.constant 0 : index
    %815 = vector.load %arg47[%c0_386, %c0_387] : memref<2x128xf32, #tpu.memory_space<vmem>>, vector<2x128xf32>
    tpu.vector_store %arg47[%c0_386, %c0_387], %814 {strides = array<i32>} : memref<2x128xf32, #tpu.memory_space<vmem>>, vector<2x128xf32>,
    %c0_388 = arith.constant 0 : index
    %c0_389 = arith.constant 0 : index
    %816 = vector.load %arg4[%c0_388, %c0_389] : memref<2x1xi32, #tpu.memory_space<vmem>>, vector<2x1xi32>
    %817 = vector.broadcast %816 : vector<2x1xi32> to vector<2x64xi32>
    %818 = arith.cmpi eq, %366, %817 : vector<2x64xi32>
    %819 = arith.extui %818 : vector<2x64xi1> to vector<2x64xi32>
    %820 = arith.sitofp %819 : vector<2x64xi32> to vector<2x64xf32>
    %c1_390 = arith.constant 1 : index
    %c0_391 = arith.constant 0 : index
    %c0_392 = arith.constant 0 : index
    %821 = vector.load %arg21[%c1_390, %c0_391, %c0_392] : memref<2x64x32xf32, #tpu.memory_space<vmem>>, vector<1x64x32xf32>
    %822 = vector.shape_cast %821 : vector<1x64x32xf32> to vector<64x32xf32>
    %cst_393 = arith.constant dense<0.000000e+00> : vector<2x32xf32>
    %823 = tpu.matmul %820, %822, %cst_393 {dimension_numbers = #tpu.dot_dimension_numbers<[1], [0], [0], [1], [0, 0, 1, 1], [], []>} : vector<2x64xf32>, vector<64x32xf32>, vector<2x32xf32> -> vector<2x32xf32>
    %c1_394 = arith.constant 1 : index
    %c0_395 = arith.constant 0 : index
    %c0_396 = arith.constant 0 : index
    %824 = vector.load %arg22[%c1_394, %c0_395, %c0_396] : memref<2x1x32xf32, #tpu.memory_space<vmem>>, vector<1x1x32xf32>
    %825 = vector.shape_cast %824 : vector<1x1x32xf32> to vector<1x32xf32>
    %826 = vector.broadcast %825 : vector<1x32xf32> to vector<2x32xf32>
    %827 = arith.addf %823, %826 : vector<2x32xf32>
    %c1_397 = arith.constant 1 : index
    %c0_398 = arith.constant 0 : index
    %c0_399 = arith.constant 0 : index
    %828 = vector.load %arg23[%c1_397, %c0_398, %c0_399] : memref<2x1x32xf32, #tpu.memory_space<vmem>>, vector<1x1x32xf32>
    %829 = vector.shape_cast %828 : vector<1x1x32xf32> to vector<1x32xf32>
    %c1_400 = arith.constant 1 : index
    %c0_401 = arith.constant 0 : index
    %c0_402 = arith.constant 0 : index
    %830 = vector.load %arg24[%c1_400, %c0_401, %c0_402] : memref<2x1x32xf32, #tpu.memory_space<vmem>>, vector<1x1x32xf32>
    %831 = vector.shape_cast %830 : vector<1x1x32xf32> to vector<1x32xf32>
    %cst_403 = arith.constant dense<0.000000e+00> : vector<2xf32>
    %832 = vector.multi_reduction <add>, %827, %cst_403 [1] : vector<2x32xf32> to vector<2xf32>
    %833 = vector.shape_cast %832 : vector<2xf32> to vector<2x1xf32>
    %cst_404 = arith.constant 3.200000e+01 : f32
    %834 = vector.broadcast %cst_404 : f32 to vector<2x1xf32>
    %835 = arith.divf %833, %834 : vector<2x1xf32>
    %836 = vector.broadcast %835 : vector<2x1xf32> to vector<2x32xf32>
    %837 = arith.subf %827, %836 : vector<2x32xf32>
    %838 = arith.mulf %837, %837 : vector<2x32xf32>
    %cst_405 = arith.constant dense<0.000000e+00> : vector<2xf32>
    %839 = vector.multi_reduction <add>, %838, %cst_405 [1] : vector<2x32xf32> to vector<2xf32>
    %840 = vector.shape_cast %839 : vector<2xf32> to vector<2x1xf32>
    %cst_406 = arith.constant 3.200000e+01 : f32
    %841 = vector.broadcast %cst_406 : f32 to vector<2x1xf32>
    %842 = arith.divf %840, %841 : vector<2x1xf32>
    %843 = vector.broadcast %835 : vector<2x1xf32> to vector<2x32xf32>
    %844 = arith.subf %827, %843 : vector<2x32xf32>
    %cst_407 = arith.constant 9.99999997E-7 : f32
    %845 = vector.broadcast %cst_407 : f32 to vector<2x1xf32>
    %846 = arith.addf %842, %845 : vector<2x1xf32>
    %847 = math.rsqrt %846 : vector<2x1xf32>
    %848 = vector.broadcast %847 : vector<2x1xf32> to vector<2x32xf32>
    %849 = arith.mulf %844, %848 : vector<2x32xf32>
    %850 = vector.broadcast %829 : vector<1x32xf32> to vector<2x32xf32>
    %851 = arith.mulf %849, %850 : vector<2x32xf32>
    %852 = vector.broadcast %831 : vector<1x32xf32> to vector<2x32xf32>
    %853 = arith.addf %851, %852 : vector<2x32xf32>
    %c2 = arith.constant 2 : index
    %c0_408 = arith.constant 0 : index
    %c0_409 = arith.constant 0 : index
    %854 = vector.load %arg25[%c2, %c0_408, %c0_409] : memref<4x32x32xf32, #tpu.memory_space<vmem>>, vector<1x32x32xf32>
    %855 = vector.shape_cast %854 : vector<1x32x32xf32> to vector<32x32xf32>
    %cst_410 = arith.constant dense<0.000000e+00> : vector<2x32xf32>
    %856 = tpu.matmul %853, %855, %cst_410 {dimension_numbers = #tpu.dot_dimension_numbers<[1], [0], [0], [1], [0, 0, 1, 1], [], []>} : vector<2x32xf32>, vector<32x32xf32>, vector<2x32xf32> -> vector<2x32xf32>
    %c2_411 = arith.constant 2 : index
    %c0_412 = arith.constant 0 : index
    %c0_413 = arith.constant 0 : index
    %857 = vector.load %arg26[%c2_411, %c0_412, %c0_413] : memref<4x1x32xf32, #tpu.memory_space<vmem>>, vector<1x1x32xf32>
    %858 = vector.shape_cast %857 : vector<1x1x32xf32> to vector<1x32xf32>
    %859 = vector.broadcast %858 : vector<1x32xf32> to vector<2x32xf32>
    %860 = arith.addf %856, %859 : vector<2x32xf32>
    %c2_414 = arith.constant 2 : index
    %c0_415 = arith.constant 0 : index
    %c0_416 = arith.constant 0 : index
    %861 = vector.load %arg27[%c2_414, %c0_415, %c0_416] : memref<4x32x32xf32, #tpu.memory_space<vmem>>, vector<1x32x32xf32>
    %862 = vector.shape_cast %861 : vector<1x32x32xf32> to vector<32x32xf32>
    %cst_417 = arith.constant dense<0.000000e+00> : vector<2x32xf32>
    %863 = tpu.matmul %860, %862, %cst_417 {dimension_numbers = #tpu.dot_dimension_numbers<[1], [0], [0], [1], [0, 0, 1, 1], [], []>} : vector<2x32xf32>, vector<32x32xf32>, vector<2x32xf32> -> vector<2x32xf32>
    %c2_418 = arith.constant 2 : index
    %c0_419 = arith.constant 0 : index
    %c0_420 = arith.constant 0 : index
    %864 = vector.load %arg28[%c2_418, %c0_419, %c0_420] : memref<4x1x32xf32, #tpu.memory_space<vmem>>, vector<1x1x32xf32>
    %865 = vector.shape_cast %864 : vector<1x1x32xf32> to vector<1x32xf32>
    %866 = vector.broadcast %865 : vector<1x32xf32> to vector<2x32xf32>
    %867 = arith.addf %863, %866 : vector<2x32xf32>
    %868 = arith.addf %867, %853 : vector<2x32xf32>
    %c2_421 = arith.constant 2 : index
    %c0_422 = arith.constant 0 : index
    %c0_423 = arith.constant 0 : index
    %869 = vector.load %arg29[%c2_421, %c0_422, %c0_423] : memref<4x1x32xf32, #tpu.memory_space<vmem>>, vector<1x1x32xf32>
    %870 = vector.shape_cast %869 : vector<1x1x32xf32> to vector<1x32xf32>
    %c2_424 = arith.constant 2 : index
    %c0_425 = arith.constant 0 : index
    %c0_426 = arith.constant 0 : index
    %871 = vector.load %arg30[%c2_424, %c0_425, %c0_426] : memref<4x1x32xf32, #tpu.memory_space<vmem>>, vector<1x1x32xf32>
    %872 = vector.shape_cast %871 : vector<1x1x32xf32> to vector<1x32xf32>
    %cst_427 = arith.constant dense<0.000000e+00> : vector<2xf32>
    %873 = vector.multi_reduction <add>, %868, %cst_427 [1] : vector<2x32xf32> to vector<2xf32>
    %874 = vector.shape_cast %873 : vector<2xf32> to vector<2x1xf32>
    %cst_428 = arith.constant 3.200000e+01 : f32
    %875 = vector.broadcast %cst_428 : f32 to vector<2x1xf32>
    %876 = arith.divf %874, %875 : vector<2x1xf32>
    %877 = vector.broadcast %876 : vector<2x1xf32> to vector<2x32xf32>
    %878 = arith.subf %868, %877 : vector<2x32xf32>
    %879 = arith.mulf %878, %878 : vector<2x32xf32>
    %cst_429 = arith.constant dense<0.000000e+00> : vector<2xf32>
    %880 = vector.multi_reduction <add>, %879, %cst_429 [1] : vector<2x32xf32> to vector<2xf32>
    %881 = vector.shape_cast %880 : vector<2xf32> to vector<2x1xf32>
    %cst_430 = arith.constant 3.200000e+01 : f32
    %882 = vector.broadcast %cst_430 : f32 to vector<2x1xf32>
    %883 = arith.divf %881, %882 : vector<2x1xf32>
    %884 = vector.broadcast %876 : vector<2x1xf32> to vector<2x32xf32>
    %885 = arith.subf %868, %884 : vector<2x32xf32>
    %cst_431 = arith.constant 9.99999997E-7 : f32
    %886 = vector.broadcast %cst_431 : f32 to vector<2x1xf32>
    %887 = arith.addf %883, %886 : vector<2x1xf32>
    %888 = math.rsqrt %887 : vector<2x1xf32>
    %889 = vector.broadcast %888 : vector<2x1xf32> to vector<2x32xf32>
    %890 = arith.mulf %885, %889 : vector<2x32xf32>
    %891 = vector.broadcast %870 : vector<1x32xf32> to vector<2x32xf32>
    %892 = arith.mulf %890, %891 : vector<2x32xf32>
    %893 = vector.broadcast %872 : vector<1x32xf32> to vector<2x32xf32>
    %894 = arith.addf %892, %893 : vector<2x32xf32>
    %c2_432 = arith.constant 2 : index
    %c0_433 = arith.constant 0 : index
    %c0_434 = arith.constant 0 : index
    %895 = vector.load %arg31[%c2_432, %c0_433, %c0_434] : memref<4x32x32xf32, #tpu.memory_space<vmem>>, vector<1x32x32xf32>
    %896 = vector.shape_cast %895 : vector<1x32x32xf32> to vector<32x32xf32>
    %cst_435 = arith.constant dense<0.000000e+00> : vector<2x32xf32>
    %897 = tpu.matmul %894, %896, %cst_435 {dimension_numbers = #tpu.dot_dimension_numbers<[1], [0], [0], [1], [0, 0, 1, 1], [], []>} : vector<2x32xf32>, vector<32x32xf32>, vector<2x32xf32> -> vector<2x32xf32>
    %c2_436 = arith.constant 2 : index
    %c0_437 = arith.constant 0 : index
    %c0_438 = arith.constant 0 : index
    %898 = vector.load %arg32[%c2_436, %c0_437, %c0_438] : memref<4x1x32xf32, #tpu.memory_space<vmem>>, vector<1x1x32xf32>
    %899 = vector.shape_cast %898 : vector<1x1x32xf32> to vector<1x32xf32>
    %900 = vector.broadcast %899 : vector<1x32xf32> to vector<2x32xf32>
    %901 = arith.addf %897, %900 : vector<2x32xf32>
    %cst_439 = arith.constant 0.353553385 : f32
    %902 = vector.broadcast %cst_439 : f32 to vector<2x32xf32>
    %903 = arith.mulf %901, %902 : vector<2x32xf32>
    %c2_440 = arith.constant 2 : index
    %c0_441 = arith.constant 0 : index
    %c0_442 = arith.constant 0 : index
    %904 = vector.load %arg33[%c2_440, %c0_441, %c0_442] : memref<4x32x64xf32, #tpu.memory_space<vmem>>, vector<1x32x64xf32>
    %905 = vector.shape_cast %904 : vector<1x32x64xf32> to vector<32x64xf32>
    %cst_443 = arith.constant dense<0.000000e+00> : vector<16x64xf32>
    %906 = tpu.matmul %365, %905, %cst_443 {dimension_numbers = #tpu.dot_dimension_numbers<[1], [0], [0], [1], [0, 0, 1, 1], [], []>} : vector<16x32xf32>, vector<32x64xf32>, vector<16x64xf32> -> vector<16x64xf32>
    %c2_444 = arith.constant 2 : index
    %c0_445 = arith.constant 0 : index
    %c0_446 = arith.constant 0 : index
    %907 = vector.load %arg34[%c2_444, %c0_445, %c0_446] : memref<4x1x64xf32, #tpu.memory_space<vmem>>, vector<1x1x64xf32>
    %908 = vector.shape_cast %907 : vector<1x1x64xf32> to vector<1x64xf32>
    %909 = vector.broadcast %908 : vector<1x64xf32> to vector<16x64xf32>
    %910 = arith.addf %906, %909 : vector<16x64xf32>
    %911 = vector.extract_strided_slice %910 {offsets = [0, 0], sizes = [16, 32], strides = [1, 1]} : vector<16x64xf32> to vector<16x32xf32>
    %912 = vector.extract_strided_slice %910 {offsets = [0, 32], sizes = [16, 32], strides = [1, 1]} : vector<16x64xf32> to vector<16x32xf32>
    %c2_447 = arith.constant 2 : index
    %c0_448 = arith.constant 0 : index
    %c0_449 = arith.constant 0 : index
    %913 = vector.load %arg35[%c2_447, %c0_448, %c0_449] : memref<4x32x32xf32, #tpu.memory_space<vmem>>, vector<1x32x32xf32>
    %914 = vector.shape_cast %913 : vector<1x32x32xf32> to vector<32x32xf32>
    %c2_450 = arith.constant 2 : index
    %c0_451 = arith.constant 0 : index
    %c0_452 = arith.constant 0 : index
    %915 = vector.load %arg36[%c2_450, %c0_451, %c0_452] : memref<4x1x32xf32, #tpu.memory_space<vmem>>, vector<1x1x32xf32>
    %916 = vector.shape_cast %915 : vector<1x1x32xf32> to vector<1x32xf32>
    %c2_453 = arith.constant 2 : index
    %c0_454 = arith.constant 0 : index
    %c0_455 = arith.constant 0 : index
    %917 = vector.load %arg37[%c2_453, %c0_454, %c0_455] : memref<4x1x32xf32, #tpu.memory_space<vmem>>, vector<1x1x32xf32>
    %918 = vector.shape_cast %917 : vector<1x1x32xf32> to vector<1x32xf32>
    %c2_456 = arith.constant 2 : index
    %c0_457 = arith.constant 0 : index
    %c0_458 = arith.constant 0 : index
    %919 = vector.load %arg38[%c2_456, %c0_457, %c0_458] : memref<4x1x32xf32, #tpu.memory_space<vmem>>, vector<1x1x32xf32>
    %920 = vector.shape_cast %919 : vector<1x1x32xf32> to vector<1x32xf32>
    %921 = tpu.transpose %911, [1, 0] : vector<16x32xf32> -> vector<32x16xf32>
    %922 = vector.extract_strided_slice %903 {offsets = [0, 0], sizes = [2, 8], strides = [1, 1]} : vector<2x32xf32> to vector<2x8xf32>
    %923 = vector.extract_strided_slice %921 {offsets = [0, 0], sizes = [8, 16], strides = [1, 1]} : vector<32x16xf32> to vector<8x16xf32>
    %cst_459 = arith.constant dense<0.000000e+00> : vector<2x16xf32>
    %924 = tpu.matmul %922, %923, %cst_459 {dimension_numbers = #tpu.dot_dimension_numbers<[1], [0], [0], [1], [0, 0, 1, 1], [], []>} : vector<2x8xf32>, vector<8x16xf32>, vector<2x16xf32> -> vector<2x16xf32>
    %925 = arith.addf %924, %21 : vector<2x16xf32>
    %cst_460 = arith.constant dense<0xFF800000> : vector<2xf32>
    %926 = vector.multi_reduction <maximumf>, %925, %cst_460 [1] : vector<2x16xf32> to vector<2xf32>
    %927 = vector.shape_cast %926 : vector<2xf32> to vector<2x1xf32>
    %928 = vector.broadcast %927 : vector<2x1xf32> to vector<2x16xf32>
    %929 = arith.subf %925, %928 : vector<2x16xf32>
    %930 = math.exp %929 : vector<2x16xf32>
    %cst_461 = arith.constant dense<0.000000e+00> : vector<2xf32>
    %931 = vector.multi_reduction <add>, %930, %cst_461 [1] : vector<2x16xf32> to vector<2xf32>
    %932 = vector.shape_cast %931 : vector<2xf32> to vector<2x1xf32>
    %933 = tpu.reciprocal %932 : vector<2x1xf32> -> vector<2x1xf32>
    %934 = vector.broadcast %933 : vector<2x1xf32> to vector<2x16xf32>
    %935 = arith.mulf %930, %934 : vector<2x16xf32>
    %936 = vector.extract_strided_slice %912 {offsets = [0, 0], sizes = [16, 8], strides = [1, 1]} : vector<16x32xf32> to vector<16x8xf32>
    %cst_462 = arith.constant dense<0.000000e+00> : vector<2x8xf32>
    %937 = tpu.matmul %935, %936, %cst_462 {dimension_numbers = #tpu.dot_dimension_numbers<[1], [0], [0], [1], [0, 0, 1, 1], [], []>} : vector<2x16xf32>, vector<16x8xf32>, vector<2x8xf32> -> vector<2x8xf32>
    %938 = vector.extract_strided_slice %903 {offsets = [0, 8], sizes = [2, 8], strides = [1, 1]} : vector<2x32xf32> to vector<2x8xf32>
    %939 = vector.extract_strided_slice %921 {offsets = [8, 0], sizes = [8, 16], strides = [1, 1]} : vector<32x16xf32> to vector<8x16xf32>
    %cst_463 = arith.constant dense<0.000000e+00> : vector<2x16xf32>
    %940 = tpu.matmul %938, %939, %cst_463 {dimension_numbers = #tpu.dot_dimension_numbers<[1], [0], [0], [1], [0, 0, 1, 1], [], []>} : vector<2x8xf32>, vector<8x16xf32>, vector<2x16xf32> -> vector<2x16xf32>
    %941 = arith.addf %940, %21 : vector<2x16xf32>
    %cst_464 = arith.constant dense<0xFF800000> : vector<2xf32>
    %942 = vector.multi_reduction <maximumf>, %941, %cst_464 [1] : vector<2x16xf32> to vector<2xf32>
    %943 = vector.shape_cast %942 : vector<2xf32> to vector<2x1xf32>
    %944 = vector.broadcast %943 : vector<2x1xf32> to vector<2x16xf32>
    %945 = arith.subf %941, %944 : vector<2x16xf32>
    %946 = math.exp %945 : vector<2x16xf32>
    %cst_465 = arith.constant dense<0.000000e+00> : vector<2xf32>
    %947 = vector.multi_reduction <add>, %946, %cst_465 [1] : vector<2x16xf32> to vector<2xf32>
    %948 = vector.shape_cast %947 : vector<2xf32> to vector<2x1xf32>
    %949 = tpu.reciprocal %948 : vector<2x1xf32> -> vector<2x1xf32>
    %950 = vector.broadcast %949 : vector<2x1xf32> to vector<2x16xf32>
    %951 = arith.mulf %946, %950 : vector<2x16xf32>
    %952 = vector.extract_strided_slice %912 {offsets = [0, 8], sizes = [16, 8], strides = [1, 1]} : vector<16x32xf32> to vector<16x8xf32>
    %cst_466 = arith.constant dense<0.000000e+00> : vector<2x8xf32>
    %953 = tpu.matmul %951, %952, %cst_466 {dimension_numbers = #tpu.dot_dimension_numbers<[1], [0], [0], [1], [0, 0, 1, 1], [], []>} : vector<2x16xf32>, vector<16x8xf32>, vector<2x8xf32> -> vector<2x8xf32>
    %954 = vector.extract_strided_slice %903 {offsets = [0, 16], sizes = [2, 8], strides = [1, 1]} : vector<2x32xf32> to vector<2x8xf32>
    %955 = vector.extract_strided_slice %921 {offsets = [16, 0], sizes = [8, 16], strides = [1, 1]} : vector<32x16xf32> to vector<8x16xf32>
    %cst_467 = arith.constant dense<0.000000e+00> : vector<2x16xf32>
    %956 = tpu.matmul %954, %955, %cst_467 {dimension_numbers = #tpu.dot_dimension_numbers<[1], [0], [0], [1], [0, 0, 1, 1], [], []>} : vector<2x8xf32>, vector<8x16xf32>, vector<2x16xf32> -> vector<2x16xf32>
    %957 = arith.addf %956, %21 : vector<2x16xf32>
    %cst_468 = arith.constant dense<0xFF800000> : vector<2xf32>
    %958 = vector.multi_reduction <maximumf>, %957, %cst_468 [1] : vector<2x16xf32> to vector<2xf32>
    %959 = vector.shape_cast %958 : vector<2xf32> to vector<2x1xf32>
    %960 = vector.broadcast %959 : vector<2x1xf32> to vector<2x16xf32>
    %961 = arith.subf %957, %960 : vector<2x16xf32>
    %962 = math.exp %961 : vector<2x16xf32>
    %cst_469 = arith.constant dense<0.000000e+00> : vector<2xf32>
    %963 = vector.multi_reduction <add>, %962, %cst_469 [1] : vector<2x16xf32> to vector<2xf32>
    %964 = vector.shape_cast %963 : vector<2xf32> to vector<2x1xf32>
    %965 = tpu.reciprocal %964 : vector<2x1xf32> -> vector<2x1xf32>
    %966 = vector.broadcast %965 : vector<2x1xf32> to vector<2x16xf32>
    %967 = arith.mulf %962, %966 : vector<2x16xf32>
    %968 = vector.extract_strided_slice %912 {offsets = [0, 16], sizes = [16, 8], strides = [1, 1]} : vector<16x32xf32> to vector<16x8xf32>
    %cst_470 = arith.constant dense<0.000000e+00> : vector<2x8xf32>
    %969 = tpu.matmul %967, %968, %cst_470 {dimension_numbers = #tpu.dot_dimension_numbers<[1], [0], [0], [1], [0, 0, 1, 1], [], []>} : vector<2x16xf32>, vector<16x8xf32>, vector<2x8xf32> -> vector<2x8xf32>
    %970 = vector.extract_strided_slice %903 {offsets = [0, 24], sizes = [2, 8], strides = [1, 1]} : vector<2x32xf32> to vector<2x8xf32>
    %971 = vector.extract_strided_slice %921 {offsets = [24, 0], sizes = [8, 16], strides = [1, 1]} : vector<32x16xf32> to vector<8x16xf32>
    %cst_471 = arith.constant dense<0.000000e+00> : vector<2x16xf32>
    %972 = tpu.matmul %970, %971, %cst_471 {dimension_numbers = #tpu.dot_dimension_numbers<[1], [0], [0], [1], [0, 0, 1, 1], [], []>} : vector<2x8xf32>, vector<8x16xf32>, vector<2x16xf32> -> vector<2x16xf32>
    %973 = arith.addf %972, %21 : vector<2x16xf32>
    %cst_472 = arith.constant dense<0xFF800000> : vector<2xf32>
    %974 = vector.multi_reduction <maximumf>, %973, %cst_472 [1] : vector<2x16xf32> to vector<2xf32>
    %975 = vector.shape_cast %974 : vector<2xf32> to vector<2x1xf32>
    %976 = vector.broadcast %975 : vector<2x1xf32> to vector<2x16xf32>
    %977 = arith.subf %973, %976 : vector<2x16xf32>
    %978 = math.exp %977 : vector<2x16xf32>
    %cst_473 = arith.constant dense<0.000000e+00> : vector<2xf32>
    %979 = vector.multi_reduction <add>, %978, %cst_473 [1] : vector<2x16xf32> to vector<2xf32>
    %980 = vector.shape_cast %979 : vector<2xf32> to vector<2x1xf32>
    %981 = tpu.reciprocal %980 : vector<2x1xf32> -> vector<2x1xf32>
    %982 = vector.broadcast %981 : vector<2x1xf32> to vector<2x16xf32>
    %983 = arith.mulf %978, %982 : vector<2x16xf32>
    %984 = vector.extract_strided_slice %912 {offsets = [0, 24], sizes = [16, 8], strides = [1, 1]} : vector<16x32xf32> to vector<16x8xf32>
    %cst_474 = arith.constant dense<0.000000e+00> : vector<2x8xf32>
    %985 = tpu.matmul %983, %984, %cst_474 {dimension_numbers = #tpu.dot_dimension_numbers<[1], [0], [0], [1], [0, 0, 1, 1], [], []>} : vector<2x16xf32>, vector<16x8xf32>, vector<2x8xf32> -> vector<2x8xf32>
    %986 = tpu.concatenate %937, %953, %969, %985 in 1 : vector<2x8xf32>, vector<2x8xf32>, vector<2x8xf32>, vector<2x8xf32> -> vector<2x32xf32>
    %cst_475 = arith.constant dense<0.000000e+00> : vector<2x32xf32>
    %987 = tpu.matmul %986, %914, %cst_475 {dimension_numbers = #tpu.dot_dimension_numbers<[1], [0], [0], [1], [0, 0, 1, 1], [], []>} : vector<2x32xf32>, vector<32x32xf32>, vector<2x32xf32> -> vector<2x32xf32>
    %988 = vector.broadcast %916 : vector<1x32xf32> to vector<2x32xf32>
    %989 = arith.addf %987, %988 : vector<2x32xf32>
    %990 = arith.addf %989, %894 : vector<2x32xf32>
    %cst_476 = arith.constant dense<0.000000e+00> : vector<2xf32>
    %991 = vector.multi_reduction <add>, %990, %cst_476 [1] : vector<2x32xf32> to vector<2xf32>
    %992 = vector.shape_cast %991 : vector<2xf32> to vector<2x1xf32>
    %cst_477 = arith.constant 3.200000e+01 : f32
    %993 = vector.broadcast %cst_477 : f32 to vector<2x1xf32>
    %994 = arith.divf %992, %993 : vector<2x1xf32>
    %995 = vector.broadcast %994 : vector<2x1xf32> to vector<2x32xf32>
    %996 = arith.subf %990, %995 : vector<2x32xf32>
    %997 = arith.mulf %996, %996 : vector<2x32xf32>
    %cst_478 = arith.constant dense<0.000000e+00> : vector<2xf32>
    %998 = vector.multi_reduction <add>, %997, %cst_478 [1] : vector<2x32xf32> to vector<2xf32>
    %999 = vector.shape_cast %998 : vector<2xf32> to vector<2x1xf32>
    %cst_479 = arith.constant 3.200000e+01 : f32
    %1000 = vector.broadcast %cst_479 : f32 to vector<2x1xf32>
    %1001 = arith.divf %999, %1000 : vector<2x1xf32>
    %1002 = vector.broadcast %994 : vector<2x1xf32> to vector<2x32xf32>
    %1003 = arith.subf %990, %1002 : vector<2x32xf32>
    %cst_480 = arith.constant 9.99999997E-7 : f32
    %1004 = vector.broadcast %cst_480 : f32 to vector<2x1xf32>
    %1005 = arith.addf %1001, %1004 : vector<2x1xf32>
    %1006 = math.rsqrt %1005 : vector<2x1xf32>
    %1007 = vector.broadcast %1006 : vector<2x1xf32> to vector<2x32xf32>
    %1008 = arith.mulf %1003, %1007 : vector<2x32xf32>
    %1009 = vector.broadcast %918 : vector<1x32xf32> to vector<2x32xf32>
    %1010 = arith.mulf %1008, %1009 : vector<2x32xf32>
    %1011 = vector.broadcast %920 : vector<1x32xf32> to vector<2x32xf32>
    %1012 = arith.addf %1010, %1011 : vector<2x32xf32>
    %c2_481 = arith.constant 2 : index
    %c0_482 = arith.constant 0 : index
    %c0_483 = arith.constant 0 : index
    %1013 = vector.load %arg39[%c2_481, %c0_482, %c0_483] : memref<4x32x64xf32, #tpu.memory_space<vmem>>, vector<1x32x64xf32>
    %1014 = vector.shape_cast %1013 : vector<1x32x64xf32> to vector<32x64xf32>
    %c2_484 = arith.constant 2 : index
    %c0_485 = arith.constant 0 : index
    %c0_486 = arith.constant 0 : index
    %1015 = vector.load %arg40[%c2_484, %c0_485, %c0_486] : memref<4x1x64xf32, #tpu.memory_space<vmem>>, vector<1x1x64xf32>
    %1016 = vector.shape_cast %1015 : vector<1x1x64xf32> to vector<1x64xf32>
    %c2_487 = arith.constant 2 : index
    %c0_488 = arith.constant 0 : index
    %c0_489 = arith.constant 0 : index
    %1017 = vector.load %arg41[%c2_487, %c0_488, %c0_489] : memref<4x64x32xf32, #tpu.memory_space<vmem>>, vector<1x64x32xf32>
    %1018 = vector.shape_cast %1017 : vector<1x64x32xf32> to vector<64x32xf32>
    %c2_490 = arith.constant 2 : index
    %c0_491 = arith.constant 0 : index
    %c0_492 = arith.constant 0 : index
    %1019 = vector.load %arg42[%c2_490, %c0_491, %c0_492] : memref<4x1x32xf32, #tpu.memory_space<vmem>>, vector<1x1x32xf32>
    %1020 = vector.shape_cast %1019 : vector<1x1x32xf32> to vector<1x32xf32>
    %c2_493 = arith.constant 2 : index
    %c0_494 = arith.constant 0 : index
    %c0_495 = arith.constant 0 : index
    %1021 = vector.load %arg43[%c2_493, %c0_494, %c0_495] : memref<4x1x32xf32, #tpu.memory_space<vmem>>, vector<1x1x32xf32>
    %1022 = vector.shape_cast %1021 : vector<1x1x32xf32> to vector<1x32xf32>
    %c2_496 = arith.constant 2 : index
    %c0_497 = arith.constant 0 : index
    %c0_498 = arith.constant 0 : index
    %1023 = vector.load %arg44[%c2_496, %c0_497, %c0_498] : memref<4x1x32xf32, #tpu.memory_space<vmem>>, vector<1x1x32xf32>
    %1024 = vector.shape_cast %1023 : vector<1x1x32xf32> to vector<1x32xf32>
    %cst_499 = arith.constant dense<0.000000e+00> : vector<2x64xf32>
    %1025 = tpu.matmul %1012, %1014, %cst_499 {dimension_numbers = #tpu.dot_dimension_numbers<[1], [0], [0], [1], [0, 0, 1, 1], [], []>} : vector<2x32xf32>, vector<32x64xf32>, vector<2x64xf32> -> vector<2x64xf32>
    %1026 = vector.broadcast %1016 : vector<1x64xf32> to vector<2x64xf32>
    %1027 = arith.addf %1025, %1026 : vector<2x64xf32>
    %cst_500 = arith.constant 0.000000e+00 : f32
    %1028 = vector.broadcast %cst_500 : f32 to vector<2x64xf32>
    %1029 = arith.maximumf %1027, %1028 : vector<2x64xf32>
    %cst_501 = arith.constant dense<0.000000e+00> : vector<2x32xf32>
    %1030 = tpu.matmul %1029, %1018, %cst_501 {dimension_numbers = #tpu.dot_dimension_numbers<[1], [0], [0], [1], [0, 0, 1, 1], [], []>} : vector<2x64xf32>, vector<64x32xf32>, vector<2x32xf32> -> vector<2x32xf32>
    %1031 = vector.broadcast %1020 : vector<1x32xf32> to vector<2x32xf32>
    %1032 = arith.addf %1030, %1031 : vector<2x32xf32>
    %1033 = arith.addf %1032, %1012 : vector<2x32xf32>
    %cst_502 = arith.constant dense<0.000000e+00> : vector<2xf32>
    %1034 = vector.multi_reduction <add>, %1033, %cst_502 [1] : vector<2x32xf32> to vector<2xf32>
    %1035 = vector.shape_cast %1034 : vector<2xf32> to vector<2x1xf32>
    %cst_503 = arith.constant 3.200000e+01 : f32
    %1036 = vector.broadcast %cst_503 : f32 to vector<2x1xf32>
    %1037 = arith.divf %1035, %1036 : vector<2x1xf32>
    %1038 = vector.broadcast %1037 : vector<2x1xf32> to vector<2x32xf32>
    %1039 = arith.subf %1033, %1038 : vector<2x32xf32>
    %1040 = arith.mulf %1039, %1039 : vector<2x32xf32>
    %cst_504 = arith.constant dense<0.000000e+00> : vector<2xf32>
    %1041 = vector.multi_reduction <add>, %1040, %cst_504 [1] : vector<2x32xf32> to vector<2xf32>
    %1042 = vector.shape_cast %1041 : vector<2xf32> to vector<2x1xf32>
    %cst_505 = arith.constant 3.200000e+01 : f32
    %1043 = vector.broadcast %cst_505 : f32 to vector<2x1xf32>
    %1044 = arith.divf %1042, %1043 : vector<2x1xf32>
    %1045 = vector.broadcast %1037 : vector<2x1xf32> to vector<2x32xf32>
    %1046 = arith.subf %1033, %1045 : vector<2x32xf32>
    %cst_506 = arith.constant 9.99999997E-7 : f32
    %1047 = vector.broadcast %cst_506 : f32 to vector<2x1xf32>
    %1048 = arith.addf %1044, %1047 : vector<2x1xf32>
    %1049 = math.rsqrt %1048 : vector<2x1xf32>
    %1050 = vector.broadcast %1049 : vector<2x1xf32> to vector<2x32xf32>
    %1051 = arith.mulf %1046, %1050 : vector<2x32xf32>
    %1052 = vector.broadcast %1022 : vector<1x32xf32> to vector<2x32xf32>
    %1053 = arith.mulf %1051, %1052 : vector<2x32xf32>
    %1054 = vector.broadcast %1024 : vector<1x32xf32> to vector<2x32xf32>
    %1055 = arith.addf %1053, %1054 : vector<2x32xf32>
    %c3 = arith.constant 3 : index
    %c0_507 = arith.constant 0 : index
    %c0_508 = arith.constant 0 : index
    %1056 = vector.load %arg25[%c3, %c0_507, %c0_508] : memref<4x32x32xf32, #tpu.memory_space<vmem>>, vector<1x32x32xf32>
    %1057 = vector.shape_cast %1056 : vector<1x32x32xf32> to vector<32x32xf32>
    %cst_509 = arith.constant dense<0.000000e+00> : vector<2x32xf32>
    %1058 = tpu.matmul %1055, %1057, %cst_509 {dimension_numbers = #tpu.dot_dimension_numbers<[1], [0], [0], [1], [0, 0, 1, 1], [], []>} : vector<2x32xf32>, vector<32x32xf32>, vector<2x32xf32> -> vector<2x32xf32>
    %c3_510 = arith.constant 3 : index
    %c0_511 = arith.constant 0 : index
    %c0_512 = arith.constant 0 : index
    %1059 = vector.load %arg26[%c3_510, %c0_511, %c0_512] : memref<4x1x32xf32, #tpu.memory_space<vmem>>, vector<1x1x32xf32>
    %1060 = vector.shape_cast %1059 : vector<1x1x32xf32> to vector<1x32xf32>
    %1061 = vector.broadcast %1060 : vector<1x32xf32> to vector<2x32xf32>
    %1062 = arith.addf %1058, %1061 : vector<2x32xf32>
    %c3_513 = arith.constant 3 : index
    %c0_514 = arith.constant 0 : index
    %c0_515 = arith.constant 0 : index
    %1063 = vector.load %arg27[%c3_513, %c0_514, %c0_515] : memref<4x32x32xf32, #tpu.memory_space<vmem>>, vector<1x32x32xf32>
    %1064 = vector.shape_cast %1063 : vector<1x32x32xf32> to vector<32x32xf32>
    %cst_516 = arith.constant dense<0.000000e+00> : vector<2x32xf32>
    %1065 = tpu.matmul %1062, %1064, %cst_516 {dimension_numbers = #tpu.dot_dimension_numbers<[1], [0], [0], [1], [0, 0, 1, 1], [], []>} : vector<2x32xf32>, vector<32x32xf32>, vector<2x32xf32> -> vector<2x32xf32>
    %c3_517 = arith.constant 3 : index
    %c0_518 = arith.constant 0 : index
    %c0_519 = arith.constant 0 : index
    %1066 = vector.load %arg28[%c3_517, %c0_518, %c0_519] : memref<4x1x32xf32, #tpu.memory_space<vmem>>, vector<1x1x32xf32>
    %1067 = vector.shape_cast %1066 : vector<1x1x32xf32> to vector<1x32xf32>
    %1068 = vector.broadcast %1067 : vector<1x32xf32> to vector<2x32xf32>
    %1069 = arith.addf %1065, %1068 : vector<2x32xf32>
    %1070 = arith.addf %1069, %1055 : vector<2x32xf32>
    %c3_520 = arith.constant 3 : index
    %c0_521 = arith.constant 0 : index
    %c0_522 = arith.constant 0 : index
    %1071 = vector.load %arg29[%c3_520, %c0_521, %c0_522] : memref<4x1x32xf32, #tpu.memory_space<vmem>>, vector<1x1x32xf32>
    %1072 = vector.shape_cast %1071 : vector<1x1x32xf32> to vector<1x32xf32>
    %c3_523 = arith.constant 3 : index
    %c0_524 = arith.constant 0 : index
    %c0_525 = arith.constant 0 : index
    %1073 = vector.load %arg30[%c3_523, %c0_524, %c0_525] : memref<4x1x32xf32, #tpu.memory_space<vmem>>, vector<1x1x32xf32>
    %1074 = vector.shape_cast %1073 : vector<1x1x32xf32> to vector<1x32xf32>
    %cst_526 = arith.constant dense<0.000000e+00> : vector<2xf32>
    %1075 = vector.multi_reduction <add>, %1070, %cst_526 [1] : vector<2x32xf32> to vector<2xf32>
    %1076 = vector.shape_cast %1075 : vector<2xf32> to vector<2x1xf32>
    %cst_527 = arith.constant 3.200000e+01 : f32
    %1077 = vector.broadcast %cst_527 : f32 to vector<2x1xf32>
    %1078 = arith.divf %1076, %1077 : vector<2x1xf32>
    %1079 = vector.broadcast %1078 : vector<2x1xf32> to vector<2x32xf32>
    %1080 = arith.subf %1070, %1079 : vector<2x32xf32>
    %1081 = arith.mulf %1080, %1080 : vector<2x32xf32>
    %cst_528 = arith.constant dense<0.000000e+00> : vector<2xf32>
    %1082 = vector.multi_reduction <add>, %1081, %cst_528 [1] : vector<2x32xf32> to vector<2xf32>
    %1083 = vector.shape_cast %1082 : vector<2xf32> to vector<2x1xf32>
    %cst_529 = arith.constant 3.200000e+01 : f32
    %1084 = vector.broadcast %cst_529 : f32 to vector<2x1xf32>
    %1085 = arith.divf %1083, %1084 : vector<2x1xf32>
    %1086 = vector.broadcast %1078 : vector<2x1xf32> to vector<2x32xf32>
    %1087 = arith.subf %1070, %1086 : vector<2x32xf32>
    %cst_530 = arith.constant 9.99999997E-7 : f32
    %1088 = vector.broadcast %cst_530 : f32 to vector<2x1xf32>
    %1089 = arith.addf %1085, %1088 : vector<2x1xf32>
    %1090 = math.rsqrt %1089 : vector<2x1xf32>
    %1091 = vector.broadcast %1090 : vector<2x1xf32> to vector<2x32xf32>
    %1092 = arith.mulf %1087, %1091 : vector<2x32xf32>
    %1093 = vector.broadcast %1072 : vector<1x32xf32> to vector<2x32xf32>
    %1094 = arith.mulf %1092, %1093 : vector<2x32xf32>
    %1095 = vector.broadcast %1074 : vector<1x32xf32> to vector<2x32xf32>
    %1096 = arith.addf %1094, %1095 : vector<2x32xf32>
    %c3_531 = arith.constant 3 : index
    %c0_532 = arith.constant 0 : index
    %c0_533 = arith.constant 0 : index
    %1097 = vector.load %arg31[%c3_531, %c0_532, %c0_533] : memref<4x32x32xf32, #tpu.memory_space<vmem>>, vector<1x32x32xf32>
    %1098 = vector.shape_cast %1097 : vector<1x32x32xf32> to vector<32x32xf32>
    %cst_534 = arith.constant dense<0.000000e+00> : vector<2x32xf32>
    %1099 = tpu.matmul %1096, %1098, %cst_534 {dimension_numbers = #tpu.dot_dimension_numbers<[1], [0], [0], [1], [0, 0, 1, 1], [], []>} : vector<2x32xf32>, vector<32x32xf32>, vector<2x32xf32> -> vector<2x32xf32>
    %c3_535 = arith.constant 3 : index
    %c0_536 = arith.constant 0 : index
    %c0_537 = arith.constant 0 : index
    %1100 = vector.load %arg32[%c3_535, %c0_536, %c0_537] : memref<4x1x32xf32, #tpu.memory_space<vmem>>, vector<1x1x32xf32>
    %1101 = vector.shape_cast %1100 : vector<1x1x32xf32> to vector<1x32xf32>
    %1102 = vector.broadcast %1101 : vector<1x32xf32> to vector<2x32xf32>
    %1103 = arith.addf %1099, %1102 : vector<2x32xf32>
    %cst_538 = arith.constant 0.353553385 : f32
    %1104 = vector.broadcast %cst_538 : f32 to vector<2x32xf32>
    %1105 = arith.mulf %1103, %1104 : vector<2x32xf32>
    %c3_539 = arith.constant 3 : index
    %c0_540 = arith.constant 0 : index
    %c0_541 = arith.constant 0 : index
    %1106 = vector.load %arg33[%c3_539, %c0_540, %c0_541] : memref<4x32x64xf32, #tpu.memory_space<vmem>>, vector<1x32x64xf32>
    %1107 = vector.shape_cast %1106 : vector<1x32x64xf32> to vector<32x64xf32>
    %cst_542 = arith.constant dense<0.000000e+00> : vector<16x64xf32>
    %1108 = tpu.matmul %365, %1107, %cst_542 {dimension_numbers = #tpu.dot_dimension_numbers<[1], [0], [0], [1], [0, 0, 1, 1], [], []>} : vector<16x32xf32>, vector<32x64xf32>, vector<16x64xf32> -> vector<16x64xf32>
    %c3_543 = arith.constant 3 : index
    %c0_544 = arith.constant 0 : index
    %c0_545 = arith.constant 0 : index
    %1109 = vector.load %arg34[%c3_543, %c0_544, %c0_545] : memref<4x1x64xf32, #tpu.memory_space<vmem>>, vector<1x1x64xf32>
    %1110 = vector.shape_cast %1109 : vector<1x1x64xf32> to vector<1x64xf32>
    %1111 = vector.broadcast %1110 : vector<1x64xf32> to vector<16x64xf32>
    %1112 = arith.addf %1108, %1111 : vector<16x64xf32>
    %1113 = vector.extract_strided_slice %1112 {offsets = [0, 0], sizes = [16, 32], strides = [1, 1]} : vector<16x64xf32> to vector<16x32xf32>
    %1114 = vector.extract_strided_slice %1112 {offsets = [0, 32], sizes = [16, 32], strides = [1, 1]} : vector<16x64xf32> to vector<16x32xf32>
    %c3_546 = arith.constant 3 : index
    %c0_547 = arith.constant 0 : index
    %c0_548 = arith.constant 0 : index
    %1115 = vector.load %arg35[%c3_546, %c0_547, %c0_548] : memref<4x32x32xf32, #tpu.memory_space<vmem>>, vector<1x32x32xf32>
    %1116 = vector.shape_cast %1115 : vector<1x32x32xf32> to vector<32x32xf32>
    %c3_549 = arith.constant 3 : index
    %c0_550 = arith.constant 0 : index
    %c0_551 = arith.constant 0 : index
    %1117 = vector.load %arg36[%c3_549, %c0_550, %c0_551] : memref<4x1x32xf32, #tpu.memory_space<vmem>>, vector<1x1x32xf32>
    %1118 = vector.shape_cast %1117 : vector<1x1x32xf32> to vector<1x32xf32>
    %c3_552 = arith.constant 3 : index
    %c0_553 = arith.constant 0 : index
    %c0_554 = arith.constant 0 : index
    %1119 = vector.load %arg37[%c3_552, %c0_553, %c0_554] : memref<4x1x32xf32, #tpu.memory_space<vmem>>, vector<1x1x32xf32>
    %1120 = vector.shape_cast %1119 : vector<1x1x32xf32> to vector<1x32xf32>
    %c3_555 = arith.constant 3 : index
    %c0_556 = arith.constant 0 : index
    %c0_557 = arith.constant 0 : index
    %1121 = vector.load %arg38[%c3_555, %c0_556, %c0_557] : memref<4x1x32xf32, #tpu.memory_space<vmem>>, vector<1x1x32xf32>
    %1122 = vector.shape_cast %1121 : vector<1x1x32xf32> to vector<1x32xf32>
    %1123 = tpu.transpose %1113, [1, 0] : vector<16x32xf32> -> vector<32x16xf32>
    %1124 = vector.extract_strided_slice %1105 {offsets = [0, 0], sizes = [2, 8], strides = [1, 1]} : vector<2x32xf32> to vector<2x8xf32>
    %1125 = vector.extract_strided_slice %1123 {offsets = [0, 0], sizes = [8, 16], strides = [1, 1]} : vector<32x16xf32> to vector<8x16xf32>
    %cst_558 = arith.constant dense<0.000000e+00> : vector<2x16xf32>
    %1126 = tpu.matmul %1124, %1125, %cst_558 {dimension_numbers = #tpu.dot_dimension_numbers<[1], [0], [0], [1], [0, 0, 1, 1], [], []>} : vector<2x8xf32>, vector<8x16xf32>, vector<2x16xf32> -> vector<2x16xf32>
    %1127 = arith.addf %1126, %21 : vector<2x16xf32>
    %cst_559 = arith.constant dense<0xFF800000> : vector<2xf32>
    %1128 = vector.multi_reduction <maximumf>, %1127, %cst_559 [1] : vector<2x16xf32> to vector<2xf32>
    %1129 = vector.shape_cast %1128 : vector<2xf32> to vector<2x1xf32>
    %1130 = vector.broadcast %1129 : vector<2x1xf32> to vector<2x16xf32>
    %1131 = arith.subf %1127, %1130 : vector<2x16xf32>
    %1132 = math.exp %1131 : vector<2x16xf32>
    %cst_560 = arith.constant dense<0.000000e+00> : vector<2xf32>
    %1133 = vector.multi_reduction <add>, %1132, %cst_560 [1] : vector<2x16xf32> to vector<2xf32>
    %1134 = vector.shape_cast %1133 : vector<2xf32> to vector<2x1xf32>
    %1135 = tpu.reciprocal %1134 : vector<2x1xf32> -> vector<2x1xf32>
    %1136 = vector.broadcast %1135 : vector<2x1xf32> to vector<2x16xf32>
    %1137 = arith.mulf %1132, %1136 : vector<2x16xf32>
    %1138 = vector.extract_strided_slice %1114 {offsets = [0, 0], sizes = [16, 8], strides = [1, 1]} : vector<16x32xf32> to vector<16x8xf32>
    %cst_561 = arith.constant dense<0.000000e+00> : vector<2x8xf32>
    %1139 = tpu.matmul %1137, %1138, %cst_561 {dimension_numbers = #tpu.dot_dimension_numbers<[1], [0], [0], [1], [0, 0, 1, 1], [], []>} : vector<2x16xf32>, vector<16x8xf32>, vector<2x8xf32> -> vector<2x8xf32>
    %1140 = vector.extract_strided_slice %1105 {offsets = [0, 8], sizes = [2, 8], strides = [1, 1]} : vector<2x32xf32> to vector<2x8xf32>
    %1141 = vector.extract_strided_slice %1123 {offsets = [8, 0], sizes = [8, 16], strides = [1, 1]} : vector<32x16xf32> to vector<8x16xf32>
    %cst_562 = arith.constant dense<0.000000e+00> : vector<2x16xf32>
    %1142 = tpu.matmul %1140, %1141, %cst_562 {dimension_numbers = #tpu.dot_dimension_numbers<[1], [0], [0], [1], [0, 0, 1, 1], [], []>} : vector<2x8xf32>, vector<8x16xf32>, vector<2x16xf32> -> vector<2x16xf32>
    %1143 = arith.addf %1142, %21 : vector<2x16xf32>
    %cst_563 = arith.constant dense<0xFF800000> : vector<2xf32>
    %1144 = vector.multi_reduction <maximumf>, %1143, %cst_563 [1] : vector<2x16xf32> to vector<2xf32>
    %1145 = vector.shape_cast %1144 : vector<2xf32> to vector<2x1xf32>
    %1146 = vector.broadcast %1145 : vector<2x1xf32> to vector<2x16xf32>
    %1147 = arith.subf %1143, %1146 : vector<2x16xf32>
    %1148 = math.exp %1147 : vector<2x16xf32>
    %cst_564 = arith.constant dense<0.000000e+00> : vector<2xf32>
    %1149 = vector.multi_reduction <add>, %1148, %cst_564 [1] : vector<2x16xf32> to vector<2xf32>
    %1150 = vector.shape_cast %1149 : vector<2xf32> to vector<2x1xf32>
    %1151 = tpu.reciprocal %1150 : vector<2x1xf32> -> vector<2x1xf32>
    %1152 = vector.broadcast %1151 : vector<2x1xf32> to vector<2x16xf32>
    %1153 = arith.mulf %1148, %1152 : vector<2x16xf32>
    %1154 = vector.extract_strided_slice %1114 {offsets = [0, 8], sizes = [16, 8], strides = [1, 1]} : vector<16x32xf32> to vector<16x8xf32>
    %cst_565 = arith.constant dense<0.000000e+00> : vector<2x8xf32>
    %1155 = tpu.matmul %1153, %1154, %cst_565 {dimension_numbers = #tpu.dot_dimension_numbers<[1], [0], [0], [1], [0, 0, 1, 1], [], []>} : vector<2x16xf32>, vector<16x8xf32>, vector<2x8xf32> -> vector<2x8xf32>
    %1156 = vector.extract_strided_slice %1105 {offsets = [0, 16], sizes = [2, 8], strides = [1, 1]} : vector<2x32xf32> to vector<2x8xf32>
    %1157 = vector.extract_strided_slice %1123 {offsets = [16, 0], sizes = [8, 16], strides = [1, 1]} : vector<32x16xf32> to vector<8x16xf32>
    %cst_566 = arith.constant dense<0.000000e+00> : vector<2x16xf32>
    %1158 = tpu.matmul %1156, %1157, %cst_566 {dimension_numbers = #tpu.dot_dimension_numbers<[1], [0], [0], [1], [0, 0, 1, 1], [], []>} : vector<2x8xf32>, vector<8x16xf32>, vector<2x16xf32> -> vector<2x16xf32>
    %1159 = arith.addf %1158, %21 : vector<2x16xf32>
    %cst_567 = arith.constant dense<0xFF800000> : vector<2xf32>
    %1160 = vector.multi_reduction <maximumf>, %1159, %cst_567 [1] : vector<2x16xf32> to vector<2xf32>
    %1161 = vector.shape_cast %1160 : vector<2xf32> to vector<2x1xf32>
    %1162 = vector.broadcast %1161 : vector<2x1xf32> to vector<2x16xf32>
    %1163 = arith.subf %1159, %1162 : vector<2x16xf32>
    %1164 = math.exp %1163 : vector<2x16xf32>
    %cst_568 = arith.constant dense<0.000000e+00> : vector<2xf32>
    %1165 = vector.multi_reduction <add>, %1164, %cst_568 [1] : vector<2x16xf32> to vector<2xf32>
    %1166 = vector.shape_cast %1165 : vector<2xf32> to vector<2x1xf32>
    %1167 = tpu.reciprocal %1166 : vector<2x1xf32> -> vector<2x1xf32>
    %1168 = vector.broadcast %1167 : vector<2x1xf32> to vector<2x16xf32>
    %1169 = arith.mulf %1164, %1168 : vector<2x16xf32>
    %1170 = vector.extract_strided_slice %1114 {offsets = [0, 16], sizes = [16, 8], strides = [1, 1]} : vector<16x32xf32> to vector<16x8xf32>
    %cst_569 = arith.constant dense<0.000000e+00> : vector<2x8xf32>
    %1171 = tpu.matmul %1169, %1170, %cst_569 {dimension_numbers = #tpu.dot_dimension_numbers<[1], [0], [0], [1], [0, 0, 1, 1], [], []>} : vector<2x16xf32>, vector<16x8xf32>, vector<2x8xf32> -> vector<2x8xf32>
    %1172 = vector.extract_strided_slice %1105 {offsets = [0, 24], sizes = [2, 8], strides = [1, 1]} : vector<2x32xf32> to vector<2x8xf32>
    %1173 = vector.extract_strided_slice %1123 {offsets = [24, 0], sizes = [8, 16], strides = [1, 1]} : vector<32x16xf32> to vector<8x16xf32>
    %cst_570 = arith.constant dense<0.000000e+00> : vector<2x16xf32>
    %1174 = tpu.matmul %1172, %1173, %cst_570 {dimension_numbers = #tpu.dot_dimension_numbers<[1], [0], [0], [1], [0, 0, 1, 1], [], []>} : vector<2x8xf32>, vector<8x16xf32>, vector<2x16xf32> -> vector<2x16xf32>
    %1175 = arith.addf %1174, %21 : vector<2x16xf32>
    %cst_571 = arith.constant dense<0xFF800000> : vector<2xf32>
    %1176 = vector.multi_reduction <maximumf>, %1175, %cst_571 [1] : vector<2x16xf32> to vector<2xf32>
    %1177 = vector.shape_cast %1176 : vector<2xf32> to vector<2x1xf32>
    %1178 = vector.broadcast %1177 : vector<2x1xf32> to vector<2x16xf32>
    %1179 = arith.subf %1175, %1178 : vector<2x16xf32>
    %1180 = math.exp %1179 : vector<2x16xf32>
    %cst_572 = arith.constant dense<0.000000e+00> : vector<2xf32>
    %1181 = vector.multi_reduction <add>, %1180, %cst_572 [1] : vector<2x16xf32> to vector<2xf32>
    %1182 = vector.shape_cast %1181 : vector<2xf32> to vector<2x1xf32>
    %1183 = tpu.reciprocal %1182 : vector<2x1xf32> -> vector<2x1xf32>
    %1184 = vector.broadcast %1183 : vector<2x1xf32> to vector<2x16xf32>
    %1185 = arith.mulf %1180, %1184 : vector<2x16xf32>
    %1186 = vector.extract_strided_slice %1114 {offsets = [0, 24], sizes = [16, 8], strides = [1, 1]} : vector<16x32xf32> to vector<16x8xf32>
    %cst_573 = arith.constant dense<0.000000e+00> : vector<2x8xf32>
    %1187 = tpu.matmul %1185, %1186, %cst_573 {dimension_numbers = #tpu.dot_dimension_numbers<[1], [0], [0], [1], [0, 0, 1, 1], [], []>} : vector<2x16xf32>, vector<16x8xf32>, vector<2x8xf32> -> vector<2x8xf32>
    %1188 = tpu.concatenate %1139, %1155, %1171, %1187 in 1 : vector<2x8xf32>, vector<2x8xf32>, vector<2x8xf32>, vector<2x8xf32> -> vector<2x32xf32>
    %cst_574 = arith.constant dense<0.000000e+00> : vector<2x32xf32>
    %1189 = tpu.matmul %1188, %1116, %cst_574 {dimension_numbers = #tpu.dot_dimension_numbers<[1], [0], [0], [1], [0, 0, 1, 1], [], []>} : vector<2x32xf32>, vector<32x32xf32>, vector<2x32xf32> -> vector<2x32xf32>
    %1190 = vector.broadcast %1118 : vector<1x32xf32> to vector<2x32xf32>
    %1191 = arith.addf %1189, %1190 : vector<2x32xf32>
    %1192 = arith.addf %1191, %1096 : vector<2x32xf32>
    %cst_575 = arith.constant dense<0.000000e+00> : vector<2xf32>
    %1193 = vector.multi_reduction <add>, %1192, %cst_575 [1] : vector<2x32xf32> to vector<2xf32>
    %1194 = vector.shape_cast %1193 : vector<2xf32> to vector<2x1xf32>
    %cst_576 = arith.constant 3.200000e+01 : f32
    %1195 = vector.broadcast %cst_576 : f32 to vector<2x1xf32>
    %1196 = arith.divf %1194, %1195 : vector<2x1xf32>
    %1197 = vector.broadcast %1196 : vector<2x1xf32> to vector<2x32xf32>
    %1198 = arith.subf %1192, %1197 : vector<2x32xf32>
    %1199 = arith.mulf %1198, %1198 : vector<2x32xf32>
    %cst_577 = arith.constant dense<0.000000e+00> : vector<2xf32>
    %1200 = vector.multi_reduction <add>, %1199, %cst_577 [1] : vector<2x32xf32> to vector<2xf32>
    %1201 = vector.shape_cast %1200 : vector<2xf32> to vector<2x1xf32>
    %cst_578 = arith.constant 3.200000e+01 : f32
    %1202 = vector.broadcast %cst_578 : f32 to vector<2x1xf32>
    %1203 = arith.divf %1201, %1202 : vector<2x1xf32>
    %1204 = vector.broadcast %1196 : vector<2x1xf32> to vector<2x32xf32>
    %1205 = arith.subf %1192, %1204 : vector<2x32xf32>
    %cst_579 = arith.constant 9.99999997E-7 : f32
    %1206 = vector.broadcast %cst_579 : f32 to vector<2x1xf32>
    %1207 = arith.addf %1203, %1206 : vector<2x1xf32>
    %1208 = math.rsqrt %1207 : vector<2x1xf32>
    %1209 = vector.broadcast %1208 : vector<2x1xf32> to vector<2x32xf32>
    %1210 = arith.mulf %1205, %1209 : vector<2x32xf32>
    %1211 = vector.broadcast %1120 : vector<1x32xf32> to vector<2x32xf32>
    %1212 = arith.mulf %1210, %1211 : vector<2x32xf32>
    %1213 = vector.broadcast %1122 : vector<1x32xf32> to vector<2x32xf32>
    %1214 = arith.addf %1212, %1213 : vector<2x32xf32>
    %c3_580 = arith.constant 3 : index
    %c0_581 = arith.constant 0 : index
    %c0_582 = arith.constant 0 : index
    %1215 = vector.load %arg39[%c3_580, %c0_581, %c0_582] : memref<4x32x64xf32, #tpu.memory_space<vmem>>, vector<1x32x64xf32>
    %1216 = vector.shape_cast %1215 : vector<1x32x64xf32> to vector<32x64xf32>
    %c3_583 = arith.constant 3 : index
    %c0_584 = arith.constant 0 : index
    %c0_585 = arith.constant 0 : index
    %1217 = vector.load %arg40[%c3_583, %c0_584, %c0_585] : memref<4x1x64xf32, #tpu.memory_space<vmem>>, vector<1x1x64xf32>
    %1218 = vector.shape_cast %1217 : vector<1x1x64xf32> to vector<1x64xf32>
    %c3_586 = arith.constant 3 : index
    %c0_587 = arith.constant 0 : index
    %c0_588 = arith.constant 0 : index
    %1219 = vector.load %arg41[%c3_586, %c0_587, %c0_588] : memref<4x64x32xf32, #tpu.memory_space<vmem>>, vector<1x64x32xf32>
    %1220 = vector.shape_cast %1219 : vector<1x64x32xf32> to vector<64x32xf32>
    %c3_589 = arith.constant 3 : index
    %c0_590 = arith.constant 0 : index
    %c0_591 = arith.constant 0 : index
    %1221 = vector.load %arg42[%c3_589, %c0_590, %c0_591] : memref<4x1x32xf32, #tpu.memory_space<vmem>>, vector<1x1x32xf32>
    %1222 = vector.shape_cast %1221 : vector<1x1x32xf32> to vector<1x32xf32>
    %c3_592 = arith.constant 3 : index
    %c0_593 = arith.constant 0 : index
    %c0_594 = arith.constant 0 : index
    %1223 = vector.load %arg43[%c3_592, %c0_593, %c0_594] : memref<4x1x32xf32, #tpu.memory_space<vmem>>, vector<1x1x32xf32>
    %1224 = vector.shape_cast %1223 : vector<1x1x32xf32> to vector<1x32xf32>
    %c3_595 = arith.constant 3 : index
    %c0_596 = arith.constant 0 : index
    %c0_597 = arith.constant 0 : index
    %1225 = vector.load %arg44[%c3_595, %c0_596, %c0_597] : memref<4x1x32xf32, #tpu.memory_space<vmem>>, vector<1x1x32xf32>
    %1226 = vector.shape_cast %1225 : vector<1x1x32xf32> to vector<1x32xf32>
    %cst_598 = arith.constant dense<0.000000e+00> : vector<2x64xf32>
    %1227 = tpu.matmul %1214, %1216, %cst_598 {dimension_numbers = #tpu.dot_dimension_numbers<[1], [0], [0], [1], [0, 0, 1, 1], [], []>} : vector<2x32xf32>, vector<32x64xf32>, vector<2x64xf32> -> vector<2x64xf32>
    %1228 = vector.broadcast %1218 : vector<1x64xf32> to vector<2x64xf32>
    %1229 = arith.addf %1227, %1228 : vector<2x64xf32>
    %cst_599 = arith.constant 0.000000e+00 : f32
    %1230 = vector.broadcast %cst_599 : f32 to vector<2x64xf32>
    %1231 = arith.maximumf %1229, %1230 : vector<2x64xf32>
    %cst_600 = arith.constant dense<0.000000e+00> : vector<2x32xf32>
    %1232 = tpu.matmul %1231, %1220, %cst_600 {dimension_numbers = #tpu.dot_dimension_numbers<[1], [0], [0], [1], [0, 0, 1, 1], [], []>} : vector<2x64xf32>, vector<64x32xf32>, vector<2x32xf32> -> vector<2x32xf32>
    %1233 = vector.broadcast %1222 : vector<1x32xf32> to vector<2x32xf32>
    %1234 = arith.addf %1232, %1233 : vector<2x32xf32>
    %1235 = arith.addf %1234, %1214 : vector<2x32xf32>
    %cst_601 = arith.constant dense<0.000000e+00> : vector<2xf32>
    %1236 = vector.multi_reduction <add>, %1235, %cst_601 [1] : vector<2x32xf32> to vector<2xf32>
    %1237 = vector.shape_cast %1236 : vector<2xf32> to vector<2x1xf32>
    %cst_602 = arith.constant 3.200000e+01 : f32
    %1238 = vector.broadcast %cst_602 : f32 to vector<2x1xf32>
    %1239 = arith.divf %1237, %1238 : vector<2x1xf32>
    %1240 = vector.broadcast %1239 : vector<2x1xf32> to vector<2x32xf32>
    %1241 = arith.subf %1235, %1240 : vector<2x32xf32>
    %1242 = arith.mulf %1241, %1241 : vector<2x32xf32>
    %cst_603 = arith.constant dense<0.000000e+00> : vector<2xf32>
    %1243 = vector.multi_reduction <add>, %1242, %cst_603 [1] : vector<2x32xf32> to vector<2xf32>
    %1244 = vector.shape_cast %1243 : vector<2xf32> to vector<2x1xf32>
    %cst_604 = arith.constant 3.200000e+01 : f32
    %1245 = vector.broadcast %cst_604 : f32 to vector<2x1xf32>
    %1246 = arith.divf %1244, %1245 : vector<2x1xf32>
    %1247 = vector.broadcast %1239 : vector<2x1xf32> to vector<2x32xf32>
    %1248 = arith.subf %1235, %1247 : vector<2x32xf32>
    %cst_605 = arith.constant 9.99999997E-7 : f32
    %1249 = vector.broadcast %cst_605 : f32 to vector<2x1xf32>
    %1250 = arith.addf %1246, %1249 : vector<2x1xf32>
    %1251 = math.rsqrt %1250 : vector<2x1xf32>
    %1252 = vector.broadcast %1251 : vector<2x1xf32> to vector<2x32xf32>
    %1253 = arith.mulf %1248, %1252 : vector<2x32xf32>
    %1254 = vector.broadcast %1224 : vector<1x32xf32> to vector<2x32xf32>
    %1255 = arith.mulf %1253, %1254 : vector<2x32xf32>
    %1256 = vector.broadcast %1226 : vector<1x32xf32> to vector<2x32xf32>
    %1257 = arith.addf %1255, %1256 : vector<2x32xf32>
    %c1_606 = arith.constant 1 : index
    %c0_607 = arith.constant 0 : index
    %c0_608 = arith.constant 0 : index
    %1258 = vector.load %arg45[%c1_606, %c0_607, %c0_608] : memref<2x32x128xf32, #tpu.memory_space<vmem>>, vector<1x32x128xf32>
    %1259 = vector.shape_cast %1258 : vector<1x32x128xf32> to vector<32x128xf32>
    %cst_609 = arith.constant dense<0.000000e+00> : vector<2x128xf32>
    %1260 = tpu.matmul %1257, %1259, %cst_609 {dimension_numbers = #tpu.dot_dimension_numbers<[1], [0], [0], [1], [0, 0, 1, 1], [], []>} : vector<2x32xf32>, vector<32x128xf32>, vector<2x128xf32> -> vector<2x128xf32>
    %c1_610 = arith.constant 1 : index
    %c0_611 = arith.constant 0 : index
    %c0_612 = arith.constant 0 : index
    %1261 = vector.load %arg46[%c1_610, %c0_611, %c0_612] : memref<2x1x128xf32, #tpu.memory_space<vmem>>, vector<1x1x128xf32>
    %1262 = vector.shape_cast %1261 : vector<1x1x128xf32> to vector<1x128xf32>
    %1263 = vector.broadcast %1262 : vector<1x128xf32> to vector<2x128xf32>
    %1264 = arith.addf %1260, %1263 : vector<2x128xf32>
    %c0_613 = arith.constant 0 : index
    %c0_614 = arith.constant 0 : index
    %1265 = vector.load %arg48[%c0_613, %c0_614] : memref<2x128xf32, #tpu.memory_space<vmem>>, vector<2x128xf32>
    tpu.vector_store %arg48[%c0_613, %c0_614], %1264 {strides = array<i32>} : memref<2x128xf32, #tpu.memory_space<vmem>>, vector<2x128xf32>,
    return
  }
}

</mosaic_0001>

<bundles_post_ra>
// kernel: _lambda_.1
= control target key start
LH: loop header
LB: loop body
LE: loop exit
PB: predicated region body
PF: predicated region fallthrough
CT: control target
= control target key end

     0   :  { %s12112_s6 = smov 1   ;;  %s12113_s10 = smov 2   ;;  %s13861_s0 = inlined_call_operand.smem [shape: u32[49], index: -1, kind: input, shape index: {}] }
   0x1   :  { %s12220_s5 = sld [smem:[%s13861_s0]]   ;;  %s12114_s14 = smov 3  }
   0x2   :  { %s12225_s9 = sld [smem:[%s13861_s0 + %s12112_s6]]   ;;  %s12115_s18 = smov 4  }
   0x3   :  { %s12230_s13 = sld [smem:[%s13861_s0 + %s12113_s10]]   ;;  %s12116_s22 = smov 5  }
   0x4   :  { %s12235_s17 = sld [smem:[%s13861_s0 + %s12114_s14]]   ;;  %s12117_s26 = smov 6  }
   0x5   :  { %s12240_s21 = sld [smem:[%s13861_s0 + %s12115_s18]]   ;;  %s12118_s30 = smov 7  }
   0x6   :  { %s12245_s25 = sld [smem:[%s13861_s0 + %s12116_s22]]   ;;  %s12119_s4 = smov 8  }
   0x7   :  { %13877 = sst [smem:[#allocation70_spill]] %s12220_s5  ;;  %s12120_s10 = smov 9  }
   0x8   :  { %13878 = sst [smem:[#allocation71_spill]] %s12225_s9  ;;  %s12121_s15 = smov 10  }
   0x9   :  { %13879 = sst [smem:[#allocation72_spill]] %s12230_s13  ;;  %s12122_s20 = smov 11  }
   0xa   :  { %13880 = sst [smem:[#allocation73_spill]] %s12235_s17  ;;  %s12124_s1 = smov 13  }
   0xb   :  { %13881 = sst [smem:[#allocation74_spill]] %s12240_s21  ;;  %s12125_s7 = smov 14  }
   0xc   :  { %13882 = sst [smem:[#allocation75_spill]] %s12245_s25  ;;  %s12127_s22 = smov 16  }
   0xd   :  { %s12250_s29 = sld [smem:[%s13861_s0 + %s12117_s26]]   ;;  %s12123_s26 = smov 12  }
   0xe   :  { %s12255_s3 = sld [smem:[%s13861_s0 + %s12118_s30]]   ;;  %s12128_s28 = smov 17  }
   0xf   :  { %s12260_s8 = sld [smem:[%s13861_s0 + %s12119_s4]]  }
  0x10   :  { %s12265_s14 = sld [smem:[%s13861_s0 + %s12120_s10]]  }
  0x11   :  { %s12270_s19 = sld [smem:[%s13861_s0 + %s12121_s15]]   ;;  %s12126_s15 = smov 15  }
  0x12   :  { %s12275_s24 = sld [smem:[%s13861_s0 + %s12122_s20]]  }
  0x13   :  { %13883 = sst [smem:[#allocation76_spill]] %s12250_s29 }
  0x14   :  { %13884 = sst [smem:[#allocation77_spill]] %s12255_s3 }
  0x15   :  { %s12280_s30 = sld [smem:[%s13861_s0 + %s12123_s26]]  }
  0x16   :  { %13885 = sst [smem:[#allocation78_spill]] %s12265_s14 }
  0x17   :  { %13886 = sst [smem:[#allocation79_spill]] %s12270_s19 }
  0x18   :  { %s12285_s6 = sld [smem:[%s13861_s0 + %s12124_s1]]  }
  0x19   :  { %s12290_s12 = sld [smem:[%s13861_s0 + %s12125_s7]]   ;;  %s12129_s7 = smov 18  }
  0x1a   :  { %s12295_s20 = sld [smem:[%s13861_s0 + %s12126_s15]]   ;;  %s12130_s15 = smov 19  }
  0x1b   :  { %13887 = sst [smem:[#allocation80_spill]] %s12280_s30 }
  0x1c   :  { %s12300_s27 = sld [smem:[%s13861_s0 + %s12127_s22]]   ;;  %s12131_s22 = smov 20  }
  0x1d   :  { %s12305_s4 = sld [smem:[%s13861_s0 + %s12128_s28]]   ;;  %s12132_s28 = smov 21  }
  0x1e   :  { %s12310_s21 = sld [smem:[%s13861_s0 + %s12129_s7]]   ;;  %s12133_s7 = smov 22  }
  0x1f   :  { %13888 = sst [smem:[#allocation81_spill]] %s12290_s12 }
  0x20   :  { %s12315_s17 = sld [smem:[%s13861_s0 + %s12130_s15]]   ;;  %s12134_s15 = smov 23  }
  0x21   :  { %s12320_s9 = sld [smem:[%s13861_s0 + %s12131_s22]]   ;;  %s12135_s22 = smov 24  }
  0x22   :  { %13889 = sst [smem:[#allocation82_spill]] %s12300_s27 }
  0x23   :  { %13890 = sst [smem:[#allocation83_spill]] %s12305_s4 }
  0x24   :  { %s12325_s4 = sld [smem:[%s13861_s0 + %s12132_s28]]   ;;  %s12136_s28 = smov 25  }
  0x25   :  { %s12330_s13 = sld [smem:[%s13861_s0 + %s12133_s7]]   ;;  %s12137_s7 = smov 26  }
  0x26   :  { %13891 = sst [smem:[#allocation84_spill]] %s12315_s17 }
  0x27   :  { %s12335_s19 = sld [smem:[%s13861_s0 + %s12134_s15]]   ;;  %s12138_s15 = smov 27  }
  0x28   :  { %s12340_s29 = sld [smem:[%s13861_s0 + %s12135_s22]]   ;;  %s12139_s22 = smov 28  }
  0x29   :  { %s12350_s25 = sld [smem:[%s13861_s0 + %s12137_s7]]   ;;  %s12141_s7 = smov 30  }
  0x2a   :  { %13892 = sst [smem:[#allocation85_spill]] %s12325_s4 }
  0x2b   :  { %13893 = sst [smem:[#allocation86_spill]] %s12330_s13 }
  0x2c   :  { %s12345_s4 = sld [smem:[%s13861_s0 + %s12136_s28]]   ;;  %s12140_s28 = smov 29  }
  0x2d   :  { %s12355_s5 = sld [smem:[%s13861_s0 + %s12138_s15]]   ;;  %s12142_s15 = smov 31  }
  0x2e   :  { %13894 = sst [smem:[#allocation87_spill]] %s12340_s29 }
  0x2f   :  { %s12360_s29 = sld [smem:[%s13861_s0 + %s12139_s22]]   ;;  %s12143_s22 = smov 32  }
  0x30   :  { %s12370_s13 = sld [smem:[%s13861_s0 + %s12141_s7]]   ;;  %s12145_s7 = smov 34  }
  0x32   :  { %13895 = sst [smem:[#allocation88_spill]] %s12345_s4 }
  0x33   :  { %13896 = sst [smem:[#allocation89_spill]] %s12355_s5 }
  0x34   :  { %s12365_s4 = sld [smem:[%s13861_s0 + %s12140_s28]]   ;;  %s12144_s28 = smov 33  }
  0x35   :  { %13897 = sst [smem:[#allocation90_spill]] %s12360_s29 }
  0x36   :  { %13898 = sst [smem:[#allocation91_spill]] %s12370_s13 }
  0x37   :  { %s12375_s5 = sld [smem:[%s13861_s0 + %s12142_s15]]   ;;  %s12146_s15 = smov 35  }
  0x38   :  { %s12380_s29 = sld [smem:[%s13861_s0 + %s12143_s22]]   ;;  %s12147_s22 = smov 36  }
  0x39   :  { %s12385_s17 = sld [smem:[%s13861_s0 + %s12144_s28]]   ;;  %s12148_s28 = smov 37  }
  0x3a   :  { %s12390_s13 = sld [smem:[%s13861_s0 + %s12145_s7]]   ;;  %s12149_s7 = smov 38  }
  0x3b   :  { %s12400_s27 = sld [smem:[%s13861_s0 + %s12147_s22]]   ;;  %s12151_s22 = smov 40  }
  0x3c   :  { %s12420_s12 = sld [smem:[%s13861_s0 + %s12151_s22]]   ;;  %s12155_s22 = smov 44  }
  0x3d   :  { %13899 = sst [smem:[#allocation92_spill]] %s12375_s5 }
  0x3e   :  { %s12395_s5 = sld [smem:[%s13861_s0 + %s12146_s15]]   ;;  %s12150_s15 = smov 39  }
  0x3f   :  { %13900 = sst [smem:[#allocation93_spill]] %s12385_s17 }
  0x40   :  { %13901 = sst [smem:[#allocation94_spill]] %s12390_s13 }
  0x41   :  { %s12405_s17 = sld [smem:[%s13861_s0 + %s12148_s28]]   ;;  %s12152_s28 = smov 41  }
  0x42   :  { %s12410_s13 = sld [smem:[%s13861_s0 + %s12149_s7]]   ;;  %s12153_s7 = smov 42  }
  0x43   :  { %13905 = sst [smem:[#allocation98_spill]] %s12420_s12 }
  0x44   :  { %13902 = sst [smem:[#allocation95_spill]] %s12395_s5 }
  0x45   :  { %s12415_s5 = sld [smem:[%s13861_s0 + %s12150_s15]]   ;;  %s12154_s15 = smov 43  }
  0x46   :  { %s12430_s30 = sld [smem:[%s13861_s0 + %s12153_s7]]   ;;  %s12157_s7 = smov 46  }
  0x47   :  { %13903 = sst [smem:[#allocation96_spill]] %s12405_s17 }
  0x48   :  { %s12425_s17 = sld [smem:[%s13861_s0 + %s12152_s28]]   ;;  %s12156_s28 = smov 45  }
  0x49   :  { %s12440_s12 = sld [smem:[%s13861_s0 + %s12155_s22]]   ;;  %s12159_s22 = smov 48  }
  0x4a   :  { %s12450_s14 = sld [smem:[%s13861_s0 + %s12157_s7]]  }
  0x4b   :  { %13904 = sst [smem:[#allocation97_spill]] %s12415_s5 }
  0x4c   :  { %s12435_s5 = sld [smem:[%s13861_s0 + %s12154_s15]]   ;;  %s12158_s15 = smov 47  }
  0x4d   :  { %s12460_s3 = sld [smem:[%s13861_s0 + %s12159_s22]]  }
  0x4e   :  { %13906 = sst [smem:[#allocation99_spill]] %s12425_s17 }
  0x4f   :  { %s12445_s17 = sld [smem:[%s13861_s0 + %s12156_s28]]  }
  0x52   :  { %13907 = sst [smem:[#allocation100_spill]] %s12435_s5 }
  0x53   :  { %s12455_s5 = sld [smem:[%s13861_s0 + %s12158_s15]]  }
  0x54   :  { %103 = vsyncpa [#allocation3], 0 }
  0x55   :  { %104 = vsyncpa [#allocation6], 0 }
  0x56   :  { %105 = vsyncpa [#allocation9], 0 }
  0x57   :  { %106 = vsyncpa [#allocation12], 0 }
  0x58   :  { %107 = vsyncpa [#allocation15], 0 }
  0x59   :  { %108 = vsyncpa [#allocation18], 0 }
  0x5a   :  { %109 = vsyncpa [#allocation21], 0 }
  0x5b   :  { %110 = vsyncpa [#allocation24], 0 }
  0x5c   :  { %111 = vsyncpa [#allocation27], 0 }
  0x5d   :  { %112 = vsyncpa [#allocation30], 0 }
  0x5e   :  { %113 = vsyncpa [#allocation33], 0 }
  0x5f   :  { %114 = vsyncpa [#allocation36], 0 }
  0x60   :  { %115 = vsyncpa [#allocation39], 0 }
  0x61   :  { %116 = vsyncpa [#allocation42], 0 }
  0x62   :  { %117 = vsyncpa [#allocation45], 0 }
  0x63   :  { %118 = vsyncpa [#allocation48], 0 }
  0x64   :  { %119 = vsyncpa [#allocation4], 0 }
  0x65   :  { %120 = vsyncpa [#allocation51], 0  ;;  %s12160_s0 = smov [#allocation5]  }
  0x66   :  { %s151_s28 = sshll.u32 %s12160_s0, 4  ;;  %s152_s28 = int_to_ptr.vmem [resolvable:$true] %s151_s28 }
  0x67   :  { %s11444_s1 = scalar_lea.vmem %s152_s28, 16  ;;  %s11448_s2 = scalar_lea.vmem %s152_s28, 32 }
  0x68   :  { %p11445_p0 = scmp.ne.s32.totalorder %s152_s28, %s11444_s1  ;;  %p11449_p1 = scmp.lt.s32.totalorder %s152_s28, %s152_s28 }
  0x69   :  { %p11450_p2 = scmp.lt.s32.totalorder %s11448_s2, %s11444_s1 }
  0x6b   :  { %p11451_p3 = por %p11450_p2, %p11449_p1 }
  0x6d   :  { %p11452_p4 = pnand %p11451_p3, %p11445_p0 }
  0x6f   :  { %11455 = shalt.err (!%p11452_p4)
}
  0x70   :  { %154 = dma.hbm_to_vmem [thread:$0]  %s12260_s8, 16, %s152_s28, [#allocation6]  }
  0x71   :  { %s12161_s7 = smov [#allocation8]  }
  0x72   :  { %s174_s10 = sshll.u32 %s12161_s7, 4  ;;  %s175_s10 = int_to_ptr.vmem [resolvable:$true] %s174_s10 }
  0x73   :  { %s11464_s11 = scalar_lea.vmem %s175_s10, 1024  ;;  %p11469_p6 = scmp.lt.s32.totalorder %s175_s10, %s175_s10 }
  0x74   :  { %p11465_p5 = scmp.ne.s32.totalorder %s175_s10, %s11464_s11  ;;  %p11470_p7 = scmp.lt.s32.totalorder %s11464_s11, %s11464_s11 }
  0x76   :  { %p11471_p8 = por %p11470_p7, %p11469_p6 }
  0x78   :  { %p11472_p9 = pnand %p11471_p8, %p11465_p5 }
  0x7a   :  { %11475 = shalt.err (!%p11472_p9)
}
  0x7b   :  { %s12162_s15 = smov 128   ;;  %s12163_s16 = smov 8  }
  0x7c   :  { %180 = dma.hbm_to_vmem [thread:$0]  %s12275_s24, 1024, %s175_s10, [#allocation9], %s12162_s15, %s12162_s15, %s12163_s16  }
  0x7d   :  { %s12164_s18 = smov [#allocation11]   ;;  %s12165_s8 = smov [#allocation14]  }
  0x7e   :  { %s198_s22 = sshll.u32 %s12164_s18, 4  ;;  %s222_s23 = sshll.u32 %s12165_s8, 4  ;;  %s199_s22 = int_to_ptr.vmem [resolvable:$true] %s198_s22  ;;  %s223_s23 = int_to_ptr.vmem [resolvable:$true] %s222_s23 }
  0x7f   :  { %s11484_s26 = scalar_lea.vmem %s199_s22, 32  ;;  %p11489_p11 = scmp.lt.s32.totalorder %s199_s22, %s199_s22 }
  0x80   :  { %p11485_p10 = scmp.ne.s32.totalorder %s199_s22, %s11484_s26  ;;  %p11490_p12 = scmp.lt.s32.totalorder %s11484_s26, %s11484_s26 }
  0x82   :  { %p11491_p13 = por %p11490_p12, %p11489_p11 }
  0x84   :  { %p11492_p0 = pnand %p11491_p13, %p11485_p10 }
  0x86   :  { %11495 = shalt.err (!%p11492_p0)
}
  0x87   :  { %s12166_s0 = smov 16   ;;  %s12167_s28 = smov 1  }
  0x88   :  { %204 = dma.hbm_to_vmem [thread:$0]  %s12285_s6, 32, %s199_s22, [#allocation12], %s12166_s0, %s12166_s0, %s12167_s28  }
  0x89   :  { %s11504_s24 = scalar_lea.vmem %s223_s23, 1024  ;;  %p11509_p2 = scmp.lt.s32.totalorder %s223_s23, %s223_s23 }
  0x8a   :  { %p11505_p1 = scmp.ne.s32.totalorder %s223_s23, %s11504_s24  ;;  %p11510_p3 = scmp.lt.s32.totalorder %s11504_s24, %s11504_s24 }
  0x8c   :  { %p11511_p4 = por %p11510_p3, %p11509_p2 }
  0x8e   :  { %p11512_p5 = pnand %p11511_p4, %p11505_p1 }
  0x90   :  { %11515 = shalt.err (!%p11512_p5)
}
  0x91   :  { %228 = dma.hbm_to_vmem [thread:$0]  %s12295_s20, 1024, %s223_s23, [#allocation15], %s12162_s15, %s12162_s15, %s12163_s16  }
  0x92   :  { %s12168_s1 = smov [#allocation17]   ;;  %s12169_s7 = smov [#allocation20]  }
  0x93   :  { %s248_s2 = sshll.u32 %s12168_s1, 4  ;;  %s272_s10 = sshll.u32 %s12169_s7, 4  ;;  %s249_s2 = int_to_ptr.vmem [resolvable:$true] %s248_s2  ;;  %s273_s10 = int_to_ptr.vmem [resolvable:$true] %s272_s10 }
  0x94   :  { %s11524_s11 = scalar_lea.vmem %s249_s2, 32  ;;  %p11529_p7 = scmp.lt.s32.totalorder %s249_s2, %s249_s2 }
  0x95   :  { %p11525_p6 = scmp.ne.s32.totalorder %s249_s2, %s11524_s11  ;;  %p11530_p8 = scmp.lt.s32.totalorder %s11524_s11, %s11524_s11 }
  0x97   :  { %p11531_p9 = por %p11530_p8, %p11529_p7 }
  0x99   :  { %p11532_p10 = pnand %p11531_p9, %p11525_p6 }
  0x9b   :  { %11535 = shalt.err (!%p11532_p10)
}
  0x9c   :  { %254 = dma.hbm_to_vmem [thread:$0]  %s12310_s21, 32, %s249_s2, [#allocation18], %s12166_s0, %s12166_s0, %s12167_s28  }
  0x9d   :  { %s11544_s6 = scalar_lea.vmem %s273_s10, 32  ;;  %p11549_p12 = scmp.lt.s32.totalorder %s273_s10, %s273_s10 }
  0x9e   :  { %p11545_p11 = scmp.ne.s32.totalorder %s273_s10, %s11544_s6  ;;  %p11550_p13 = scmp.lt.s32.totalorder %s11544_s6, %s11544_s6 }
  0xa0   :  { %p11551_p0 = por %p11550_p13, %p11549_p12 }
  0xa2   :  { %p11552_p1 = pnand %p11551_p0, %p11545_p11 }
  0xa4   :  { %11555 = shalt.err (!%p11552_p1)
}
  0xa5   :  { %278 = dma.hbm_to_vmem [thread:$0]  %s12320_s9, 32, %s273_s10, [#allocation21], %s12166_s0, %s12166_s0, %s12167_s28  }
  0xa6   :  { %s12170_s20 = smov [#allocation23]   ;;  %s12171_s22 = smov [#allocation26]  }
  0xa7   :  { %s298_s18 = sshll.u32 %s12170_s20, 4  ;;  %s324_s8 = sshll.u32 %s12171_s22, 4  ;;  %s299_s18 = int_to_ptr.vmem [resolvable:$true] %s298_s18  ;;  %s325_s8 = int_to_ptr.vmem [resolvable:$true] %s324_s8 }
  0xa8   :  { %s11564_s23 = scalar_lea.vmem %s299_s18, 32  ;;  %p11569_p3 = scmp.lt.s32.totalorder %s299_s18, %s299_s18 }
  0xa9   :  { %p11565_p2 = scmp.ne.s32.totalorder %s299_s18, %s11564_s23  ;;  %p11570_p4 = scmp.lt.s32.totalorder %s11564_s23, %s11564_s23 }
  0xab   :  { %p11571_p5 = por %p11570_p4, %p11569_p3 }
  0xad   :  { %p11572_p6 = pnand %p11571_p5, %p11565_p2 }
  0xaf   :  { %11575 = shalt.err (!%p11572_p6)
}
  0xb0   :  { %304 = dma.hbm_to_vmem [thread:$0]  %s12335_s19, 32, %s299_s18, [#allocation24], %s12166_s0, %s12166_s0, %s12167_s28  }
  0xb1   :  { %s11584_s21 = scalar_lea.vmem %s325_s8, 64  ;;  %p11589_p8 = scmp.lt.s32.totalorder %s325_s8, %s325_s8 }
  0xb2   :  { %p11585_p7 = scmp.ne.s32.totalorder %s325_s8, %s11584_s21  ;;  %p11590_p9 = scmp.lt.s32.totalorder %s11584_s21, %s11584_s21 }
  0xb4   :  { %p11591_p10 = por %p11590_p9, %p11589_p8 }
  0xb6   :  { %p11592_p11 = pnand %p11591_p10, %p11585_p7 }
  0xb8   :  { %11595 = shalt.err (!%p11592_p11)
}
  0xb9   :  { %330 = dma.hbm_to_vmem [thread:$0]  %s12350_s25, 64, %s325_s8, [#allocation27], %s12166_s0, %s12166_s0, %s12167_s28  }
  0xba   :  { %s12172_s9 = smov [#allocation29]   ;;  %s12173_s24 = smov [#allocation32]  }
  0xbb   :  { %s350_s26 = sshll.u32 %s12172_s9, 4  ;;  %s376_s1 = sshll.u32 %s12173_s24, 4  ;;  %s351_s26 = int_to_ptr.vmem [resolvable:$true] %s350_s26  ;;  %s377_s1 = int_to_ptr.vmem [resolvable:$true] %s376_s1 }
  0xbc   :  { %s11604_s2 = scalar_lea.vmem %s351_s26, 64  ;;  %p11609_p13 = scmp.lt.s32.totalorder %s351_s26, %s351_s26 }
  0xbd   :  { %p11605_p12 = scmp.ne.s32.totalorder %s351_s26, %s11604_s2  ;;  %p11610_p0 = scmp.lt.s32.totalorder %s11604_s2, %s11604_s2 }
  0xbf   :  { %p11611_p1 = por %p11610_p0, %p11609_p13 }
  0xc1   :  { %p11612_p2 = pnand %p11611_p1, %p11605_p12 }
  0xc3   :  { %11615 = shalt.err (!%p11612_p2)
}
  0xc4   :  { %356 = dma.hbm_to_vmem [thread:$0]  %s12365_s4, 64, %s351_s26, [#allocation30], %s12166_s0, %s12166_s0, %s12167_s28  }
  0xc5   :  { %s11624_s19 = scalar_lea.vmem %s377_s1, 64  ;;  %p11629_p4 = scmp.lt.s32.totalorder %s377_s1, %s377_s1 }
  0xc6   :  { %p11625_p3 = scmp.ne.s32.totalorder %s377_s1, %s11624_s19  ;;  %p11630_p5 = scmp.lt.s32.totalorder %s11624_s19, %s11624_s19 }
  0xc8   :  { %p11631_p6 = por %p11630_p5, %p11629_p4 }
  0xca   :  { %p11632_p7 = pnand %p11631_p6, %p11625_p3 }
  0xcc   :  { %11635 = shalt.err (!%p11632_p7)
}
  0xcd   :  { %382 = dma.hbm_to_vmem [thread:$0]  %s12380_s29, 64, %s377_s1, [#allocation33], %s12166_s0, %s12166_s0, %s12167_s28  }
  0xce   :  { %s12174_s25 = smov [#allocation35]   ;;  %s12175_s10 = smov [#allocation38]  }
  0xcf   :  { %s404_s7 = sshll.u32 %s12174_s25, 4  ;;  %s428_s11 = sshll.u32 %s12175_s10, 4  ;;  %s405_s7 = int_to_ptr.vmem [resolvable:$true] %s404_s7  ;;  %s429_s11 = int_to_ptr.vmem [resolvable:$true] %s428_s11 }
  0xd0   :  { %s11644_s6 = scalar_lea.vmem %s405_s7, 64  ;;  %p11649_p9 = scmp.lt.s32.totalorder %s405_s7, %s405_s7 }
  0xd1   :  { %p11645_p8 = scmp.ne.s32.totalorder %s405_s7, %s11644_s6  ;;  %p11650_p10 = scmp.lt.s32.totalorder %s11644_s6, %s11644_s6 }
  0xd3   :  { %p11651_p11 = por %p11650_p10, %p11649_p9 }
  0xd5   :  { %p11652_p12 = pnand %p11651_p11, %p11645_p8 }
  0xd7   :  { %11655 = shalt.err (!%p11652_p12)
}
  0xd8   :  { %410 = dma.hbm_to_vmem [thread:$0]  %s12400_s27, 64, %s405_s7, [#allocation36], %s12166_s0, %s12166_s0, %s12167_s28  }
  0xd9   :  { %s11664_s4 = scalar_lea.vmem %s429_s11, 64  ;;  %p11669_p0 = scmp.lt.s32.totalorder %s429_s11, %s429_s11 }
  0xda   :  { %p11665_p13 = scmp.ne.s32.totalorder %s429_s11, %s11664_s4  ;;  %p11670_p1 = scmp.lt.s32.totalorder %s11664_s4, %s11664_s4 }
  0xdc   :  { %p11671_p2 = por %p11670_p1, %p11669_p0 }
  0xde   :  { %p11672_p3 = pnand %p11671_p2, %p11665_p13 }
  0xe0   :  { %11675 = shalt.err (!%p11672_p3)
}
  0xe1   :  { %434 = dma.hbm_to_vmem [thread:$0]  %s12410_s13, 64, %s429_s11, [#allocation39], %s12166_s0, %s12166_s0, %s12167_s28  }
  0xe2   :  { %s12176_s29 = smov [#allocation41]   ;;  %s12177_s18 = smov [#allocation44]  }
  0xe3   :  { %s456_s20 = sshll.u32 %s12176_s29, 4  ;;  %s480_s22 = sshll.u32 %s12177_s18, 4  ;;  %s457_s20 = int_to_ptr.vmem [resolvable:$true] %s456_s20  ;;  %s481_s22 = int_to_ptr.vmem [resolvable:$true] %s480_s22 }
  0xe4   :  { %s11684_s8 = scalar_lea.vmem %s457_s20, 64  ;;  %p11689_p5 = scmp.lt.s32.totalorder %s457_s20, %s457_s20 }
  0xe5   :  { %p11685_p4 = scmp.ne.s32.totalorder %s457_s20, %s11684_s8  ;;  %p11690_p6 = scmp.lt.s32.totalorder %s11684_s8, %s11684_s8 }
  0xe7   :  { %p11691_p7 = por %p11690_p6, %p11689_p5 }
  0xe9   :  { %p11692_p8 = pnand %p11691_p7, %p11685_p4 }
  0xeb   :  { %11695 = shalt.err (!%p11692_p8)
}
  0xec   :  { %462 = dma.hbm_to_vmem [thread:$0]  %s12430_s30, 64, %s457_s20, [#allocation42], %s12166_s0, %s12166_s0, %s12167_s28  }
  0xed   :  { %s11704_s27 = scalar_lea.vmem %s481_s22, 64  ;;  %p11709_p10 = scmp.lt.s32.totalorder %s481_s22, %s481_s22 }
  0xee   :  { %p11705_p9 = scmp.ne.s32.totalorder %s481_s22, %s11704_s27  ;;  %p11710_p11 = scmp.lt.s32.totalorder %s11704_s27, %s11704_s27 }
  0xf0   :  { %p11711_p12 = por %p11710_p11, %p11709_p10 }
  0xf2   :  { %p11712_p13 = pnand %p11711_p12, %p11705_p9 }
  0xf4   :  { %11715 = shalt.err (!%p11712_p13)
}
  0xf5   :  { %486 = dma.hbm_to_vmem [thread:$0]  %s12440_s12, 64, %s481_s22, [#allocation45], %s12166_s0, %s12166_s0, %s12167_s28  }
  0xf6   :  { %s12178_s13 = smov [#allocation2]   ;;  %s12179_s21 = smov [#allocation7]  }
  0xf7   :  { %s141_s23 = sshll.u32 %s12178_s13, 4  ;;  %s160_s9 = sshll.u32 %s12179_s21, 4  ;;  %s142_s23 = int_to_ptr.vmem [resolvable:$true] %s141_s23  ;;  %s161_s9 = int_to_ptr.vmem [resolvable:$true] %s160_s9 }
  0xf8   :  { %s11724_s26 = scalar_lea.vmem %s142_s23, 16  ;;  %s11728_s30 = scalar_lea.vmem %s142_s23, 32 }
  0xf9   :  { %p11725_p0 = scmp.ne.s32.totalorder %s142_s23, %s11724_s26  ;;  %p11729_p1 = scmp.lt.s32.totalorder %s142_s23, %s142_s23 }
  0xfa   :  { %p11730_p2 = scmp.lt.s32.totalorder %s11728_s30, %s11724_s26 }
  0xfc   :  { %p11731_p3 = por %p11730_p2, %p11729_p1 }
  0xfe   :  { %p11732_p4 = pnand %p11731_p3, %p11725_p0 }
 0x100   :  { %11735 = shalt.err (!%p11732_p4)
}
 0x101   :  { %s13908_s24 = sld [smem:[#allocation77_spill]]  ;;  %s11744_s1 = scalar_lea.vmem %s161_s9, 1024 }
 0x102   :  { %p11745_p5 = scmp.ne.s32.totalorder %s161_s9, %s11744_s1  ;;  %p11749_p6 = scmp.lt.s32.totalorder %s161_s9, %s161_s9 }
 0x103   :  { %p11750_p7 = scmp.lt.s32.totalorder %s11744_s1, %s11744_s1 }
 0x105   :  { %p11751_p8 = por %p11750_p7, %p11749_p6 }
 0x107   :  { %144 = dma.hbm_to_vmem [thread:$0]  %s13908_s24, 16, %s142_s23, [#allocation3]  }
 0x108   :  { %p11752_p9 = pnand %p11751_p8, %p11745_p5 }
 0x10a   :  { %11755 = shalt.err (!%p11752_p9)
}
 0x10b   :  { %s13909_s12 = sld [smem:[#allocation78_spill]]  ;;  %s12180_s2 = smov [#allocation10]  }
 0x10c   :  { %s186_s19 = sshll.u32 %s12180_s2, 4  ;;  %s12181_s25 = smov [#allocation13]   ;;  %s187_s19 = int_to_ptr.vmem [resolvable:$true] %s186_s19 }
 0x10d   :  { %s210_s7 = sshll.u32 %s12181_s25, 4  ;;  %s11764_s10 = scalar_lea.vmem %s187_s19, 32  ;;  %s211_s7 = int_to_ptr.vmem [resolvable:$true] %s210_s7 }
 0x10e   :  { %p11765_p10 = scmp.ne.s32.totalorder %s187_s19, %s11764_s10  ;;  %p11769_p11 = scmp.lt.s32.totalorder %s187_s19, %s187_s19 }
 0x10f   :  { %p11770_p12 = scmp.lt.s32.totalorder %s11764_s10, %s11764_s10 }
 0x111   :  { %166 = dma.hbm_to_vmem [thread:$0]  %s13909_s12, 1024, %s161_s9, [#allocation6], %s12162_s15, %s12162_s15, %s12163_s16  }
 0x112   :  { %p11771_p13 = por %p11770_p12, %p11769_p11 }
 0x114   :  { %p11772_p0 = pnand %p11771_p13, %p11765_p10 }
 0x116   :  { %11775 = shalt.err (!%p11772_p0)
}
 0x117   :  { %s13910_s11 = sld [smem:[#allocation80_spill]]  ;;  %s11784_s6 = scalar_lea.vmem %s211_s7, 32 }
 0x118   :  { %p11785_p1 = scmp.ne.s32.totalorder %s211_s7, %s11784_s6  ;;  %p11789_p2 = scmp.lt.s32.totalorder %s211_s7, %s211_s7 }
 0x119   :  { %p11790_p3 = scmp.lt.s32.totalorder %s11784_s6, %s11784_s6 }
 0x11b   :  { %p11791_p4 = por %p11790_p3, %p11789_p2 }
 0x11d   :  { %192 = dma.hbm_to_vmem [thread:$0]  %s13910_s11, 32, %s187_s19, [#allocation9], %s12166_s0, %s12166_s0, %s12167_s28  }
 0x11e   :  { %p11792_p5 = pnand %p11791_p4, %p11785_p1 }
 0x120   :  { %11795 = shalt.err (!%p11792_p5)
}
 0x121   :  { %s13911_s4 = sld [smem:[#allocation81_spill]]  ;;  %s12182_s29 = smov [#allocation16]  }
 0x122   :  { %s234_s20 = sshll.u32 %s12182_s29, 4  ;;  %s12183_s18 = smov [#allocation19]   ;;  %s235_s20 = int_to_ptr.vmem [resolvable:$true] %s234_s20 }
 0x123   :  { %s260_s22 = sshll.u32 %s12183_s18, 4  ;;  %s11804_s8 = scalar_lea.vmem %s235_s20, 32  ;;  %s261_s22 = int_to_ptr.vmem [resolvable:$true] %s260_s22 }
 0x124   :  { %p11805_p6 = scmp.ne.s32.totalorder %s235_s20, %s11804_s8  ;;  %p11809_p7 = scmp.lt.s32.totalorder %s235_s20, %s235_s20 }
 0x125   :  { %p11810_p8 = scmp.lt.s32.totalorder %s11804_s8, %s11804_s8 }
 0x127   :  { %216 = dma.hbm_to_vmem [thread:$0]  %s13911_s4, 32, %s211_s7, [#allocation12], %s12166_s0, %s12166_s0, %s12167_s28  }
 0x128   :  { %p11811_p9 = por %p11810_p8, %p11809_p7 }
 0x12a   :  { %p11812_p10 = pnand %p11811_p9, %p11805_p6 }
 0x12c   :  { %11815 = shalt.err (!%p11812_p10)
}
 0x12d   :  { %s13912_s27 = sld [smem:[#allocation82_spill]]  ;;  %s11824_s13 = scalar_lea.vmem %s261_s22, 32 }
 0x12e   :  { %p11825_p11 = scmp.ne.s32.totalorder %s261_s22, %s11824_s13  ;;  %p11829_p12 = scmp.lt.s32.totalorder %s261_s22, %s261_s22 }
 0x12f   :  { %p11830_p13 = scmp.lt.s32.totalorder %s11824_s13, %s11824_s13 }
 0x131   :  { %p11831_p0 = por %p11830_p13, %p11829_p12 }
 0x133   :  { %240 = dma.hbm_to_vmem [thread:$0]  %s13912_s27, 32, %s235_s20, [#allocation15], %s12166_s0, %s12166_s0, %s12167_s28  }
 0x134   :  { %p11832_p1 = pnand %p11831_p0, %p11825_p11 }
 0x136   :  { %11835 = shalt.err (!%p11832_p1)
}
 0x137   :  { %s13913_s23 = sld [smem:[#allocation84_spill]]  ;;  %s12184_s21 = smov [#allocation22]  }
 0x138   :  { %s286_s9 = sshll.u32 %s12184_s21, 4  ;;  %s12185_s26 = smov [#allocation25]   ;;  %s287_s9 = int_to_ptr.vmem [resolvable:$true] %s286_s9 }
 0x139   :  { %s310_s30 = sshll.u32 %s12185_s26, 4  ;;  %s11844_s24 = scalar_lea.vmem %s287_s9, 32  ;;  %s311_s30 = int_to_ptr.vmem [resolvable:$true] %s310_s30 }
 0x13a   :  { %p11845_p2 = scmp.ne.s32.totalorder %s287_s9, %s11844_s24  ;;  %p11849_p3 = scmp.lt.s32.totalorder %s287_s9, %s287_s9 }
 0x13b   :  { %p11850_p4 = scmp.lt.s32.totalorder %s11844_s24, %s11844_s24 }
 0x13d   :  { %266 = dma.hbm_to_vmem [thread:$0]  %s13913_s23, 32, %s261_s22, [#allocation18], %s12166_s0, %s12166_s0, %s12167_s28  }
 0x13e   :  { %p11851_p5 = por %p11850_p4, %p11849_p3 }
 0x140   :  { %p11852_p6 = pnand %p11851_p5, %p11845_p2 }
 0x142   :  { %11855 = shalt.err (!%p11852_p6)
}
 0x143   :  { %s13914_s1 = sld [smem:[#allocation86_spill]]  ;;  %s11864_s12 = scalar_lea.vmem %s311_s30, 32 }
 0x144   :  { %p11865_p7 = scmp.ne.s32.totalorder %s311_s30, %s11864_s12  ;;  %p11869_p8 = scmp.lt.s32.totalorder %s311_s30, %s311_s30 }
 0x145   :  { %p11870_p9 = scmp.lt.s32.totalorder %s11864_s12, %s11864_s12 }
 0x147   :  { %p11871_p10 = por %p11870_p9, %p11869_p8 }
 0x149   :  { %292 = dma.hbm_to_vmem [thread:$0]  %s13914_s1, 32, %s287_s9, [#allocation21], %s12166_s0, %s12166_s0, %s12167_s28  }
 0x14a   :  { %p11872_p11 = pnand %p11871_p10, %p11865_p7 }
 0x14c   :  { %11875 = shalt.err (!%p11872_p11)
}
 0x14d   :  { %s13915_s2 = sld [smem:[#allocation87_spill]]  ;;  %s12186_s19 = smov [#allocation28]  }
 0x14e   :  { %s338_s25 = sshll.u32 %s12186_s19, 4  ;;  %s12187_s7 = smov [#allocation31]   ;;  %s339_s25 = int_to_ptr.vmem [resolvable:$true] %s338_s25 }
 0x14f   :  { %s362_s10 = sshll.u32 %s12187_s7, 4  ;;  %s11884_s11 = scalar_lea.vmem %s339_s25, 64  ;;  %s363_s10 = int_to_ptr.vmem [resolvable:$true] %s362_s10 }
 0x150   :  { %p11885_p12 = scmp.ne.s32.totalorder %s339_s25, %s11884_s11  ;;  %p11889_p13 = scmp.lt.s32.totalorder %s339_s25, %s339_s25 }
 0x151   :  { %p11890_p0 = scmp.lt.s32.totalorder %s11884_s11, %s11884_s11 }
 0x153   :  { %316 = dma.hbm_to_vmem [thread:$0]  %s13915_s2, 32, %s311_s30, [#allocation24], %s12166_s0, %s12166_s0, %s12167_s28  }
 0x154   :  { %p11891_p1 = por %p11890_p0, %p11889_p13 }
 0x156   :  { %p11892_p2 = pnand %p11891_p1, %p11885_p12 }
 0x158   :  { %11895 = shalt.err (!%p11892_p2)
}
 0x159   :  { %s13916_s6 = sld [smem:[#allocation90_spill]]  ;;  %s11904_s4 = scalar_lea.vmem %s363_s10, 64 }
 0x15a   :  { %p11905_p3 = scmp.ne.s32.totalorder %s363_s10, %s11904_s4  ;;  %p11909_p4 = scmp.lt.s32.totalorder %s363_s10, %s363_s10 }
 0x15b   :  { %p11910_p5 = scmp.lt.s32.totalorder %s11904_s4, %s11904_s4 }
 0x15d   :  { %p11911_p6 = por %p11910_p5, %p11909_p4 }
 0x15f   :  { %344 = dma.hbm_to_vmem [thread:$0]  %s13916_s6, 64, %s339_s25, [#allocation27], %s12166_s0, %s12166_s0, %s12167_s28  }
 0x160   :  { %p11912_p7 = pnand %p11911_p6, %p11905_p3 }
 0x162   :  { %11915 = shalt.err (!%p11912_p7)
}
 0x163   :  { %s13917_s29 = sld [smem:[#allocation91_spill]]  ;;  %s12188_s20 = smov [#allocation34]  }
 0x164   :  { %s390_s18 = sshll.u32 %s12188_s20, 4  ;;  %s12189_s22 = smov [#allocation37]   ;;  %s391_s18 = int_to_ptr.vmem [resolvable:$true] %s390_s18 }
 0x165   :  { %s416_s8 = sshll.u32 %s12189_s22, 4  ;;  %s11924_s27 = scalar_lea.vmem %s391_s18, 64  ;;  %s417_s8 = int_to_ptr.vmem [resolvable:$true] %s416_s8 }
 0x166   :  { %p11925_p8 = scmp.ne.s32.totalorder %s391_s18, %s11924_s27  ;;  %p11929_p9 = scmp.lt.s32.totalorder %s391_s18, %s391_s18 }
 0x167   :  { %p11930_p10 = scmp.lt.s32.totalorder %s11924_s27, %s11924_s27 }
 0x169   :  { %368 = dma.hbm_to_vmem [thread:$0]  %s13917_s29, 64, %s363_s10, [#allocation30], %s12166_s0, %s12166_s0, %s12167_s28  }
 0x16a   :  { %p11931_p11 = por %p11930_p10, %p11929_p9 }
 0x16c   :  { %p11932_p12 = pnand %p11931_p11, %p11925_p8 }
 0x16e   :  { %11935 = shalt.err (!%p11932_p12)
}
 0x16f   :  { %s13918_s13 = sld [smem:[#allocation94_spill]]  ;;  %s11944_s23 = scalar_lea.vmem %s417_s8, 64 }
 0x170   :  { %p11945_p13 = scmp.ne.s32.totalorder %s417_s8, %s11944_s23  ;;  %p11949_p0 = scmp.lt.s32.totalorder %s417_s8, %s417_s8 }
 0x171   :  { %p11950_p1 = scmp.lt.s32.totalorder %s11944_s23, %s11944_s23 }
 0x173   :  { %p11951_p2 = por %p11950_p1, %p11949_p0 }
 0x175   :  { %396 = dma.hbm_to_vmem [thread:$0]  %s13918_s13, 64, %s391_s18, [#allocation33], %s12166_s0, %s12166_s0, %s12167_s28  }
 0x176   :  { %p11952_p3 = pnand %p11951_p2, %p11945_p13 }
 0x178   :  { %11955 = shalt.err (!%p11952_p3)
}
 0x179   :  { %s13919_s21 = sld [smem:[#allocation96_spill]]  ;;  %s12190_s9 = smov [#allocation40]  }
 0x17a   :  { %s442_s26 = sshll.u32 %s12190_s9, 4  ;;  %s12191_s30 = smov [#allocation43]   ;;  %s443_s26 = int_to_ptr.vmem [resolvable:$true] %s442_s26 }
 0x17b   :  { %s468_s24 = sshll.u32 %s12191_s30, 4  ;;  %s11964_s1 = scalar_lea.vmem %s443_s26, 64  ;;  %s469_s24 = int_to_ptr.vmem [resolvable:$true] %s468_s24 }
 0x17c   :  { %p11965_p4 = scmp.ne.s32.totalorder %s443_s26, %s11964_s1  ;;  %p11969_p5 = scmp.lt.s32.totalorder %s443_s26, %s443_s26 }
 0x17d   :  { %p11970_p6 = scmp.lt.s32.totalorder %s11964_s1, %s11964_s1 }
 0x17f   :  { %422 = dma.hbm_to_vmem [thread:$0]  %s13919_s21, 64, %s417_s8, [#allocation36], %s12166_s0, %s12166_s0, %s12167_s28  }
 0x180   :  { %p11971_p7 = por %p11970_p6, %p11969_p5 }
 0x182   :  { %p11972_p8 = pnand %p11971_p7, %p11965_p4 }
 0x184   :  { %11975 = shalt.err (!%p11972_p8)
}
 0x185   :  { %s13920_s12 = sld [smem:[#allocation98_spill]]  ;;  %s11984_s2 = scalar_lea.vmem %s469_s24, 64 }
 0x186   :  { %p11985_p9 = scmp.ne.s32.totalorder %s469_s24, %s11984_s2  ;;  %p11989_p10 = scmp.lt.s32.totalorder %s469_s24, %s469_s24 }
 0x187   :  { %p11990_p11 = scmp.lt.s32.totalorder %s11984_s2, %s11984_s2 }
 0x189   :  { %p11991_p12 = por %p11990_p11, %p11989_p10 }
 0x18b   :  { %448 = dma.hbm_to_vmem [thread:$0]  %s13920_s12, 64, %s443_s26, [#allocation39], %s12166_s0, %s12166_s0, %s12167_s28  }
 0x18c   :  { %p11992_p13 = pnand %p11991_p12, %p11985_p9 }
 0x18e   :  { %11995 = shalt.err (!%p11992_p13)
}
 0x18f   :  { %s13921_s19 = sld [smem:[#allocation100_spill]]  ;;  %s12192_s25 = smov [#allocation46]  }
 0x190   :  { %s492_s7 = sshll.u32 %s12192_s25, 4  ;;  %s12193_s10 = smov [#allocation47]   ;;  %s493_s7 = int_to_ptr.vmem [resolvable:$true] %s492_s7 }
 0x191   :  { %s504_s11 = sshll.u32 %s12193_s10, 4  ;;  %s12004_s6 = scalar_lea.vmem %s493_s7, 1024  ;;  %s505_s11 = int_to_ptr.vmem [resolvable:$true] %s504_s11 }
 0x192   :  { %p12005_p0 = scmp.ne.s32.totalorder %s493_s7, %s12004_s6  ;;  %p12009_p1 = scmp.lt.s32.totalorder %s493_s7, %s493_s7 }
 0x193   :  { %p12010_p2 = scmp.lt.s32.totalorder %s12004_s6, %s12004_s6 }
 0x195   :  { %474 = dma.hbm_to_vmem [thread:$0]  %s13921_s19, 64, %s469_s24, [#allocation42], %s12166_s0, %s12166_s0, %s12167_s28  }
 0x196   :  { %p12011_p3 = por %p12010_p2, %p12009_p1 }
 0x198   :  { %p12012_p4 = pnand %p12011_p3, %p12005_p0 }
 0x19a   :  { %12015 = shalt.err (!%p12012_p4)
}
 0x19b   :  { %498 = dma.hbm_to_vmem [thread:$0]  %s12445_s17, 1024, %s493_s7, [#allocation45], %s12162_s15, %s12162_s15, %s12163_s16  }
 0x19c   :  { %s12024_s4 = scalar_lea.vmem %s505_s11, 32  ;;  %p12029_p6 = scmp.lt.s32.totalorder %s505_s11, %s505_s11 }
 0x19d   :  { %p12025_p5 = scmp.ne.s32.totalorder %s505_s11, %s12024_s4  ;;  %p12030_p7 = scmp.lt.s32.totalorder %s12024_s4, %s12024_s4 }
 0x19f   :  { %p12031_p8 = por %p12030_p7, %p12029_p6 }
 0x1a1   :  { %p12032_p9 = pnand %p12031_p8, %p12025_p5 }
 0x1a3   :  { %12035 = shalt.err (!%p12032_p9)
}
 0x1a4   :  { %510 = dma.hbm_to_vmem [thread:$0]  %s12450_s14, 32, %s505_s11, [#allocation48], %s12166_s0, %s12166_s0, %s12167_s28  }
 0x1a5   :  { %12076 = dma.done.wait [#allocation3], 16  }
 0x1a6   :  { %12077 = vsyncadd [#allocation3], 4294967280 }
 0x1a7   :  { %12078 = dma.done.wait [#allocation6], 1040  }
 0x1a8   :  { %12079 = vsyncadd [#allocation6], 4294966256 }
 0x1a9   :  { %12080 = dma.done.wait [#allocation9], 1056  }
 0x1aa   :  { %12081 = vsyncadd [#allocation9], 4294966240 }
 0x1ab   :  { %12082 = dma.done.wait [#allocation12], 64  }
 0x1ac   :  { %12083 = vsyncadd [#allocation12], 4294967232 }
 0x1ad   :  { %12084 = dma.done.wait [#allocation15], 1056  }
 0x1ae   :  { %12085 = vsyncadd [#allocation15], 4294966240 }
 0x1af   :  { %12086 = dma.done.wait [#allocation18], 64  }
 0x1b0   :  { %12087 = vsyncadd [#allocation18], 4294967232 }
 0x1b1   :  { %12088 = dma.done.wait [#allocation21], 64  }
 0x1b2   :  { %12089 = vsyncadd [#allocation21], 4294967232 }
 0x1b3   :  { %12090 = dma.done.wait [#allocation24], 64  }
 0x1b4   :  { %12091 = vsyncadd [#allocation24], 4294967232 }
 0x1b5   :  { %12092 = dma.done.wait [#allocation27], 128  }
 0x1b6   :  { %12093 = vsyncadd [#allocation27], 4294967168 }
 0x1b7   :  { %12094 = dma.done.wait [#allocation30], 128  }
 0x1b8   :  { %12095 = vsyncadd [#allocation30], 4294967168 }
 0x1b9   :  { %12096 = dma.done.wait [#allocation33], 128  }
 0x1ba   :  { %12097 = vsyncadd [#allocation33], 4294967168 }
 0x1bb   :  { %12098 = dma.done.wait [#allocation36], 128  }
 0x1bc   :  { %12099 = vsyncadd [#allocation36], 4294967168 }
 0x1bd   :  { %12100 = dma.done.wait [#allocation39], 128  }
 0x1be   :  { %12101 = vsyncadd [#allocation39], 4294967168 }
 0x1bf   :  { %12102 = dma.done.wait [#allocation42], 128  }
 0x1c0   :  { %12103 = vsyncadd [#allocation42], 4294967168 }
 0x1c1   :  { %12104 = dma.done.wait [#allocation45], 1088  }
 0x1c2   :  { %12105 = vsyncadd [#allocation45], 4294966208 }
 0x1c3   :  { %12106 = dma.done.wait [#allocation48], 32  }
 0x1c4   :  { %12107 = vsyncadd [#allocation48], 4294967264  ;;  %s13922_s17 = sld [smem:[#allocation70_spill]]  ;;  %v12194_v0 = vmov 0   ;;  %v619_v11 = vlaneseq  ;;  %vm659_vm0 = vcmask 523264   ;;  %v12195_v14 = vmov 0.0  }
 0x1c5   :  { %s13923_s14 = sld [smem:[#allocation75_spill]]  ;;  %11257 = vset.pattern.permute.xlu0 %v12194_v0  ;;  %11258 = vset.pattern.permute.xlu1 %v12194_v0  ;;  %vm743_vm3 = vcmask 261120   ;;  %v790_v36 = vld [vmem:[#allocation7 + $0x18] sm:$0xff]  ;;  %v789_v37 = vld [vmem:[#allocation7 + $0x10] sm:$0xff]  ;;  %v788_v38 = vld [vmem:[#allocation7 + $0x8] sm:$0xff]  ;;  %s12196_s20 = smov 96  }
 0x1c6   :  { %s13924_s15 = sld [smem:[#allocation76_spill]]  ;;  %v12589_v12 = vand.u32 127, %v619_v11  ;;  %10317 = vmatprep.subr.mxu1 %v790_v36  ;;  %v787_v39 = vld [vmem:[#allocation7] sm:$0xff]  ;;  %v9527_v47 = vld [vmem:[#allocation2] ss:$0 sm:$0xff]  ;;  %vm894_vm4 = vcmask 64512  }
 0x1c7   :  { %10318 = vmatpush3.msra.mxu1 %v790_v36  ;;  %s13925_s28 = sld [smem:[#allocation79_spill]]  ;;  %v9528_v49 = vld [vmem:[#allocation5] ss:$0 sm:$0xff]  ;;  %vm980_vm11 = vcmask 130048   ;;  %s12198_s8 = smov 88   ;;  %vm1718_vm12 = vcmask 195584  }
 0x1c8   :  { %10319 = vmatprep.subr.mxu1 %v789_v37  ;;  %s13926_s29 = sld [smem:[#allocation72_spill]]  ;;  %s12199_s27 = smov 64   ;;  %vm12209_vm13 = vmmov 0   ;;  %vm3398_vm14 = vcmp.eq.s32.totalorder %v12589_v12, 2  ;;  %vm3491_vm15 = vcmask 254976  }
 0x1c9   :  { %10320 = vmatpush3.msra.mxu1 %v789_v37  ;;  %s13927_s18 = sld [smem:[#allocation71_spill]]  ;;  %s12200_s13 = smov 120  }
 0x1ca   :  { %v635_v1 = vld [vmem:[%s13922_s17] sm:$0xff]  ;;  %v636_v4 = vld [vmem:[%s13922_s17 + $0x8] sm:$0xff]  ;;  %10321 = vmatprep.subr.mxu1 %v788_v38  ;;  %s13928_s22 = sld [smem:[#allocation73_spill]]  ;;  %s12201_s23 = smov 56  }
 0x1cb   :  { %638 = vperm.xlu0 %11257, %v635_v1   ;;  %v656_v2 = vld [vmem:[%s13923_s14 + $0x38] sm:$0xff]  ;;  %v655_v3 = vld [vmem:[%s13923_s14 + $0x30] sm:$0xff]  ;;  %v654_v5 = vld [vmem:[%s13923_s14 + $0x28] sm:$0xff]  ;;  %10322 = vmatpush3.msra.mxu1 %v788_v38  ;;  %s12202_s21 = smov 80   ;;  %s12203_s9 = smov 112  }
 0x1cc   :  { %10298 = vmatprep.subr.mxu0 %v656_v2  ;;  %v653_v6 = vld [vmem:[%s13923_s14 + $0x20] sm:$0xff]  ;;  %v652_v7 = vld [vmem:[%s13923_s14 + $0x18] sm:$0xff]  ;;  %v651_v8 = vld [vmem:[%s13923_s14 + $0x10] sm:$0xff]  ;;  %10323 = vmatprep.subr.mxu1 %v787_v39  ;;  %s12204_s26 = smov 48   ;;  %s12205_s30 = smov 72  }
 0x1cd   :  { %10299 = vmatpush3.msra.mxu0 %v656_v2  ;;  %v650_v9 = vld [vmem:[%s13923_s14 + $0x8] sm:$0xff]  ;;  %v649_v10 = vld [vmem:[%s13923_s14] sm:$0xff]  ;;  %10324 = vmatpush3.msra.mxu1 %v787_v39  ;;  %s12206_s24 = smov 104   ;;  %s12207_s1 = smov 40  }
 0x1ce   :  { %10300 = vmatprep.subr.mxu0 %v655_v3  ;;  %v657_v19 = vld [vmem:[%s13924_s15] sm:$0xff]  ;;  %v658_v20 = vld [vmem:[%s13924_s15 + $0x8] sm:$0xff]  ;;  %s12208_s12 = smov 24   ;;  %s13929_s2 = sld [smem:[#allocation83_spill]] }
 0x1cf   :  { %641 = vperm.xlu0 %11257, %v636_v4   ;;  %10301 = vmatpush3.msra.mxu0 %v655_v3  ;;  %v9529_v56 = vld [vmem:[%s13925_s28] ss:$0 sm:$0xff]  ;;  %v604_v63 = vld [vmem:[%s13926_s29 + $0x8] sm:$0xff]  ;;  %s13930_s19 = sld [smem:[#allocation85_spill]] }
 0x1d0   :  { %10302 = vmatprep.subr.mxu0 %v654_v5  ;;  %v603_v62 = vld [vmem:[%s13926_s29] sm:$0xff]  ;;  %s13931_s25 = sld [smem:[#allocation88_spill]] }
 0x1d1   :  { %10303 = vmatpush3.msra.mxu0 %v654_v5  ;;  %v601_v4 = vld [vmem:[%s13927_s18] sm:$0x1]  ;;  %v12638_v5 = vshrl.u32 %v619_v11, 7  ;;  %v12197_v11 = vmov -1e+09   ;;  %s13932_s7 = sld [smem:[#allocation89_spill]] }
 0x1d2   :  { %10304 = vmatprep.subr.mxu0 %v653_v6  ;;  %vm602_vm5 = vcmp.ne.s32.totalorder %v601_v4, 0  ;;  %s13933_s10 = sld [smem:[#allocation93_spill]] }
 0x1d3   :  { %10305 = vmatpush3.msra.mxu0 %v653_v6  ;;  %s13934_s11 = sld [smem:[#allocation92_spill]] }
 0x1d4   :  { %10306 = vmatprep.subr.mxu0 %v652_v7  ;;  %s13935_s6 = sld [smem:[#allocation95_spill]] }
 0x1d5   :  { %10307 = vmatpush3.msra.mxu0 %v652_v7  ;;  %v621_v7 = vsub.s32 0, %v12638_v5  ;;  %s13936_s4 = sld [smem:[#allocation97_spill]] }
 0x1d6   :  { %10308 = vmatprep.subr.mxu0 %v651_v8  ;;  %s13937_s17 = sld [smem:[#allocation99_spill]] }
 0x1d7   :  { %10309 = vmatpush3.msra.mxu0 %v651_v8  ;;  %v618_v8 = vsel %vm602_vm5, 1, %v12194_v0  ;;  %vm3980_vm5 = vcmask 123904   ;;  %s13938_s14 = sld [smem:[#allocation74_spill]] }
 0x1d8   :  { %10310 = vmatprep.subr.mxu0 %v650_v9 }
 0x1d9   :  { %10311 = vmatpush3.msra.mxu0 %v650_v9  ;;  %v12642_v9 = vrot.slane %v618_v8, %v621_v7 }
 0x1da   :  { %10312 = vmatprep.subr.mxu0 %v649_v10 }
 0x1db   :  { %10313 = vmatpush3.msra.mxu0 %v649_v10  ;;  %v9522_v10 = vld [vmem:[%s13928_s22] ss:$0 sm:$0xff]  ;;  %vm623_vm6 = vcmp.eq.s32.totalorder %v12642_v9, 1 }
 0x246   :  { %v639_v13 = vpop.permute.xlu0 %638 }
 0x247   :  { %vm643_vm1 = vcmp.eq.s32.totalorder %v12589_v12, %v639_v13 }
 0x248   :  { %v9523_v15 = vsel %vm643_vm1, 1.0, %v12195_v14 }
 0x249   :  { %10314 = vmatprep.mubr.msk.f32.mxu0 %vm659_vm0, %v9523_v15 }
 0x24a   :  { %v642_v16 = vpop.permute.xlu0 %641 }
 0x24b   :  { %vm644_vm2 = vcmp.eq.s32.totalorder %v12589_v12, %v642_v16 }
 0x24c   :  { %v9524_v17 = vsel %vm644_vm2, 1.0, %v12195_v14 }
 0x24d   :  { %10315 = vmatmul.mubr.msk.f32.vlgmr.msra.gmra.mxu0 %vm659_vm0, %v9524_v17 }
 0x30d   :  { %v10316_v18 = vpop.f32.mrf.mxu0 }
 0x30e   :  { %v738_v23 = vadd.f32 %v10316_v18, %v658_v20 }
 0x30f   :  { %v732_v21 = vpop.f32.mrf.mxu0 }
 0x310   :  { %v733_v22 = vadd.f32 %v732_v21, %v657_v19  ;;  %v747_v25 = vsel %vm743_vm3, %v738_v23, 0.0 }
 0x312   :  { %v744_v24 = vsel %vm743_vm3, %v733_v22, 0.0 }
 0x313   :  { %745 = vadd.xlane.f32.xlu1 %v744_v24 }
 0x317   :  { %748 = vadd.xlane.f32.xlu1 %v747_v25 }
 0x39c   :  { %v746_v26 = vpop.xlane.xlu1 %745 }
 0x39d   :  { %v751_v27 = vmul.f32 0.03125, %v746_v26 }
 0x39f   :  { %v753_v28 = vsub.f32 %v733_v22, %v751_v27 }
 0x3a0   :  { %v749_v29 = vpop.xlane.xlu1 %748 }
 0x3a1   :  { %v752_v30 = vmul.f32 0.03125, %v749_v29  ;;  %v755_v31 = vmul.f32 %v753_v28, %v753_v28 }
 0x3a3   :  { %v754_v32 = vsub.f32 %v738_v23, %v752_v30  ;;  %v757_v33 = vsel %vm743_vm3, %v755_v31, 0.0 }
 0x3a4   :  { %758 = vadd.xlane.f32.xlu0 %v757_v33 }
 0x3a5   :  { %v756_v34 = vmul.f32 %v754_v32, %v754_v32 }
 0x3a7   :  { %v760_v35 = vsel %vm743_vm3, %v756_v34, 0.0 }
 0x3a8   :  { %761 = vadd.xlane.f32.xlu1 %v760_v35 }
 0x42d   :  { %v759_v40 = vpop.xlane.xlu0 %758 }
 0x42e   :  { %v763_v41 = vmul.f32 0.03125, %v759_v40 }
 0x430   :  { %v765_v42 = vadd.f32 1e-06, %v763_v41 }
 0x431   :  { %v762_v43 = vpop.xlane.xlu1 %761 }
 0x432   :  { %11259 = vrsqrt.f32 %v765_v42  ;;  %v764_v44 = vmul.f32 0.03125, %v762_v43 }
 0x434   :  { %v766_v45 = vadd.f32 1e-06, %v764_v44 }
 0x436   :  { %11261 = vrsqrt.f32 %v766_v45 }
 0x43f   :  { %v11260_v46 = vpop.eup %11259 }
 0x440   :  { %v769_v48 = vmul.f32 %v11260_v46, %v753_v28 }
 0x442   :  { %v777_v50 = vmul.f32 %v9527_v47, %v769_v48 }
 0x443   :  { %v11262_v51 = vpop.eup %11261 }
 0x444   :  { %v770_v52 = vmul.f32 %v11262_v51, %v754_v32  ;;  %v12603_v53 = vadd.f32 %v9528_v49, %v777_v50 }
 0x446   :  { %v778_v54 = vmul.f32 %v9527_v47, %v770_v52  ;;  %10325 = vmatprep.mubr.msk.f32.mxu1 %vm743_vm3, %v12603_v53 }
 0x448   :  { %v12607_v55 = vadd.f32 %v9528_v49, %v778_v54 }
 0x44a   :  { %10326 = vmatmul.mubr.msk.f32.vlgmr.msra.gmra.mxu1 %vm743_vm3, %v12607_v55 }
 0x50a   :  { %v10327_v57 = vpop.f32.mrf.mxu1 }
 0x50b   :  { %v12612_v58 = vadd.f32 %v10327_v57, %v9529_v56 }
 0x50c   :  { %v870_v59 = vpop.f32.mrf.mxu1 }
 0x50d   :  { %v12614_v60 = vadd.f32 %v9529_v56, %v870_v59  ;;  %892 = vrot.lane.b32.xlu1 %v12612_v58, %s12196_s20  ;;  %v12632_v3 = vmul.f32 0.35355338, %v12612_v58 }
 0x50f   :  { %v12619_v61 = vmul.f32 0.35355338, %v12614_v60 }
 0x511   :  { %890 = vrot.lane.b32.xlu1 %v12614_v60, %s12196_s20  ;;  %10332 = vmatprep.mubr.msk.f32.mxu1 %vm894_vm4, %v12619_v61 }
 0x515   :  { %607 = vperm.xlu1 %11258, %v603_v62  }
 0x519   :  { %610 = vperm.xlu1 %11258, %v604_v63  }
 0x57f   :  { %v893_v1 = vpop.permute.xlu1 %892 }
 0x580   :  { %10328 = vmatprep.subr.msk.mxu1 %vm894_vm4, %v893_v1 }
 0x581   :  { %10329 = vmatpush3.xpose.msk.msra.mxu1 %vm894_vm4, %v893_v1 }
 0x583   :  { %v891_v2 = vpop.permute.xlu1 %890 }
 0x584   :  { %10330 = vmatprep.subr.msk.mxu1 %vm894_vm4, %v891_v2 }
 0x585   :  { %10331 = vmatpush3.xpose.msk.msra.mxu1 %vm894_vm4, %v891_v2 }
 0x588   :  { %10333 = vmatmul.mubr.msk.f32.vlgmr.msra.gmra.mxu1 %vm894_vm4, %v12632_v3 }
 0x590   :  { %v608_v6 = vpop.permute.xlu1 %607 }
 0x591   :  { %vm616_vm8 = vcmp.eq.s32.totalorder %v608_v6, %v9522_v10 }
 0x592   :  { %vm624_vm10 = vmand %vm616_vm8, %vm623_vm6 }
 0x593   :  { %v12655_v17 = vsel %vm624_vm10, 0.0, %v12197_v11 }
 0x594   :  { %v611_v13 = vpop.permute.xlu1 %610 }
 0x595   :  { %vm617_vm7 = vcmp.eq.s32.totalorder %v611_v13, %v9522_v10 }
 0x596   :  { %vm625_vm9 = vmand %vm617_vm7, %vm623_vm6 }
 0x597   :  { %v12651_v15 = vsel %vm625_vm9, 0.0, %v12197_v11 }
 0x648   :  { %v10334_v16 = vpop.f32.mrf.mxu1 }
 0x649   :  { %v977_v0 = vadd.f32 %v10334_v16, %v12651_v15 }
 0x64a   :  { %v971_v18 = vpop.f32.mrf.mxu1 }
 0x64b   :  { %v972_v19 = vadd.f32 %v971_v18, %v12655_v17  ;;  %v984_v20 = vsel %vm980_vm11, %v977_v0, -inf }
 0x64c   :  { %985 = vmax.xlane.f32.xlu1 %v984_v20 }
 0x64d   :  { %v981_v21 = vsel %vm980_vm11, %v972_v19, -inf }
 0x64e   :  { %982 = vmax.xlane.f32.xlu0 %v981_v21 }
 0x65d   :  { %1094 = vrot.lane.b32.xlu1 %v12614_v60, %s12198_s8 }
 0x664   :  { %1005 = vrot.lane.b32.xlu0 %v12612_v58, %s12199_s27 }
 0x668   :  { %1003 = vrot.lane.b32.xlu0 %v12614_v60, %s12199_s27 }
 0x6d5   :  { %v986_v22 = vpop.xlane.xlu1 %985 }
 0x6d6   :  { %v988_v23 = vsub.f32 %v977_v0, %v986_v22 }
 0x6d7   :  { %v983_v24 = vpop.xlane.xlu0 %982 }
 0x6d8   :  { %v991_v25 = vmul.f32 1.442695, %v988_v23  ;;  %v987_v26 = vsub.f32 %v972_v19, %v983_v24 }
 0x6d9   :  { %v1095_v42 = vpop.permute.xlu1 %1094 }
 0x6da   :  { %11263 = vpow2.f32 %v991_v25  ;;  %v989_v27 = vmul.f32 1.442695, %v987_v26 }
 0x6db   :  { %v1006_v28 = vpop.permute.xlu0 %1005 }
 0x6dc   :  { %11265 = vpow2.f32 %v989_v27  ;;  %10335 = vmatprep.subr.mxu1 %v1006_v28 }
 0x6dd   :  { %10336 = vmatpush3.msra.mxu1 %v1006_v28 }
 0x6df   :  { %v1004_v29 = vpop.permute.xlu0 %1003 }
 0x6e0   :  { %10337 = vmatprep.subr.mxu1 %v1004_v29 }
 0x6e1   :  { %10338 = vmatpush3.msra.mxu1 %v1004_v29 }
 0x6e7   :  { %v11264_v30 = vpop.eup %11263 }
 0x6e8   :  { %v996_v31 = vsel %vm980_vm11, %v11264_v30, 0.0 }
 0x6e9   :  { %v11266_v32 = vpop.eup %11265  ;;  %997 = vadd.xlane.f32.xlu0 %v996_v31 }
 0x6ea   :  { %v993_v33 = vsel %vm980_vm11, %v11266_v32, 0.0 }
 0x6ed   :  { %994 = vadd.xlane.f32.xlu0 %v993_v33 }
 0x703   :  { %1096 = vrot.lane.b32.xlu0 %v12612_v58, %s12198_s8 }
 0x707   :  { %1090 = vrot.lane.b32.xlu0 %v12619_v61, %s12200_s13 }
 0x70b   :  { %1092 = vrot.lane.b32.xlu0 %v12632_v3, %s12200_s13 }
 0x772   :  { %v998_v34 = vpop.xlane.xlu0 %997 }
 0x773   :  { %11267 = vrcp.f32 %v998_v34 }
 0x776   :  { %v995_v35 = vpop.xlane.xlu0 %994 }
 0x777   :  { %11269 = vrcp.f32 %v995_v35 }
 0x77a   :  { %v1097_v36 = vpop.permute.xlu0 %1096 }
 0x77b   :  { %10342 = vmatprep.subr.msk.mxu1 %vm894_vm4, %v1097_v36 }
 0x77e   :  { %v1091_v41 = vpop.permute.xlu0 %1090 }
 0x780   :  { %v11268_v37 = vpop.eup %11267 }
 0x781   :  { %v1002_v40 = vmul.f32 %v11268_v37, %v11264_v30 }
 0x782   :  { %v1093_v43 = vpop.permute.xlu0 %1092 }
 0x784   :  { %v11270_v38 = vpop.eup %11269 }
 0x785   :  { %v1001_v39 = vmul.f32 %v11270_v38, %v11266_v32 }
 0x787   :  { %10339 = vmatprep.mubr.msk.f32.mxu1 %vm980_vm11, %v1001_v39 }
 0x788   :  { %10340 = vmatmul.mubr.msk.f32.vlgmr.msra.gmra.mxu1 %vm980_vm11, %v1002_v40 }
 0x789   :  { %10343 = vmatpush3.xpose.msk.msra.mxu1 %vm894_vm4, %v1097_v36  ;;  %10346 = vmatprep.mubr.msk.f32.mxu1 %vm894_vm4, %v1091_v41 }
 0x78a   :  { %10344 = vmatprep.subr.msk.mxu1 %vm894_vm4, %v1095_v42 }
 0x78d   :  { %10345 = vmatpush3.xpose.msk.msra.mxu1 %vm894_vm4, %v1095_v42 }
 0x790   :  { %10347 = vmatmul.mubr.msk.f32.vlgmr.msra.gmra.mxu1 %vm894_vm4, %v1093_v43 }
 0x848   :  { %v12682_v44 = vpop.f32.mrf.mxu1 }
 0x84a   :  { %v12684_v45 = vpop.f32.mrf.mxu1 }
 0x850   :  { %v10348_v46 = vpop.f32.mrf.mxu1 }
 0x851   :  { %v1178_v47 = vadd.f32 %v10348_v46, %v12651_v15 }
 0x852   :  { %v1172_v48 = vpop.f32.mrf.mxu1 }
 0x853   :  { %v1173_v49 = vadd.f32 %v1172_v48, %v12655_v17  ;;  %v1184_v50 = vsel %vm980_vm11, %v1178_v47, -inf }
 0x854   :  { %1185 = vmax.xlane.f32.xlu1 %v1184_v50 }
 0x855   :  { %v1181_v51 = vsel %vm980_vm11, %v1173_v49, -inf }
 0x856   :  { %1182 = vmax.xlane.f32.xlu0 %v1181_v51 }
 0x865   :  { %1203 = vrot.lane.b32.xlu1 %v12614_v60, %s12201_s23 }
 0x869   :  { %1296 = vrot.lane.b32.xlu1 %v12612_v58, %s12202_s21 }
 0x86d   :  { %1290 = vrot.lane.b32.xlu1 %v12619_v61, %s12203_s9 }
 0x8dd   :  { %v1186_v52 = vpop.xlane.xlu1 %1185 }
 0x8de   :  { %v1188_v54 = vsub.f32 %v1178_v47, %v1186_v52 }
 0x8df   :  { %v1183_v56 = vpop.xlane.xlu0 %1182 }
 0x8e0   :  { %v1191_v57 = vmul.f32 1.442695, %v1188_v54  ;;  %v1187_v59 = vsub.f32 %v1173_v49, %v1183_v56 }
 0x8e1   :  { %v1204_v8 = vpop.permute.xlu1 %1203 }
 0x8e2   :  { %11271 = vpow2.f32 %v1191_v57  ;;  %v1189_v62 = vmul.f32 1.442695, %v1187_v59 }
 0x8e4   :  { %11273 = vpow2.f32 %v1189_v62 }
 0x8e5   :  { %v1297_v13 = vpop.permute.xlu1 %1296 }
 0x8e9   :  { %v1291_v20 = vpop.permute.xlu1 %1290 }
 0x8ef   :  { %v11272_v63 = vpop.eup %11271 }
 0x8f0   :  { %v1196_v1 = vsel %vm980_vm11, %v11272_v63, 0.0 }
 0x8f1   :  { %v11274_v2 = vpop.eup %11273  ;;  %1197 = vadd.xlane.f32.xlu0 %v1196_v1 }
 0x8f2   :  { %v1193_v4 = vsel %vm980_vm11, %v11274_v2, 0.0 }
 0x8f5   :  { %1194 = vadd.xlane.f32.xlu0 %v1193_v4 }
 0x90b   :  { %1205 = vrot.lane.b32.xlu0 %v12612_v58, %s12201_s23 }
 0x90f   :  { %1294 = vrot.lane.b32.xlu0 %v12614_v60, %s12202_s21 }
 0x913   :  { %1292 = vrot.lane.b32.xlu0 %v12632_v3, %s12203_s9 }
 0x97a   :  { %v1198_v6 = vpop.xlane.xlu0 %1197 }
 0x97b   :  { %11275 = vrcp.f32 %v1198_v6 }
 0x97e   :  { %v1195_v7 = vpop.xlane.xlu0 %1194 }
 0x97f   :  { %11277 = vrcp.f32 %v1195_v7 }
 0x982   :  { %v1206_v10 = vpop.permute.xlu0 %1205 }
 0x983   :  { %10349 = vmatprep.subr.mxu0 %v1206_v10 }
 0x984   :  { %10350 = vmatpush3.msra.mxu0 %v1206_v10 }
 0x985   :  { %10351 = vmatprep.subr.mxu0 %v1204_v8 }
 0x986   :  { %10352 = vmatpush3.msra.mxu0 %v1204_v8  ;;  %v1295_v21 = vpop.permute.xlu0 %1294 }
 0x987   :  { %10356 = vmatprep.subr.msk.mxu0 %vm894_vm4, %v1297_v13 }
 0x988   :  { %v11276_v16 = vpop.eup %11275 }
 0x989   :  { %v1202_v19 = vmul.f32 %v11276_v16, %v11272_v63 }
 0x98a   :  { %v1293_v22 = vpop.permute.xlu0 %1292 }
 0x98c   :  { %v11278_v0 = vpop.eup %11277 }
 0x98d   :  { %v1201_v18 = vmul.f32 %v11278_v0, %v11274_v2 }
 0x98f   :  { %10353 = vmatprep.mubr.msk.f32.mxu0 %vm980_vm11, %v1201_v18 }
 0x990   :  { %10354 = vmatmul.mubr.msk.f32.vlgmr.msra.gmra.mxu0 %vm980_vm11, %v1202_v19 }
 0x991   :  { %10357 = vmatpush3.xpose.msk.msra.mxu0 %vm894_vm4, %v1297_v13  ;;  %10360 = vmatprep.mubr.msk.f32.mxu0 %vm894_vm4, %v1291_v20 }
 0x992   :  { %10358 = vmatprep.subr.msk.mxu0 %vm894_vm4, %v1295_v21 }
 0x995   :  { %10359 = vmatpush3.xpose.msk.msra.mxu0 %vm894_vm4, %v1295_v21 }
 0x998   :  { %10361 = vmatmul.mubr.msk.f32.vlgmr.msra.gmra.mxu0 %vm894_vm4, %v1293_v22 }
 0xa50   :  { %v12712_v23 = vpop.f32.mrf.mxu0 }
 0xa52   :  { %v12714_v24 = vpop.f32.mrf.mxu0 }
 0xa58   :  { %v10362_v25 = vpop.f32.mrf.mxu0 }
 0xa59   :  { %v1378_v26 = vadd.f32 %v10362_v25, %v12651_v15 }
 0xa5a   :  { %v1372_v27 = vpop.f32.mrf.mxu0 }
 0xa5b   :  { %v1373_v28 = vadd.f32 %v1372_v27, %v12655_v17  ;;  %v1384_v29 = vsel %vm980_vm11, %v1378_v26, -inf  ;;  %v883_v27 = vld [vmem:[#allocation8 + $0x10] sm:$0xff] }
 0xa5c   :  { %1385 = vmax.xlane.f32.xlu0 %v1384_v29  ;;  %v881_v29 = vld [vmem:[#allocation8] sm:$0xff] }
 0xa5d   :  { %v1381_v30 = vsel %vm980_vm11, %v1373_v28, -inf }
 0xa5e   :  { %1382 = vmax.xlane.f32.xlu1 %v1381_v30 }
 0xae5   :  { %v1386_v31 = vpop.xlane.xlu0 %1385 }
 0xae6   :  { %v1388_v32 = vsub.f32 %v1378_v26, %v1386_v31 }
 0xae7   :  { %v1383_v33 = vpop.xlane.xlu1 %1382 }
 0xae8   :  { %v1391_v34 = vmul.f32 1.442695, %v1388_v32  ;;  %v1387_v35 = vsub.f32 %v1373_v28, %v1383_v33  ;;  %v882_v28 = vld [vmem:[#allocation8 + $0x8] sm:$0xff] }
 0xaea   :  { %11279 = vpow2.f32 %v1391_v34  ;;  %v1389_v36 = vmul.f32 1.442695, %v1387_v35 }
 0xaec   :  { %11281 = vpow2.f32 %v1389_v36 }
 0xaf7   :  { %v11280_v37 = vpop.eup %11279 }
 0xaf8   :  { %v1396_v38 = vsel %vm980_vm11, %v11280_v37, 0.0 }
 0xaf9   :  { %v11282_v39 = vpop.eup %11281  ;;  %1397 = vadd.xlane.f32.xlu1 %v1396_v38 }
 0xafa   :  { %v1393_v40 = vsel %vm980_vm11, %v11282_v39, 0.0 }
 0xafb   :  { %1394 = vadd.xlane.f32.xlu0 %v1393_v40 }
 0xb0a   :  { %1403 = vrot.lane.b32.xlu1 %v12614_v60, %s12204_s26 }
 0xb0e   :  { %1496 = vrot.lane.b32.xlu1 %v12612_v58, %s12205_s30 }
 0xb11   :  { %1405 = vrot.lane.b32.xlu0 %v12612_v58, %s12204_s26 }
 0xb12   :  { %1490 = vrot.lane.b32.xlu1 %v12619_v61, %s12206_s24 }
 0xb15   :  { %1494 = vrot.lane.b32.xlu0 %v12614_v60, %s12205_s30 }
 0xb19   :  { %1492 = vrot.lane.b32.xlu0 %v12632_v3, %s12206_s24 }
 0xb82   :  { %v1398_v41 = vpop.xlane.xlu1 %1397 }
 0xb83   :  { %11283 = vrcp.f32 %v1398_v41 }
 0xb84   :  { %v1395_v42 = vpop.xlane.xlu0 %1394 }
 0xb85   :  { %11285 = vrcp.f32 %v1395_v42 }
 0xb86   :  { %v1404_v43 = vpop.permute.xlu1 %1403 }
 0xb88   :  { %v1406_v46 = vpop.permute.xlu0 %1405 }
 0xb89   :  { %10363 = vmatprep.subr.mxu1 %v1406_v46 }
 0xb8a   :  { %10364 = vmatpush3.msra.mxu1 %v1406_v46  ;;  %v1497_v47 = vpop.permute.xlu1 %1496  ;;  %v9556_v46 = vld [vmem:[#allocation10] ss:$0 sm:$0xff] }
 0xb8b   :  { %10365 = vmatprep.subr.mxu1 %v1404_v43 }
 0xb8c   :  { %10366 = vmatpush3.msra.mxu1 %v1404_v43  ;;  %v1495_v51 = vpop.permute.xlu0 %1494 }
 0xb8d   :  { %10370 = vmatprep.subr.msk.mxu1 %vm894_vm4, %v1497_v47 }
 0xb8e   :  { %v1491_v3 = vpop.permute.xlu1 %1490 }
 0xb90   :  { %v11284_v61 = vpop.eup %11283  ;;  %v1493_v52 = vpop.permute.xlu0 %1492 }
 0xb91   :  { %v1402_v50 = vmul.f32 %v11284_v61, %v11280_v37 }
 0xb92   :  { %v11286_v48 = vpop.eup %11285 }
 0xb93   :  { %v1401_v49 = vmul.f32 %v11286_v48, %v11282_v39 }
 0xb95   :  { %10367 = vmatprep.mubr.msk.f32.mxu1 %vm980_vm11, %v1401_v49 }
 0xb96   :  { %10368 = vmatmul.mubr.msk.f32.vlgmr.msra.gmra.mxu1 %vm980_vm11, %v1402_v50 }
 0xb97   :  { %10371 = vmatpush3.xpose.msk.msra.mxu1 %vm894_vm4, %v1497_v47  ;;  %10374 = vmatprep.mubr.msk.f32.mxu1 %vm894_vm4, %v1491_v3 }
 0xb98   :  { %10372 = vmatprep.subr.msk.mxu1 %vm894_vm4, %v1495_v51 }
 0xb9b   :  { %10373 = vmatpush3.xpose.msk.msra.mxu1 %vm894_vm4, %v1495_v51 }
 0xb9e   :  { %10375 = vmatmul.mubr.msk.f32.vlgmr.msra.gmra.mxu1 %vm894_vm4, %v1493_v52 }
 0xc56   :  { %v10369_v54 = vpop.f32.mrf.mxu1 }
 0xc58   :  { %v1481_v56 = vpop.f32.mrf.mxu1 }
 0xc5e   :  { %v10376_v57 = vpop.f32.mrf.mxu1 }
 0xc5f   :  { %v1578_v59 = vadd.f32 %v10376_v57, %v12651_v15 }
 0xc60   :  { %v1572_v62 = vpop.f32.mrf.mxu1 }
 0xc61   :  { %v1573_v63 = vadd.f32 %v1572_v62, %v12655_v17  ;;  %v1584_v1 = vsel %vm980_vm11, %v1578_v59, -inf }
 0xc62   :  { %1585 = vmax.xlane.f32.xlu0 %v1584_v1 }
 0xc63   :  { %v1581_v2 = vsel %vm980_vm11, %v1573_v63, -inf }
 0xc64   :  { %1582 = vmax.xlane.f32.xlu1 %v1581_v2  ;;  %v1854_v2 = vld [vmem:[#allocation14 + $0x10] sm:$0xff] }
 0xceb   :  { %v1586_v4 = vpop.xlane.xlu0 %1585 }
 0xcec   :  { %v1588_v6 = vsub.f32 %v1578_v59, %v1586_v4  ;;  %v1853_v4 = vld [vmem:[#allocation14 + $0x8] sm:$0xff] }
 0xced   :  { %v1583_v7 = vpop.xlane.xlu1 %1582 }
 0xcee   :  { %v1591_v8 = vmul.f32 1.442695, %v1588_v6  ;;  %v1587_v10 = vsub.f32 %v1573_v63, %v1583_v7  ;;  %v1852_v6 = vld [vmem:[#allocation14] sm:$0xff]  ;;  %v1864_v7 = vld [vmem:[%s13929_s2 + $0x38] sm:$0xff] }
 0xcf0   :  { %11287 = vpow2.f32 %v1591_v8  ;;  %v1589_v13 = vmul.f32 1.442695, %v1587_v10  ;;  %v1863_v8 = vld [vmem:[%s13929_s2 + $0x30] sm:$0xff]  ;;  %v1862_v10 = vld [vmem:[%s13929_s2 + $0x28] sm:$0xff] }
 0xcf2   :  { %11289 = vpow2.f32 %v1589_v13  ;;  %v1861_v13 = vld [vmem:[%s13929_s2 + $0x20] sm:$0xff] }
 0xcfd   :  { %v11288_v16 = vpop.eup %11287 }
 0xcfe   :  { %v1596_v0 = vsel %vm980_vm11, %v11288_v16, 0.0 }
 0xcff   :  { %v11290_v18 = vpop.eup %11289  ;;  %1597 = vadd.xlane.f32.xlu1 %v1596_v0 }
 0xd00   :  { %v1593_v19 = vsel %vm980_vm11, %v11290_v18, 0.0 }
 0xd01   :  { %1594 = vadd.xlane.f32.xlu0 %v1593_v19 }
 0xd10   :  { %1603 = vrot.lane.b32.xlu1 %v12614_v60, %s12207_s1 }
 0xd14   :  { %1692 = vrot.lane.b32.xlu1 %v12714_v24, %s12163_s16 }
 0xd17   :  { %1605 = vrot.lane.b32.xlu0 %v12612_v58, %s12207_s1 }
 0xd18   :  { %1700 = vrot.lane.b32.xlu1 %v1481_v56, %s12166_s0 }
 0xd1b   :  { %1694 = vrot.lane.b32.xlu0 %v12712_v23, %s12163_s16  ;;  %v884_v23 = vld [vmem:[#allocation8 + $0x18] sm:$0xff] }
 0xd1f   :  { %1702 = vrot.lane.b32.xlu0 %v10369_v54, %s12166_s0 }
 0xd88   :  { %v1598_v20 = vpop.xlane.xlu1 %1597 }
 0xd89   :  { %11291 = vrcp.f32 %v1598_v20 }
 0xd8a   :  { %v1595_v21 = vpop.xlane.xlu0 %1594 }
 0xd8b   :  { %11293 = vrcp.f32 %v1595_v21 }
 0xd8c   :  { %v1604_v60 = vpop.permute.xlu1 %1603 }
 0xd8e   :  { %v1606_v22 = vpop.permute.xlu0 %1605 }
 0xd8f   :  { %10377 = vmatprep.subr.mxu0 %v1606_v22 }
 0xd90   :  { %10378 = vmatpush3.msra.mxu0 %v1606_v22  ;;  %v1693_v33 = vpop.permute.xlu1 %1692 }
 0xd91   :  { %10379 = vmatprep.subr.mxu0 %v1604_v60  ;;  %v1714_v36 = vsel %vm894_vm4, %v12684_v45, %v1693_v33  ;;  %v1857_v33 = vld [vmem:[%s13929_s2] sm:$0xff] }
 0xd92   :  { %10380 = vmatpush3.msra.mxu0 %v1604_v60  ;;  %v1695_v32 = vpop.permute.xlu0 %1694  ;;  %v9559_v60 = vld [vmem:[#allocation11] ss:$0 sm:$0xff] }
 0xd93   :  { %10384 = vmatprep.subr.mxu0 %v884_v23  ;;  %v1715_v38 = vsel %vm894_vm4, %v12682_v44, %v1695_v32  ;;  %v1858_v32 = vld [vmem:[%s13929_s2 + $0x8] sm:$0xff] }
 0xd94   :  { %v1701_v35 = vpop.permute.xlu1 %1700 }
 0xd95   :  { %v1716_v39 = vsel %vm980_vm11, %v1714_v36, %v1701_v35 }
 0xd96   :  { %v11292_v24 = vpop.eup %11291  ;;  %v1703_v34 = vpop.permute.xlu0 %1702 }
 0xd97   :  { %v1602_v26 = vmul.f32 %v11292_v24, %v11288_v16  ;;  %v1717_v41 = vsel %vm980_vm11, %v1715_v38, %v1703_v34  ;;  %v9561_v34 = vld [vmem:[#allocation16] ss:$0 sm:$0xff] }
 0xd98   :  { %v11294_v25 = vpop.eup %11293 }
 0xd99   :  { %v1601_v58 = vmul.f32 %v11294_v25, %v11290_v18 }
 0xd9b   :  { %10381 = vmatprep.mubr.msk.f32.mxu0 %vm980_vm11, %v1601_v58 }
 0xd9c   :  { %10382 = vmatmul.mubr.msk.f32.vlgmr.msra.gmra.mxu0 %vm980_vm11, %v1602_v26 }
 0xd9d   :  { %10385 = vmatpush3.msra.mxu0 %v884_v23  ;;  %v9560_v23 = vld [vmem:[#allocation13] ss:$0 sm:$0xff] }
 0xd9e   :  { %10386 = vmatprep.subr.mxu0 %v883_v27 }
 0xd9f   :  { %10387 = vmatpush3.msra.mxu0 %v883_v27 }
 0xda0   :  { %10388 = vmatprep.subr.mxu0 %v882_v28 }
 0xda1   :  { %10389 = vmatpush3.msra.mxu0 %v882_v28 }
 0xda2   :  { %10390 = vmatprep.subr.mxu0 %v881_v29 }
 0xda3   :  { %10391 = vmatpush3.msra.mxu0 %v881_v29 }
 0xda4   :  { %10406 = vmatprep.subr.mxu0 %v1864_v7 }
 0xe5c   :  { %v10383_v30 = vpop.f32.mrf.mxu0 }
 0xe5d   :  { %1710 = vrot.lane.b32.xlu0 %v10383_v30, %s12208_s12  ;;  %v1860_v30 = vld [vmem:[%s13929_s2 + $0x18] sm:$0xff] }
 0xe5e   :  { %v1681_v31 = vpop.f32.mrf.mxu0 }
 0xe5f   :  { %1708 = vrot.lane.b32.xlu1 %v1681_v31, %s12208_s12  ;;  %v1859_v31 = vld [vmem:[%s13929_s2 + $0x10] sm:$0xff] }
 0xecf   :  { %v1711_v37 = vpop.permute.xlu0 %1710 }
 0xed0   :  { %v1720_v43 = vsel %vm1718_vm12, %v1717_v41, %v1711_v37  ;;  %v9564_v41 = vld [vmem:[#allocation17] ss:$0 sm:$0xff] }
 0xed1   :  { %v1709_v40 = vpop.permute.xlu1 %1708 }
 0xed2   :  { %v1719_v42 = vsel %vm1718_vm12, %v1716_v39, %v1709_v40 }
 0xed3   :  { %10392 = vmatprep.mubr.msk.f32.mxu0 %vm743_vm3, %v1719_v42 }
 0xed4   :  { %10393 = vmatmul.mubr.msk.f32.vlgmr.msra.gmra.mxu0 %vm743_vm3, %v1720_v43 }
 0xed5   :  { %10407 = vmatpush3.msra.mxu0 %v1864_v7 }
 0xed6   :  { %10408 = vmatprep.subr.mxu0 %v1863_v8 }
 0xed7   :  { %10409 = vmatpush3.msra.mxu0 %v1863_v8 }
 0xed8   :  { %10410 = vmatprep.subr.mxu0 %v1862_v10 }
 0xed9   :  { %10411 = vmatpush3.msra.mxu0 %v1862_v10 }
 0xeda   :  { %10412 = vmatprep.subr.mxu0 %v1861_v13 }
 0xedb   :  { %10413 = vmatpush3.msra.mxu0 %v1861_v13 }
 0xedc   :  { %10414 = vmatprep.subr.mxu0 %v1860_v30 }
 0xedd   :  { %10415 = vmatpush3.msra.mxu0 %v1860_v30 }
 0xede   :  { %10416 = vmatprep.subr.mxu0 %v1859_v31 }
 0xedf   :  { %10417 = vmatpush3.msra.mxu0 %v1859_v31 }
 0xee0   :  { %10418 = vmatprep.subr.mxu0 %v1858_v32 }
 0xee1   :  { %10419 = vmatpush3.msra.mxu0 %v1858_v32 }
 0xee2   :  { %10420 = vmatprep.subr.mxu0 %v1857_v33 }
 0xee3   :  { %10421 = vmatpush3.msra.mxu0 %v1857_v33 }
 0xf94   :  { %v10394_v45 = vpop.f32.mrf.mxu0 }
 0xf95   :  { %v1805_v47 = vadd.f32 %v10394_v45, %v9556_v46 }
 0xf96   :  { %v1799_v61 = vpop.f32.mrf.mxu0 }
 0xf97   :  { %v1800_v48 = vadd.f32 %v9556_v46, %v1799_v61  ;;  %v1809_v44 = vadd.f32 %v1805_v47, %v12607_v55 }
 0xf99   :  { %v1813_v49 = vsel %vm743_vm3, %v1809_v44, 0.0  ;;  %v1808_v50 = vadd.f32 %v1800_v48, %v12603_v53  ;;  %v1855_v53 = vld [vmem:[#allocation14 + $0x18] sm:$0xff] }
 0xf9a   :  { %1814 = vadd.xlane.f32.xlu0 %v1813_v49  ;;  %10395 = vmatprep.subr.mxu1 %v1855_v53 }
 0xf9b   :  { %v1810_v3 = vsel %vm743_vm3, %v1808_v50, 0.0  ;;  %10396 = vmatpush3.msra.mxu1 %v1855_v53  ;;  %v2089_v53 = vld [vmem:[#allocation7 + $0x20] sm:$0xff] }
 0xf9c   :  { %1811 = vadd.xlane.f32.xlu1 %v1810_v3  ;;  %10397 = vmatprep.subr.mxu1 %v1854_v2 }
 0xf9d   :  { %10398 = vmatpush3.msra.mxu1 %v1854_v2 }
 0xf9e   :  { %10399 = vmatprep.subr.mxu1 %v1853_v4 }
 0xf9f   :  { %10400 = vmatpush3.msra.mxu1 %v1853_v4 }
 0xfa0   :  { %10401 = vmatprep.subr.mxu1 %v1852_v6 }
 0xfa1   :  { %10402 = vmatpush3.msra.mxu1 %v1852_v6 }
0x1023   :  { %v1815_v51 = vpop.xlane.xlu0 %1814 }
0x1024   :  { %v1817_v52 = vmul.f32 0.03125, %v1815_v51 }
0x1025   :  { %v1812_v54 = vpop.xlane.xlu1 %1811 }
0x1026   :  { %v1819_v56 = vsub.f32 %v1809_v44, %v1817_v52  ;;  %v1816_v57 = vmul.f32 0.03125, %v1812_v54 }
0x1028   :  { %v1818_v59 = vsub.f32 %v1808_v50, %v1816_v57  ;;  %v1821_v62 = vmul.f32 %v1819_v56, %v1819_v56 }
0x102a   :  { %v1825_v63 = vsel %vm743_vm3, %v1821_v62, 0.0  ;;  %v1820_v1 = vmul.f32 %v1818_v59, %v1818_v59 }
0x102b   :  { %1826 = vadd.xlane.f32.xlu1 %v1825_v63  ;;  %v2092_v63 = vld [vmem:[#allocation7 + $0x38] sm:$0xff] }
0x102c   :  { %v1822_v55 = vsel %vm743_vm3, %v1820_v1, 0.0  ;;  %v2091_v1 = vld [vmem:[#allocation7 + $0x30] sm:$0xff]  ;;  %10425 = vmatprep.subr.mxu1 %v2092_v63 }
0x102d   :  { %1823 = vadd.xlane.f32.xlu0 %v1822_v55  ;;  %v2090_v55 = vld [vmem:[#allocation7 + $0x28] sm:$0xff] }
0x10b4   :  { %v1827_v16 = vpop.xlane.xlu1 %1826 }
0x10b5   :  { %v1829_v0 = vmul.f32 0.03125, %v1827_v16  ;;  %v9567_v16 = vld [vmem:[#allocation19] ss:$0 sm:$0xff] }
0x10b6   :  { %v1824_v18 = vpop.xlane.xlu0 %1823 }
0x10b7   :  { %v1831_v19 = vadd.f32 1e-06, %v1829_v0  ;;  %v1828_v20 = vmul.f32 0.03125, %v1824_v18 }
0x10b9   :  { %11295 = vrsqrt.f32 %v1831_v19  ;;  %v1830_v21 = vadd.f32 1e-06, %v1828_v20 }
0x10bb   :  { %11297 = vrsqrt.f32 %v1830_v21  ;;  %v9568_v21 = vld [vmem:[#allocation20] ss:$0 sm:$0xff] }
0x10c6   :  { %v11296_v22 = vpop.eup %11295 }
0x10c7   :  { %v1835_v24 = vmul.f32 %v11296_v22, %v1819_v56 }
0x10c8   :  { %v11298_v25 = vpop.eup %11297 }
0x10c9   :  { %v1834_v58 = vmul.f32 %v11298_v25, %v1818_v59  ;;  %v1843_v26 = vmul.f32 %v9559_v60, %v1835_v24  ;;  %v9570_v25 = vld [vmem:[%s13925_s28 + $0x1] ss:$0 sm:$0xff] }
0x10cb   :  { %v1842_v27 = vmul.f32 %v9559_v60, %v1834_v58  ;;  %v1851_v29 = vadd.f32 %v9560_v23, %v1843_v26 }
0x10cd   :  { %v1850_v28 = vadd.f32 %v9560_v23, %v1842_v27 }
0x10cf   :  { %10403 = vmatprep.mubr.msk.f32.mxu1 %vm743_vm3, %v1850_v28 }
0x10d0   :  { %10404 = vmatmul.mubr.msk.f32.vlgmr.msra.gmra.mxu1 %vm743_vm3, %v1851_v29 }
0x10d1   :  { %10426 = vmatpush3.msra.mxu1 %v2092_v63 }
0x10d2   :  { %10427 = vmatprep.subr.mxu1 %v2091_v1 }
0x10d3   :  { %10428 = vmatpush3.msra.mxu1 %v2091_v1 }
0x10d4   :  { %10429 = vmatprep.subr.mxu1 %v2090_v55 }
0x10d5   :  { %10430 = vmatpush3.msra.mxu1 %v2090_v55 }
0x10d6   :  { %10431 = vmatprep.subr.mxu1 %v2089_v53 }
0x10d7   :  { %10432 = vmatpush3.msra.mxu1 %v2089_v53 }
0x1190   :  { %v10405_v35 = vpop.f32.mrf.mxu1 }
0x1191   :  { %v1952_v36 = vadd.f32 %v10405_v35, %v9561_v34 }
0x1192   :  { %v1946_v37 = vpop.f32.mrf.mxu1 }
0x1193   :  { %v1947_v38 = vadd.f32 %v9561_v34, %v1946_v37  ;;  %v1956_v40 = vmax.f32 %v1952_v36, 0.0 }
0x1195   :  { %v1955_v39 = vmax.f32 %v1947_v38, 0.0 }
0x1197   :  { %10422 = vmatprep.mubr.msk.f32.mxu0 %vm659_vm0, %v1955_v39 }
0x1198   :  { %10423 = vmatmul.mubr.msk.f32.vlgmr.msra.gmra.mxu0 %vm659_vm0, %v1956_v40 }
0x1258   :  { %v10424_v42 = vpop.f32.mrf.mxu0 }
0x1259   :  { %v2041_v43 = vadd.f32 %v10424_v42, %v9564_v41 }
0x125a   :  { %v2035_v46 = vpop.f32.mrf.mxu0 }
0x125b   :  { %v2036_v45 = vadd.f32 %v9564_v41, %v2035_v46  ;;  %v2045_v47 = vadd.f32 %v2041_v43, %v1851_v29 }
0x125d   :  { %v2049_v61 = vsel %vm743_vm3, %v2045_v47, 0.0  ;;  %v2044_v48 = vadd.f32 %v2036_v45, %v1850_v28 }
0x125e   :  { %2050 = vadd.xlane.f32.xlu1 %v2049_v61 }
0x125f   :  { %v2046_v44 = vsel %vm743_vm3, %v2044_v48, 0.0 }
0x1260   :  { %2047 = vadd.xlane.f32.xlu0 %v2046_v44 }
0x12e7   :  { %v2051_v49 = vpop.xlane.xlu1 %2050 }
0x12e8   :  { %v2053_v50 = vmul.f32 0.03125, %v2051_v49 }
0x12e9   :  { %v2048_v3 = vpop.xlane.xlu0 %2047 }
0x12ea   :  { %v2055_v51 = vsub.f32 %v2045_v47, %v2053_v50  ;;  %v2052_v52 = vmul.f32 0.03125, %v2048_v3 }
0x12ec   :  { %v2054_v54 = vsub.f32 %v2044_v48, %v2052_v52  ;;  %v2057_v56 = vmul.f32 %v2055_v51, %v2055_v51 }
0x12ee   :  { %v2061_v57 = vsel %vm743_vm3, %v2057_v56, 0.0  ;;  %v2056_v59 = vmul.f32 %v2054_v54, %v2054_v54 }
0x12ef   :  { %2062 = vadd.xlane.f32.xlu1 %v2061_v57 }
0x12f0   :  { %v2058_v62 = vsel %vm743_vm3, %v2056_v59, 0.0 }
0x12f1   :  { %2059 = vadd.xlane.f32.xlu0 %v2058_v62 }
0x1378   :  { %v2063_v2 = vpop.xlane.xlu1 %2062 }
0x1379   :  { %v2065_v4 = vmul.f32 0.03125, %v2063_v2 }
0x137a   :  { %v2060_v6 = vpop.xlane.xlu0 %2059 }
0x137b   :  { %v2067_v7 = vadd.f32 1e-06, %v2065_v4  ;;  %v2064_v8 = vmul.f32 0.03125, %v2060_v6 }
0x137d   :  { %11299 = vrsqrt.f32 %v2067_v7  ;;  %v2066_v10 = vadd.f32 1e-06, %v2064_v8 }
0x137f   :  { %11301 = vrsqrt.f32 %v2066_v10 }
0x138a   :  { %v11300_v13 = vpop.eup %11299 }
0x138b   :  { %v2071_v0 = vmul.f32 %v11300_v13, %v2055_v51 }
0x138c   :  { %v11302_v18 = vpop.eup %11301 }
0x138d   :  { %v2070_v19 = vmul.f32 %v11302_v18, %v2054_v54  ;;  %v2079_v20 = vmul.f32 %v9567_v16, %v2071_v0 }
0x138f   :  { %v2078_v22 = vmul.f32 %v9567_v16, %v2070_v19  ;;  %v12796_v24 = vadd.f32 %v9568_v21, %v2079_v20 }
0x1391   :  { %v12794_v60 = vadd.f32 %v9568_v21, %v2078_v22 }
0x1393   :  { %10433 = vmatprep.mubr.msk.f32.mxu1 %vm743_vm3, %v12794_v60 }
0x1394   :  { %10434 = vmatmul.mubr.msk.f32.vlgmr.msra.gmra.mxu1 %vm743_vm3, %v12796_v24 }
0x1454   :  { %v10435_v58 = vpop.f32.mrf.mxu1 }
0x1455   :  { %v12803_v26 = vadd.f32 %v10435_v58, %v9570_v25 }
0x1456   :  { %v2173_v23 = vpop.f32.mrf.mxu1 }
0x1457   :  { %v12805_v27 = vadd.f32 %v9570_v25, %v2173_v23  ;;  %2199 = vrot.lane.b32.xlu0 %v12803_v26, %s12196_s20  ;;  %v12821_v29 = vmul.f32 0.35355338, %v12803_v26 }
0x1459   :  { %2197 = vrot.lane.b32.xlu1 %v12805_v27, %s12196_s20  ;;  %v12812_v28 = vmul.f32 0.35355338, %v12805_v27 }
0x145b   :  { %2399 = vrot.lane.b32.xlu0 %v12805_v27, %s12198_s8  ;;  %10440 = vmatprep.mubr.msk.f32.mxu1 %vm894_vm4, %v12812_v28 }
0x145d   :  { %2401 = vrot.lane.b32.xlu1 %v12803_v26, %s12198_s8 }
0x145f   :  { %2397 = vrot.lane.b32.xlu0 %v12821_v29, %s12200_s13 }
0x1461   :  { %2395 = vrot.lane.b32.xlu1 %v12812_v28, %s12200_s13 }
0x14c9   :  { %v2200_v30 = vpop.permute.xlu0 %2199 }
0x14ca   :  { %10436 = vmatprep.subr.msk.mxu1 %vm894_vm4, %v2200_v30 }
0x14cb   :  { %10437 = vmatpush3.xpose.msk.msra.mxu1 %vm894_vm4, %v2200_v30  ;;  %v2198_v31 = vpop.permute.xlu1 %2197 }
0x14cc   :  { %10438 = vmatprep.subr.msk.mxu1 %vm894_vm4, %v2198_v31 }
0x14cd   :  { %v2400_v33 = vpop.permute.xlu0 %2399 }
0x14cf   :  { %10439 = vmatpush3.xpose.msk.msra.mxu1 %vm894_vm4, %v2198_v31  ;;  %v2402_v32 = vpop.permute.xlu1 %2401 }
0x14d0   :  { %10450 = vmatprep.subr.msk.mxu1 %vm894_vm4, %v2402_v32 }
0x14d1   :  { %v2398_v35 = vpop.permute.xlu0 %2397 }
0x14d2   :  { %10441 = vmatmul.mubr.msk.f32.vlgmr.msra.gmra.mxu1 %vm894_vm4, %v12821_v29 }
0x14d3   :  { %v2396_v34 = vpop.permute.xlu1 %2395  ;;  %10451 = vmatpush3.xpose.msk.msra.mxu1 %vm894_vm4, %v2402_v32 }
0x14d4   :  { %10452 = vmatprep.subr.msk.mxu1 %vm894_vm4, %v2400_v33  ;;  %10454 = vmatprep.mubr.msk.f32.mxu1 %vm894_vm4, %v2396_v34 }
0x14d7   :  { %10453 = vmatpush3.xpose.msk.msra.mxu1 %vm894_vm4, %v2400_v33 }
0x14da   :  { %10455 = vmatmul.mubr.msk.f32.vlgmr.msra.gmra.mxu1 %vm894_vm4, %v2398_v35 }
0x1592   :  { %v10442_v36 = vpop.f32.mrf.mxu1 }
0x1593   :  { %v2283_v37 = vadd.f32 %v10442_v36, %v12651_v15 }
0x1594   :  { %v2277_v38 = vpop.f32.mrf.mxu1 }
0x1595   :  { %v2278_v39 = vadd.f32 %v2277_v38, %v12655_v17  ;;  %v2289_v40 = vsel %vm980_vm11, %v2283_v37, -inf }
0x1596   :  { %2290 = vmax.xlane.f32.xlu0 %v2289_v40 }
0x1597   :  { %v2286_v41 = vsel %vm980_vm11, %v2278_v39, -inf }
0x1598   :  { %2287 = vmax.xlane.f32.xlu1 %v2286_v41 }
0x159a   :  { %v10456_v42 = vpop.f32.mrf.mxu1 }
0x159b   :  { %v2483_v43 = vadd.f32 %v10456_v42, %v12651_v15 }
0x159c   :  { %v2477_v46 = vpop.f32.mrf.mxu1 }
0x159d   :  { %v2478_v45 = vadd.f32 %v2477_v46, %v12655_v17  ;;  %v2489_v47 = vsel %vm980_vm11, %v2483_v43, -inf }
0x159e   :  { %2490 = vmax.xlane.f32.xlu1 %v2489_v47 }
0x159f   :  { %v2486_v61 = vsel %vm980_vm11, %v2478_v45, -inf }
0x15a0   :  { %2487 = vmax.xlane.f32.xlu0 %v2486_v61 }
0x15af   :  { %2308 = vrot.lane.b32.xlu1 %v12805_v27, %s12199_s27 }
0x15b3   :  { %2510 = vrot.lane.b32.xlu1 %v12803_v26, %s12201_s23 }
0x15b6   :  { %2310 = vrot.lane.b32.xlu0 %v12803_v26, %s12199_s27 }
0x161f   :  { %v2291_v48 = vpop.xlane.xlu0 %2290 }
0x1620   :  { %v2293_v44 = vsub.f32 %v2283_v37, %v2291_v48 }
0x1621   :  { %v2288_v49 = vpop.xlane.xlu1 %2287 }
0x1622   :  { %v2296_v50 = vmul.f32 1.442695, %v2293_v44  ;;  %v2292_v3 = vsub.f32 %v2278_v39, %v2288_v49 }
0x1624   :  { %11303 = vpow2.f32 %v2296_v50  ;;  %v2294_v51 = vmul.f32 1.442695, %v2292_v3 }
0x1626   :  { %11305 = vpow2.f32 %v2294_v51 }
0x1627   :  { %v2491_v52 = vpop.xlane.xlu1 %2490 }
0x1628   :  { %v2493_v54 = vsub.f32 %v2483_v43, %v2491_v52 }
0x1629   :  { %v2488_v56 = vpop.xlane.xlu0 %2487 }
0x162a   :  { %v2496_v57 = vmul.f32 1.442695, %v2493_v54  ;;  %v2492_v59 = vsub.f32 %v2478_v45, %v2488_v56 }
0x162b   :  { %v2309_v62 = vpop.permute.xlu1 %2308 }
0x162c   :  { %11307 = vpow2.f32 %v2496_v57  ;;  %v2494_v63 = vmul.f32 1.442695, %v2492_v59 }
0x162d   :  { %v2311_v1 = vpop.permute.xlu0 %2310 }
0x162e   :  { %11309 = vpow2.f32 %v2494_v63  ;;  %10443 = vmatprep.subr.mxu0 %v2311_v1 }
0x162f   :  { %10444 = vmatpush3.msra.mxu0 %v2311_v1  ;;  %v2511_v53 = vpop.permute.xlu1 %2510 }
0x1630   :  { %10445 = vmatprep.subr.mxu0 %v2309_v62 }
0x1631   :  { %v11304_v55 = vpop.eup %11303  ;;  %10446 = vmatpush3.msra.mxu0 %v2309_v62 }
0x1632   :  { %10457 = vmatprep.subr.mxu0 %v2511_v53  ;;  %v2301_v2 = vsel %vm980_vm11, %v11304_v55, 0.0 }
0x1633   :  { %v11306_v4 = vpop.eup %11305  ;;  %2302 = vadd.xlane.f32.xlu1 %v2301_v2 }
0x1634   :  { %v2298_v6 = vsel %vm980_vm11, %v11306_v4, 0.0 }
0x1635   :  { %2299 = vadd.xlane.f32.xlu0 %v2298_v6 }
0x1639   :  { %v11308_v7 = vpop.eup %11307 }
0x163a   :  { %v2501_v8 = vsel %vm980_vm11, %v11308_v7, 0.0 }
0x163b   :  { %v11310_v10 = vpop.eup %11309  ;;  %2502 = vadd.xlane.f32.xlu1 %v2501_v8 }
0x163c   :  { %v2498_v13 = vsel %vm980_vm11, %v11310_v10, 0.0 }
0x163d   :  { %2499 = vadd.xlane.f32.xlu0 %v2498_v13 }
0x164c   :  { %2601 = vrot.lane.b32.xlu1 %v12803_v26, %s12202_s21 }
0x1650   :  { %2595 = vrot.lane.b32.xlu1 %v12812_v28, %s12203_s9 }
0x1653   :  { %2508 = vrot.lane.b32.xlu0 %v12805_v27, %s12201_s23 }
0x1657   :  { %2599 = vrot.lane.b32.xlu0 %v12805_v27, %s12202_s21 }
0x165b   :  { %2597 = vrot.lane.b32.xlu0 %v12821_v29, %s12203_s9 }
0x16bc   :  { %v2303_v16 = vpop.xlane.xlu1 %2302 }
0x16bd   :  { %11311 = vrcp.f32 %v2303_v16 }
0x16be   :  { %v2300_v0 = vpop.xlane.xlu0 %2299 }
0x16bf   :  { %11313 = vrcp.f32 %v2300_v0 }
0x16c4   :  { %v2503_v18 = vpop.xlane.xlu1 %2502 }
0x16c5   :  { %11315 = vrcp.f32 %v2503_v18 }
0x16c6   :  { %v2500_v19 = vpop.xlane.xlu0 %2499 }
0x16c7   :  { %11317 = vrcp.f32 %v2500_v19 }
0x16c8   :  { %v2602_v23 = vpop.permute.xlu1 %2601 }
0x16ca   :  { %v11312_v20 = vpop.eup %11311  ;;  %v2509_v58 = vpop.permute.xlu0 %2508 }
0x16cb   :  { %v2307_v25 = vmul.f32 %v11312_v20, %v11304_v55 }
0x16cc   :  { %v11314_v21 = vpop.eup %11313  ;;  %v2596_v34 = vpop.permute.xlu1 %2595 }
0x16cd   :  { %v2306_v22 = vmul.f32 %v11314_v21, %v11306_v4 }
0x16ce   :  { %v2600_v35 = vpop.permute.xlu0 %2599 }
0x16cf   :  { %10447 = vmatprep.mubr.msk.f32.mxu0 %vm980_vm11, %v2306_v22 }
0x16d0   :  { %10448 = vmatmul.mubr.msk.f32.vlgmr.msra.gmra.mxu0 %vm980_vm11, %v2307_v25 }
0x16d1   :  { %10458 = vmatpush3.msra.mxu0 %v2511_v53 }
0x16d2   :  { %10459 = vmatprep.subr.mxu0 %v2509_v58  ;;  %v11316_v30 = vpop.eup %11315  ;;  %v2598_v36 = vpop.permute.xlu0 %2597 }
0x16d3   :  { %10460 = vmatpush3.msra.mxu0 %v2509_v58  ;;  %v2507_v33 = vmul.f32 %v11316_v30, %v11308_v7 }
0x16d4   :  { %v11318_v31 = vpop.eup %11317  ;;  %10464 = vmatprep.subr.msk.mxu0 %vm894_vm4, %v2602_v23 }
0x16d5   :  { %v2506_v32 = vmul.f32 %v11318_v31, %v11310_v10 }
0x16d7   :  { %10461 = vmatprep.mubr.msk.f32.mxu0 %vm980_vm11, %v2506_v32 }
0x16d8   :  { %10462 = vmatmul.mubr.msk.f32.vlgmr.msra.gmra.mxu0 %vm980_vm11, %v2507_v33 }
0x16d9   :  { %10465 = vmatpush3.xpose.msk.msra.mxu0 %vm894_vm4, %v2602_v23  ;;  %10468 = vmatprep.mubr.msk.f32.mxu0 %vm894_vm4, %v2596_v34 }
0x16da   :  { %10466 = vmatprep.subr.msk.mxu0 %vm894_vm4, %v2600_v35 }
0x16dd   :  { %10467 = vmatpush3.xpose.msk.msra.mxu0 %vm894_vm4, %v2600_v35 }
0x16e0   :  { %10469 = vmatmul.mubr.msk.f32.vlgmr.msra.gmra.mxu0 %vm894_vm4, %v2598_v36 }
0x1790   :  { %v12877_v37 = vpop.f32.mrf.mxu0 }
0x1792   :  { %v12879_v38 = vpop.f32.mrf.mxu0 }
0x1798   :  { %v12881_v39 = vpop.f32.mrf.mxu0 }
0x179a   :  { %v12883_v40 = vpop.f32.mrf.mxu0 }
0x17a0   :  { %v10470_v41 = vpop.f32.mrf.mxu0 }
0x17a1   :  { %v2683_v42 = vadd.f32 %v10470_v41, %v12651_v15  ;;  %v2187_v41 = vld [vmem:[#allocation8 + $0x30] sm:$0xff] }
0x17a2   :  { %v2677_v43 = vpop.f32.mrf.mxu0 }
0x17a3   :  { %v2678_v46 = vadd.f32 %v2677_v43, %v12655_v17  ;;  %v2689_v45 = vsel %vm980_vm11, %v2683_v42, -inf  ;;  %v2185_v43 = vld [vmem:[#allocation8 + $0x20] sm:$0xff] }
0x17a4   :  { %2690 = vmax.xlane.f32.xlu0 %v2689_v45 }
0x17a5   :  { %v2686_v47 = vsel %vm980_vm11, %v2678_v46, -inf }
0x17a6   :  { %2687 = vmax.xlane.f32.xlu1 %v2686_v47 }
0x182d   :  { %v2691_v61 = vpop.xlane.xlu0 %2690 }
0x182e   :  { %v2693_v48 = vsub.f32 %v2683_v42, %v2691_v61  ;;  %v2186_v42 = vld [vmem:[#allocation8 + $0x28] sm:$0xff] }
0x182f   :  { %v2688_v44 = vpop.xlane.xlu1 %2687 }
0x1830   :  { %v2696_v49 = vmul.f32 1.442695, %v2693_v48  ;;  %v2692_v50 = vsub.f32 %v2678_v46, %v2688_v44 }
0x1832   :  { %11319 = vpow2.f32 %v2696_v49  ;;  %v2694_v3 = vmul.f32 1.442695, %v2692_v50 }
0x1834   :  { %11321 = vpow2.f32 %v2694_v3 }
0x183f   :  { %v11320_v51 = vpop.eup %11319 }
0x1840   :  { %v2701_v52 = vsel %vm980_vm11, %v11320_v51, 0.0 }
0x1841   :  { %v11322_v54 = vpop.eup %11321  ;;  %2702 = vadd.xlane.f32.xlu1 %v2701_v52 }
0x1842   :  { %v2698_v56 = vsel %vm980_vm11, %v11322_v54, 0.0 }
0x1843   :  { %2699 = vadd.xlane.f32.xlu0 %v2698_v56 }
0x1852   :  { %2708 = vrot.lane.b32.xlu1 %v12805_v27, %s12204_s26 }
0x1856   :  { %2801 = vrot.lane.b32.xlu1 %v12803_v26, %s12205_s30 }
0x1859   :  { %2710 = vrot.lane.b32.xlu0 %v12803_v26, %s12204_s26 }
0x185a   :  { %2795 = vrot.lane.b32.xlu1 %v12812_v28, %s12206_s24 }
0x185d   :  { %2799 = vrot.lane.b32.xlu0 %v12805_v27, %s12205_s30 }
0x1861   :  { %2797 = vrot.lane.b32.xlu0 %v12821_v29, %s12206_s24 }
0x18ca   :  { %v2703_v57 = vpop.xlane.xlu1 %2702 }
0x18cb   :  { %11323 = vrcp.f32 %v2703_v57 }
0x18cc   :  { %v2700_v59 = vpop.xlane.xlu0 %2699 }
0x18cd   :  { %11325 = vrcp.f32 %v2700_v59  ;;  %v9597_v59 = vld [vmem:[#allocation10 + $0x1] ss:$0 sm:$0xff] }
0x18ce   :  { %v2709_v62 = vpop.permute.xlu1 %2708 }
0x18d0   :  { %v2711_v63 = vpop.permute.xlu0 %2710 }
0x18d1   :  { %10471 = vmatprep.subr.mxu1 %v2711_v63 }
0x18d2   :  { %10472 = vmatpush3.msra.mxu1 %v2711_v63  ;;  %v2802_v1 = vpop.permute.xlu1 %2801 }
0x18d3   :  { %10473 = vmatprep.subr.mxu1 %v2709_v62 }
0x18d4   :  { %10474 = vmatpush3.msra.mxu1 %v2709_v62  ;;  %v2800_v4 = vpop.permute.xlu0 %2799 }
0x18d5   :  { %10478 = vmatprep.subr.msk.mxu1 %vm894_vm4, %v2802_v1 }
0x18d6   :  { %v2796_v29 = vpop.permute.xlu1 %2795 }
0x18d8   :  { %v11324_v28 = vpop.eup %11323  ;;  %v2798_v6 = vpop.permute.xlu0 %2797 }
0x18d9   :  { %v2707_v2 = vmul.f32 %v11324_v28, %v11320_v51 }
0x18da   :  { %v11326_v55 = vpop.eup %11325 }
0x18db   :  { %v2706_v53 = vmul.f32 %v11326_v55, %v11322_v54 }
0x18dd   :  { %10475 = vmatprep.mubr.msk.f32.mxu1 %vm980_vm11, %v2706_v53 }
0x18de   :  { %10476 = vmatmul.mubr.msk.f32.vlgmr.msra.gmra.mxu1 %vm980_vm11, %v2707_v2 }
0x18df   :  { %10479 = vmatpush3.xpose.msk.msra.mxu1 %vm894_vm4, %v2802_v1  ;;  %10482 = vmatprep.mubr.msk.f32.mxu1 %vm894_vm4, %v2796_v29 }
0x18e0   :  { %10480 = vmatprep.subr.msk.mxu1 %vm894_vm4, %v2800_v4 }
0x18e3   :  { %10481 = vmatpush3.xpose.msk.msra.mxu1 %vm894_vm4, %v2800_v4 }
0x18e6   :  { %10483 = vmatmul.mubr.msk.f32.vlgmr.msra.gmra.mxu1 %vm894_vm4, %v2798_v6 }
0x199e   :  { %v10477_v7 = vpop.f32.mrf.mxu1 }
0x19a0   :  { %v2786_v8 = vpop.f32.mrf.mxu1 }
0x19a6   :  { %v10484_v10 = vpop.f32.mrf.mxu1 }
0x19a7   :  { %v2883_v13 = vadd.f32 %v10484_v10, %v12651_v15 }
0x19a8   :  { %v2877_v16 = vpop.f32.mrf.mxu1 }
0x19a9   :  { %v2878_v0 = vadd.f32 %v2877_v16, %v12655_v17  ;;  %v2889_v18 = vsel %vm980_vm11, %v2883_v13, -inf }
0x19aa   :  { %2890 = vmax.xlane.f32.xlu0 %v2889_v18  ;;  %v3158_v18 = vld [vmem:[#allocation14 + $0x28] sm:$0xff] }
0x19ab   :  { %v2886_v19 = vsel %vm980_vm11, %v2878_v0, -inf }
0x19ac   :  { %2887 = vmax.xlane.f32.xlu1 %v2886_v19  ;;  %v3157_v19 = vld [vmem:[#allocation14 + $0x20] sm:$0xff] }
0x1a33   :  { %v2891_v20 = vpop.xlane.xlu0 %2890 }
0x1a34   :  { %v2893_v21 = vsub.f32 %v2883_v13, %v2891_v20  ;;  %v9609_v20 = vld [vmem:[%s13929_s2 + $0x78] sm:$0xff] }
0x1a35   :  { %v2888_v22 = vpop.xlane.xlu1 %2887 }
0x1a36   :  { %v2896_v25 = vmul.f32 1.442695, %v2893_v21  ;;  %v2892_v58 = vsub.f32 %v2878_v0, %v2888_v22  ;;  %v3159_v0 = vld [vmem:[#allocation14 + $0x30] sm:$0xff]  ;;  %v9608_v21 = vld [vmem:[%s13929_s2 + $0x70] sm:$0xff]  ;;  %v9607_v22 = vld [vmem:[%s13929_s2 + $0x68] sm:$0xff] }
0x1a38   :  { %11327 = vpow2.f32 %v2896_v25  ;;  %v2894_v23 = vmul.f32 1.442695, %v2892_v58  ;;  %v9606_v25 = vld [vmem:[%s13929_s2 + $0x60] sm:$0xff] }
0x1a3a   :  { %11329 = vpow2.f32 %v2894_v23 }
0x1a45   :  { %v11328_v30 = vpop.eup %11327 }
0x1a46   :  { %v2901_v15 = vsel %vm980_vm11, %v11328_v30, 0.0 }
0x1a47   :  { %v11330_v31 = vpop.eup %11329  ;;  %2902 = vadd.xlane.f32.xlu1 %v2901_v15 }
0x1a48   :  { %v2898_v17 = vsel %vm980_vm11, %v11330_v31, 0.0 }
0x1a49   :  { %2899 = vadd.xlane.f32.xlu0 %v2898_v17 }
0x1a58   :  { %2908 = vrot.lane.b32.xlu1 %v12805_v27, %s12207_s1 }
0x1a5c   :  { %2997 = vrot.lane.b32.xlu1 %v12883_v40, %s12163_s16 }
0x1a5f   :  { %2910 = vrot.lane.b32.xlu0 %v12803_v26, %s12207_s1 }
0x1a60   :  { %3005 = vrot.lane.b32.xlu1 %v2786_v8, %s12166_s0 }
0x1a63   :  { %2999 = vrot.lane.b32.xlu0 %v12881_v39, %s12163_s16  ;;  %v2188_v39 = vld [vmem:[#allocation8 + $0x38] sm:$0xff] }
0x1a67   :  { %3007 = vrot.lane.b32.xlu0 %v10477_v7, %s12166_s0 }
0x1ad0   :  { %v2903_v32 = vpop.xlane.xlu1 %2902 }
0x1ad1   :  { %11331 = vrcp.f32 %v2903_v32 }
0x1ad2   :  { %v2900_v33 = vpop.xlane.xlu0 %2899 }
0x1ad3   :  { %11333 = vrcp.f32 %v2900_v33  ;;  %v9600_v33 = vld [vmem:[#allocation11 + $0x1] ss:$0 sm:$0xff] }
0x1ad4   :  { %v2909_v27 = vpop.permute.xlu1 %2908 }
0x1ad6   :  { %v2911_v34 = vpop.permute.xlu0 %2910 }
0x1ad7   :  { %10485 = vmatprep.subr.mxu0 %v2911_v34 }
0x1ad8   :  { %10486 = vmatpush3.msra.mxu0 %v2911_v34  ;;  %v2998_v61 = vpop.permute.xlu1 %2997 }
0x1ad9   :  { %10487 = vmatprep.subr.mxu0 %v2909_v27  ;;  %v3019_v49 = vsel %vm894_vm4, %v12879_v38, %v2998_v61  ;;  %v3403_v61 = vld [vmem:[%s13930_s19 + $0x10] sm:$0xff] }
0x1ada   :  { %10488 = vmatpush3.msra.mxu0 %v2909_v27  ;;  %v3000_v47 = vpop.permute.xlu0 %2999 }
0x1adb   :  { %10492 = vmatprep.subr.mxu0 %v2188_v39  ;;  %v3020_v3 = vsel %vm894_vm4, %v12877_v37, %v3000_v47  ;;  %v3404_v47 = vld [vmem:[%s13930_s19 + $0x18] sm:$0xff] }
0x1adc   :  { %v3006_v44 = vpop.permute.xlu1 %3005 }
0x1add   :  { %v3021_v51 = vsel %vm980_vm11, %v3019_v49, %v3006_v44  ;;  %v3401_v44 = vld [vmem:[%s13930_s19] sm:$0xff]  ;;  %v9618_v49 = vsel %vm3398_vm14, 1.0, %v12195_v14 }
0x1ade   :  { %v11332_v35 = vpop.eup %11331  ;;  %v3008_v48 = vpop.permute.xlu0 %3007 }
0x1adf   :  { %v2907_v40 = vmul.f32 %v11332_v35, %v11328_v30  ;;  %v3022_v54 = vsel %vm980_vm11, %v3020_v3, %v3008_v48  ;;  %v3402_v48 = vld [vmem:[%s13930_s19 + $0x8] sm:$0xff]  ;;  %v9604_v3 = vld [vmem:[%s13929_s2 + $0x50] sm:$0xff] }
0x1ae0   :  { %v11334_v36 = vpop.eup %11333 }
0x1ae1   :  { %v2906_v26 = vmul.f32 %v11334_v36, %v11330_v31 }
0x1ae3   :  { %10489 = vmatprep.mubr.msk.f32.mxu0 %vm980_vm11, %v2906_v26  ;;  %v9601_v26 = vld [vmem:[#allocation13 + $0x1] ss:$0 sm:$0xff] }
0x1ae4   :  { %10490 = vmatmul.mubr.msk.f32.vlgmr.msra.gmra.mxu0 %vm980_vm11, %v2907_v40 }
0x1ae5   :  { %10493 = vmatpush3.msra.mxu0 %v2188_v39 }
0x1ae6   :  { %10494 = vmatprep.subr.mxu0 %v2187_v41 }
0x1ae7   :  { %10495 = vmatpush3.msra.mxu0 %v2187_v41 }
0x1ae8   :  { %10496 = vmatprep.subr.mxu0 %v2186_v42 }
0x1ae9   :  { %10497 = vmatpush3.msra.mxu0 %v2186_v42  ;;  %v3408_v42 = vld [vmem:[%s13930_s19 + $0x38] sm:$0xff] }
0x1aea   :  { %10498 = vmatprep.subr.mxu0 %v2185_v43 }
0x1aeb   :  { %10499 = vmatpush3.msra.mxu0 %v2185_v43  ;;  %v3407_v43 = vld [vmem:[%s13930_s19 + $0x30] sm:$0xff] }
0x1aec   :  { %10514 = vmatprep.subr.mxu0 %v9609_v20 }
0x1ba4   :  { %v10491_v46 = vpop.f32.mrf.mxu0 }
0x1ba5   :  { %3015 = vrot.lane.b32.xlu0 %v10491_v46, %s12208_s12  ;;  %v3406_v46 = vld [vmem:[%s13930_s19 + $0x28] sm:$0xff] }
0x1ba6   :  { %v2986_v45 = vpop.f32.mrf.mxu0 }
0x1ba7   :  { %3013 = vrot.lane.b32.xlu1 %v2986_v45, %s12208_s12  ;;  %v3405_v45 = vld [vmem:[%s13930_s19 + $0x20] sm:$0xff] }
0x1c17   :  { %v3016_v50 = vpop.permute.xlu0 %3015 }
0x1c18   :  { %v3024_v57 = vsel %vm1718_vm12, %v3022_v54, %v3016_v50  ;;  %v9605_v50 = vld [vmem:[%s13929_s2 + $0x58] sm:$0xff]  ;;  %v9610_v54 = vld [vmem:[#allocation16 + $0x1] ss:$0 sm:$0xff] }
0x1c19   :  { %v3014_v52 = vpop.permute.xlu1 %3013 }
0x1c1a   :  { %v3023_v56 = vsel %vm1718_vm12, %v3021_v51, %v3014_v52  ;;  %v9603_v51 = vld [vmem:[%s13929_s2 + $0x48] sm:$0xff]  ;;  %v9602_v52 = vld [vmem:[%s13929_s2 + $0x40] sm:$0xff] }
0x1c1b   :  { %10500 = vmatprep.mubr.msk.f32.mxu0 %vm743_vm3, %v3023_v56 }
0x1c1c   :  { %10501 = vmatmul.mubr.msk.f32.vlgmr.msra.gmra.mxu0 %vm743_vm3, %v3024_v57 }
0x1c1d   :  { %10515 = vmatpush3.msra.mxu0 %v9609_v20 }
0x1c1e   :  { %10516 = vmatprep.subr.mxu0 %v9608_v21 }
0x1c1f   :  { %10517 = vmatpush3.msra.mxu0 %v9608_v21 }
0x1c20   :  { %10518 = vmatprep.subr.mxu0 %v9607_v22 }
0x1c21   :  { %10519 = vmatpush3.msra.mxu0 %v9607_v22 }
0x1c22   :  { %10520 = vmatprep.subr.mxu0 %v9606_v25 }
0x1c23   :  { %10521 = vmatpush3.msra.mxu0 %v9606_v25 }
0x1c24   :  { %10522 = vmatprep.subr.mxu0 %v9605_v50 }
0x1c25   :  { %10523 = vmatpush3.msra.mxu0 %v9605_v50  ;;  %v9623_v50 = vld [vmem:[#allocation26] ss:$0 sm:$0xff] }
0x1c26   :  { %10524 = vmatprep.subr.mxu0 %v9604_v3 }
0x1c27   :  { %10525 = vmatpush3.msra.mxu0 %v9604_v3 }
0x1c28   :  { %10526 = vmatprep.subr.mxu0 %v9603_v51 }
0x1c29   :  { %10527 = vmatpush3.msra.mxu0 %v9603_v51  ;;  %v9617_v51 = vld [vmem:[#allocation20 + $0x1] ss:$0 sm:$0xff] }
0x1c2a   :  { %10528 = vmatprep.subr.mxu0 %v9602_v52 }
0x1c2b   :  { %10529 = vmatpush3.msra.mxu0 %v9602_v52 }
0x1c2c   :  { %10552 = vmatprep.subr.mxu0 %v12195_v14 }
0x1cdc   :  { %v10502_v62 = vpop.f32.mrf.mxu0 }
0x1cdd   :  { %v3109_v38 = vadd.f32 %v10502_v62, %v9597_v59 }
0x1cde   :  { %v3103_v63 = vpop.f32.mrf.mxu0 }
0x1cdf   :  { %v3113_v1 = vadd.f32 %v3109_v38, %v12796_v24  ;;  %v3104_v37 = vadd.f32 %v9597_v59, %v3103_v63  ;;  %v3160_v24 = vld [vmem:[#allocation14 + $0x38] sm:$0xff] }
0x1ce0   :  { %10503 = vmatprep.subr.mxu1 %v3160_v24 }
0x1ce1   :  { %v3112_v28 = vadd.f32 %v3104_v37, %v12794_v60  ;;  %v3117_v55 = vsel %vm743_vm3, %v3113_v1, 0.0  ;;  %10504 = vmatpush3.msra.mxu1 %v3160_v24 }
0x1ce2   :  { %3118 = vadd.xlane.f32.xlu0 %v3117_v55  ;;  %10505 = vmatprep.subr.mxu1 %v3159_v0 }
0x1ce3   :  { %v3114_v53 = vsel %vm743_vm3, %v3112_v28, 0.0  ;;  %10506 = vmatpush3.msra.mxu1 %v3159_v0 }
0x1ce4   :  { %3115 = vadd.xlane.f32.xlu1 %v3114_v53  ;;  %10507 = vmatprep.subr.mxu1 %v3158_v18 }
0x1ce5   :  { %10508 = vmatpush3.msra.mxu1 %v3158_v18 }
0x1ce6   :  { %10509 = vmatprep.subr.mxu1 %v3157_v19 }
0x1ce7   :  { %10510 = vmatpush3.msra.mxu1 %v3157_v19 }
0x1ce8   :  { %10533 = vmatprep.subr.mxu1 %v12195_v14 }
0x1d6b   :  { %v3119_v2 = vpop.xlane.xlu0 %3118 }
0x1d6c   :  { %v3121_v29 = vmul.f32 0.03125, %v3119_v2 }
0x1d6d   :  { %v3116_v4 = vpop.xlane.xlu1 %3115 }
0x1d6e   :  { %v3123_v6 = vsub.f32 %v3113_v1, %v3121_v29  ;;  %v3120_v7 = vmul.f32 0.03125, %v3116_v4  ;;  %v9619_v1 = vld [vmem:[#allocation22] ss:$0 sm:$0xff] }
0x1d70   :  { %v3122_v8 = vsub.f32 %v3112_v28, %v3120_v7  ;;  %v3125_v10 = vmul.f32 %v3123_v6, %v3123_v6 }
0x1d72   :  { %v3129_v13 = vsel %vm743_vm3, %v3125_v10, 0.0  ;;  %v3124_v16 = vmul.f32 %v3122_v8, %v3122_v8  ;;  %v3521_v10 = vld [vmem:[%s13931_s25 + $0x10] sm:$0xff] }
0x1d73   :  { %3130 = vadd.xlane.f32.xlu1 %v3129_v13  ;;  %v3520_v13 = vld [vmem:[%s13931_s25 + $0x8] sm:$0xff] }
0x1d74   :  { %v3126_v60 = vsel %vm743_vm3, %v3124_v16, 0.0  ;;  %v3519_v16 = vld [vmem:[%s13931_s25] sm:$0xff] }
0x1d75   :  { %3127 = vadd.xlane.f32.xlu0 %v3126_v60  ;;  %v9613_v60 = vld [vmem:[#allocation17 + $0x1] ss:$0 sm:$0xff] }
0x1dfc   :  { %v3131_v58 = vpop.xlane.xlu1 %3130 }
0x1dfd   :  { %v3133_v23 = vmul.f32 0.03125, %v3131_v58 }
0x1dfe   :  { %v3128_v30 = vpop.xlane.xlu0 %3127 }
0x1dff   :  { %v3135_v15 = vadd.f32 1e-06, %v3133_v23  ;;  %v3132_v31 = vmul.f32 0.03125, %v3128_v30 }
0x1e01   :  { %11335 = vrsqrt.f32 %v3135_v15  ;;  %v3134_v17 = vadd.f32 1e-06, %v3132_v31  ;;  %v9621_v31 = vld [vmem:[#allocation23] ss:$0 sm:$0xff] }
0x1e03   :  { %11337 = vrsqrt.f32 %v3134_v17 }
0x1e0e   :  { %v11336_v32 = vpop.eup %11335 }
0x1e0f   :  { %v3139_v34 = vmul.f32 %v11336_v32, %v3123_v6  ;;  %v9622_v32 = vld [vmem:[#allocation25] ss:$0 sm:$0xff] }
0x1e10   :  { %v11338_v27 = vpop.eup %11337 }
0x1e11   :  { %v3138_v35 = vmul.f32 %v11338_v27, %v3122_v8  ;;  %v3147_v36 = vmul.f32 %v9600_v33, %v3139_v34  ;;  %v3522_v8 = vld [vmem:[%s13931_s25 + $0x18] sm:$0xff] }
0x1e13   :  { %v3146_v40 = vmul.f32 %v9600_v33, %v3138_v35  ;;  %v12954_v41 = vadd.f32 %v9601_v26, %v3147_v36 }
0x1e15   :  { %v12952_v39 = vadd.f32 %v9601_v26, %v3146_v40 }
0x1e17   :  { %10511 = vmatprep.mubr.msk.f32.mxu1 %vm743_vm3, %v12952_v39 }
0x1e18   :  { %10512 = vmatmul.mubr.msk.f32.vlgmr.msra.gmra.mxu1 %vm743_vm3, %v12954_v41 }
0x1e19   :  { %10534 = vmatpush3.msra.mxu1 %v3408_v42  ;;  %10549 = vmatprep.mubr.msk.f32.mxu1 %vm12209_vm13, %v12195_v14  ;;  %v3604_v42 = vld [vmem:[%s13932_s7 + $0x8] sm:$0xff] }
0x1e1a   :  { %10535 = vmatprep.subr.mxu1 %v12195_v14 }
0x1e1b   :  { %10536 = vmatpush3.msra.mxu1 %v3407_v43  ;;  %v3603_v43 = vld [vmem:[%s13932_s7] sm:$0xff] }
0x1e1c   :  { %10537 = vmatprep.subr.mxu1 %v12195_v14 }
0x1e1d   :  { %10538 = vmatpush3.msra.mxu1 %v3406_v46 }
0x1e1e   :  { %10539 = vmatprep.subr.mxu1 %v12195_v14 }
0x1e1f   :  { %10540 = vmatpush3.msra.mxu1 %v3405_v45 }
0x1e20   :  { %10541 = vmatprep.subr.mxu1 %v12195_v14 }
0x1e21   :  { %10542 = vmatpush3.msra.mxu1 %v3404_v47 }
0x1e22   :  { %10543 = vmatprep.subr.mxu1 %v12195_v14 }
0x1e23   :  { %10544 = vmatpush3.msra.mxu1 %v3403_v61 }
0x1e24   :  { %10545 = vmatprep.subr.mxu1 %v12195_v14 }
0x1e25   :  { %10546 = vmatpush3.msra.mxu1 %v3402_v48 }
0x1e26   :  { %10547 = vmatprep.subr.mxu1 %v12195_v14 }
0x1e27   :  { %10548 = vmatpush3.msra.mxu1 %v3401_v44 }
0x1e28   :  { %10550 = vmatmul.mubr.msk.f32.vlgmr.msra.gmra.mxu1 %vm659_vm0, %v9618_v49  ;;  %10563 = vmatprep.subr.mxu1 %v12195_v14  ;;  %v9616_v49 = vld [vmem:[#allocation19 + $0x1] ss:$0 sm:$0xff] }
0x1e29   :  { %10571 = vmatprep.mubr.msk.f32.mxu1 %vm12209_vm13, %v12195_v14 }
0x1ed8   :  { %v10513_v56 = vpop.f32.mrf.mxu1 }
0x1ed9   :  { %v3262_v57 = vadd.f32 %v10513_v56, %v9610_v54 }
0x1eda   :  { %v3256_v59 = vpop.f32.mrf.mxu1 }
0x1edb   :  { %v3257_v62 = vadd.f32 %v9610_v54, %v3256_v59  ;;  %v3266_v63 = vmax.f32 %v3262_v57, 0.0 }
0x1edd   :  { %v3265_v38 = vmax.f32 %v3257_v62, 0.0  ;;  %v9625_v62 = vld [vmem:[#allocation28] ss:$0 sm:$0xff] }
0x1edf   :  { %10530 = vmatprep.mubr.msk.f32.mxu0 %vm659_vm0, %v3265_v38 }
0x1ee0   :  { %10531 = vmatmul.mubr.msk.f32.vlgmr.msra.gmra.mxu0 %vm659_vm0, %v3266_v63 }
0x1ee1   :  { %10560 = vmatprep.mubr.msk.f32.mxu0 %vm12209_vm13, %v12195_v14  ;;  %10553 = vmatpush3.msra.mxu0 %v3522_v8 }
0x1ee2   :  { %10554 = vmatprep.subr.mxu0 %v12195_v14 }
0x1ee3   :  { %10555 = vmatpush3.msra.mxu0 %v3521_v10 }
0x1ee4   :  { %10556 = vmatprep.subr.mxu0 %v12195_v14 }
0x1ee5   :  { %10557 = vmatpush3.msra.mxu0 %v3520_v13 }
0x1ee6   :  { %10558 = vmatprep.subr.mxu0 %v12195_v14 }
0x1ee7   :  { %10559 = vmatpush3.msra.mxu0 %v3519_v16 }
0x1ee8   :  { %v3485_v37 = vpop.f32.mrf.mxu1  ;;  %10574 = vmatprep.subr.mxu0 %v12195_v14 }
0x1ee9   :  { %v3486_v28 = vadd.f32 %v9619_v1, %v3485_v37 }
0x1eea   :  { %v10551_v55 = vpop.f32.mrf.mxu1 }
0x1eeb   :  { %v3492_v53 = vsel %vm3491_vm15, %v3486_v28, 0.0 }
0x1eec   :  { %3493 = vadd.xlane.f32.xlu0 %v3492_v53 }
0x1f75   :  { %v3494_v2 = vpop.xlane.xlu0 %3493 }
0x1f76   :  { %v3495_v29 = vmul.f32 0.03125, %v3494_v2 }
0x1f78   :  { %v3496_v4 = vsub.f32 %v3486_v28, %v3495_v29  ;;  %v3805_v29 = vld [vmem:[%s13933_s10 + $0x18] sm:$0xff] }
0x1f7a   :  { %v3497_v6 = vmul.f32 %v3496_v4, %v3496_v4 }
0x1f7c   :  { %v3498_v7 = vsel %vm3491_vm15, %v3497_v6, 0.0  ;;  %v3803_v6 = vld [vmem:[%s13933_s10 + $0x8] sm:$0xff] }
0x1f7d   :  { %3499 = vadd.xlane.f32.xlu1 %v3498_v7  ;;  %v3802_v7 = vld [vmem:[%s13933_s10] sm:$0xff] }
0x1fa0   :  { %v10532_v24 = vpop.f32.mrf.mxu0 }
0x1fa1   :  { %v3351_v0 = vadd.f32 %v10532_v24, %v9613_v60 }
0x1fa2   :  { %v3345_v18 = vpop.f32.mrf.mxu0 }
0x1fa3   :  { %v3355_v19 = vadd.f32 %v3351_v0, %v12954_v41  ;;  %v3346_v20 = vadd.f32 %v9613_v60, %v3345_v18  ;;  %v3605_v41 = vld [vmem:[%s13932_s7 + $0x10] sm:$0xff] }
0x1fa5   :  { %v3354_v21 = vadd.f32 %v3346_v20, %v12952_v39  ;;  %v3359_v22 = vsel %vm743_vm3, %v3355_v19, 0.0  ;;  %v3606_v39 = vld [vmem:[%s13932_s7 + $0x18] sm:$0xff] }
0x1fa6   :  { %3360 = vadd.xlane.f32.xlu1 %v3359_v22  ;;  %10564 = vmatpush3.msra.mxu1 %v3606_v39  ;;  %v3720_v20 = vld [vmem:[%s13934_s11 + $0x18] sm:$0xff] }
0x1fa7   :  { %v3356_v25 = vsel %vm743_vm3, %v3354_v21, 0.0  ;;  %10565 = vmatprep.subr.mxu1 %v12195_v14 }
0x1fa8   :  { %3357 = vadd.xlane.f32.xlu0 %v3356_v25  ;;  %10566 = vmatpush3.msra.mxu1 %v3605_v41  ;;  %v3718_v25 = vld [vmem:[%s13934_s11 + $0x8] sm:$0xff] }
0x1fa9   :  { %10567 = vmatprep.subr.mxu1 %v12195_v14 }
0x1faa   :  { %10568 = vmatpush3.msra.mxu1 %v3604_v42 }
0x1fab   :  { %10569 = vmatprep.subr.mxu1 %v12195_v14 }
0x1fac   :  { %10570 = vmatpush3.msra.mxu1 %v3603_v43  ;;  %v9629_v43 = vld [vmem:[#allocation32] ss:$0 sm:$0xff] }
0x1fad   :  { %10585 = vmatprep.subr.mxu1 %v3805_v29 }
0x2006   :  { %v3500_v58 = vpop.xlane.xlu1 %3499 }
0x2007   :  { %v3501_v23 = vmul.f32 0.03125, %v3500_v58 }
0x2009   :  { %v3502_v30 = vadd.f32 1e-06, %v3501_v23  ;;  %v3717_v23 = vld [vmem:[%s13934_s11] sm:$0xff] }
0x200b   :  { %11339 = vrsqrt.f32 %v3502_v30 }
0x2018   :  { %v11340_v15 = vpop.eup %11339 }
0x2019   :  { %v3504_v17 = vmul.f32 %v11340_v15, %v3496_v4  ;;  %v3804_v4 = vld [vmem:[%s13933_s10 + $0x10] sm:$0xff] }
0x201b   :  { %v3511_v33 = vmul.f32 %v9621_v31, %v3504_v17 }
0x201d   :  { %v3518_v34 = vadd.f32 %v9622_v32, %v3511_v33  ;;  %v9627_v33 = vld [vmem:[#allocation29] ss:$0 sm:$0xff] }
0x201f   :  { %10561 = vmatmul.mubr.msk.f32.vlgmr.msra.gmra.mxu0 %vm743_vm3, %v3518_v34 }
0x2020   :  { %10582 = vmatprep.mubr.msk.f32.mxu0 %vm12209_vm13, %v12195_v14  ;;  %10575 = vmatpush3.msra.mxu0 %v3720_v20 }
0x2021   :  { %10576 = vmatprep.subr.mxu0 %v12195_v14 }
0x202f   :  { %v3361_v46 = vpop.xlane.xlu1 %3360 }
0x2030   :  { %v3363_v59 = vmul.f32 0.03125, %v3361_v46 }
0x2031   :  { %v3358_v27 = vpop.xlane.xlu0 %3357 }
0x2032   :  { %v3362_v35 = vmul.f32 0.03125, %v3358_v27  ;;  %v3365_v63 = vsub.f32 %v3355_v19, %v3363_v59  ;;  %v9628_v27 = vld [vmem:[#allocation31] ss:$0 sm:$0xff] }
0x2034   :  { %v3364_v36 = vsub.f32 %v3354_v21, %v3362_v35  ;;  %v3367_v53 = vmul.f32 %v3365_v63, %v3365_v63  ;;  %v3719_v21 = vld [vmem:[%s13934_s11 + $0x10] sm:$0xff] }
0x2035   :  { %10577 = vmatpush3.msra.mxu0 %v3719_v21 }
0x2036   :  { %v3366_v26 = vmul.f32 %v3364_v36, %v3364_v36  ;;  %v3371_v2 = vsel %vm743_vm3, %v3367_v53, 0.0  ;;  %10578 = vmatprep.subr.mxu0 %v12195_v14 }
0x2037   :  { %10579 = vmatpush3.msra.mxu0 %v3718_v25 }
0x2038   :  { %v3368_v40 = vsel %vm743_vm3, %v3366_v26, 0.0  ;;  %10580 = vmatprep.subr.mxu0 %v12195_v14  ;;  %v9631_v26 = vld [vmem:[#allocation34] ss:$0 sm:$0xff] }
0x2039   :  { %3369 = vadd.xlane.f32.xlu1 %v3368_v40  ;;  %10581 = vmatpush3.msra.mxu0 %v3717_v23 }
0x203a   :  { %10596 = vmatprep.subr.mxu0 %v12195_v14 }
0x20c2   :  { %v3370_v45 = vpop.xlane.xlu1 %3369 }
0x20c3   :  { %v3374_v47 = vmul.f32 0.03125, %v3370_v45 }
0x20c5   :  { %v3376_v61 = vadd.f32 1e-06, %v3374_v47 }
0x20c7   :  { %11341 = vrsqrt.f32 %v3376_v61 }
0x20d4   :  { %v11342_v48 = vpop.eup %11341 }
0x20d5   :  { %v3380_v44 = vmul.f32 %v11342_v48, %v3364_v36  ;;  %v11435_v48 = vld [vmem:[%s13928_s22] ss:$0 sm:$0xff] }
0x20d6   :  { %vm630_vm1 = vcmp.eq.s32.totalorder %v12638_v5, %v11435_v48 }
0x20d7   :  { %v3388_v3 = vmul.f32 %v9616_v49, %v3380_v44  ;;  %vm631_vm2 = vmand %vm630_vm1, %vm623_vm6 }
0x20d8   :  { %v13075_v44 = vsel %vm631_vm2, 0.0, %v12197_v11 }
0x20d9   :  { %v13017_v57 = vadd.f32 %v9617_v51, %v3388_v3 }
0x20df   :  { %v3599_v52 = vpop.f32.mrf.mxu0 }
0x20e0   :  { %v3600_v54 = vadd.f32 %v9623_v50, %v3599_v52 }
0x20e1   :  { %v10562_v56 = vpop.f32.mrf.mxu0 }
0x20e2   :  { %10572 = vmatmul.mubr.msk.f32.vlgmr.msra.gmra.mxu1 %vm743_vm3, %v3600_v54 }
0x20e3   :  { %10593 = vmatprep.mubr.msk.f32.mxu1 %vm743_vm3, %v13017_v57  ;;  %10586 = vmatpush3.msra.mxu1 %v3805_v29 }
0x20e4   :  { %10587 = vmatprep.subr.mxu1 %v3804_v4 }
0x20e5   :  { %10588 = vmatpush3.msra.mxu1 %v3804_v4 }
0x20e6   :  { %10589 = vmatprep.subr.mxu1 %v3803_v6 }
0x20e7   :  { %10590 = vmatpush3.msra.mxu1 %v3803_v6 }
0x20e8   :  { %10591 = vmatprep.subr.mxu1 %v3802_v7 }
0x20e9   :  { %10592 = vmatpush3.msra.mxu1 %v3802_v7 }
0x20ea   :  { %10603 = vmatprep.subr.mxu1 %v12195_v14 }
0x21a2   :  { %v3683_v38 = vpop.f32.mrf.mxu1 }
0x21a3   :  { %v3684_v1 = vadd.f32 %v9625_v62, %v3683_v38 }
0x21a4   :  { %v10573_v37 = vpop.f32.mrf.mxu1 }
0x21a5   :  { %v3687_v28 = vadd.f32 %v3684_v1, %v3518_v34 }
0x21a7   :  { %v3690_v55 = vsel %vm3491_vm15, %v3687_v28, 0.0 }
0x21a8   :  { %3691 = vadd.xlane.f32.xlu0 %v3690_v55 }
0x21ac   :  { %3372 = vadd.xlane.f32.xlu0 %v3371_v2 }
0x2231   :  { %v3692_v8 = vpop.xlane.xlu0 %3691 }
0x2232   :  { %v3693_v10 = vmul.f32 0.03125, %v3692_v8 }
0x2234   :  { %v3694_v13 = vsub.f32 %v3687_v28, %v3693_v10 }
0x2235   :  { %v3373_v16 = vpop.xlane.xlu0 %3372 }
0x2236   :  { %v3375_v60 = vmul.f32 0.03125, %v3373_v16  ;;  %v3695_v24 = vmul.f32 %v3694_v13, %v3694_v13 }
0x2238   :  { %v3377_v0 = vadd.f32 1e-06, %v3375_v60  ;;  %v3696_v18 = vsel %vm3491_vm15, %v3695_v24, 0.0 }
0x2239   :  { %3697 = vadd.xlane.f32.xlu1 %v3696_v18 }
0x223a   :  { %11343 = vrsqrt.f32 %v3377_v0 }
0x2247   :  { %v11344_v19 = vpop.eup %11343 }
0x2248   :  { %v3381_v22 = vmul.f32 %v11344_v19, %v3365_v63 }
0x224a   :  { %v3389_v58 = vmul.f32 %v9616_v49, %v3381_v22 }
0x224c   :  { %v13036_v30 = vadd.f32 %v9617_v51, %v3389_v58 }
0x224e   :  { %10594 = vmatmul.mubr.msk.f32.vlgmr.msra.gmra.mxu1 %vm743_vm3, %v13036_v30 }
0x224f   :  { %10607 = vmatprep.mubr.msk.f32.mxu1 %vm12209_vm13, %v12195_v14 }
0x22c2   :  { %v3698_v15 = vpop.xlane.xlu1 %3697 }
0x22c3   :  { %v3699_v31 = vmul.f32 0.03125, %v3698_v15 }
0x22c5   :  { %v3700_v17 = vadd.f32 1e-06, %v3699_v31 }
0x22c7   :  { %11345 = vrsqrt.f32 %v3700_v17 }
0x22d4   :  { %v11346_v32 = vpop.eup %11345 }
0x22d5   :  { %v3702_v34 = vmul.f32 %v11346_v32, %v3694_v13 }
0x22d7   :  { %v3709_v35 = vmul.f32 %v9627_v33, %v3702_v34 }
0x22d9   :  { %v13044_v36 = vadd.f32 %v9628_v27, %v3709_v35 }
0x22db   :  { %10583 = vmatmul.mubr.msk.f32.vlgmr.msra.gmra.mxu0 %vm743_vm3, %v13044_v36 }
0x22dc   :  { %10600 = vmatprep.mubr.msk.f32.mxu0 %vm12209_vm13, %v12195_v14 }
0x230e   :  { %v10595_v40 = vpop.f32.mrf.mxu1 }
0x230f   :  { %v13050_v39 = vadd.f32 %v10595_v40, %v9631_v26 }
0x2310   :  { %v3885_v41 = vpop.f32.mrf.mxu1 }
0x2311   :  { %v13052_v42 = vadd.f32 %v9631_v26, %v3885_v41  ;;  %10597 = vmatpush3.xpose.msk.msra.mxu0 %vm894_vm4, %v13050_v39 }
0x2312   :  { %10598 = vmatprep.subr.mxu0 %v12195_v14 }
0x2313   :  { %3992 = vrot.lane.b32.xlu1 %v13052_v42, %s12196_s20 }
0x2315   :  { %10599 = vmatpush3.xpose.msk.msra.mxu0 %vm894_vm4, %v13052_v42 }
0x2316   :  { %10617 = vmatprep.subr.mxu0 %v12195_v14 }
0x2317   :  { %4075 = vrot.lane.b32.xlu1 %v13050_v39, %s12200_s13 }
0x2385   :  { %v3993_v11 = vpop.permute.xlu1 %3992 }
0x2389   :  { %v4076_v62 = vpop.permute.xlu1 %4075 }
0x239b   :  { %v3797_v46 = vpop.f32.mrf.mxu0 }
0x239c   :  { %v3798_v45 = vadd.f32 %v9629_v43, %v3797_v46 }
0x239d   :  { %v10584_v47 = vpop.f32.mrf.mxu0 }
0x239e   :  { %v13064_v61 = vmul.f32 0.35355338, %v3798_v45 }
0x23a0   :  { %10601 = vmatmul.mubr.msk.f32.vlgmr.msra.gmra.mxu0 %vm894_vm4, %v13064_v61 }
0x23a1   :  { %10621 = vmatprep.mubr.msk.f32.mxu0 %vm12209_vm13, %v12195_v14 }
0x2460   :  { %v3976_v49 = vpop.f32.mrf.mxu0 }
0x2461   :  { %v3977_v50 = vadd.f32 %v3976_v49, %v13075_v44 }
0x2462   :  { %v10602_v3 = vpop.f32.mrf.mxu0 }
0x2463   :  { %v3981_v51 = vsel %vm3980_vm5, %v3977_v50, -inf }
0x2464   :  { %3982 = vmax.xlane.f32.xlu0 %v3981_v51 }
0x247a   :  { %3994 = vrot.lane.b32.xlu0 %v13050_v39, %s12196_s20 }
0x247e   :  { %4073 = vrot.lane.b32.xlu0 %v13052_v42, %s12200_s13 }
0x24ed   :  { %v3983_v5 = vpop.xlane.xlu0 %3982 }
0x24ee   :  { %v3984_v9 = vsub.f32 %v3977_v50, %v3983_v5 }
0x24f0   :  { %v3985_v52 = vmul.f32 1.442695, %v3984_v9 }
0x24f1   :  { %v3995_v54 = vpop.permute.xlu0 %3994 }
0x24f2   :  { %11347 = vpow2.f32 %v3985_v52  ;;  %10604 = vmatpush3.msra.mxu1 %v3995_v54 }
0x24f3   :  { %10605 = vmatprep.subr.mxu1 %v12195_v14 }
0x24f4   :  { %10606 = vmatpush3.msra.mxu1 %v3993_v11 }
0x24f5   :  { %10610 = vmatprep.subr.mxu1 %v12195_v14  ;;  %v4074_v37 = vpop.permute.xlu0 %4073 }
0x24ff   :  { %v11348_v56 = vpop.eup %11347 }
0x2500   :  { %v3987_v59 = vsel %vm3980_vm5, %v11348_v56, 0.0 }
0x2501   :  { %3988 = vadd.xlane.f32.xlu1 %v3987_v59 }
0x2512   :  { %4071 = vrot.lane.b32.xlu1 %v13064_v61, %s12200_s13 }
0x2516   :  { %4164 = vrot.lane.b32.xlu1 %v13052_v42, %s12198_s8 }
0x258a   :  { %v3989_v38 = vpop.xlane.xlu1 %3988 }
0x258b   :  { %11349 = vrcp.f32 %v3989_v38 }
0x258e   :  { %v4072_v28 = vpop.permute.xlu1 %4071 }
0x2592   :  { %v4165_v16 = vpop.permute.xlu1 %4164 }
0x2598   :  { %v11350_v63 = vpop.eup %11349 }
0x2599   :  { %v3991_v1 = vmul.f32 %v11350_v63, %v11348_v56 }
0x259b   :  { %10608 = vmatmul.mubr.msk.f32.vlgmr.msra.gmra.mxu1 %vm980_vm11, %v3991_v1  ;;  %v3897_v1 = vld [vmem:[%s13935_s6 + $0x18] sm:$0xff] }
0x259c   :  { %10611 = vmatpush3.xpose.msk.msra.mxu1 %vm894_vm4, %v4076_v62  ;;  %10614 = vmatprep.mubr.msk.f32.mxu1 %vm12209_vm13, %v12195_v14 }
0x259d   :  { %10612 = vmatprep.subr.mxu1 %v12195_v14 }
0x25a0   :  { %10613 = vmatpush3.xpose.msk.msra.mxu1 %vm894_vm4, %v4074_v37  ;;  %v3896_v37 = vld [vmem:[%s13935_s6 + $0x10] sm:$0xff] }
0x25a1   :  { %10631 = vmatprep.subr.mxu1 %v12195_v14 }
0x25a3   :  { %10615 = vmatmul.mubr.msk.f32.vlgmr.msra.gmra.mxu1 %vm894_vm4, %v4072_v28  ;;  %v3894_v28 = vld [vmem:[%s13935_s6] sm:$0xff] }
0x25a4   :  { %10635 = vmatprep.mubr.msk.f32.mxu1 %vm12209_vm13, %v12195_v14 }
0x265b   :  { %v13100_v55 = vpop.f32.mrf.mxu1 }
0x265d   :  { %v10609_v53 = vpop.f32.mrf.mxu1 }
0x2663   :  { %v4149_v2 = vpop.f32.mrf.mxu1 }
0x2664   :  { %v4150_v29 = vadd.f32 %v4149_v2, %v13075_v44 }
0x2665   :  { %v10616_v4 = vpop.f32.mrf.mxu1 }
0x2666   :  { %v4153_v6 = vsel %vm3980_vm5, %v4150_v29, -inf }
0x2667   :  { %4154 = vmax.xlane.f32.xlu0 %v4153_v6 }
0x267d   :  { %4166 = vrot.lane.b32.xlu0 %v13050_v39, %s12198_s8 }
0x2681   :  { %4247 = vrot.lane.b32.xlu0 %v13050_v39, %s12203_s9 }
0x2685   :  { %4243 = vrot.lane.b32.xlu0 %v13064_v61, %s12203_s9 }
0x26f0   :  { %v4155_v7 = vpop.xlane.xlu0 %4154 }
0x26f1   :  { %v4156_v8 = vsub.f32 %v4150_v29, %v4155_v7 }
0x26f3   :  { %v4157_v10 = vmul.f32 1.442695, %v4156_v8 }
0x26f4   :  { %v4167_v13 = vpop.permute.xlu0 %4166 }
0x26f5   :  { %11351 = vpow2.f32 %v4157_v10  ;;  %10618 = vmatpush3.msra.mxu0 %v4167_v13  ;;  %v9650_v13 = vld [vmem:[#allocation35] ss:$0 sm:$0xff] }
0x26f6   :  { %10619 = vmatprep.subr.mxu0 %v12195_v14 }
0x26f7   :  { %10620 = vmatpush3.msra.mxu0 %v4165_v16 }
0x26f8   :  { %10624 = vmatprep.subr.mxu0 %v12195_v14  ;;  %v4248_v20 = vpop.permute.xlu0 %4247 }
0x26fc   :  { %v4244_v22 = vpop.permute.xlu0 %4243 }
0x2702   :  { %v11352_v60 = vpop.eup %11351 }
0x2703   :  { %v4159_v24 = vsel %vm3980_vm5, %v11352_v60, 0.0 }
0x2704   :  { %4160 = vadd.xlane.f32.xlu1 %v4159_v24 }
0x2715   :  { %4245 = vrot.lane.b32.xlu1 %v13052_v42, %s12203_s9 }
0x278d   :  { %v4161_v0 = vpop.xlane.xlu1 %4160 }
0x278e   :  { %11353 = vrcp.f32 %v4161_v0 }
0x2791   :  { %v4246_v21 = vpop.permute.xlu1 %4245 }
0x279b   :  { %v11354_v18 = vpop.eup %11353 }
0x279c   :  { %v4163_v19 = vmul.f32 %v11354_v18, %v11352_v60 }
0x279e   :  { %10622 = vmatmul.mubr.msk.f32.vlgmr.msra.gmra.mxu0 %vm980_vm11, %v4163_v19 }
0x279f   :  { %10625 = vmatpush3.xpose.msk.msra.mxu0 %vm894_vm4, %v4248_v20  ;;  %10628 = vmatprep.mubr.msk.f32.mxu0 %vm12209_vm13, %v12195_v14 }
0x27a0   :  { %10626 = vmatprep.subr.mxu0 %v12195_v14 }
0x27a3   :  { %10627 = vmatpush3.xpose.msk.msra.mxu0 %vm894_vm4, %v4246_v21 }
0x27a4   :  { %10645 = vmatprep.subr.mxu0 %v12195_v14 }
0x27a6   :  { %10629 = vmatmul.mubr.msk.f32.vlgmr.msra.gmra.mxu0 %vm894_vm4, %v4244_v22 }
0x27a7   :  { %10649 = vmatprep.mubr.msk.f32.mxu0 %vm12209_vm13, %v12195_v14 }
0x285e   :  { %v4239_v25 = vpop.f32.mrf.mxu0 }
0x2860   :  { %v10623_v58 = vpop.f32.mrf.mxu0 }
0x2861   :  { %v4711_v58 = vld [vmem:[%s13936_s4 + $0x10] sm:$0xff] }
0x2866   :  { %v4321_v23 = vpop.f32.mrf.mxu0 }
0x2867   :  { %v4322_v15 = vadd.f32 %v4321_v23, %v13075_v44  ;;  %v4709_v23 = vld [vmem:[%s13936_s4] sm:$0xff] }
0x2868   :  { %v10630_v31 = vpop.f32.mrf.mxu0 }
0x2869   :  { %v4325_v17 = vsel %vm3980_vm5, %v4322_v15, -inf  ;;  %v4720_v31 = vld [vmem:[%s13937_s17 + $0x30] sm:$0xff] }
0x286a   :  { %4326 = vmax.xlane.f32.xlu1 %v4325_v17  ;;  %v4719_v17 = vld [vmem:[%s13937_s17 + $0x28] sm:$0xff] }
0x287b   :  { %4336 = vrot.lane.b32.xlu1 %v13052_v42, %s12202_s21 }
0x287f   :  { %4419 = vrot.lane.b32.xlu1 %v13050_v39, %s12206_s24 }
0x2883   :  { %4415 = vrot.lane.b32.xlu1 %v13064_v61, %s12206_s24 }
0x28f3   :  { %v4327_v32 = vpop.xlane.xlu1 %4326 }
0x28f4   :  { %v4328_v33 = vsub.f32 %v4322_v15, %v4327_v32  ;;  %v4721_v15 = vld [vmem:[%s13937_s17 + $0x38] sm:$0xff]  ;;  %v4718_v32 = vld [vmem:[%s13937_s17 + $0x20] sm:$0xff] }
0x28f6   :  { %v4329_v34 = vmul.f32 1.442695, %v4328_v33  ;;  %v4717_v33 = vld [vmem:[%s13937_s17 + $0x18] sm:$0xff] }
0x28f7   :  { %v4337_v41 = vpop.permute.xlu1 %4336 }
0x28f8   :  { %11355 = vpow2.f32 %v4329_v34 }
0x28fb   :  { %v4420_v45 = vpop.permute.xlu1 %4419 }
0x28ff   :  { %v4416_v61 = vpop.permute.xlu1 %4415 }
0x2905   :  { %v11356_v27 = vpop.eup %11355 }
0x2906   :  { %v4331_v35 = vsel %vm3980_vm5, %v11356_v27, 0.0 }
0x2907   :  { %4332 = vadd.xlane.f32.xlu0 %v4331_v35 }
0x291d   :  { %4338 = vrot.lane.b32.xlu0 %v13050_v39, %s12202_s21 }
0x2921   :  { %4417 = vrot.lane.b32.xlu0 %v13052_v42, %s12206_s24 }
0x2990   :  { %v4333_v26 = vpop.xlane.xlu0 %4332 }
0x2991   :  { %11357 = vrcp.f32 %v4333_v26 }
0x2994   :  { %v4339_v40 = vpop.permute.xlu0 %4338 }
0x2995   :  { %10632 = vmatpush3.msra.mxu1 %v4339_v40  ;;  %v9652_v40 = vld [vmem:[#allocation37] ss:$0 sm:$0xff] }
0x2996   :  { %10633 = vmatprep.subr.mxu1 %v12195_v14 }
0x2997   :  { %10634 = vmatpush3.msra.mxu1 %v4337_v41 }
0x2998   :  { %10638 = vmatprep.subr.mxu1 %v12195_v14  ;;  %v4418_v47 = vpop.permute.xlu0 %4417 }
0x299e   :  { %v11358_v43 = vpop.eup %11357 }
0x299f   :  { %v4335_v46 = vmul.f32 %v11358_v43, %v11356_v27  ;;  %v9653_v43 = vld [vmem:[#allocation38] ss:$0 sm:$0xff] }
0x29a1   :  { %10636 = vmatmul.mubr.msk.f32.vlgmr.msra.gmra.mxu1 %vm980_vm11, %v4335_v46 }
0x29a2   :  { %10639 = vmatpush3.xpose.msk.msra.mxu1 %vm894_vm4, %v4420_v45  ;;  %10642 = vmatprep.mubr.msk.f32.mxu1 %vm12209_vm13, %v12195_v14 }
0x29a3   :  { %10640 = vmatprep.subr.mxu1 %v12195_v14 }
0x29a6   :  { %10641 = vmatpush3.xpose.msk.msra.mxu1 %vm894_vm4, %v4418_v47  ;;  %v4716_v47 = vld [vmem:[%s13937_s17 + $0x10] sm:$0xff] }
0x29a7   :  { %10663 = vmatprep.subr.mxu1 %v12195_v14 }
0x29a9   :  { %10643 = vmatmul.mubr.msk.f32.vlgmr.msra.gmra.mxu1 %vm894_vm4, %v4416_v61  ;;  %v4715_v61 = vld [vmem:[%s13937_s17 + $0x8] sm:$0xff] }
0x29aa   :  { %10671 = vmatprep.mubr.msk.f32.mxu1 %vm12209_vm13, %v12195_v14 }
0x2a61   :  { %v4411_v48 = vpop.f32.mrf.mxu1 }
0x2a63   :  { %v10637_v49 = vpop.f32.mrf.mxu1 }
0x2a64   :  { %v9654_v49 = vld [vmem:[#allocation40] ss:$0 sm:$0xff] }
0x2a69   :  { %v4493_v50 = vpop.f32.mrf.mxu1 }
0x2a6a   :  { %v4494_v3 = vadd.f32 %v4493_v50, %v13075_v44 }
0x2a6b   :  { %v10644_v51 = vpop.f32.mrf.mxu1 }
0x2a6c   :  { %v4497_v5 = vsel %vm3980_vm5, %v4494_v3, -inf }
0x2a6d   :  { %4498 = vmax.xlane.f32.xlu0 %v4497_v5 }
0x2a83   :  { %4510 = vrot.lane.b32.xlu0 %v13050_v39, %s12205_s30 }
0x2a87   :  { %4588 = vrot.lane.b32.xlu0 %v4239_v25, %s12163_s16  ;;  %v4712_v25 = vld [vmem:[%s13936_s4 + $0x18] sm:$0xff] }
0x2a88   :  { %10664 = vmatpush3.msra.mxu1 %v4712_v25  ;;  %v9682_v25 = vld [vmem:[%s13933_s10 + $0x30] sm:$0xff] }
0x2a89   :  { %10665 = vmatprep.subr.mxu1 %v12195_v14 }
0x2a8a   :  { %10666 = vmatpush3.msra.mxu1 %v4711_v58  ;;  %v9681_v58 = vld [vmem:[%s13933_s10 + $0x28] sm:$0xff] }
0x2a8b   :  { %10667 = vmatprep.subr.mxu1 %v12195_v14 }
0x2af6   :  { %v4499_v9 = vpop.xlane.xlu0 %4498 }
0x2af7   :  { %v4500_v52 = vsub.f32 %v4494_v3, %v4499_v9  ;;  %v9656_v9 = vld [vmem:[#allocation41] ss:$0 sm:$0xff] }
0x2af9   :  { %v4501_v54 = vmul.f32 1.442695, %v4500_v52 }
0x2afa   :  { %v4511_v11 = vpop.permute.xlu0 %4510 }
0x2afb   :  { %11359 = vpow2.f32 %v4501_v54  ;;  %10646 = vmatpush3.msra.mxu0 %v4511_v11 }
0x2afc   :  { %10647 = vmatprep.subr.mxu0 %v12195_v14 }
0x2afe   :  { %v4589_v29 = vpop.permute.xlu0 %4588 }
0x2aff   :  { %v4599_v6 = vsel %vm894_vm4, %v13100_v55, %v4589_v29 }
0x2b08   :  { %v11360_v56 = vpop.eup %11359 }
0x2b09   :  { %v4503_v59 = vsel %vm3980_vm5, %v11360_v56, 0.0 }
0x2b0a   :  { %4504 = vadd.xlane.f32.xlu1 %v4503_v59 }
0x2b1b   :  { %4508 = vrot.lane.b32.xlu1 %v13052_v42, %s12205_s30  ;;  %v3895_v42 = vld [vmem:[%s13935_s6 + $0x8] sm:$0xff] }
0x2b1f   :  { %4592 = vrot.lane.b32.xlu1 %v4411_v48, %s12166_s0  ;;  %v4714_v48 = vld [vmem:[%s13937_s17] sm:$0xff] }
0x2b93   :  { %v4505_v39 = vpop.xlane.xlu1 %4504 }
0x2b94   :  { %11361 = vrcp.f32 %v4505_v39 }
0x2b97   :  { %v4509_v62 = vpop.permute.xlu1 %4508 }
0x2b98   :  { %10648 = vmatpush3.msra.mxu0 %v4509_v62 }
0x2b99   :  { %10652 = vmatprep.subr.mxu0 %v12195_v14 }
0x2b9b   :  { %v4593_v4 = vpop.permute.xlu1 %4592 }
0x2b9c   :  { %v4600_v7 = vsel %vm980_vm11, %v4599_v6, %v4593_v4 }
0x2ba1   :  { %v11362_v38 = vpop.eup %11361 }
0x2ba2   :  { %v4507_v63 = vmul.f32 %v11362_v38, %v11360_v56 }
0x2ba4   :  { %10650 = vmatmul.mubr.msk.f32.vlgmr.msra.gmra.mxu0 %vm980_vm11, %v4507_v63 }
0x2ba5   :  { %10660 = vmatprep.mubr.msk.f32.mxu0 %vm12209_vm13, %v12195_v14  ;;  %10653 = vmatpush3.msra.mxu0 %v3897_v1 }
0x2ba6   :  { %10654 = vmatprep.subr.mxu0 %v12195_v14 }
0x2ba7   :  { %10655 = vmatpush3.msra.mxu0 %v3896_v37  ;;  %v9663_v37 = vld [vmem:[%s13931_s25 + $0x38] sm:$0xff] }
0x2ba8   :  { %10656 = vmatprep.subr.mxu0 %v12195_v14 }
0x2ba9   :  { %10657 = vmatpush3.msra.mxu0 %v3895_v42  ;;  %v9662_v42 = vld [vmem:[%s13931_s25 + $0x30] sm:$0xff] }
0x2baa   :  { %10658 = vmatprep.subr.mxu0 %v12195_v14 }
0x2bab   :  { %10659 = vmatpush3.msra.mxu0 %v3894_v28  ;;  %v9661_v28 = vld [vmem:[%s13931_s25 + $0x28] sm:$0xff] }
0x2bac   :  { %10674 = vmatprep.subr.mxu0 %v12195_v14 }
0x2c64   :  { %v4583_v53 = vpop.f32.mrf.mxu0 }
0x2c65   :  { %4596 = vrot.lane.b32.xlu0 %v4583_v53, %s12208_s12  ;;  %v9660_v53 = vld [vmem:[%s13931_s25 + $0x20] sm:$0xff] }
0x2c66   :  { %v10651_v2 = vpop.f32.mrf.mxu0 }
0x2cd7   :  { %v4597_v8 = vpop.permute.xlu0 %4596 }
0x2cd8   :  { %v4601_v10 = vsel %vm1718_vm12, %v4600_v7, %v4597_v8  ;;  %v9658_v7 = vld [vmem:[#allocation43] ss:$0 sm:$0xff] }
0x2cd9   :  { %10661 = vmatmul.mubr.msk.f32.vlgmr.msra.gmra.mxu0 %vm743_vm3, %v4601_v10  ;;  %v9659_v10 = vld [vmem:[#allocation44] ss:$0 sm:$0xff] }
0x2cda   :  { %10690 = vmatprep.mubr.msk.f32.mxu0 %vm12209_vm13, %v12195_v14  ;;  %10675 = vmatpush3.msra.mxu0 %v4721_v15 }
0x2cdb   :  { %10676 = vmatprep.subr.mxu0 %v12195_v14 }
0x2cdc   :  { %10677 = vmatpush3.msra.mxu0 %v4720_v31 }
0x2cdd   :  { %10678 = vmatprep.subr.mxu0 %v12195_v14 }
0x2cde   :  { %10679 = vmatpush3.msra.mxu0 %v4719_v17 }
0x2cdf   :  { %10680 = vmatprep.subr.mxu0 %v12195_v14 }
0x2ce0   :  { %10681 = vmatpush3.msra.mxu0 %v4718_v32 }
0x2ce1   :  { %10682 = vmatprep.subr.mxu0 %v12195_v14 }
0x2ce2   :  { %10683 = vmatpush3.msra.mxu0 %v4717_v33 }
0x2ce3   :  { %10684 = vmatprep.subr.mxu0 %v12195_v14 }
0x2ce4   :  { %10685 = vmatpush3.msra.mxu0 %v4716_v47  ;;  %v9677_v47 = vld [vmem:[%s13934_s11 + $0x38] sm:$0xff] }
0x2ce5   :  { %10686 = vmatprep.subr.mxu0 %v12195_v14 }
0x2ce6   :  { %10687 = vmatpush3.msra.mxu0 %v4715_v61  ;;  %v9676_v61 = vld [vmem:[%s13934_s11 + $0x30] sm:$0xff] }
0x2ce7   :  { %10688 = vmatprep.subr.mxu0 %v12195_v14 }
0x2ce8   :  { %10689 = vmatpush3.msra.mxu0 %v4714_v48 }
0x2ce9   :  { %10715 = vmatprep.subr.mxu0 %v12195_v14 }
0x2d99   :  { %v4677_v16 = vpop.f32.mrf.mxu0 }
0x2d9a   :  { %v4678_v60 = vadd.f32 %v9650_v13, %v4677_v16 }
0x2d9b   :  { %v10662_v24 = vpop.f32.mrf.mxu0 }
0x2d9c   :  { %v4681_v0 = vadd.f32 %v4678_v60, %v13044_v36  ;;  %v4710_v36 = vld [vmem:[%s13936_s4 + $0x8] sm:$0xff]  ;;  %v9669_v60 = vld [vmem:[%s13932_s7 + $0x38] sm:$0xff]  ;;  %v9668_v24 = vld [vmem:[%s13932_s7 + $0x30] sm:$0xff] }
0x2d9d   :  { %10668 = vmatpush3.msra.mxu1 %v4710_v36  ;;  %v9680_v36 = vld [vmem:[%s13933_s10 + $0x20] sm:$0xff] }
0x2d9e   :  { %v4682_v55 = vsel %vm3491_vm15, %v4681_v0, 0.0  ;;  %10669 = vmatprep.subr.mxu1 %v12195_v14 }
0x2d9f   :  { %4683 = vadd.xlane.f32.xlu1 %v4682_v55  ;;  %10670 = vmatpush3.msra.mxu1 %v4709_v23  ;;  %v9666_v55 = vld [vmem:[%s13932_s7 + $0x20] sm:$0xff]  ;;  %v9670_v23 = vld [vmem:[#allocation28 + $0x1] ss:$0 sm:$0xff] }
0x2da0   :  { %10693 = vmatprep.subr.mxu1 %v12195_v14 }
0x2e28   :  { %v4684_v18 = vpop.xlane.xlu1 %4683 }
0x2e29   :  { %v4685_v19 = vmul.f32 0.03125, %v4684_v18  ;;  %v9683_v18 = vld [vmem:[%s13933_s10 + $0x38] sm:$0xff] }
0x2e2b   :  { %v4686_v20 = vsub.f32 %v4681_v0, %v4685_v19  ;;  %v9667_v0 = vld [vmem:[%s13932_s7 + $0x28] sm:$0xff]  ;;  %v9664_v19 = vld [vmem:[#allocation26 + $0x1] ss:$0 sm:$0xff] }
0x2e2d   :  { %v4687_v21 = vmul.f32 %v4686_v20, %v4686_v20 }
0x2e2f   :  { %v4688_v22 = vsel %vm3491_vm15, %v4687_v21, 0.0 }
0x2e30   :  { %4689 = vadd.xlane.f32.xlu0 %v4688_v22 }
0x2eb9   :  { %v4690_v34 = vpop.xlane.xlu0 %4689 }
0x2eba   :  { %v4691_v27 = vmul.f32 0.03125, %v4690_v34 }
0x2ebc   :  { %v4692_v35 = vadd.f32 1e-06, %v4691_v27 }
0x2ebe   :  { %11363 = vrsqrt.f32 %v4692_v35 }
0x2ecb   :  { %v11364_v26 = vpop.eup %11363 }
0x2ecc   :  { %v4694_v41 = vmul.f32 %v11364_v26, %v4686_v20 }
0x2ece   :  { %v4701_v46 = vmul.f32 %v9652_v40, %v4694_v41 }
0x2ed0   :  { %v4708_v45 = vadd.f32 %v9653_v43, %v4701_v46  ;;  %v9684_v46 = vld [vmem:[#allocation34 + $0x1] ss:$0 sm:$0xff] }
0x2ed2   :  { %10672 = vmatmul.mubr.msk.f32.vlgmr.msra.gmra.mxu1 %vm743_vm3, %v4708_v45 }
0x2ed3   :  { %10701 = vmatprep.mubr.msk.f32.mxu1 %vm12209_vm13, %v12195_v14  ;;  %10694 = vmatpush3.msra.mxu1 %v9663_v37 }
0x2ed4   :  { %10695 = vmatprep.subr.mxu1 %v12195_v14 }
0x2ed5   :  { %10696 = vmatpush3.msra.mxu1 %v9662_v42 }
0x2ed6   :  { %10697 = vmatprep.subr.mxu1 %v12195_v14 }
0x2ed7   :  { %10698 = vmatpush3.msra.mxu1 %v9661_v28 }
0x2ed8   :  { %10699 = vmatprep.subr.mxu1 %v12195_v14 }
0x2ed9   :  { %10700 = vmatpush3.msra.mxu1 %v9660_v53 }
0x2eda   :  { %10704 = vmatprep.subr.mxu1 %v12195_v14 }
0x2f92   :  { %v4800_v50 = vpop.f32.mrf.mxu1 }
0x2f93   :  { %v4801_v3 = vadd.f32 %v9654_v49, %v4800_v50  ;;  %v9675_v49 = vld [vmem:[%s13934_s11 + $0x28] sm:$0xff]  ;;  %v9674_v50 = vld [vmem:[%s13934_s11 + $0x20] sm:$0xff] }
0x2f94   :  { %v10673_v51 = vpop.f32.mrf.mxu1 }
0x2f95   :  { %v4804_v5 = vmax.f32 %v4801_v3, 0.0 }
0x2f97   :  { %10691 = vmatmul.mubr.msk.f32.vlgmr.msra.gmra.mxu0 %vm659_vm0, %v4804_v5 }
0x2f98   :  { %10723 = vmatprep.mubr.msk.f32.mxu0 %vm12209_vm13, %v12195_v14  ;;  %10716 = vmatpush3.msra.mxu0 %v9677_v47 }
0x2f99   :  { %10717 = vmatprep.subr.mxu0 %v12195_v14 }
0x2f9a   :  { %10718 = vmatpush3.msra.mxu0 %v9676_v61 }
0x2f9b   :  { %10719 = vmatprep.subr.mxu0 %v12195_v14 }
0x2f9c   :  { %10720 = vmatpush3.msra.mxu0 %v9675_v49 }
0x2f9d   :  { %10721 = vmatprep.subr.mxu0 %v12195_v14 }
0x2f9e   :  { %10722 = vmatpush3.msra.mxu0 %v9674_v50 }
0x2f9f   :  { %10737 = vmatprep.subr.mxu0 %v12195_v14 }
0x3057   :  { %v4880_v52 = vpop.f32.mrf.mxu0 }
0x3058   :  { %v4881_v54 = vadd.f32 %v9656_v9, %v4880_v52  ;;  %v9672_v52 = vld [vmem:[#allocation29 + $0x1] ss:$0 sm:$0xff] }
0x3059   :  { %v10692_v11 = vpop.f32.mrf.mxu0 }
0x305a   :  { %v4884_v56 = vadd.f32 %v4881_v54, %v4708_v45  ;;  %v9673_v11 = vld [vmem:[#allocation31 + $0x1] ss:$0 sm:$0xff] }
0x305c   :  { %v4885_v59 = vsel %vm3491_vm15, %v4884_v56, 0.0 }
0x305d   :  { %4886 = vadd.xlane.f32.xlu0 %v4885_v59 }
0x30e6   :  { %v4887_v39 = vpop.xlane.xlu0 %4886 }
0x30e7   :  { %v4888_v62 = vmul.f32 0.03125, %v4887_v39  ;;  %v9678_v39 = vld [vmem:[#allocation32 + $0x1] ss:$0 sm:$0xff] }
0x30e9   :  { %v4889_v38 = vsub.f32 %v4884_v56, %v4888_v62 }
0x30eb   :  { %v4890_v63 = vmul.f32 %v4889_v38, %v4889_v38 }
0x30ed   :  { %v4891_v1 = vsel %vm3491_vm15, %v4890_v63, 0.0 }
0x30ee   :  { %4892 = vadd.xlane.f32.xlu1 %v4891_v1 }
0x3177   :  { %v4893_v2 = vpop.xlane.xlu1 %4892 }
0x3178   :  { %v4894_v29 = vmul.f32 0.03125, %v4893_v2 }
0x317a   :  { %v4895_v4 = vadd.f32 1e-06, %v4894_v29 }
0x317c   :  { %11365 = vrsqrt.f32 %v4895_v4 }
0x3189   :  { %v11366_v6 = vpop.eup %11365 }
0x318a   :  { %v4897_v8 = vmul.f32 %v11366_v6, %v4889_v38 }
0x318c   :  { %v4904_v13 = vmul.f32 %v9658_v7, %v4897_v8 }
0x318e   :  { %v4911_v16 = vadd.f32 %v9659_v10, %v4904_v13 }
0x3190   :  { %10702 = vmatmul.mubr.msk.f32.vlgmr.msra.gmra.mxu1 %vm743_vm3, %v4911_v16 }
0x3191   :  { %10705 = vmatpush3.msra.mxu1 %v9669_v60  ;;  %10712 = vmatprep.mubr.msk.f32.mxu1 %vm12209_vm13, %v12195_v14 }
0x3192   :  { %10706 = vmatprep.subr.mxu1 %v12195_v14 }
0x3193   :  { %10707 = vmatpush3.msra.mxu1 %v9668_v24 }
0x3194   :  { %10708 = vmatprep.subr.mxu1 %v12195_v14 }
0x3195   :  { %10709 = vmatpush3.msra.mxu1 %v9667_v0 }
0x3196   :  { %10710 = vmatprep.subr.mxu1 %v12195_v14 }
0x3197   :  { %10711 = vmatpush3.msra.mxu1 %v9666_v55 }
0x3198   :  { %10726 = vmatprep.subr.mxu1 %v9683_v18 }
0x3250   :  { %v4994_v20 = vpop.f32.mrf.mxu1 }
0x3251   :  { %v4995_v21 = vadd.f32 %v9664_v19, %v4994_v20 }
0x3252   :  { %v10703_v22 = vpop.f32.mrf.mxu1 }
0x3253   :  { %10713 = vmatmul.mubr.msk.f32.vlgmr.msra.gmra.mxu1 %vm743_vm3, %v4995_v21 }
0x3254   :  { %10727 = vmatpush3.msra.mxu1 %v9683_v18  ;;  %10734 = vmatprep.mubr.msk.f32.mxu1 %vm743_vm3, %v13017_v57 }
0x3255   :  { %10728 = vmatprep.subr.mxu1 %v9682_v25 }
0x3256   :  { %10729 = vmatpush3.msra.mxu1 %v9682_v25 }
0x3257   :  { %10730 = vmatprep.subr.mxu1 %v9681_v58 }
0x3258   :  { %10731 = vmatpush3.msra.mxu1 %v9681_v58 }
0x3259   :  { %10732 = vmatprep.subr.mxu1 %v9680_v36 }
0x325a   :  { %10733 = vmatpush3.msra.mxu1 %v9680_v36 }
0x325b   :  { %10735 = vmatmul.mubr.msk.f32.vlgmr.msra.gmra.mxu1 %vm743_vm3, %v13036_v30  ;;  %10744 = vmatprep.subr.mxu1 %v12195_v14 }
0x325c   :  { %10748 = vmatprep.mubr.msk.f32.mxu1 %vm12209_vm13, %v12195_v14 }
0x3313   :  { %v5080_v15 = vpop.f32.mrf.mxu1 }
0x3314   :  { %v5081_v31 = vadd.f32 %v9670_v23, %v5080_v15 }
0x3315   :  { %v10714_v17 = vpop.f32.mrf.mxu1 }
0x3316   :  { %v5084_v32 = vadd.f32 %v5081_v31, %v4911_v16 }
0x3318   :  { %v5089_v33 = vsel %vm3491_vm15, %v5084_v32, 0.0 }
0x3319   :  { %5090 = vadd.xlane.f32.xlu0 %v5089_v33 }
0x331b   :  { %v10736_v41 = vpop.f32.mrf.mxu1 }
0x331c   :  { %v13253_v48 = vadd.f32 %v10736_v41, %v9684_v46 }
0x331d   :  { %v5282_v43 = vpop.f32.mrf.mxu1 }
0x331e   :  { %v13247_v45 = vadd.f32 %v9684_v46, %v5282_v43 }
0x33a2   :  { %v5091_v34 = vpop.xlane.xlu0 %5090 }
0x33a3   :  { %v5092_v27 = vmul.f32 0.03125, %v5091_v34 }
0x33a5   :  { %v5093_v35 = vsub.f32 %v5084_v32, %v5092_v27 }
0x33a7   :  { %v5094_v26 = vmul.f32 %v5093_v35, %v5093_v35 }
0x33a9   :  { %v5095_v40 = vsel %vm3491_vm15, %v5094_v26, 0.0 }
0x33aa   :  { %5096 = vadd.xlane.f32.xlu1 %v5095_v40 }
0x33bb   :  { %5392 = vrot.lane.b32.xlu1 %v13247_v45, %s12196_s20 }
0x33bf   :  { %5475 = vrot.lane.b32.xlu1 %v13253_v48, %s12200_s13 }
0x3433   :  { %v5097_v3 = vpop.xlane.xlu1 %5096 }
0x3434   :  { %v5098_v51 = vmul.f32 0.03125, %v5097_v3 }
0x3436   :  { %v5099_v5 = vadd.f32 1e-06, %v5098_v51 }
0x3437   :  { %v5393_v7 = vpop.permute.xlu1 %5392 }
0x3438   :  { %11367 = vrsqrt.f32 %v5099_v5 }
0x343b   :  { %v5476_v13 = vpop.permute.xlu1 %5475 }
0x3445   :  { %v11368_v9 = vpop.eup %11367 }
0x3446   :  { %v5101_v54 = vmul.f32 %v11368_v9, %v5093_v35 }
0x3448   :  { %v5108_v56 = vmul.f32 %v9672_v52, %v5101_v54 }
0x344a   :  { %v13263_v59 = vadd.f32 %v9673_v11, %v5108_v56 }
0x344c   :  { %10724 = vmatmul.mubr.msk.f32.vlgmr.msra.gmra.mxu0 %vm743_vm3, %v13263_v59 }
0x344d   :  { %10738 = vmatpush3.xpose.msk.msra.mxu0 %vm894_vm4, %v13253_v48  ;;  %10741 = vmatprep.mubr.msk.f32.mxu0 %vm12209_vm13, %v12195_v14 }
0x344e   :  { %10739 = vmatprep.subr.mxu0 %v12195_v14 }
0x3451   :  { %10740 = vmatpush3.xpose.msk.msra.mxu0 %vm894_vm4, %v13247_v45 }
0x3452   :  { %10758 = vmatprep.subr.mxu0 %v12195_v14 }
0x350c   :  { %v5198_v62 = vpop.f32.mrf.mxu0 }
0x350d   :  { %v5199_v38 = vadd.f32 %v9678_v39, %v5198_v62 }
0x350e   :  { %v10725_v63 = vpop.f32.mrf.mxu0 }
0x350f   :  { %v13275_v1 = vmul.f32 0.35355338, %v5199_v38 }
0x3511   :  { %10742 = vmatmul.mubr.msk.f32.vlgmr.msra.gmra.mxu0 %vm894_vm4, %v13275_v1 }
0x3512   :  { %10762 = vmatprep.mubr.msk.f32.mxu0 %vm12209_vm13, %v12195_v14 }
0x35d1   :  { %v5377_v37 = vpop.f32.mrf.mxu0 }
0x35d2   :  { %v5378_v42 = vadd.f32 %v5377_v37, %v13075_v44 }
0x35d3   :  { %v10743_v28 = vpop.f32.mrf.mxu0 }
0x35d4   :  { %v5381_v53 = vsel %vm3980_vm5, %v5378_v42, -inf }
0x35d5   :  { %5382 = vmax.xlane.f32.xlu0 %v5381_v53 }
0x35eb   :  { %5394 = vrot.lane.b32.xlu0 %v13253_v48, %s12196_s20 }
0x35ef   :  { %5473 = vrot.lane.b32.xlu0 %v13247_v45, %s12200_s13 }
0x365e   :  { %v5383_v2 = vpop.xlane.xlu0 %5382 }
0x365f   :  { %v5384_v29 = vsub.f32 %v5378_v42, %v5383_v2 }
0x3661   :  { %v5385_v4 = vmul.f32 1.442695, %v5384_v29 }
0x3662   :  { %v5395_v6 = vpop.permute.xlu0 %5394 }
0x3663   :  { %11369 = vpow2.f32 %v5385_v4  ;;  %10745 = vmatpush3.msra.mxu1 %v5395_v6 }
0x3664   :  { %10746 = vmatprep.subr.mxu1 %v12195_v14 }
0x3665   :  { %10747 = vmatpush3.msra.mxu1 %v5393_v7 }
0x3666   :  { %10751 = vmatprep.subr.mxu1 %v12195_v14  ;;  %v5474_v0 = vpop.permute.xlu0 %5473 }
0x3670   :  { %v11370_v8 = vpop.eup %11369 }
0x3671   :  { %v5387_v10 = vsel %vm3980_vm5, %v11370_v8, 0.0 }
0x3672   :  { %5388 = vadd.xlane.f32.xlu1 %v5387_v10 }
0x3683   :  { %5471 = vrot.lane.b32.xlu1 %v13275_v1, %s12200_s13 }
0x3687   :  { %5564 = vrot.lane.b32.xlu1 %v13247_v45, %s12198_s8 }
0x36fb   :  { %v5389_v16 = vpop.xlane.xlu1 %5388 }
0x36fc   :  { %11371 = vrcp.f32 %v5389_v16 }
0x36ff   :  { %v5472_v55 = vpop.permute.xlu1 %5471 }
0x3703   :  { %v5565_v31 = vpop.permute.xlu1 %5564 }
0x3709   :  { %v11372_v60 = vpop.eup %11371 }
0x370a   :  { %v5391_v24 = vmul.f32 %v11372_v60, %v11370_v8 }
0x370c   :  { %10749 = vmatmul.mubr.msk.f32.vlgmr.msra.gmra.mxu1 %vm980_vm11, %v5391_v24  ;;  %v9690_v24 = vld [vmem:[%s13935_s6 + $0x38] sm:$0xff] }
0x370d   :  { %10752 = vmatpush3.xpose.msk.msra.mxu1 %vm894_vm4, %v5476_v13  ;;  %10755 = vmatprep.mubr.msk.f32.mxu1 %vm12209_vm13, %v12195_v14 }
0x370e   :  { %10753 = vmatprep.subr.mxu1 %v12195_v14 }
0x3711   :  { %10754 = vmatpush3.xpose.msk.msra.mxu1 %vm894_vm4, %v5474_v0  ;;  %v9689_v0 = vld [vmem:[%s13935_s6 + $0x30] sm:$0xff] }
0x3712   :  { %10772 = vmatprep.subr.mxu1 %v12195_v14 }
0x3714   :  { %10756 = vmatmul.mubr.msk.f32.vlgmr.msra.gmra.mxu1 %vm894_vm4, %v5472_v55  ;;  %v9687_v55 = vld [vmem:[%s13935_s6 + $0x20] sm:$0xff] }
0x3715   :  { %10776 = vmatprep.mubr.msk.f32.mxu1 %vm12209_vm13, %v12195_v14 }
0x37cc   :  { %v13304_v18 = vpop.f32.mrf.mxu1 }
0x37ce   :  { %v10750_v19 = vpop.f32.mrf.mxu1 }
0x37d4   :  { %v5549_v20 = vpop.f32.mrf.mxu1 }
0x37d5   :  { %v5550_v21 = vadd.f32 %v5549_v20, %v13075_v44 }
0x37d6   :  { %v10757_v22 = vpop.f32.mrf.mxu1 }
0x37d7   :  { %v5553_v25 = vsel %vm3980_vm5, %v5550_v21, -inf }
0x37d8   :  { %5554 = vmax.xlane.f32.xlu0 %v5553_v25 }
0x37ee   :  { %5566 = vrot.lane.b32.xlu0 %v13253_v48, %s12198_s8 }
0x37f2   :  { %5647 = vrot.lane.b32.xlu0 %v13253_v48, %s12203_s9 }
0x37f6   :  { %5643 = vrot.lane.b32.xlu0 %v13275_v1, %s12203_s9 }
0x3861   :  { %v5555_v58 = vpop.xlane.xlu0 %5554 }
0x3862   :  { %v5556_v36 = vsub.f32 %v5550_v21, %v5555_v58 }
0x3864   :  { %v5557_v23 = vmul.f32 1.442695, %v5556_v36 }
0x3865   :  { %v5567_v15 = vpop.permute.xlu0 %5566 }
0x3866   :  { %11373 = vpow2.f32 %v5557_v23  ;;  %10759 = vmatpush3.msra.mxu0 %v5567_v15  ;;  %v9707_v15 = vld [vmem:[#allocation35 + $0x1] ss:$0 sm:$0xff] }
0x3867   :  { %10760 = vmatprep.subr.mxu0 %v12195_v14 }
0x3868   :  { %10761 = vmatpush3.msra.mxu0 %v5565_v31 }
0x3869   :  { %10765 = vmatprep.subr.mxu0 %v12195_v14  ;;  %v5648_v35 = vpop.permute.xlu0 %5647 }
0x386d   :  { %v5644_v40 = vpop.permute.xlu0 %5643 }
0x3873   :  { %v11374_v17 = vpop.eup %11373 }
0x3874   :  { %v5559_v32 = vsel %vm3980_vm5, %v11374_v17, 0.0 }
0x3875   :  { %5560 = vadd.xlane.f32.xlu1 %v5559_v32 }
0x3886   :  { %5645 = vrot.lane.b32.xlu1 %v13247_v45, %s12203_s9 }
0x38fe   :  { %v5561_v33 = vpop.xlane.xlu1 %5560 }
0x38ff   :  { %11375 = vrcp.f32 %v5561_v33 }
0x3902   :  { %v5646_v26 = vpop.permute.xlu1 %5645 }
0x390c   :  { %v11376_v34 = vpop.eup %11375 }
0x390d   :  { %v5563_v27 = vmul.f32 %v11376_v34, %v11374_v17 }
0x390f   :  { %10763 = vmatmul.mubr.msk.f32.vlgmr.msra.gmra.mxu0 %vm980_vm11, %v5563_v27 }
0x3910   :  { %10766 = vmatpush3.xpose.msk.msra.mxu0 %vm894_vm4, %v5648_v35  ;;  %10769 = vmatprep.mubr.msk.f32.mxu0 %vm12209_vm13, %v12195_v14 }
0x3911   :  { %10767 = vmatprep.subr.mxu0 %v12195_v14 }
0x3914   :  { %10768 = vmatpush3.xpose.msk.msra.mxu0 %vm894_vm4, %v5646_v26 }
0x3915   :  { %10786 = vmatprep.subr.mxu0 %v12195_v14 }
0x3917   :  { %10770 = vmatmul.mubr.msk.f32.vlgmr.msra.gmra.mxu0 %vm894_vm4, %v5644_v40 }
0x3918   :  { %10790 = vmatprep.mubr.msk.f32.mxu0 %vm12209_vm13, %v12195_v14 }
0x39cf   :  { %v5639_v41 = vpop.f32.mrf.mxu0 }
0x39d1   :  { %v10764_v43 = vpop.f32.mrf.mxu0 }
0x39d2   :  { %v9713_v43 = vld [vmem:[%s13936_s4 + $0x30] sm:$0xff] }
0x39d7   :  { %v5721_v46 = vpop.f32.mrf.mxu0 }
0x39d8   :  { %v5722_v47 = vadd.f32 %v5721_v46, %v13075_v44  ;;  %v9711_v46 = vld [vmem:[%s13936_s4 + $0x20] sm:$0xff] }
0x39d9   :  { %v10771_v61 = vpop.f32.mrf.mxu0 }
0x39da   :  { %v5725_v49 = vsel %vm3980_vm5, %v5722_v47, -inf  ;;  %v9721_v61 = vld [vmem:[%s13937_s17 + $0x70] sm:$0xff] }
0x39db   :  { %5726 = vmax.xlane.f32.xlu1 %v5725_v49  ;;  %v9720_v49 = vld [vmem:[%s13937_s17 + $0x68] sm:$0xff] }
0x39ec   :  { %5736 = vrot.lane.b32.xlu1 %v13247_v45, %s12202_s21 }
0x39f0   :  { %5819 = vrot.lane.b32.xlu1 %v13253_v48, %s12206_s24 }
0x39f4   :  { %5815 = vrot.lane.b32.xlu1 %v13275_v1, %s12206_s24 }
0x3a64   :  { %v5727_v50 = vpop.xlane.xlu1 %5726 }
0x3a65   :  { %v5728_v3 = vsub.f32 %v5722_v47, %v5727_v50  ;;  %v9722_v47 = vld [vmem:[%s13937_s17 + $0x78] sm:$0xff]  ;;  %v9719_v50 = vld [vmem:[%s13937_s17 + $0x60] sm:$0xff] }
0x3a67   :  { %v5729_v51 = vmul.f32 1.442695, %v5728_v3  ;;  %v9718_v3 = vld [vmem:[%s13937_s17 + $0x58] sm:$0xff] }
0x3a68   :  { %v5737_v11 = vpop.permute.xlu1 %5736 }
0x3a69   :  { %11377 = vpow2.f32 %v5729_v51 }
0x3a6c   :  { %v5820_v62 = vpop.permute.xlu1 %5819 }
0x3a70   :  { %v5816_v63 = vpop.permute.xlu1 %5815 }
0x3a76   :  { %v11378_v5 = vpop.eup %11377 }
0x3a77   :  { %v5731_v9 = vsel %vm3980_vm5, %v11378_v5, 0.0 }
0x3a78   :  { %5732 = vadd.xlane.f32.xlu0 %v5731_v9 }
0x3a8e   :  { %5738 = vrot.lane.b32.xlu0 %v13253_v48, %s12202_s21 }
0x3a92   :  { %5817 = vrot.lane.b32.xlu0 %v13247_v45, %s12206_s24 }
0x3b01   :  { %v5733_v52 = vpop.xlane.xlu0 %5732 }
0x3b02   :  { %11379 = vrcp.f32 %v5733_v52 }
0x3b05   :  { %v5739_v54 = vpop.permute.xlu0 %5738 }
0x3b06   :  { %10773 = vmatpush3.msra.mxu1 %v5739_v54  ;;  %v9709_v54 = vld [vmem:[#allocation37 + $0x1] ss:$0 sm:$0xff] }
0x3b07   :  { %10774 = vmatprep.subr.mxu1 %v12195_v14 }
0x3b08   :  { %10775 = vmatpush3.msra.mxu1 %v5737_v11 }
0x3b09   :  { %10779 = vmatprep.subr.mxu1 %v12195_v14  ;;  %v5818_v38 = vpop.permute.xlu0 %5817 }
0x3b0f   :  { %v11380_v56 = vpop.eup %11379 }
0x3b10   :  { %v5735_v39 = vmul.f32 %v11380_v56, %v11378_v5  ;;  %v9710_v56 = vld [vmem:[#allocation38 + $0x1] ss:$0 sm:$0xff] }
0x3b12   :  { %10777 = vmatmul.mubr.msk.f32.vlgmr.msra.gmra.mxu1 %vm980_vm11, %v5735_v39 }
0x3b13   :  { %10780 = vmatpush3.xpose.msk.msra.mxu1 %vm894_vm4, %v5820_v62  ;;  %10783 = vmatprep.mubr.msk.f32.mxu1 %vm12209_vm13, %v12195_v14 }
0x3b14   :  { %10781 = vmatprep.subr.mxu1 %v12195_v14 }
0x3b17   :  { %10782 = vmatpush3.xpose.msk.msra.mxu1 %vm894_vm4, %v5818_v38  ;;  %v9717_v38 = vld [vmem:[%s13937_s17 + $0x50] sm:$0xff] }
0x3b18   :  { %10804 = vmatprep.subr.mxu1 %v12195_v14 }
0x3b1a   :  { %10784 = vmatmul.mubr.msk.f32.vlgmr.msra.gmra.mxu1 %vm894_vm4, %v5816_v63  ;;  %v9716_v63 = vld [vmem:[%s13937_s17 + $0x48] sm:$0xff] }
0x3b1b   :  { %10812 = vmatprep.mubr.msk.f32.mxu1 %vm12209_vm13, %v12195_v14 }
0x3bd2   :  { %v5811_v1 = vpop.f32.mrf.mxu1 }
0x3bd4   :  { %v10778_v37 = vpop.f32.mrf.mxu1 }
0x3bd5   :  { %v9723_v37 = vld [vmem:[#allocation40 + $0x1] ss:$0 sm:$0xff] }
0x3bda   :  { %v5893_v42 = vpop.f32.mrf.mxu1 }
0x3bdb   :  { %v5894_v28 = vadd.f32 %v5893_v42, %v13075_v44 }
0x3bdc   :  { %v10785_v53 = vpop.f32.mrf.mxu1 }
0x3bdd   :  { %v5897_v2 = vsel %vm3980_vm5, %v5894_v28, -inf }
0x3bde   :  { %5898 = vmax.xlane.f32.xlu0 %v5897_v2 }
0x3bf4   :  { %5910 = vrot.lane.b32.xlu0 %v13253_v48, %s12205_s30 }
0x3bf8   :  { %5988 = vrot.lane.b32.xlu0 %v5639_v41, %s12163_s16  ;;  %v9714_v41 = vld [vmem:[%s13936_s4 + $0x38] sm:$0xff] }
0x3bf9   :  { %10805 = vmatpush3.msra.mxu1 %v9714_v41  ;;  %v9732_v41 = vld [vmem:[%s13930_s19 + $0x40] sm:$0xff] }
0x3bfa   :  { %10806 = vmatprep.subr.mxu1 %v12195_v14 }
0x3bfb   :  { %10807 = vmatpush3.msra.mxu1 %v9713_v43 }
0x3bfc   :  { %10808 = vmatprep.subr.mxu1 %v12195_v14 }
0x3c67   :  { %v5899_v29 = vpop.xlane.xlu0 %5898 }
0x3c68   :  { %v5900_v4 = vsub.f32 %v5894_v28, %v5899_v29  ;;  %v9725_v29 = vld [vmem:[#allocation41 + $0x1] ss:$0 sm:$0xff] }
0x3c6a   :  { %v5901_v6 = vmul.f32 1.442695, %v5900_v4 }
0x3c6b   :  { %v5911_v7 = vpop.permute.xlu0 %5910 }
0x3c6c   :  { %11381 = vpow2.f32 %v5901_v6  ;;  %10787 = vmatpush3.msra.mxu0 %v5911_v7 }
0x3c6d   :  { %10788 = vmatprep.subr.mxu0 %v12195_v14 }
0x3c6f   :  { %v5989_v21 = vpop.permute.xlu0 %5988 }
0x3c70   :  { %v5999_v25 = vsel %vm894_vm4, %v13304_v18, %v5989_v21 }
0x3c79   :  { %v11382_v8 = vpop.eup %11381 }
0x3c7a   :  { %v5903_v10 = vsel %vm3980_vm5, %v11382_v8, 0.0 }
0x3c7b   :  { %5904 = vadd.xlane.f32.xlu1 %v5903_v10 }
0x3c8c   :  { %5908 = vrot.lane.b32.xlu1 %v13247_v45, %s12205_s30  ;;  %v9688_v45 = vld [vmem:[%s13935_s6 + $0x28] sm:$0xff] }
0x3c90   :  { %5992 = vrot.lane.b32.xlu1 %v5811_v1, %s12166_s0  ;;  %v9715_v1 = vld [vmem:[%s13937_s17 + $0x40] sm:$0xff] }
0x3d04   :  { %v5905_v48 = vpop.xlane.xlu1 %5904 }
0x3d05   :  { %11383 = vrcp.f32 %v5905_v48  ;;  %v6403_v48 = vld [vmem:[%s13938_s14] sm:$0x3] }
0x3d08   :  { %v5909_v13 = vpop.permute.xlu1 %5908 }
0x3d09   :  { %10789 = vmatpush3.msra.mxu0 %v5909_v13 }
0x3d0a   :  { %10793 = vmatprep.subr.mxu0 %v12195_v14 }
0x3d0c   :  { %v5993_v22 = vpop.permute.xlu1 %5992 }
0x3d0d   :  { %v6000_v58 = vsel %vm980_vm11, %v5999_v25, %v5993_v22 }
0x3d12   :  { %v11384_v16 = vpop.eup %11383 }
0x3d13   :  { %v5907_v60 = vmul.f32 %v11384_v16, %v11382_v8 }
0x3d15   :  { %10791 = vmatmul.mubr.msk.f32.vlgmr.msra.gmra.mxu0 %vm980_vm11, %v5907_v60 }
0x3d16   :  { %10801 = vmatprep.mubr.msk.f32.mxu0 %vm12209_vm13, %v12195_v14  ;;  %10794 = vmatpush3.msra.mxu0 %v9690_v24 }
0x3d17   :  { %10795 = vmatprep.subr.mxu0 %v12195_v14 }
0x3d18   :  { %10796 = vmatpush3.msra.mxu0 %v9689_v0 }
0x3d19   :  { %10797 = vmatprep.subr.mxu0 %v12195_v14 }
0x3d1a   :  { %10798 = vmatpush3.msra.mxu0 %v9688_v45  ;;  %v6321_v45 = vld [vmem:[#allocation46 + $0x18] sm:$0xff] }
0x3d1b   :  { %10799 = vmatprep.subr.mxu0 %v12195_v14 }
0x3d1c   :  { %10800 = vmatpush3.msra.mxu0 %v9687_v55  ;;  %v6320_v55 = vld [vmem:[#allocation46 + $0x10] sm:$0xff] }
0x3d1d   :  { %10815 = vmatprep.subr.mxu0 %v12195_v14 }
0x3dd5   :  { %v5983_v19 = vpop.f32.mrf.mxu0 }
0x3dd6   :  { %5996 = vrot.lane.b32.xlu0 %v5983_v19, %s12208_s12  ;;  %v6319_v19 = vld [vmem:[#allocation46 + $0x8] sm:$0xff] }
0x3dd7   :  { %v10792_v20 = vpop.f32.mrf.mxu0 }
0x3dd8   :  { %v6318_v20 = vld [vmem:[#allocation46] sm:$0xff] }
0x3e48   :  { %v5997_v36 = vpop.permute.xlu0 %5996 }
0x3e49   :  { %v6001_v23 = vsel %vm1718_vm12, %v6000_v58, %v5997_v36  ;;  %v9727_v36 = vld [vmem:[#allocation43 + $0x1] ss:$0 sm:$0xff] }
0x3e4a   :  { %10802 = vmatmul.mubr.msk.f32.vlgmr.msra.gmra.mxu0 %vm743_vm3, %v6001_v23 }
0x3e4b   :  { %10831 = vmatprep.mubr.msk.f32.mxu0 %vm12209_vm13, %v12195_v14  ;;  %10816 = vmatpush3.msra.mxu0 %v9722_v47 }
0x3e4c   :  { %10817 = vmatprep.subr.mxu0 %v12195_v14 }
0x3e4d   :  { %10818 = vmatpush3.msra.mxu0 %v9721_v61  ;;  %v9740_v61 = vld [vmem:[#allocation22 + $0x1] ss:$0 sm:$0xff] }
0x3e4e   :  { %10819 = vmatprep.subr.mxu0 %v12195_v14 }
0x3e4f   :  { %10820 = vmatpush3.msra.mxu0 %v9720_v49 }
0x3e50   :  { %10821 = vmatprep.subr.mxu0 %v12195_v14 }
0x3e51   :  { %10822 = vmatpush3.msra.mxu0 %v9719_v50 }
0x3e52   :  { %10823 = vmatprep.subr.mxu0 %v12195_v14 }
0x3e53   :  { %10824 = vmatpush3.msra.mxu0 %v9718_v3 }
0x3e54   :  { %10825 = vmatprep.subr.mxu0 %v12195_v14 }
0x3e55   :  { %10826 = vmatpush3.msra.mxu0 %v9717_v38  ;;  %v9744_v38 = vld [vmem:[%s13931_s25 + $0x40] sm:$0xff] }
0x3e56   :  { %10827 = vmatprep.subr.mxu0 %v12195_v14 }
0x3e57   :  { %10828 = vmatpush3.msra.mxu0 %v9716_v63 }
0x3e58   :  { %10829 = vmatprep.subr.mxu0 %v12195_v14 }
0x3e59   :  { %10830 = vmatpush3.msra.mxu0 %v9715_v1 }
0x3e5a   :  { %10864 = vmatprep.subr.mxu0 %v12195_v14 }
0x3f0a   :  { %v6077_v31 = vpop.f32.mrf.mxu0 }
0x3f0b   :  { %v6078_v17 = vadd.f32 %v9707_v15, %v6077_v31  ;;  %v9728_v15 = vld [vmem:[#allocation44 + $0x1] ss:$0 sm:$0xff] }
0x3f0c   :  { %v10803_v32 = vpop.f32.mrf.mxu0 }
0x3f0d   :  { %v6081_v33 = vadd.f32 %v6078_v17, %v13263_v59  ;;  %v9712_v59 = vld [vmem:[%s13936_s4 + $0x28] sm:$0xff]  ;;  %v9739_v32 = vld [vmem:[%s13930_s19 + $0x78] sm:$0xff] }
0x3f0e   :  { %10809 = vmatpush3.msra.mxu1 %v9712_v59  ;;  %v9729_v59 = vld [vmem:[#allocation47] ss:$0 sm:$0xff] }
0x3f0f   :  { %v6082_v18 = vsel %vm3491_vm15, %v6081_v33, 0.0  ;;  %10810 = vmatprep.subr.mxu1 %v12195_v14 }
0x3f10   :  { %6083 = vadd.xlane.f32.xlu1 %v6082_v18  ;;  %10811 = vmatpush3.msra.mxu1 %v9711_v46  ;;  %v9737_v18 = vld [vmem:[%s13930_s19 + $0x68] sm:$0xff] }
0x3f11   :  { %10834 = vmatprep.subr.mxu1 %v12195_v14 }
0x3f99   :  { %v6084_v34 = vpop.xlane.xlu1 %6083 }
0x3f9a   :  { %v6085_v27 = vmul.f32 0.03125, %v6084_v34  ;;  %v9736_v34 = vld [vmem:[%s13930_s19 + $0x60] sm:$0xff] }
0x3f9c   :  { %v6086_v35 = vsub.f32 %v6081_v33, %v6085_v27  ;;  %v9738_v33 = vld [vmem:[%s13930_s19 + $0x70] sm:$0xff]  ;;  %v9735_v27 = vld [vmem:[%s13930_s19 + $0x58] sm:$0xff] }
0x3f9e   :  { %v6087_v26 = vmul.f32 %v6086_v35, %v6086_v35 }
0x3fa0   :  { %v6088_v40 = vsel %vm3491_vm15, %v6087_v26, 0.0 }
0x3fa1   :  { %6089 = vadd.xlane.f32.xlu0 %v6088_v40  ;;  %v9733_v40 = vld [vmem:[%s13930_s19 + $0x48] sm:$0xff] }
0x402a   :  { %v6090_v51 = vpop.xlane.xlu0 %6089 }
0x402b   :  { %v6091_v5 = vmul.f32 0.03125, %v6090_v51 }
0x402d   :  { %v6092_v9 = vadd.f32 1e-06, %v6091_v5 }
0x402f   :  { %11385 = vrsqrt.f32 %v6092_v9 }
0x403c   :  { %v11386_v52 = vpop.eup %11385 }
0x403d   :  { %v6094_v11 = vmul.f32 %v11386_v52, %v6086_v35  ;;  %v9734_v35 = vld [vmem:[%s13930_s19 + $0x50] sm:$0xff] }
0x403f   :  { %v6101_v39 = vmul.f32 %v9709_v54, %v6094_v11 }
0x4041   :  { %v6108_v62 = vadd.f32 %v9710_v56, %v6101_v39  ;;  %v9747_v56 = vld [vmem:[%s13931_s25 + $0x58] sm:$0xff]  ;;  %v9746_v39 = vld [vmem:[%s13931_s25 + $0x50] sm:$0xff] }
0x4043   :  { %10813 = vmatmul.mubr.msk.f32.vlgmr.msra.gmra.mxu1 %vm743_vm3, %v6108_v62 }
0x4044   :  { %10842 = vmatprep.mubr.msk.f32.mxu1 %vm12209_vm13, %v12195_v14  ;;  %10835 = vmatpush3.msra.mxu1 %v6321_v45  ;;  %v9765_v45 = vld [vmem:[%s13933_s10 + $0x48] sm:$0xff] }
0x4045   :  { %10836 = vmatprep.subr.mxu1 %v12195_v14 }
0x4046   :  { %10837 = vmatpush3.msra.mxu1 %v6320_v55  ;;  %v9764_v55 = vld [vmem:[%s13933_s10 + $0x40] sm:$0xff] }
0x4047   :  { %10838 = vmatprep.subr.mxu1 %v12195_v14 }
0x4048   :  { %10839 = vmatpush3.msra.mxu1 %v6319_v19  ;;  %v9754_v19 = vld [vmem:[#allocation28 + $0x2] ss:$0 sm:$0xff] }
0x4049   :  { %10840 = vmatprep.subr.mxu1 %v12195_v14 }
0x404a   :  { %10841 = vmatpush3.msra.mxu1 %v6318_v20 }
0x404b   :  { %10845 = vmatprep.subr.mxu1 %v12195_v14 }
0x4103   :  { %v6206_v42 = vpop.f32.mrf.mxu1 }
0x4104   :  { %v6207_v28 = vadd.f32 %v9723_v37, %v6206_v42 }
0x4105   :  { %v10814_v53 = vpop.f32.mrf.mxu1 }
0x4106   :  { %v6210_v2 = vmax.f32 %v6207_v28, 0.0  ;;  %v9742_v28 = vld [vmem:[#allocation23 + $0x1] ss:$0 sm:$0xff] }
0x4108   :  { %10832 = vmatmul.mubr.msk.f32.vlgmr.msra.gmra.mxu0 %vm659_vm0, %v6210_v2  ;;  %v9743_v2 = vld [vmem:[#allocation25 + $0x1] ss:$0 sm:$0xff] }
0x4109   :  { %10872 = vmatprep.mubr.msk.f32.mxu0 %vm12209_vm13, %v12195_v14  ;;  %10865 = vmatpush3.msra.mxu0 %v9747_v56 }
0x410a   :  { %10866 = vmatprep.subr.mxu0 %v12195_v14 }
0x410b   :  { %10867 = vmatpush3.msra.mxu0 %v9746_v39 }
0x410c   :  { %10868 = vmatprep.subr.mxu0 %v12195_v14 }
0x41c8   :  { %v6286_v4 = vpop.f32.mrf.mxu0 }
0x41c9   :  { %v6287_v6 = vadd.f32 %v9725_v29, %v6286_v4 }
0x41ca   :  { %v10833_v7 = vpop.f32.mrf.mxu0 }
0x41cb   :  { %v6290_v8 = vadd.f32 %v6287_v6, %v6108_v62  ;;  %v9745_v62 = vld [vmem:[%s13931_s25 + $0x48] sm:$0xff]  ;;  %v9753_v6 = vld [vmem:[%s13932_s7 + $0x58] sm:$0xff]  ;;  %v9752_v7 = vld [vmem:[%s13932_s7 + $0x50] sm:$0xff] }
0x41cc   :  { %10869 = vmatpush3.msra.mxu0 %v9745_v62 }
0x41cd   :  { %v6291_v10 = vsel %vm3491_vm15, %v6290_v8, 0.0  ;;  %10870 = vmatprep.subr.mxu0 %v12195_v14 }
0x41ce   :  { %6292 = vadd.xlane.f32.xlu0 %v6291_v10  ;;  %10871 = vmatpush3.msra.mxu0 %v9744_v38  ;;  %v9750_v10 = vld [vmem:[%s13932_s7 + $0x40] sm:$0xff] }
0x41cf   :  { %10875 = vmatprep.subr.mxu0 %v12195_v14 }
0x41e4   :  { %6405 = vperm.xlu0 %11257, %v6403_v48   ;;  %v9767_v48 = vld [vmem:[%s13933_s10 + $0x58] sm:$0xff] }
0x4257   :  { %v6293_v13 = vpop.xlane.xlu0 %6292 }
0x4258   :  { %v6294_v16 = vmul.f32 0.03125, %v6293_v13  ;;  %v9748_v13 = vld [vmem:[#allocation26 + $0x2] ss:$0 sm:$0xff] }
0x425a   :  { %v6295_v60 = vsub.f32 %v6290_v8, %v6294_v16  ;;  %v9751_v8 = vld [vmem:[%s13932_s7 + $0x48] sm:$0xff] }
0x425c   :  { %v6296_v24 = vmul.f32 %v6295_v60, %v6295_v60 }
0x425e   :  { %v6297_v0 = vsel %vm3491_vm15, %v6296_v24, 0.0 }
0x425f   :  { %6298 = vadd.xlane.f32.xlu1 %v6297_v0  ;;  %v6406_v26 = vpop.permute.xlu0 %6405  ;;  %v9766_v0 = vld [vmem:[%s13933_s10 + $0x50] sm:$0xff] }
0x4260   :  { %vm6407_vm6 = vcmp.eq.s32.totalorder %v12589_v12, %v6406_v26  ;;  %v9760_v26 = vld [vmem:[%s13934_s11 + $0x50] sm:$0xff] }
0x4261   :  { %v9731_v43 = vsel %vm6407_vm6, 1.0, %v12195_v14 }
0x42e8   :  { %v6299_v21 = vpop.xlane.xlu1 %6298 }
0x42e9   :  { %v6300_v22 = vmul.f32 0.03125, %v6299_v21 }
0x42eb   :  { %v6301_v25 = vadd.f32 1e-06, %v6300_v22 }
0x42ed   :  { %11387 = vrsqrt.f32 %v6301_v25 }
0x42fa   :  { %v11388_v58 = vpop.eup %11387 }
0x42fb   :  { %v6303_v23 = vmul.f32 %v11388_v58, %v6295_v60 }
0x42fd   :  { %v6310_v31 = vmul.f32 %v9727_v36, %v6303_v23  ;;  %v9768_v36 = vld [vmem:[#allocation34 + $0x2] ss:$0 sm:$0xff] }
0x42ff   :  { %v6317_v17 = vadd.f32 %v9728_v15, %v6310_v31 }
0x4301   :  { %10843 = vmatmul.mubr.msk.f32.vlgmr.msra.gmra.mxu1 %vm743_vm3, %v6317_v17 }
0x4302   :  { %10846 = vmatpush3.msra.mxu1 %v9739_v32  ;;  %10861 = vmatprep.mubr.msk.f32.mxu1 %vm12209_vm13, %v12195_v14 }
0x4303   :  { %10847 = vmatprep.subr.mxu1 %v12195_v14 }
0x4304   :  { %10848 = vmatpush3.msra.mxu1 %v9738_v33 }
0x4305   :  { %10849 = vmatprep.subr.mxu1 %v12195_v14 }
0x4306   :  { %10850 = vmatpush3.msra.mxu1 %v9737_v18 }
0x4307   :  { %10851 = vmatprep.subr.mxu1 %v12195_v14 }
0x4308   :  { %10852 = vmatpush3.msra.mxu1 %v9736_v34 }
0x4309   :  { %10853 = vmatprep.subr.mxu1 %v12195_v14 }
0x430a   :  { %10854 = vmatpush3.msra.mxu1 %v9735_v27 }
0x430b   :  { %10855 = vmatprep.subr.mxu1 %v12195_v14 }
0x430c   :  { %10856 = vmatpush3.msra.mxu1 %v9734_v35  ;;  %v9761_v35 = vld [vmem:[%s13934_s11 + $0x58] sm:$0xff] }
0x430d   :  { %10857 = vmatprep.subr.mxu1 %v12195_v14 }
0x430e   :  { %10858 = vmatpush3.msra.mxu1 %v9733_v40  ;;  %v9759_v40 = vld [vmem:[%s13934_s11 + $0x48] sm:$0xff] }
0x430f   :  { %10859 = vmatprep.subr.mxu1 %v12195_v14 }
0x4310   :  { %10860 = vmatpush3.msra.mxu1 %v9732_v41  ;;  %v9758_v41 = vld [vmem:[%s13934_s11 + $0x40] sm:$0xff] }
0x4311   :  { %10862 = vmatmul.mubr.msk.f32.vlgmr.msra.gmra.mxu1 %vm659_vm0, %v9731_v43  ;;  %10886 = vmatprep.subr.mxu1 %v12195_v14 }
0x4312   :  { %10894 = vmatprep.mubr.msk.f32.mxu1 %vm12209_vm13, %v12195_v14  ;;  %10887 = vmatpush3.msra.mxu1 %v9761_v35 }
0x4313   :  { %10888 = vmatprep.subr.mxu1 %v12195_v14 }
0x4314   :  { %10889 = vmatpush3.msra.mxu1 %v9760_v26 }
0x4315   :  { %10890 = vmatprep.subr.mxu1 %v12195_v14 }
0x4316   :  { %10891 = vmatpush3.msra.mxu1 %v9759_v40 }
0x4317   :  { %10892 = vmatprep.subr.mxu1 %v12195_v14 }
0x4318   :  { %10893 = vmatpush3.msra.mxu1 %v9758_v41 }
0x4319   :  { %10908 = vmatprep.subr.mxu1 %v12195_v14 }
0x43c1   :  { %v6398_v46 = vpop.f32.mrf.mxu1 }
0x43c2   :  { %v6399_v12 = vadd.f32 %v9729_v59, %v6398_v46 }
0x43c3   :  { %v10844_v47 = vpop.f32.mrf.mxu1 }
0x43c4   :  { %6402 = vst [vmem:[#allocation49] sm:$0x3] %v6399_v12  ;;  %v9756_v47 = vld [vmem:[#allocation29 + $0x2] ss:$0 sm:$0xff] }
0x43d1   :  { %v6496_v49 = vpop.f32.mrf.mxu1 }
0x43d2   :  { %v6497_v50 = vadd.f32 %v9740_v61, %v6496_v49  ;;  %v9757_v49 = vld [vmem:[#allocation31 + $0x2] ss:$0 sm:$0xff] }
0x43d3   :  { %v10863_v3 = vpop.f32.mrf.mxu1 }
0x43d4   :  { %v6504_v51 = vsel %vm3491_vm15, %v6497_v50, 0.0 }
0x43d5   :  { %6505 = vadd.xlane.f32.xlu1 %v6504_v51  ;;  %v9762_v51 = vld [vmem:[#allocation32 + $0x2] ss:$0 sm:$0xff] }
0x445e   :  { %v6506_v5 = vpop.xlane.xlu1 %6505 }
0x445f   :  { %v6507_v9 = vmul.f32 0.03125, %v6506_v5 }
0x4461   :  { %v6508_v52 = vsub.f32 %v6497_v50, %v6507_v9 }
0x4463   :  { %v6509_v54 = vmul.f32 %v6508_v52, %v6508_v52 }
0x4465   :  { %v6510_v11 = vsel %vm3491_vm15, %v6509_v54, 0.0 }
0x4466   :  { %6511 = vadd.xlane.f32.xlu1 %v6510_v11 }
0x44ef   :  { %v6512_v63 = vpop.xlane.xlu1 %6511 }
0x44f0   :  { %v6513_v1 = vmul.f32 0.03125, %v6512_v63 }
0x44f2   :  { %v6514_v37 = vadd.f32 1e-06, %v6513_v1 }
0x44f4   :  { %11389 = vrsqrt.f32 %v6514_v37 }
0x4501   :  { %v11390_v42 = vpop.eup %11389 }
0x4502   :  { %v6516_v53 = vmul.f32 %v11390_v42, %v6508_v52 }
0x4504   :  { %v6523_v29 = vmul.f32 %v9742_v28, %v6516_v53 }
0x4506   :  { %v6530_v4 = vadd.f32 %v9743_v2, %v6523_v29 }
0x4508   :  { %10873 = vmatmul.mubr.msk.f32.vlgmr.msra.gmra.mxu0 %vm743_vm3, %v6530_v4 }
0x4509   :  { %10876 = vmatpush3.msra.mxu0 %v9753_v6  ;;  %10883 = vmatprep.mubr.msk.f32.mxu0 %vm12209_vm13, %v12195_v14 }
0x450a   :  { %10877 = vmatprep.subr.mxu0 %v12195_v14 }
0x450b   :  { %10878 = vmatpush3.msra.mxu0 %v9752_v7 }
0x450c   :  { %10879 = vmatprep.subr.mxu0 %v12195_v14 }
0x450d   :  { %10880 = vmatpush3.msra.mxu0 %v9751_v8 }
0x450e   :  { %10881 = vmatprep.subr.mxu0 %v12195_v14 }
0x450f   :  { %10882 = vmatpush3.msra.mxu0 %v9750_v10 }
0x4510   :  { %10897 = vmatprep.subr.mxu0 %v9767_v48 }
0x45c8   :  { %v6613_v16 = vpop.f32.mrf.mxu0 }
0x45c9   :  { %v6614_v60 = vadd.f32 %v9748_v13, %v6613_v16 }
0x45ca   :  { %v10874_v24 = vpop.f32.mrf.mxu0 }
0x45cb   :  { %10884 = vmatmul.mubr.msk.f32.vlgmr.msra.gmra.mxu0 %vm743_vm3, %v6614_v60 }
0x45cc   :  { %10898 = vmatpush3.msra.mxu0 %v9767_v48  ;;  %10905 = vmatprep.mubr.msk.f32.mxu0 %vm743_vm3, %v13017_v57 }
0x45cd   :  { %10899 = vmatprep.subr.mxu0 %v9766_v0 }
0x45ce   :  { %10900 = vmatpush3.msra.mxu0 %v9766_v0 }
0x45cf   :  { %10901 = vmatprep.subr.mxu0 %v9765_v45 }
0x45d0   :  { %10902 = vmatpush3.msra.mxu0 %v9765_v45 }
0x45d1   :  { %10903 = vmatprep.subr.mxu0 %v9764_v55 }
0x45d2   :  { %10904 = vmatpush3.msra.mxu0 %v9764_v55 }
0x45d3   :  { %10906 = vmatmul.mubr.msk.f32.vlgmr.msra.gmra.mxu0 %vm743_vm3, %v13036_v30  ;;  %10915 = vmatprep.subr.mxu0 %v12195_v14 }
0x45d4   :  { %10919 = vmatprep.mubr.msk.f32.mxu0 %vm12209_vm13, %v12195_v14 }
0x468b   :  { %v6699_v20 = vpop.f32.mrf.mxu0 }
0x468c   :  { %v6700_v21 = vadd.f32 %v9754_v19, %v6699_v20 }
0x468d   :  { %v10885_v22 = vpop.f32.mrf.mxu0 }
0x468e   :  { %v6703_v25 = vadd.f32 %v6700_v21, %v6530_v4 }
0x4690   :  { %v6708_v58 = vsel %vm3491_vm15, %v6703_v25, 0.0 }
0x4691   :  { %6709 = vadd.xlane.f32.xlu1 %v6708_v58 }
0x4693   :  { %v10907_v23 = vpop.f32.mrf.mxu0 }
0x4694   :  { %v13481_v15 = vadd.f32 %v10907_v23, %v9768_v36 }
0x4695   :  { %v6901_v31 = vpop.f32.mrf.mxu0 }
0x4696   :  { %v13483_v17 = vadd.f32 %v9768_v36, %v6901_v31 }
0x4698   :  { %7092 = vrot.lane.b32.xlu0 %v13483_v17, %s12200_s13 }
0x470a   :  { %v7093_v56 = vpop.permute.xlu0 %7092 }
0x471a   :  { %v6710_v32 = vpop.xlane.xlu1 %6709 }
0x471b   :  { %v6711_v33 = vmul.f32 0.03125, %v6710_v32 }
0x471d   :  { %v6712_v18 = vsub.f32 %v6703_v25, %v6711_v33 }
0x471f   :  { %v6713_v34 = vmul.f32 %v6712_v18, %v6712_v18 }
0x4721   :  { %v6714_v27 = vsel %vm3491_vm15, %v6713_v34, 0.0 }
0x4722   :  { %6715 = vadd.xlane.f32.xlu1 %v6714_v27 }
0x4733   :  { %7094 = vrot.lane.b32.xlu1 %v13481_v15, %s12200_s13 }
0x47ab   :  { %v6716_v43 = vpop.xlane.xlu1 %6715 }
0x47ac   :  { %v6717_v59 = vmul.f32 0.03125, %v6716_v43 }
0x47ae   :  { %v6718_v46 = vadd.f32 1e-06, %v6717_v59 }
0x47af   :  { %v7095_v11 = vpop.permute.xlu1 %7094 }
0x47b0   :  { %11391 = vrsqrt.f32 %v6718_v46 }
0x47bd   :  { %v11392_v12 = vpop.eup %11391 }
0x47be   :  { %v6720_v61 = vmul.f32 %v11392_v12, %v6712_v18 }
0x47c0   :  { %v6727_v50 = vmul.f32 %v9756_v47, %v6720_v61 }
0x47c2   :  { %v13498_v3 = vadd.f32 %v9757_v49, %v6727_v50 }
0x47c4   :  { %10895 = vmatmul.mubr.msk.f32.vlgmr.msra.gmra.mxu1 %vm743_vm3, %v13498_v3 }
0x47c5   :  { %10909 = vmatpush3.xpose.msk.msra.mxu1 %vm894_vm4, %v13481_v15  ;;  %10912 = vmatprep.mubr.msk.f32.mxu1 %vm12209_vm13, %v12195_v14 }
0x47c6   :  { %10910 = vmatprep.subr.mxu1 %v12195_v14 }
0x47c9   :  { %10911 = vmatpush3.xpose.msk.msra.mxu1 %vm894_vm4, %v13483_v17 }
0x47ca   :  { %10922 = vmatprep.subr.mxu1 %v12195_v14 }
0x4884   :  { %v6817_v5 = vpop.f32.mrf.mxu1 }
0x4885   :  { %v6818_v9 = vadd.f32 %v9762_v51, %v6817_v5 }
0x4886   :  { %v10896_v52 = vpop.f32.mrf.mxu1 }
0x4887   :  { %v13510_v54 = vmul.f32 0.35355338, %v6818_v9 }
0x4889   :  { %7090 = vrot.lane.b32.xlu0 %v13510_v54, %s12200_s13  ;;  %10913 = vmatmul.mubr.msk.f32.vlgmr.msra.gmra.mxu1 %vm894_vm4, %v13510_v54 }
0x488a   :  { %10923 = vmatpush3.xpose.msk.msra.mxu1 %vm894_vm4, %v7095_v11  ;;  %10926 = vmatprep.mubr.msk.f32.mxu1 %vm12209_vm13, %v12195_v14 }
0x488b   :  { %10924 = vmatprep.subr.mxu1 %v12195_v14 }
0x488e   :  { %10925 = vmatpush3.xpose.msk.msra.mxu1 %vm894_vm4, %v7093_v56 }
0x488f   :  { %10943 = vmatprep.subr.mxu1 %v12195_v14 }
0x48fb   :  { %v7091_v39 = vpop.permute.xlu0 %7090 }
0x48fc   :  { %10927 = vmatmul.mubr.msk.f32.vlgmr.msra.gmra.mxu1 %vm894_vm4, %v7091_v39 }
0x48fd   :  { %10947 = vmatprep.mubr.msk.f32.mxu1 %vm12209_vm13, %v12195_v14 }
0x4949   :  { %v6996_v62 = vpop.f32.mrf.mxu1 }
0x494a   :  { %v6997_v38 = vadd.f32 %v6996_v62, %v13075_v44 }
0x494b   :  { %v10914_v63 = vpop.f32.mrf.mxu1 }
0x494c   :  { %v7000_v1 = vsel %vm3980_vm5, %v6997_v38, -inf }
0x494d   :  { %7001 = vmax.xlane.f32.xlu0 %v7000_v1 }
0x4963   :  { %7013 = vrot.lane.b32.xlu0 %v13481_v15, %s12196_s20 }
0x49bc   :  { %v7168_v37 = vpop.f32.mrf.mxu1 }
0x49bd   :  { %v7169_v42 = vadd.f32 %v7168_v37, %v13075_v44 }
0x49be   :  { %v10928_v28 = vpop.f32.mrf.mxu1 }
0x49bf   :  { %v7172_v53 = vsel %vm3980_vm5, %v7169_v42, -inf }
0x49c0   :  { %7173 = vmax.xlane.f32.xlu1 %v7172_v53 }
0x49d1   :  { %7011 = vrot.lane.b32.xlu1 %v13483_v17, %s12196_s20 }
0x49d5   :  { %7185 = vrot.lane.b32.xlu1 %v13481_v15, %s12198_s8 }
0x49d6   :  { %v7002_v2 = vpop.xlane.xlu0 %7001 }
0x49d7   :  { %v7003_v29 = vsub.f32 %v6997_v38, %v7002_v2 }
0x49d9   :  { %v7004_v4 = vmul.f32 1.442695, %v7003_v29  ;;  %7266 = vrot.lane.b32.xlu1 %v13481_v15, %s12203_s9 }
0x49da   :  { %v7014_v6 = vpop.permute.xlu0 %7013 }
0x49db   :  { %11393 = vpow2.f32 %v7004_v4  ;;  %10916 = vmatpush3.msra.mxu0 %v7014_v6  ;;  %v9773_v4 = vld [vmem:[%s13935_s6 + $0x50] sm:$0xff]  ;;  %v9772_v6 = vld [vmem:[%s13935_s6 + $0x48] sm:$0xff] }
0x49dc   :  { %10917 = vmatprep.subr.mxu0 %v12195_v14 }
0x49dd   :  { %7262 = vrot.lane.b32.xlu1 %v13510_v54, %s12203_s9 }
0x49e1   :  { %7355 = vrot.lane.b32.xlu1 %v13483_v17, %s12202_s21 }
0x49e8   :  { %v11394_v7 = vpop.eup %11393 }
0x49e9   :  { %v7006_v8 = vsel %vm3980_vm5, %v11394_v7, 0.0 }
0x49ea   :  { %7007 = vadd.xlane.f32.xlu0 %v7006_v8 }
0x4a49   :  { %v7174_v10 = vpop.xlane.xlu1 %7173 }
0x4a4a   :  { %v7175_v48 = vsub.f32 %v7169_v42, %v7174_v10 }
0x4a4c   :  { %v7176_v13 = vmul.f32 1.442695, %v7175_v48 }
0x4a4d   :  { %v7012_v16 = vpop.permute.xlu1 %7011 }
0x4a4e   :  { %11395 = vpow2.f32 %v7176_v13  ;;  %10918 = vmatpush3.msra.mxu0 %v7012_v16 }
0x4a4f   :  { %10929 = vmatprep.subr.mxu0 %v12195_v14 }
0x4a51   :  { %v7186_v19 = vpop.permute.xlu1 %7185 }
0x4a55   :  { %v7267_v58 = vpop.permute.xlu1 %7266 }
0x4a59   :  { %v7263_v23 = vpop.permute.xlu1 %7262 }
0x4a5b   :  { %v11396_v60 = vpop.eup %11395 }
0x4a5c   :  { %v7178_v24 = vsel %vm3980_vm5, %v11396_v60, 0.0 }
0x4a5d   :  { %7179 = vadd.xlane.f32.xlu0 %v7178_v24  ;;  %v7356_v46 = vpop.permute.xlu1 %7355 }
0x4a73   :  { %v7008_v0 = vpop.xlane.xlu0 %7007  ;;  %7183 = vrot.lane.b32.xlu0 %v13483_v17, %s12198_s8 }
0x4a74   :  { %11397 = vrcp.f32 %v7008_v0 }
0x4a77   :  { %7264 = vrot.lane.b32.xlu0 %v13483_v17, %s12203_s9 }
0x4a81   :  { %v11398_v45 = vpop.eup %11397 }
0x4a82   :  { %v7010_v55 = vmul.f32 %v11398_v45, %v11394_v7  ;;  %v9771_v7 = vld [vmem:[%s13935_s6 + $0x40] sm:$0xff]  ;;  %v9791_v45 = vld [vmem:[#allocation35 + $0x2] ss:$0 sm:$0xff] }
0x4a84   :  { %10920 = vmatmul.mubr.msk.f32.vlgmr.msra.gmra.mxu0 %vm980_vm11, %v7010_v55 }
0x4a85   :  { %10930 = vmatpush3.msra.mxu0 %v7186_v19  ;;  %10933 = vmatprep.mubr.msk.f32.mxu0 %vm12209_vm13, %v12195_v14 }
0x4a86   :  { %10931 = vmatprep.subr.mxu0 %v12195_v14 }
0x4ae6   :  { %v7180_v20 = vpop.xlane.xlu0 %7179 }
0x4ae7   :  { %11399 = vrcp.f32 %v7180_v20 }
0x4aea   :  { %v7184_v21 = vpop.permute.xlu0 %7183 }
0x4aeb   :  { %10932 = vmatpush3.msra.mxu0 %v7184_v21 }
0x4aec   :  { %10936 = vmatprep.subr.mxu0 %v12195_v14 }
0x4aee   :  { %v7265_v36 = vpop.permute.xlu0 %7264 }
0x4af4   :  { %v11400_v22 = vpop.eup %11399 }
0x4af5   :  { %v7182_v25 = vmul.f32 %v11400_v22, %v11396_v60 }
0x4af7   :  { %10934 = vmatmul.mubr.msk.f32.vlgmr.msra.gmra.mxu0 %vm980_vm11, %v7182_v25 }
0x4af8   :  { %10937 = vmatpush3.xpose.msk.msra.mxu0 %vm894_vm4, %v7267_v58  ;;  %10940 = vmatprep.mubr.msk.f32.mxu0 %vm12209_vm13, %v12195_v14 }
0x4af9   :  { %10938 = vmatprep.subr.mxu0 %v12195_v14 }
0x4afc   :  { %10939 = vmatpush3.xpose.msk.msra.mxu0 %vm894_vm4, %v7265_v36 }
0x4afd   :  { %10957 = vmatprep.subr.mxu0 %v12195_v14 }
0x4aff   :  { %10941 = vmatmul.mubr.msk.f32.vlgmr.msra.gmra.mxu0 %vm894_vm4, %v7263_v23 }
0x4b00   :  { %10961 = vmatprep.mubr.msk.f32.mxu0 %vm12209_vm13, %v12195_v14 }
0x4b44   :  { %v13564_v31 = vpop.f32.mrf.mxu0 }
0x4b46   :  { %v10921_v32 = vpop.f32.mrf.mxu0 }
0x4b47   :  { %v9798_v32 = vld [vmem:[%s13936_s4 + $0x58] sm:$0xff] }
0x4bb7   :  { %v7258_v33 = vpop.f32.mrf.mxu0 }
0x4bb9   :  { %v10935_v18 = vpop.f32.mrf.mxu0 }
0x4bba   :  { %v9795_v18 = vld [vmem:[%s13936_s4 + $0x40] sm:$0xff] }
0x4bbf   :  { %v7340_v34 = vpop.f32.mrf.mxu0 }
0x4bc0   :  { %v7341_v27 = vadd.f32 %v7340_v34, %v13075_v44  ;;  %v9806_v34 = vld [vmem:[%s13937_s17 + $0xb8] sm:$0xff] }
0x4bc1   :  { %v10942_v35 = vpop.f32.mrf.mxu0 }
0x4bc2   :  { %v7344_v26 = vsel %vm3980_vm5, %v7341_v27, -inf  ;;  %v9804_v35 = vld [vmem:[%s13937_s17 + $0xa8] sm:$0xff] }
0x4bc3   :  { %7345 = vmax.xlane.f32.xlu0 %v7344_v26  ;;  %v9803_v26 = vld [vmem:[%s13937_s17 + $0xa0] sm:$0xff] }
0x4bd9   :  { %7357 = vrot.lane.b32.xlu0 %v13481_v15, %s12202_s21 }
0x4bdd   :  { %7438 = vrot.lane.b32.xlu0 %v13481_v15, %s12206_s24 }
0x4be1   :  { %7434 = vrot.lane.b32.xlu0 %v13510_v54, %s12206_s24 }
0x4c4c   :  { %v7346_v40 = vpop.xlane.xlu0 %7345 }
0x4c4d   :  { %v7347_v41 = vsub.f32 %v7341_v27, %v7346_v40  ;;  %v9805_v27 = vld [vmem:[%s13937_s17 + $0xb0] sm:$0xff]  ;;  %v9802_v40 = vld [vmem:[%s13937_s17 + $0x98] sm:$0xff] }
0x4c4f   :  { %v7348_v43 = vmul.f32 1.442695, %v7347_v41 }
0x4c50   :  { %v7358_v59 = vpop.permute.xlu0 %7357 }
0x4c51   :  { %11401 = vpow2.f32 %v7348_v43  ;;  %10944 = vmatpush3.msra.mxu1 %v7358_v59 }
0x4c52   :  { %10945 = vmatprep.subr.mxu1 %v12195_v14 }
0x4c53   :  { %10946 = vmatpush3.msra.mxu1 %v7356_v46 }
0x4c54   :  { %10950 = vmatprep.subr.mxu1 %v12195_v14  ;;  %v7439_v51 = vpop.permute.xlu0 %7438 }
0x4c58   :  { %v7435_v9 = vpop.permute.xlu0 %7434 }
0x4c5e   :  { %v11402_v12 = vpop.eup %11401 }
0x4c5f   :  { %v7350_v47 = vsel %vm3980_vm5, %v11402_v12, 0.0 }
0x4c60   :  { %7351 = vadd.xlane.f32.xlu1 %v7350_v47 }
0x4c71   :  { %7436 = vrot.lane.b32.xlu1 %v13483_v17, %s12206_s24 }
0x4ce9   :  { %v7352_v61 = vpop.xlane.xlu1 %7351 }
0x4cea   :  { %11403 = vrcp.f32 %v7352_v61  ;;  %v9794_v61 = vld [vmem:[#allocation38 + $0x2] ss:$0 sm:$0xff] }
0x4ced   :  { %v7437_v5 = vpop.permute.xlu1 %7436 }
0x4cf7   :  { %v11404_v49 = vpop.eup %11403 }
0x4cf8   :  { %v7354_v50 = vmul.f32 %v11404_v49, %v11402_v12  ;;  %v9793_v12 = vld [vmem:[#allocation37 + $0x2] ss:$0 sm:$0xff] }
0x4cfa   :  { %10948 = vmatmul.mubr.msk.f32.vlgmr.msra.gmra.mxu1 %vm980_vm11, %v7354_v50 }
0x4cfb   :  { %10951 = vmatpush3.xpose.msk.msra.mxu1 %vm894_vm4, %v7439_v51  ;;  %10954 = vmatprep.mubr.msk.f32.mxu1 %vm12209_vm13, %v12195_v14  ;;  %v9801_v51 = vld [vmem:[%s13937_s17 + $0x90] sm:$0xff] }
0x4cfc   :  { %10952 = vmatprep.subr.mxu1 %v12195_v14 }
0x4cff   :  { %10953 = vmatpush3.xpose.msk.msra.mxu1 %vm894_vm4, %v7437_v5  ;;  %v9800_v5 = vld [vmem:[%s13937_s17 + $0x88] sm:$0xff] }
0x4d00   :  { %10975 = vmatprep.subr.mxu1 %v12195_v14 }
0x4d02   :  { %10955 = vmatmul.mubr.msk.f32.vlgmr.msra.gmra.mxu1 %vm894_vm4, %v7435_v9  ;;  %v9799_v9 = vld [vmem:[%s13937_s17 + $0x80] sm:$0xff] }
0x4d03   :  { %10983 = vmatprep.mubr.msk.f32.mxu1 %vm12209_vm13, %v12195_v14  ;;  %10976 = vmatpush3.msra.mxu1 %v9798_v32  ;;  %v9834_v32 = vld [vmem:[%s13933_s10 + $0x68] sm:$0xff] }
0x4d04   :  { %10977 = vmatprep.subr.mxu1 %v12195_v14 }
0x4dba   :  { %v7430_v52 = vpop.f32.mrf.mxu1 }
0x4dbc   :  { %v10949_v54 = vpop.f32.mrf.mxu1 }
0x4dc2   :  { %v7512_v11 = vpop.f32.mrf.mxu1 }
0x4dc3   :  { %v7513_v56 = vadd.f32 %v7512_v11, %v13075_v44 }
0x4dc4   :  { %v10956_v39 = vpop.f32.mrf.mxu1 }
0x4dc5   :  { %v7516_v62 = vsel %vm3980_vm5, %v7513_v56, -inf }
0x4dc6   :  { %7517 = vmax.xlane.f32.xlu1 %v7516_v62  ;;  %v9809_v62 = vld [vmem:[#allocation41 + $0x2] ss:$0 sm:$0xff] }
0x4dd7   :  { %7527 = vrot.lane.b32.xlu1 %v13483_v17, %s12205_s30 }
0x4ddb   :  { %7607 = vrot.lane.b32.xlu1 %v7258_v33, %s12163_s16  ;;  %v9797_v33 = vld [vmem:[%s13936_s4 + $0x50] sm:$0xff] }
0x4ddc   :  { %10978 = vmatpush3.msra.mxu1 %v9797_v33  ;;  %v9833_v33 = vld [vmem:[%s13933_s10 + $0x60] sm:$0xff] }
0x4ddd   :  { %10979 = vmatprep.subr.mxu1 %v12195_v14 }
0x4e4f   :  { %v7518_v38 = vpop.xlane.xlu1 %7517 }
0x4e50   :  { %v7519_v63 = vsub.f32 %v7513_v56, %v7518_v38 }
0x4e52   :  { %v7520_v1 = vmul.f32 1.442695, %v7519_v63 }
0x4e53   :  { %v7528_v53 = vpop.permute.xlu1 %7527 }
0x4e54   :  { %11405 = vpow2.f32 %v7520_v1 }
0x4e57   :  { %v7608_v48 = vpop.permute.xlu1 %7607 }
0x4e58   :  { %v7618_v16 = vsel %vm894_vm4, %v13564_v31, %v7608_v48 }
0x4e61   :  { %v11406_v37 = vpop.eup %11405 }
0x4e62   :  { %v7522_v42 = vsel %vm3980_vm5, %v11406_v37, 0.0 }
0x4e63   :  { %7523 = vadd.xlane.f32.xlu0 %v7522_v42 }
0x4e79   :  { %7529 = vrot.lane.b32.xlu0 %v13481_v15, %s12205_s30  ;;  %v9774_v15 = vld [vmem:[%s13935_s6 + $0x58] sm:$0xff] }
0x4e7d   :  { %7611 = vrot.lane.b32.xlu0 %v7430_v52, %s12166_s0  ;;  %v9807_v52 = vld [vmem:[#allocation40 + $0x2] ss:$0 sm:$0xff] }
0x4eec   :  { %v7524_v28 = vpop.xlane.xlu0 %7523 }
0x4eed   :  { %11407 = vrcp.f32 %v7524_v28 }
0x4ef0   :  { %v7530_v17 = vpop.permute.xlu0 %7529 }
0x4ef1   :  { %10958 = vmatpush3.msra.mxu0 %v7530_v17 }
0x4ef2   :  { %10959 = vmatprep.subr.mxu0 %v12195_v14 }
0x4ef3   :  { %10960 = vmatpush3.msra.mxu0 %v7528_v53 }
0x4ef4   :  { %10964 = vmatprep.subr.mxu0 %v12195_v14  ;;  %v7612_v13 = vpop.permute.xlu0 %7611 }
0x4ef5   :  { %v7619_v60 = vsel %vm980_vm11, %v7618_v16, %v7612_v13  ;;  %v9811_v16 = vld [vmem:[#allocation43 + $0x2] ss:$0 sm:$0xff] }
0x4efa   :  { %v11408_v2 = vpop.eup %11407 }
0x4efb   :  { %v7526_v29 = vmul.f32 %v11408_v2, %v11406_v37 }
0x4efd   :  { %10962 = vmatmul.mubr.msk.f32.vlgmr.msra.gmra.mxu0 %vm980_vm11, %v7526_v29 }
0x4efe   :  { %10972 = vmatprep.mubr.msk.f32.mxu0 %vm12209_vm13, %v12195_v14  ;;  %10965 = vmatpush3.msra.mxu0 %v9774_v15  ;;  %v9816_v15 = vld [vmem:[%s13931_s25 + $0x78] sm:$0xff] }
0x4eff   :  { %10966 = vmatprep.subr.mxu0 %v12195_v14 }
0x4f00   :  { %10967 = vmatpush3.msra.mxu0 %v9773_v4  ;;  %v9815_v4 = vld [vmem:[%s13931_s25 + $0x70] sm:$0xff] }
0x4f01   :  { %10968 = vmatprep.subr.mxu0 %v12195_v14 }
0x4f02   :  { %10969 = vmatpush3.msra.mxu0 %v9772_v6  ;;  %v9814_v6 = vld [vmem:[%s13931_s25 + $0x68] sm:$0xff] }
0x4f03   :  { %10970 = vmatprep.subr.mxu0 %v12195_v14 }
0x4f04   :  { %10971 = vmatpush3.msra.mxu0 %v9771_v7  ;;  %v9813_v7 = vld [vmem:[%s13931_s25 + $0x60] sm:$0xff] }
0x4f05   :  { %10986 = vmatprep.subr.mxu0 %v12195_v14 }
0x4fbd   :  { %v7602_v8 = vpop.f32.mrf.mxu0 }
0x4fbe   :  { %7615 = vrot.lane.b32.xlu1 %v7602_v8, %s12208_s12 }
0x4fbf   :  { %v10963_v10 = vpop.f32.mrf.mxu0 }
0x5030   :  { %v7616_v24 = vpop.permute.xlu1 %7615 }
0x5031   :  { %v7620_v0 = vsel %vm1718_vm12, %v7619_v60, %v7616_v24  ;;  %v9812_v24 = vld [vmem:[#allocation44 + $0x2] ss:$0 sm:$0xff] }
0x5032   :  { %10973 = vmatmul.mubr.msk.f32.vlgmr.msra.gmra.mxu0 %vm743_vm3, %v7620_v0 }
0x5033   :  { %11002 = vmatprep.mubr.msk.f32.mxu0 %vm12209_vm13, %v12195_v14  ;;  %10987 = vmatpush3.msra.mxu0 %v9806_v34 }
0x5034   :  { %10988 = vmatprep.subr.mxu0 %v12195_v14 }
0x5035   :  { %10989 = vmatpush3.msra.mxu0 %v9805_v27 }
0x5036   :  { %10990 = vmatprep.subr.mxu0 %v12195_v14 }
0x5037   :  { %10991 = vmatpush3.msra.mxu0 %v9804_v35 }
0x5038   :  { %10992 = vmatprep.subr.mxu0 %v12195_v14 }
0x5039   :  { %10993 = vmatpush3.msra.mxu0 %v9803_v26 }
0x503a   :  { %10994 = vmatprep.subr.mxu0 %v12195_v14 }
0x503b   :  { %10995 = vmatpush3.msra.mxu0 %v9802_v40 }
0x503c   :  { %10996 = vmatprep.subr.mxu0 %v12195_v14 }
0x503d   :  { %10997 = vmatpush3.msra.mxu0 %v9801_v51 }
0x503e   :  { %10998 = vmatprep.subr.mxu0 %v12195_v14 }
0x503f   :  { %10999 = vmatpush3.msra.mxu0 %v9800_v5  ;;  %v9825_v5 = vld [vmem:[#allocation29 + $0x3] ss:$0 sm:$0xff] }
0x5040   :  { %11000 = vmatprep.subr.mxu0 %v12195_v14 }
0x5041   :  { %11001 = vmatpush3.msra.mxu0 %v9799_v9 }
0x5042   :  { %11027 = vmatprep.subr.mxu0 %v12195_v14 }
0x50f2   :  { %v7696_v55 = vpop.f32.mrf.mxu0 }
0x50f3   :  { %v7697_v19 = vadd.f32 %v9791_v45, %v7696_v55  ;;  %v9822_v55 = vld [vmem:[%s13932_s7 + $0x78] sm:$0xff] }
0x50f4   :  { %v10974_v20 = vpop.f32.mrf.mxu0 }
0x50f5   :  { %v7700_v21 = vadd.f32 %v7697_v19, %v13498_v3  ;;  %v9796_v3 = vld [vmem:[%s13936_s4 + $0x48] sm:$0xff]  ;;  %v9821_v19 = vld [vmem:[%s13932_s7 + $0x70] sm:$0xff] }
0x50f6   :  { %10980 = vmatpush3.msra.mxu1 %v9796_v3  ;;  %v9820_v20 = vld [vmem:[%s13932_s7 + $0x68] sm:$0xff]  ;;  %v9823_v3 = vld [vmem:[#allocation28 + $0x3] ss:$0 sm:$0xff] }
0x50f7   :  { %v7701_v22 = vsel %vm3491_vm15, %v7700_v21, 0.0  ;;  %10981 = vmatprep.subr.mxu1 %v12195_v14 }
0x50f8   :  { %7702 = vadd.xlane.f32.xlu0 %v7701_v22  ;;  %10982 = vmatpush3.msra.mxu1 %v9795_v18  ;;  %v9836_v22 = vld [vmem:[%s13933_s10 + $0x78] sm:$0xff] }
0x50f9   :  { %11005 = vmatprep.subr.mxu1 %v12195_v14 }
0x5181   :  { %v7703_v25 = vpop.xlane.xlu0 %7702 }
0x5182   :  { %v7704_v58 = vmul.f32 0.03125, %v7703_v25  ;;  %v9817_v25 = vld [vmem:[#allocation26 + $0x3] ss:$0 sm:$0xff] }
0x5184   :  { %v7705_v36 = vsub.f32 %v7700_v21, %v7704_v58  ;;  %v9819_v21 = vld [vmem:[%s13932_s7 + $0x60] sm:$0xff] }
0x5186   :  { %v7706_v23 = vmul.f32 %v7705_v36, %v7705_v36 }
0x5188   :  { %v7707_v31 = vsel %vm3491_vm15, %v7706_v23, 0.0 }
0x5189   :  { %7708 = vadd.xlane.f32.xlu1 %v7707_v31  ;;  %v9835_v31 = vld [vmem:[%s13933_s10 + $0x70] sm:$0xff] }
0x5212   :  { %v7709_v41 = vpop.xlane.xlu1 %7708 }
0x5213   :  { %v7710_v43 = vmul.f32 0.03125, %v7709_v41 }
0x5215   :  { %v7711_v59 = vadd.f32 1e-06, %v7710_v43 }
0x5217   :  { %11409 = vrsqrt.f32 %v7711_v59  ;;  %v9830_v59 = vld [vmem:[%s13934_s11 + $0x78] sm:$0xff] }
0x5224   :  { %v11410_v46 = vpop.eup %11409 }
0x5225   :  { %v7713_v47 = vmul.f32 %v11410_v46, %v7705_v36  ;;  %v9829_v46 = vld [vmem:[%s13934_s11 + $0x70] sm:$0xff] }
0x5227   :  { %v7720_v49 = vmul.f32 %v9793_v12, %v7713_v47  ;;  %v9828_v12 = vld [vmem:[%s13934_s11 + $0x68] sm:$0xff]  ;;  %v9827_v47 = vld [vmem:[%s13934_s11 + $0x60] sm:$0xff] }
0x5229   :  { %v7727_v50 = vadd.f32 %v9794_v61, %v7720_v49 }
0x522b   :  { %10984 = vmatmul.mubr.msk.f32.vlgmr.msra.gmra.mxu1 %vm743_vm3, %v7727_v50 }
0x522c   :  { %11013 = vmatprep.mubr.msk.f32.mxu1 %vm12209_vm13, %v12195_v14  ;;  %11006 = vmatpush3.msra.mxu1 %v9816_v15 }
0x522d   :  { %11007 = vmatprep.subr.mxu1 %v12195_v14 }
0x522e   :  { %11008 = vmatpush3.msra.mxu1 %v9815_v4 }
0x522f   :  { %11009 = vmatprep.subr.mxu1 %v12195_v14 }
0x5230   :  { %11010 = vmatpush3.msra.mxu1 %v9814_v6 }
0x5231   :  { %11011 = vmatprep.subr.mxu1 %v12195_v14 }
0x5232   :  { %11012 = vmatpush3.msra.mxu1 %v9813_v7 }
0x5233   :  { %11016 = vmatprep.subr.mxu1 %v12195_v14 }
0x52eb   :  { %v7825_v54 = vpop.f32.mrf.mxu1 }
0x52ec   :  { %v7826_v11 = vadd.f32 %v9807_v52, %v7825_v54  ;;  %v9826_v52 = vld [vmem:[#allocation31 + $0x3] ss:$0 sm:$0xff] }
0x52ed   :  { %v10985_v56 = vpop.f32.mrf.mxu1 }
0x52ee   :  { %v7829_v39 = vmax.f32 %v7826_v11, 0.0  ;;  %v9837_v11 = vld [vmem:[#allocation34 + $0x3] ss:$0 sm:$0xff] }
0x52f0   :  { %11003 = vmatmul.mubr.msk.f32.vlgmr.msra.gmra.mxu0 %vm659_vm0, %v7829_v39 }
0x52f1   :  { %11035 = vmatprep.mubr.msk.f32.mxu0 %vm12209_vm13, %v12195_v14  ;;  %11028 = vmatpush3.msra.mxu0 %v9830_v59 }
0x52f2   :  { %11029 = vmatprep.subr.mxu0 %v12195_v14 }
0x52f3   :  { %11030 = vmatpush3.msra.mxu0 %v9829_v46 }
0x52f4   :  { %11031 = vmatprep.subr.mxu0 %v12195_v14 }
0x52f5   :  { %11032 = vmatpush3.msra.mxu0 %v9828_v12 }
0x52f6   :  { %11033 = vmatprep.subr.mxu0 %v12195_v14 }
0x52f7   :  { %11034 = vmatpush3.msra.mxu0 %v9827_v47 }
0x52f8   :  { %11049 = vmatprep.subr.mxu0 %v12195_v14 }
0x53b0   :  { %v7905_v38 = vpop.f32.mrf.mxu0 }
0x53b1   :  { %v7906_v63 = vadd.f32 %v9809_v62, %v7905_v38 }
0x53b2   :  { %v11004_v1 = vpop.f32.mrf.mxu0 }
0x53b3   :  { %v7909_v37 = vadd.f32 %v7906_v63, %v7727_v50  ;;  %v9831_v1 = vld [vmem:[#allocation32 + $0x3] ss:$0 sm:$0xff] }
0x53b5   :  { %v7910_v42 = vsel %vm3491_vm15, %v7909_v37, 0.0 }
0x53b6   :  { %7911 = vadd.xlane.f32.xlu0 %v7910_v42 }
0x543f   :  { %v7912_v28 = vpop.xlane.xlu0 %7911 }
0x5440   :  { %v7913_v17 = vmul.f32 0.03125, %v7912_v28 }
0x5442   :  { %v7914_v53 = vsub.f32 %v7909_v37, %v7913_v17 }
0x5444   :  { %v7915_v2 = vmul.f32 %v7914_v53, %v7914_v53 }
0x5446   :  { %v7916_v29 = vsel %vm3491_vm15, %v7915_v2, 0.0 }
0x5447   :  { %7917 = vadd.xlane.f32.xlu0 %v7916_v29 }
0x54d0   :  { %v7918_v8 = vpop.xlane.xlu0 %7917 }
0x54d1   :  { %v7919_v10 = vmul.f32 0.03125, %v7918_v8 }
0x54d3   :  { %v7920_v48 = vadd.f32 1e-06, %v7919_v10 }
0x54d5   :  { %11411 = vrsqrt.f32 %v7920_v48 }
0x54e2   :  { %v11412_v13 = vpop.eup %11411 }
0x54e3   :  { %v7922_v60 = vmul.f32 %v11412_v13, %v7914_v53 }
0x54e5   :  { %v7929_v0 = vmul.f32 %v9811_v16, %v7922_v60 }
0x54e7   :  { %v7936_v45 = vadd.f32 %v9812_v24, %v7929_v0 }
0x54e9   :  { %11014 = vmatmul.mubr.msk.f32.vlgmr.msra.gmra.mxu1 %vm743_vm3, %v7936_v45 }
0x54ea   :  { %11017 = vmatpush3.msra.mxu1 %v9822_v55  ;;  %11024 = vmatprep.mubr.msk.f32.mxu1 %vm12209_vm13, %v12195_v14 }
0x54eb   :  { %11018 = vmatprep.subr.mxu1 %v12195_v14 }
0x54ec   :  { %11019 = vmatpush3.msra.mxu1 %v9821_v19 }
0x54ed   :  { %11020 = vmatprep.subr.mxu1 %v12195_v14 }
0x54ee   :  { %11021 = vmatpush3.msra.mxu1 %v9820_v20 }
0x54ef   :  { %11022 = vmatprep.subr.mxu1 %v12195_v14 }
0x54f0   :  { %11023 = vmatpush3.msra.mxu1 %v9819_v21 }
0x54f1   :  { %11038 = vmatprep.subr.mxu1 %v9836_v22 }
0x55a9   :  { %v8019_v58 = vpop.f32.mrf.mxu1 }
0x55aa   :  { %v8020_v36 = vadd.f32 %v9817_v25, %v8019_v58 }
0x55ab   :  { %v11015_v23 = vpop.f32.mrf.mxu1 }
0x55ac   :  { %11025 = vmatmul.mubr.msk.f32.vlgmr.msra.gmra.mxu1 %vm743_vm3, %v8020_v36 }
0x55ad   :  { %11039 = vmatpush3.msra.mxu1 %v9836_v22  ;;  %11046 = vmatprep.mubr.msk.f32.mxu1 %vm743_vm3, %v13017_v57 }
0x55ae   :  { %11040 = vmatprep.subr.mxu1 %v9835_v31 }
0x55af   :  { %11041 = vmatpush3.msra.mxu1 %v9835_v31 }
0x55b0   :  { %11042 = vmatprep.subr.mxu1 %v9834_v32 }
0x55b1   :  { %11043 = vmatpush3.msra.mxu1 %v9834_v32 }
0x55b2   :  { %11044 = vmatprep.subr.mxu1 %v9833_v33 }
0x55b3   :  { %11045 = vmatpush3.msra.mxu1 %v9833_v33 }
0x55b4   :  { %11047 = vmatmul.mubr.msk.f32.vlgmr.msra.gmra.mxu1 %vm743_vm3, %v13036_v30  ;;  %11056 = vmatprep.subr.mxu1 %v12195_v14 }
0x55b5   :  { %11060 = vmatprep.mubr.msk.f32.mxu1 %vm12209_vm13, %v12195_v14 }
0x566c   :  { %v8105_v57 = vpop.f32.mrf.mxu1 }
0x566d   :  { %v8106_v18 = vadd.f32 %v9823_v3, %v8105_v57 }
0x566e   :  { %v11026_v34 = vpop.f32.mrf.mxu1 }
0x566f   :  { %v8109_v27 = vadd.f32 %v8106_v18, %v7936_v45 }
0x5671   :  { %v8114_v35 = vsel %vm3491_vm15, %v8109_v27, 0.0 }
0x5672   :  { %8115 = vadd.xlane.f32.xlu1 %v8114_v35 }
0x5674   :  { %v11048_v54 = vpop.f32.mrf.mxu1 }
0x5675   :  { %v13696_v62 = vadd.f32 %v11048_v54, %v9837_v11 }
0x5676   :  { %v8307_v38 = vpop.f32.mrf.mxu1 }
0x5677   :  { %v13705_v63 = vadd.f32 %v9837_v11, %v8307_v38 }
0x56fb   :  { %v8116_v26 = vpop.xlane.xlu1 %8115 }
0x56fc   :  { %v8117_v40 = vmul.f32 0.03125, %v8116_v26 }
0x56fe   :  { %v8118_v30 = vsub.f32 %v8109_v27, %v8117_v40 }
0x5700   :  { %v8119_v41 = vmul.f32 %v8118_v30, %v8118_v30 }
0x5702   :  { %v8120_v43 = vsel %vm3491_vm15, %v8119_v41, 0.0 }
0x5703   :  { %8121 = vadd.xlane.f32.xlu0 %v8120_v43 }
0x578c   :  { %v8122_v61 = vpop.xlane.xlu0 %8121 }
0x578d   :  { %v8123_v49 = vmul.f32 0.03125, %v8122_v61 }
0x578f   :  { %v8124_v50 = vadd.f32 1e-06, %v8123_v49 }
0x5791   :  { %11413 = vrsqrt.f32 %v8124_v50 }
0x579e   :  { %v11414_v51 = vpop.eup %11413 }
0x579f   :  { %v8126_v9 = vmul.f32 %v11414_v51, %v8118_v30 }
0x57a1   :  { %v8133_v56 = vmul.f32 %v9825_v5, %v8126_v9 }
0x57a3   :  { %v13694_v39 = vadd.f32 %v9826_v52, %v8133_v56 }
0x57a5   :  { %11036 = vmatmul.mubr.msk.f32.vlgmr.msra.gmra.mxu0 %vm743_vm3, %v13694_v39 }
0x57a6   :  { %11050 = vmatpush3.xpose.msk.msra.mxu0 %vm894_vm4, %v13696_v62  ;;  %11053 = vmatprep.mubr.msk.f32.mxu0 %vm12209_vm13, %v12195_v14 }
0x57a7   :  { %11051 = vmatprep.subr.mxu0 %v12195_v14 }
0x57aa   :  { %11052 = vmatpush3.xpose.msk.msra.mxu0 %vm894_vm4, %v13705_v63 }
0x57ab   :  { %11070 = vmatprep.subr.mxu0 %v12195_v14 }
0x5865   :  { %v8223_v37 = vpop.f32.mrf.mxu0 }
0x5866   :  { %v8224_v42 = vadd.f32 %v9831_v1, %v8223_v37 }
0x5867   :  { %v11037_v28 = vpop.f32.mrf.mxu0 }
0x5868   :  { %v13710_v17 = vmul.f32 0.35355338, %v8224_v42 }
0x586a   :  { %11054 = vmatmul.mubr.msk.f32.vlgmr.msra.gmra.mxu0 %vm894_vm4, %v13710_v17 }
0x586b   :  { %11074 = vmatprep.mubr.msk.f32.mxu0 %vm12209_vm13, %v12195_v14 }
0x592a   :  { %v8402_v53 = vpop.f32.mrf.mxu0 }
0x592b   :  { %v8403_v2 = vadd.f32 %v8402_v53, %v13075_v44 }
0x592c   :  { %v11055_v29 = vpop.f32.mrf.mxu0 }
0x592d   :  { %v8406_v15 = vsel %vm3980_vm5, %v8403_v2, -inf }
0x592e   :  { %8407 = vmax.xlane.f32.xlu1 %v8406_v15 }
0x593f   :  { %8419 = vrot.lane.b32.xlu1 %v13696_v62, %s12196_s20 }
0x5943   :  { %8500 = vrot.lane.b32.xlu1 %v13696_v62, %s12200_s13 }
0x5947   :  { %8498 = vrot.lane.b32.xlu1 %v13705_v63, %s12200_s13 }
0x59b7   :  { %v8408_v4 = vpop.xlane.xlu1 %8407 }
0x59b8   :  { %v8409_v6 = vsub.f32 %v8403_v2, %v8408_v4 }
0x59ba   :  { %v8410_v7 = vmul.f32 1.442695, %v8409_v6 }
0x59bb   :  { %v8420_v8 = vpop.permute.xlu1 %8419 }
0x59bc   :  { %11415 = vpow2.f32 %v8410_v7  ;;  %11057 = vmatpush3.msra.mxu1 %v8420_v8 }
0x59bd   :  { %11058 = vmatprep.subr.mxu1 %v12195_v14 }
0x59bf   :  { %v8501_v24 = vpop.permute.xlu1 %8500 }
0x59c3   :  { %v8499_v45 = vpop.permute.xlu1 %8498 }
0x59c9   :  { %v11416_v10 = vpop.eup %11415 }
0x59ca   :  { %v8412_v48 = vsel %vm3980_vm5, %v11416_v10, 0.0 }
0x59cb   :  { %8413 = vadd.xlane.f32.xlu0 %v8412_v48 }
0x59e1   :  { %8417 = vrot.lane.b32.xlu0 %v13705_v63, %s12196_s20 }
0x59e5   :  { %8496 = vrot.lane.b32.xlu0 %v13710_v17, %s12200_s13 }
0x5a54   :  { %v8414_v13 = vpop.xlane.xlu0 %8413 }
0x5a55   :  { %11417 = vrcp.f32 %v8414_v13  ;;  %v9842_v13 = vld [vmem:[%s13935_s6 + $0x70] sm:$0xff] }
0x5a58   :  { %v8418_v16 = vpop.permute.xlu0 %8417 }
0x5a59   :  { %11059 = vmatpush3.msra.mxu1 %v8418_v16  ;;  %v9841_v16 = vld [vmem:[%s13935_s6 + $0x68] sm:$0xff] }
0x5a5a   :  { %11063 = vmatprep.subr.mxu1 %v12195_v14 }
0x5a5c   :  { %v8497_v55 = vpop.permute.xlu0 %8496 }
0x5a62   :  { %v11418_v60 = vpop.eup %11417 }
0x5a63   :  { %v8416_v0 = vmul.f32 %v11418_v60, %v11416_v10  ;;  %v9840_v60 = vld [vmem:[%s13935_s6 + $0x60] sm:$0xff] }
0x5a65   :  { %11061 = vmatmul.mubr.msk.f32.vlgmr.msra.gmra.mxu1 %vm980_vm11, %v8416_v0 }
0x5a66   :  { %11064 = vmatpush3.xpose.msk.msra.mxu1 %vm894_vm4, %v8501_v24  ;;  %11067 = vmatprep.mubr.msk.f32.mxu1 %vm12209_vm13, %v12195_v14 }
0x5a67   :  { %11065 = vmatprep.subr.mxu1 %v12195_v14 }
0x5a6a   :  { %11066 = vmatpush3.xpose.msk.msra.mxu1 %vm894_vm4, %v8499_v45 }
0x5a6b   :  { %11084 = vmatprep.subr.mxu1 %v12195_v14 }
0x5a6d   :  { %11068 = vmatmul.mubr.msk.f32.vlgmr.msra.gmra.mxu1 %vm894_vm4, %v8497_v55 }
0x5a6e   :  { %11088 = vmatprep.mubr.msk.f32.mxu1 %vm12209_vm13, %v12195_v14 }
0x5b25   :  { %v13741_v19 = vpop.f32.mrf.mxu1 }
0x5b27   :  { %v11062_v20 = vpop.f32.mrf.mxu1 }
0x5b2d   :  { %v8574_v21 = vpop.f32.mrf.mxu1 }
0x5b2e   :  { %v8575_v22 = vadd.f32 %v8574_v21, %v13075_v44 }
0x5b2f   :  { %v11069_v25 = vpop.f32.mrf.mxu1 }
0x5b30   :  { %v8578_v58 = vsel %vm3980_vm5, %v8575_v22, -inf }
0x5b31   :  { %8579 = vmax.xlane.f32.xlu1 %v8578_v58  ;;  %v9860_v58 = vld [vmem:[#allocation35 + $0x3] ss:$0 sm:$0xff] }
0x5b42   :  { %8589 = vrot.lane.b32.xlu1 %v13705_v63, %s12198_s8 }
0x5b46   :  { %8672 = vrot.lane.b32.xlu1 %v13696_v62, %s12203_s9 }
0x5b4a   :  { %8668 = vrot.lane.b32.xlu1 %v13710_v17, %s12203_s9 }
0x5b4e   :  { %8761 = vrot.lane.b32.xlu1 %v13705_v63, %s12202_s21 }
0x5bba   :  { %v8580_v36 = vpop.xlane.xlu1 %8579 }
0x5bbb   :  { %v8581_v23 = vsub.f32 %v8575_v22, %v8580_v36 }
0x5bbd   :  { %v8582_v31 = vmul.f32 1.442695, %v8581_v23 }
0x5bbe   :  { %v8590_v18 = vpop.permute.xlu1 %8589 }
0x5bbf   :  { %11419 = vpow2.f32 %v8582_v31 }
0x5bc2   :  { %v8673_v35 = vpop.permute.xlu1 %8672 }
0x5bc6   :  { %v8669_v40 = vpop.permute.xlu1 %8668 }
0x5bca   :  { %v8762_v51 = vpop.permute.xlu1 %8761 }
0x5bcc   :  { %v11420_v32 = vpop.eup %11419 }
0x5bcd   :  { %v8584_v33 = vsel %vm3980_vm5, %v11420_v32, 0.0 }
0x5bce   :  { %8585 = vadd.xlane.f32.xlu0 %v8584_v33 }
0x5be4   :  { %8591 = vrot.lane.b32.xlu0 %v13696_v62, %s12198_s8 }
0x5be8   :  { %8670 = vrot.lane.b32.xlu0 %v13705_v63, %s12203_s9 }
0x5c57   :  { %v8586_v3 = vpop.xlane.xlu0 %8585 }
0x5c58   :  { %11421 = vrcp.f32 %v8586_v3 }
0x5c5b   :  { %v8592_v57 = vpop.permute.xlu0 %8591 }
0x5c5c   :  { %11071 = vmatpush3.msra.mxu0 %v8592_v57 }
0x5c5d   :  { %11072 = vmatprep.subr.mxu0 %v12195_v14 }
0x5c5e   :  { %11073 = vmatpush3.msra.mxu0 %v8590_v18 }
0x5c5f   :  { %11077 = vmatprep.subr.mxu0 %v12195_v14  ;;  %v8671_v26 = vpop.permute.xlu0 %8670 }
0x5c65   :  { %v11422_v34 = vpop.eup %11421 }
0x5c66   :  { %v8588_v27 = vmul.f32 %v11422_v34, %v11420_v32 }
0x5c68   :  { %11075 = vmatmul.mubr.msk.f32.vlgmr.msra.gmra.mxu0 %vm980_vm11, %v8588_v27  ;;  %v9867_v27 = vld [vmem:[%s13936_s4 + $0x78] sm:$0xff] }
0x5c69   :  { %11078 = vmatpush3.xpose.msk.msra.mxu0 %vm894_vm4, %v8673_v35  ;;  %11081 = vmatprep.mubr.msk.f32.mxu0 %vm12209_vm13, %v12195_v14  ;;  %v9866_v35 = vld [vmem:[%s13936_s4 + $0x70] sm:$0xff] }
0x5c6a   :  { %11079 = vmatprep.subr.mxu0 %v12195_v14 }
0x5c6d   :  { %11080 = vmatpush3.xpose.msk.msra.mxu0 %vm894_vm4, %v8671_v26  ;;  %v9864_v26 = vld [vmem:[%s13936_s4 + $0x60] sm:$0xff] }
0x5c6e   :  { %11098 = vmatprep.subr.mxu0 %v12195_v14 }
0x5c70   :  { %11082 = vmatmul.mubr.msk.f32.vlgmr.msra.gmra.mxu0 %vm894_vm4, %v8669_v40  ;;  %v9875_v40 = vld [vmem:[%s13937_s17 + $0xf8] sm:$0xff] }
0x5c71   :  { %11102 = vmatprep.mubr.msk.f32.mxu0 %vm12209_vm13, %v12195_v14 }
0x5d28   :  { %v8664_v30 = vpop.f32.mrf.mxu0 }
0x5d2a   :  { %v11076_v41 = vpop.f32.mrf.mxu0 }
0x5d2b   :  { %v9873_v41 = vld [vmem:[%s13937_s17 + $0xe8] sm:$0xff] }
0x5d30   :  { %v8746_v43 = vpop.f32.mrf.mxu0 }
0x5d31   :  { %v8747_v59 = vadd.f32 %v8746_v43, %v13075_v44  ;;  %v9872_v43 = vld [vmem:[%s13937_s17 + $0xe0] sm:$0xff] }
0x5d32   :  { %v11083_v46 = vpop.f32.mrf.mxu0 }
0x5d33   :  { %v8750_v12 = vsel %vm3980_vm5, %v8747_v59, -inf }
0x5d34   :  { %8751 = vmax.xlane.f32.xlu0 %v8750_v12 }
0x5d4a   :  { %8763 = vrot.lane.b32.xlu0 %v13696_v62, %s12202_s21 }
0x5d4e   :  { %8844 = vrot.lane.b32.xlu0 %v13696_v62, %s12206_s24 }
0x5d52   :  { %8840 = vrot.lane.b32.xlu0 %v13710_v17, %s12206_s24 }
0x5dbd   :  { %v8752_v47 = vpop.xlane.xlu0 %8751 }
0x5dbe   :  { %v8753_v61 = vsub.f32 %v8747_v59, %v8752_v47  ;;  %v9871_v59 = vld [vmem:[%s13937_s17 + $0xd8] sm:$0xff] }
0x5dc0   :  { %v8754_v49 = vmul.f32 1.442695, %v8753_v61 }
0x5dc1   :  { %v8764_v50 = vpop.permute.xlu0 %8763 }
0x5dc2   :  { %11423 = vpow2.f32 %v8754_v49  ;;  %11085 = vmatpush3.msra.mxu1 %v8764_v50  ;;  %v9862_v49 = vld [vmem:[#allocation37 + $0x3] ss:$0 sm:$0xff] }
0x5dc3   :  { %11086 = vmatprep.subr.mxu1 %v12195_v14 }
0x5dc4   :  { %11087 = vmatpush3.msra.mxu1 %v8762_v51  ;;  %v9863_v51 = vld [vmem:[#allocation38 + $0x3] ss:$0 sm:$0xff] }
0x5dc5   :  { %11091 = vmatprep.subr.mxu1 %v12195_v14  ;;  %v8845_v56 = vpop.permute.xlu0 %8844 }
0x5dc9   :  { %v8841_v1 = vpop.permute.xlu0 %8840 }
0x5dcf   :  { %v11424_v5 = vpop.eup %11423 }
0x5dd0   :  { %v8756_v9 = vsel %vm3980_vm5, %v11424_v5, 0.0 }
0x5dd1   :  { %8757 = vadd.xlane.f32.xlu1 %v8756_v9 }
0x5de2   :  { %8842 = vrot.lane.b32.xlu1 %v13705_v63, %s12206_s24 }
0x5e5a   :  { %v8758_v52 = vpop.xlane.xlu1 %8757 }
0x5e5b   :  { %11425 = vrcp.f32 %v8758_v52  ;;  %v9870_v52 = vld [vmem:[%s13937_s17 + $0xd0] sm:$0xff] }
0x5e5e   :  { %v8843_v38 = vpop.permute.xlu1 %8842 }
0x5e68   :  { %v11426_v54 = vpop.eup %11425 }
0x5e69   :  { %v8760_v11 = vmul.f32 %v11426_v54, %v11424_v5  ;;  %v9869_v54 = vld [vmem:[%s13937_s17 + $0xc8] sm:$0xff] }
0x5e6b   :  { %11089 = vmatmul.mubr.msk.f32.vlgmr.msra.gmra.mxu1 %vm980_vm11, %v8760_v11  ;;  %v9868_v11 = vld [vmem:[%s13937_s17 + $0xc0] sm:$0xff] }
0x5e6c   :  { %11092 = vmatpush3.xpose.msk.msra.mxu1 %vm894_vm4, %v8845_v56  ;;  %11095 = vmatprep.mubr.msk.f32.mxu1 %vm12209_vm13, %v12195_v14  ;;  %v9876_v56 = vld [vmem:[#allocation40 + $0x3] ss:$0 sm:$0xff] }
0x5e6d   :  { %11093 = vmatprep.subr.mxu1 %v12195_v14 }
0x5e70   :  { %11094 = vmatpush3.xpose.msk.msra.mxu1 %vm894_vm4, %v8843_v38 }
0x5e71   :  { %11116 = vmatprep.subr.mxu1 %v12195_v14 }
0x5e73   :  { %11096 = vmatmul.mubr.msk.f32.vlgmr.msra.gmra.mxu1 %vm894_vm4, %v8841_v1 }
0x5e74   :  { %11124 = vmatprep.mubr.msk.f32.mxu1 %vm12209_vm13, %v12195_v14  ;;  %11117 = vmatpush3.msra.mxu1 %v9867_v27 }
0x5e75   :  { %11118 = vmatprep.subr.mxu1 %v12195_v14 }
0x5e76   :  { %11119 = vmatpush3.msra.mxu1 %v9866_v35 }
0x5e77   :  { %11120 = vmatprep.subr.mxu1 %v12195_v14 }
0x5f2b   :  { %v8836_v37 = vpop.f32.mrf.mxu1 }
0x5f2d   :  { %v11090_v42 = vpop.f32.mrf.mxu1 }
0x5f33   :  { %v8918_v28 = vpop.f32.mrf.mxu1 }
0x5f34   :  { %v8919_v17 = vadd.f32 %v8918_v28, %v13075_v44  ;;  %v9878_v28 = vld [vmem:[#allocation41 + $0x3] ss:$0 sm:$0xff] }
0x5f35   :  { %v11097_v53 = vpop.f32.mrf.mxu1 }
0x5f36   :  { %v8922_v2 = vsel %vm3980_vm5, %v8919_v17, -inf }
0x5f37   :  { %8923 = vmax.xlane.f32.xlu1 %v8922_v2 }
0x5f48   :  { %8933 = vrot.lane.b32.xlu1 %v13705_v63, %s12205_s30 }
0x5f4c   :  { %9013 = vrot.lane.b32.xlu1 %v8664_v30, %s12163_s16  ;;  %v9874_v30 = vld [vmem:[%s13937_s17 + $0xf0] sm:$0xff]  ;;  %s12210_s16 = smov [#allocation49]  }
0x5fc0   :  { %v8924_v29 = vpop.xlane.xlu1 %8923 }
0x5fc1   :  { %v8925_v15 = vsub.f32 %v8919_v17, %v8924_v29 }
0x5fc3   :  { %v8926_v4 = vmul.f32 1.442695, %v8925_v15 }
0x5fc4   :  { %v8934_v8 = vpop.permute.xlu1 %8933 }
0x5fc5   :  { %11427 = vpow2.f32 %v8926_v4 }
0x5fc8   :  { %v9014_v45 = vpop.permute.xlu1 %9013 }
0x5fc9   :  { %v9024_v20 = vsel %vm894_vm4, %v13741_v19, %v9014_v45 }
0x5fd2   :  { %v11428_v6 = vpop.eup %11427 }
0x5fd3   :  { %v8928_v7 = vsel %vm3980_vm5, %v11428_v6, 0.0 }
0x5fd4   :  { %8929 = vadd.xlane.f32.xlu0 %v8928_v7 }
0x5fea   :  { %8935 = vrot.lane.b32.xlu0 %v13696_v62, %s12205_s30  ;;  %v9843_v62 = vld [vmem:[%s13935_s6 + $0x78] sm:$0xff] }
0x5fee   :  { %9017 = vrot.lane.b32.xlu0 %v8836_v37, %s12166_s0  ;;  %s9436_s0 = sshll.u32 %s12210_s16, 4  ;;  %s9437_s0 = int_to_ptr.vmem [resolvable:$true] %s9436_s0 }
0x5fef   :  { %s12036_s15 = scalar_lea.vmem %s9437_s0, 32  ;;  %p12041_p11 = scmp.lt.s32.totalorder %s9437_s0, %s9437_s0 }
0x5ff0   :  { %p12037_p10 = scmp.ne.s32.totalorder %s9437_s0, %s12036_s15  ;;  %p12042_p12 = scmp.lt.s32.totalorder %s12036_s15, %s12036_s15 }
0x5ff2   :  { %p12043_p13 = por %p12042_p12, %p12041_p11 }
0x5ff4   :  { %p12044_p0 = pnand %p12043_p13, %p12037_p10 }
0x605d   :  { %v8930_v44 = vpop.xlane.xlu0 %8929 }
0x605e   :  { %11429 = vrcp.f32 %v8930_v44 }
0x6061   :  { %v8936_v63 = vpop.permute.xlu0 %8935 }
0x6062   :  { %11099 = vmatpush3.msra.mxu0 %v8936_v63 }
0x6063   :  { %11100 = vmatprep.subr.mxu0 %v12195_v14 }
0x6064   :  { %11101 = vmatpush3.msra.mxu0 %v8934_v8  ;;  %v9347_v8 = vld [vmem:[#allocation46 + $0x38] sm:$0xff] }
0x6065   :  { %11105 = vmatprep.subr.mxu0 %v12195_v14  ;;  %v9018_v55 = vpop.permute.xlu0 %9017 }
0x6066   :  { %v9025_v21 = vsel %vm980_vm11, %v9024_v20, %v9018_v55  ;;  %v9881_v55 = vld [vmem:[#allocation44 + $0x3] ss:$0 sm:$0xff] }
0x606b   :  { %v11430_v10 = vpop.eup %11429 }
0x606c   :  { %v8932_v48 = vmul.f32 %v11430_v10, %v11428_v6  ;;  %v9346_v10 = vld [vmem:[#allocation46 + $0x30] sm:$0xff] }
0x606e   :  { %11103 = vmatmul.mubr.msk.f32.vlgmr.msra.gmra.mxu0 %vm980_vm11, %v8932_v48  ;;  %v9345_v48 = vld [vmem:[#allocation46 + $0x28] sm:$0xff] }
0x606f   :  { %11113 = vmatprep.mubr.msk.f32.mxu0 %vm12209_vm13, %v12195_v14  ;;  %11106 = vmatpush3.msra.mxu0 %v9843_v62  ;;  %v9344_v62 = vld [vmem:[#allocation46 + $0x20] sm:$0xff] }
0x6070   :  { %11107 = vmatprep.subr.mxu0 %v12195_v14 }
0x6071   :  { %11108 = vmatpush3.msra.mxu0 %v9842_v13 }
0x6072   :  { %11109 = vmatprep.subr.mxu0 %v12195_v14 }
0x6073   :  { %11110 = vmatpush3.msra.mxu0 %v9841_v16 }
0x6074   :  { %11111 = vmatprep.subr.mxu0 %v12195_v14 }
0x6075   :  { %11112 = vmatpush3.msra.mxu0 %v9840_v60 }
0x6076   :  { %11127 = vmatprep.subr.mxu0 %v12195_v14 }
0x612e   :  { %v9008_v24 = vpop.f32.mrf.mxu0 }
0x612f   :  { %9021 = vrot.lane.b32.xlu1 %v9008_v24, %s12208_s12 }
0x6130   :  { %v11104_v0 = vpop.f32.mrf.mxu0 }
0x6131   :  { %v9880_v0 = vld [vmem:[#allocation43 + $0x3] ss:$0 sm:$0xff] }
0x61a1   :  { %v9022_v22 = vpop.permute.xlu1 %9021 }
0x61a2   :  { %v9026_v25 = vsel %vm1718_vm12, %v9025_v21, %v9022_v22 }
0x61a3   :  { %11114 = vmatmul.mubr.msk.f32.vlgmr.msra.gmra.mxu0 %vm743_vm3, %v9026_v25 }
0x61a4   :  { %11143 = vmatprep.mubr.msk.f32.mxu0 %vm12209_vm13, %v12195_v14  ;;  %11128 = vmatpush3.msra.mxu0 %v9875_v40 }
0x61a5   :  { %11129 = vmatprep.subr.mxu0 %v12195_v14 }
0x61a6   :  { %11130 = vmatpush3.msra.mxu0 %v9874_v30 }
0x61a7   :  { %11131 = vmatprep.subr.mxu0 %v12195_v14 }
0x61a8   :  { %11132 = vmatpush3.msra.mxu0 %v9873_v41 }
0x61a9   :  { %11133 = vmatprep.subr.mxu0 %v12195_v14 }
0x61aa   :  { %11134 = vmatpush3.msra.mxu0 %v9872_v43 }
0x61ab   :  { %11135 = vmatprep.subr.mxu0 %v12195_v14 }
0x61ac   :  { %11136 = vmatpush3.msra.mxu0 %v9871_v59 }
0x61ad   :  { %11137 = vmatprep.subr.mxu0 %v12195_v14 }
0x61ae   :  { %11138 = vmatpush3.msra.mxu0 %v9870_v52 }
0x61af   :  { %11139 = vmatprep.subr.mxu0 %v12195_v14 }
0x61b0   :  { %11140 = vmatpush3.msra.mxu0 %v9869_v54 }
0x61b1   :  { %11141 = vmatprep.subr.mxu0 %v12195_v14 }
0x61b2   :  { %11142 = vmatpush3.msra.mxu0 %v9868_v11 }
0x6263   :  { %v9102_v36 = vpop.f32.mrf.mxu0 }
0x6264   :  { %v9103_v23 = vadd.f32 %v9860_v58, %v9102_v36 }
0x6265   :  { %v11115_v31 = vpop.f32.mrf.mxu0 }
0x6266   :  { %v9106_v32 = vadd.f32 %v9103_v23, %v13694_v39  ;;  %v9865_v39 = vld [vmem:[%s13936_s4 + $0x68] sm:$0xff] }
0x6267   :  { %11121 = vmatpush3.msra.mxu1 %v9865_v39 }
0x6268   :  { %v9107_v19 = vsel %vm3491_vm15, %v9106_v32, 0.0  ;;  %11122 = vmatprep.subr.mxu1 %v12195_v14 }
0x6269   :  { %9108 = vadd.xlane.f32.xlu0 %v9107_v19  ;;  %11123 = vmatpush3.msra.mxu1 %v9864_v26 }
0x626a   :  { %11146 = vmatprep.subr.mxu1 %v12195_v14 }
0x62f2   :  { %v9109_v33 = vpop.xlane.xlu0 %9108 }
0x62f3   :  { %v9110_v3 = vmul.f32 0.03125, %v9109_v33 }
0x62f5   :  { %v9111_v57 = vsub.f32 %v9106_v32, %v9110_v3 }
0x62f7   :  { %v9112_v18 = vmul.f32 %v9111_v57, %v9111_v57 }
0x62f9   :  { %v9113_v34 = vsel %vm3491_vm15, %v9112_v18, 0.0 }
0x62fa   :  { %9114 = vadd.xlane.f32.xlu1 %v9113_v34 }
0x6383   :  { %v9115_v46 = vpop.xlane.xlu1 %9114 }
0x6384   :  { %v9116_v12 = vmul.f32 0.03125, %v9115_v46 }
0x6386   :  { %v9117_v47 = vadd.f32 1e-06, %v9116_v12 }
0x6388   :  { %11431 = vrsqrt.f32 %v9117_v47 }
0x6395   :  { %v11432_v61 = vpop.eup %11431 }
0x6396   :  { %v9119_v50 = vmul.f32 %v11432_v61, %v9111_v57 }
0x6398   :  { %v9126_v5 = vmul.f32 %v9862_v49, %v9119_v50 }
0x639a   :  { %v9133_v9 = vadd.f32 %v9863_v51, %v9126_v5 }
0x639c   :  { %11125 = vmatmul.mubr.msk.f32.vlgmr.msra.gmra.mxu1 %vm743_vm3, %v9133_v9 }
0x639d   :  { %11154 = vmatprep.mubr.msk.f32.mxu1 %vm12209_vm13, %v12195_v14  ;;  %11147 = vmatpush3.msra.mxu1 %v9347_v8 }
0x639e   :  { %11148 = vmatprep.subr.mxu1 %v12195_v14 }
0x639f   :  { %11149 = vmatpush3.msra.mxu1 %v9346_v10 }
0x63a0   :  { %11150 = vmatprep.subr.mxu1 %v12195_v14 }
0x63a1   :  { %11151 = vmatpush3.msra.mxu1 %v9345_v48 }
0x63a2   :  { %11152 = vmatprep.subr.mxu1 %v12195_v14 }
0x63a3   :  { %11153 = vmatpush3.msra.mxu1 %v9344_v62 }
0x645c   :  { %v9231_v38 = vpop.f32.mrf.mxu1 }
0x645d   :  { %v9232_v1 = vadd.f32 %v9876_v56, %v9231_v38 }
0x645e   :  { %v11126_v37 = vpop.f32.mrf.mxu1 }
0x645f   :  { %v9235_v42 = vmax.f32 %v9232_v1, 0.0 }
0x6461   :  { %11144 = vmatmul.mubr.msk.f32.vlgmr.msra.gmra.mxu0 %vm659_vm0, %v9235_v42 }
0x6521   :  { %v9311_v17 = vpop.f32.mrf.mxu0 }
0x6522   :  { %v9312_v53 = vadd.f32 %v9878_v28, %v9311_v17 }
0x6523   :  { %v11145_v2 = vpop.f32.mrf.mxu0 }
0x6524   :  { %v9315_v29 = vadd.f32 %v9312_v53, %v9133_v9 }
0x6526   :  { %v9316_v15 = vsel %vm3491_vm15, %v9315_v29, 0.0 }
0x6527   :  { %9317 = vadd.xlane.f32.xlu0 %v9316_v15 }
0x65b0   :  { %v9318_v4 = vpop.xlane.xlu0 %9317 }
0x65b1   :  { %v9319_v6 = vmul.f32 0.03125, %v9318_v4 }
0x65b3   :  { %v9320_v7 = vsub.f32 %v9315_v29, %v9319_v6 }
0x65b5   :  { %v9321_v44 = vmul.f32 %v9320_v7, %v9320_v7 }
0x65b7   :  { %v9322_v63 = vsel %vm3491_vm15, %v9321_v44, 0.0 }
0x65b8   :  { %9323 = vadd.xlane.f32.xlu0 %v9322_v63 }
0x6641   :  { %v9324_v13 = vpop.xlane.xlu0 %9323 }
0x6642   :  { %v9325_v16 = vmul.f32 0.03125, %v9324_v13 }
0x6644   :  { %v9326_v60 = vadd.f32 1e-06, %v9325_v16 }
0x6646   :  { %11433 = vrsqrt.f32 %v9326_v60 }
0x6653   :  { %v11434_v24 = vpop.eup %11433 }
0x6654   :  { %v9328_v45 = vmul.f32 %v11434_v24, %v9320_v7 }
0x6656   :  { %v9335_v20 = vmul.f32 %v9880_v0, %v9328_v45 }
0x6658   :  { %v9342_v21 = vadd.f32 %v9881_v55, %v9335_v20 }
0x665a   :  { %11155 = vmatmul.mubr.msk.f32.vlgmr.msra.gmra.mxu1 %vm743_vm3, %v9342_v21 }
0x665b   :  { %12047 = shalt.err (!%p12044_p0)
}
0x665c   :  { %9439 = dma.vmem_to_hbm [thread:$0]  %s9437_s0, 32, %s12455_s5, [#allocation4]   ;;  %v9882_v14 = vld [vmem:[#allocation47 + $0x1] ss:$0 sm:$0xff] }
0x665d   :  { %s12211_s28 = smov [#allocation50]  }
0x665e   :  { %s9446_s29 = sshll.u32 %s12211_s28, 4  ;;  %s9447_s29 = int_to_ptr.vmem [resolvable:$true] %s9446_s29 }
0x665f   :  { %s12056_s20 = scalar_lea.vmem %s9447_s29, 32  ;;  %p12061_p2 = scmp.lt.s32.totalorder %s9447_s29, %s9447_s29 }
0x6660   :  { %p12057_p1 = scmp.ne.s32.totalorder %s9447_s29, %s12056_s20  ;;  %p12062_p3 = scmp.lt.s32.totalorder %s12056_s20, %s12056_s20 }
0x6662   :  { %p12063_p4 = por %p12062_p3, %p12061_p2 }
0x6664   :  { %p12064_p5 = pnand %p12063_p4, %p12057_p1 }
0x671a   :  { %v9425_v22 = vpop.f32.mrf.mxu1 }
0x671b   :  { %v9426_v25 = vadd.f32 %v9882_v14, %v9425_v22 }
0x671c   :  { %v11156_v58 = vpop.f32.mrf.mxu1 }
0x671d   :  { %9429 = vst [vmem:[#allocation50] sm:$0x3] %v9426_v25 }
0x671e   :  { %12067 = shalt.err (!%p12064_p5)
}
0x671f   :  { %9449 = dma.vmem_to_hbm [thread:$0]  %s9447_s29, 32, %s12460_s3, [#allocation51]  }
0x6720   :  { %12108 = dma.done.wait [#allocation4], 32  }
0x6721   :  { %12109 = vsyncadd [#allocation4], 4294967264 }
0x6722   :  { %12110 = dma.done.wait [#allocation51], 32  }
0x6723   :  { %12111 = vsyncadd [#allocation51], 4294967264 }
0x6724   :  { %9456 = vsyncpa [#allocation3], 1 }
0x6725   :  { %9457 = vsyncpa [#allocation6], 1 }
0x6726   :  { %9458 = vsyncpa [#allocation9], 1 }
0x6727   :  { %9459 = vsyncpa [#allocation12], 1 }
0x6728   :  { %9460 = vsyncpa [#allocation15], 1 }
0x6729   :  { %9461 = vsyncpa [#allocation18], 1 }
0x672a   :  { %9462 = vsyncpa [#allocation21], 1 }
0x672b   :  { %9463 = vsyncpa [#allocation24], 1 }
0x672c   :  { %9464 = vsyncpa [#allocation27], 1 }
0x672d   :  { %9465 = vsyncpa [#allocation30], 1 }
0x672e   :  { %9466 = vsyncpa [#allocation33], 1 }
0x672f   :  { %9467 = vsyncpa [#allocation36], 1 }
0x6730   :  { %9468 = vsyncpa [#allocation39], 1 }
0x6731   :  { %9469 = vsyncpa [#allocation42], 1 }
0x6732   :  { %9470 = vsyncpa [#allocation45], 1 }
0x6733   :  { %9471 = vsyncpa [#allocation48], 1 }
0x6734   :  { %9472 = vsyncpa [#allocation4], 1 }
0x6735   :  { %9473 = vsyncpa [#allocation51], 1 }

</bundles_post_ra>
